<compile_context>
chip_gen: v7x
topology: tpu7x:2x2x1
jax: 0.10.0
libtpu: 0.0.40
codegen_flags: <defaults>
</compile_context>

<pallas_src>
import math
import functools

import jax
import jax.numpy as jnp
from jax.experimental import pallas as pl
from jax.experimental.pallas import tpu as pltpu


# ----------------------------- in-kernel helpers -----------------------------

def _mm(a, b):
    """a @ b, f32 in / f32 accumulate (a, b are 2-D)."""
    return jax.lax.dot_general(
        a, b, dimension_numbers=(((1,), (0,)), ((), ())),
        preferred_element_type=jnp.float32)


def _mm_nt(a, b):
    """a @ b.T without an explicit transpose (contract last dims)."""
    return jax.lax.dot_general(
        a, b, dimension_numbers=(((1,), (1,)), ((), ())),
        preferred_element_type=jnp.float32)


def _layernorm(z, g, b, eps):
    mean = jnp.mean(z, axis=-1, keepdims=True)
    zc = z - mean
    var = jnp.mean(zc * zc, axis=-1, keepdims=True)
    return zc * jax.lax.rsqrt(var + eps) * g + b


def _mha(q, k, v, mask, nhead):
    """Multi-head attention over batch-flattened rows.

    q: (Rq, D), k/v: (Rk, D), mask: (Rq, Rk) additive, block-diagonal over the
    batch (off-batch blocks are -inf), so all B batch elements are handled in
    one matmul per head.  The 1/sqrt(Dh) scale is already folded into the Q
    projection weights.  Heads use static lane slices (Dh wide), statically
    unrolled — at D=32 this is not MXU-bound, and it lowers robustly.
    """
    D = q.shape[1]
    Dh = D // nhead
    outs = []
    for h in range(nhead):
        sl = slice(h * Dh, (h + 1) * Dh)
        s = _mm_nt(q[:, sl], k[:, sl]) + mask            # (Rq, Rk) f32
        m = jnp.max(s, axis=-1, keepdims=True)
        e = jnp.exp(s - m)
        p = e / jnp.sum(e, axis=-1, keepdims=True)       # exact divide
        outs.append(_mm(p, v[:, sl]))                    # (Rq, Dh)
    return jnp.concatenate(outs, axis=-1)                # (Rq, D)


# ----------------------------- layer bodies (pure fns on values) -------------

def _encoder_layer(x, mask, p, nhead, eps):
    D = x.shape[1]
    qkv = _mm(x, p["wqkv"]) + p["bqkv"]                  # fused QKV (R, 3D)
    attn = _mha(qkv[:, :D], qkv[:, D:2 * D], qkv[:, 2 * D:], mask, nhead)
    attn = _mm(attn, p["wo"]) + p["bo"]
    x = _layernorm(x + attn, p["ln1_g"], p["ln1_b"], eps)
    h = jnp.maximum(_mm(x, p["w1"]) + p["b1"], 0.0)
    h = _mm(h, p["w2"]) + p["b2"]
    return _layernorm(x + h, p["ln2_g"], p["ln2_b"], eps)


def _decoder_layer(x, memory, tmask, mmask, p, nhead, eps):
    D = x.shape[1]
    # self attention (fused QKV)
    qkv = _mm(x, p["sa_wqkv"]) + p["sa_bqkv"]
    sa = _mha(qkv[:, :D], qkv[:, D:2 * D], qkv[:, 2 * D:], tmask, nhead)
    sa = _mm(sa, p["sa_wo"]) + p["sa_bo"]
    x = _layernorm(x + sa, p["ln1_g"], p["ln1_b"], eps)
    # cross attention (fused KV from memory)
    q = _mm(x, p["ca_wq"]) + p["ca_bq"]
    kv = _mm(memory, p["ca_wkv"]) + p["ca_bkv"]
    ca = _mha(q, kv[:, :D], kv[:, D:], mmask, nhead)
    ca = _mm(ca, p["ca_wo"]) + p["ca_bo"]
    x = _layernorm(x + ca, p["ln2_g"], p["ln2_b"], eps)
    # FFN
    h = jnp.maximum(_mm(x, p["w1"]) + p["b1"], 0.0)
    h = _mm(h, p["w2"]) + p["b2"]
    return _layernorm(x + h, p["ln3_g"], p["ln3_b"], eps)


# ----------------------------- fused whole-model kernel ----------------------

def _fused_forward_kernel(*refs, treedef, nhead, eps):
    in_refs, o_ref = refs[:-1], refs[-1]
    t = jax.tree_util.tree_unflatten(treedef, [r[...] for r in in_refs])

    # --- encoder stack (activations stay in VMEM / vregs) ---
    x = t["src"]                                         # (B*S, D)
    for lp in t["enc"]:
        x = _encoder_layer(x, t["smask"], lp, nhead, eps)
    memory = x

    # --- decoder stack ---
    y = t["tgt"]                                         # (B*T, D)
    for lp in t["dec"]:
        y = _decoder_layer(y, memory, t["tmask"], t["mmask"], lp, nhead, eps)

    # --- vocab head: lane-dense (128-padded) store ---
    o_ref[...] = _mm(y, t["w_out"]) + t["b_out"]


# ----------------------------- model forward ---------------------------------

def _block_diag_mask(mask, B):
    """Tile a per-example additive mask (R, C) into a (B*R, B*C) block-diagonal
    mask with -inf on the off-batch blocks (so batch-flattened attention rows
    only attend to their own batch element)."""
    R, C = mask.shape
    rb = jnp.repeat(jnp.arange(B), R)
    cb = jnp.repeat(jnp.arange(B), C)
    same = rb[:, None] == cb[None, :]
    tiled = jnp.tile(mask, (B, B))
    return jnp.where(same, tiled, -jnp.inf).astype(jnp.float32)


def sinusoidal_pe(max_len, d_model):
    position = jnp.arange(max_len, dtype=jnp.float32)[:, None]
    div_term = jnp.exp(jnp.arange(0, d_model, 2, dtype=jnp.float32)
                       * (-math.log(10000.0) / d_model))
    pe_sin = jnp.sin(position * div_term)
    pe_cos = jnp.cos(position * div_term)
    return jnp.stack([pe_sin, pe_cos], axis=-1).reshape(max_len, d_model)


def transformer_forward(params, src_ids, tgt_ids, src_mask, tgt_mask, memory_mask,
                        *, nhead, d_model, tgt_vocab):
    B, S = src_ids.shape
    T = tgt_ids.shape[1]
    emb_scale = math.sqrt(d_model)

    # embedding gather + PE add is data-movement glue (not the compute hot path)
    # TODO(synk): dropout layers are identity here (eval-mode forward).
    src = jnp.take(params["src_emb"], src_ids, axis=0) * emb_scale
    tgt = jnp.take(params["tgt_emb"], tgt_ids, axis=0) * emb_scale
    src = src + params["pe"][:S][None, :, :]
    tgt = tgt + params["pe"][:T][None, :, :]

    # Batch is folded into rows; attention uses block-diagonal masks.
    src2d = src.reshape(B * S, d_model)
    tgt2d = tgt.reshape(B * T, d_model)
    smask = _block_diag_mask(src_mask, B)                # (B*S, B*S)
    tmask = _block_diag_mask(tgt_mask, B)                # (B*T, B*T)
    mmask = _block_diag_mask(memory_mask, B)             # (B*T, B*S)

    tree = {
        "src": src2d, "tgt": tgt2d,
        "smask": smask, "tmask": tmask, "mmask": mmask,
        "enc": params["enc_layers"], "dec": params["dec_layers"],
        "w_out": params["w_out_pad"], "b_out": params["b_out_pad"],
    }
    leaves, treedef = jax.tree_util.tree_flatten(tree)
    Npad = params["w_out_pad"].shape[1]

    # Single invocation (no grid): everything fits comfortably in VMEM even on
    # v7x (64 MiB); no dimension_semantics / vmem_limit_bytes needed at this
    # size — re-derive if d_model / seq are scaled up.
    logits_pad = pl.pallas_call(
        functools.partial(_fused_forward_kernel, treedef=treedef,
                          nhead=nhead, eps=1e-5),
        out_shape=jax.ShapeDtypeStruct((B * T, Npad), jnp.float32),
        in_specs=[pl.BlockSpec(memory_space=pltpu.MemorySpace.VMEM)] * len(leaves),
        out_specs=pl.BlockSpec(memory_space=pltpu.MemorySpace.VMEM),
    )(*leaves)

    return logits_pad.reshape(B, T, Npad)[:, :, :tgt_vocab]


# ----------------------------- parameter init --------------------------------

def _dense(key, shape, scale=0.02):
    return jax.random.normal(key, shape, jnp.float32) * scale


def _init_self_attn(key, d, nhead):
    ks = jax.random.split(key, 4)
    wq, wk, wv, wo = (_dense(k, (d, d)) for k in ks)
    # Fold the 1/sqrt(Dh) softmax scale into the Q projection (numerically
    # equivalent to scaling the scores; Q bias is zero so no extra fold needed).
    wq = wq * (1.0 / math.sqrt(d // nhead))
    return {
        "wqkv": jnp.concatenate([wq, wk, wv], axis=1),    # fused QKV (D, 3D)
        "bqkv": jnp.zeros((1, 3 * d), jnp.float32),
        "wo": wo, "bo": jnp.zeros((1, d), jnp.float32),
    }


def _init_cross_attn(key, d, nhead):
    ks = jax.random.split(key, 4)
    wq, wk, wv, wo = (_dense(k, (d, d)) for k in ks)
    wq = wq * (1.0 / math.sqrt(d // nhead))               # scale folded into Q
    return {
        "wq": wq, "bq": jnp.zeros((1, d), jnp.float32),
        "wkv": jnp.concatenate([wk, wv], axis=1),         # fused KV (D, 2D)
        "bkv": jnp.zeros((1, 2 * d), jnp.float32),
        "wo": wo, "bo": jnp.zeros((1, d), jnp.float32),
    }


def init_enc_layer(key, d, dff, nhead):
    ks = jax.random.split(key, 3)
    p = _init_self_attn(ks[0], d, nhead)
    p.update({
        "w1": _dense(ks[1], (d, dff)), "b1": jnp.zeros((1, dff), jnp.float32),
        "w2": _dense(ks[2], (dff, d)), "b2": jnp.zeros((1, d), jnp.float32),
        "ln1_g": jnp.ones((1, d), jnp.float32), "ln1_b": jnp.zeros((1, d), jnp.float32),
        "ln2_g": jnp.ones((1, d), jnp.float32), "ln2_b": jnp.zeros((1, d), jnp.float32),
    })
    return p


def init_dec_layer(key, d, dff, nhead):
    ks = jax.random.split(key, 4)
    sa = _init_self_attn(ks[0], d, nhead)
    ca = _init_cross_attn(ks[1], d, nhead)
    return {
        "sa_wqkv": sa["wqkv"], "sa_bqkv": sa["bqkv"],
        "sa_wo": sa["wo"], "sa_bo": sa["bo"],
        "ca_wq": ca["wq"], "ca_bq": ca["bq"],
        "ca_wkv": ca["wkv"], "ca_bkv": ca["bkv"],
        "ca_wo": ca["wo"], "ca_bo": ca["bo"],
        "w1": _dense(ks[2], (d, dff)), "b1": jnp.zeros((1, dff), jnp.float32),
        "w2": _dense(ks[3], (dff, d)), "b2": jnp.zeros((1, d), jnp.float32),
        "ln1_g": jnp.ones((1, d), jnp.float32), "ln1_b": jnp.zeros((1, d), jnp.float32),
        "ln2_g": jnp.ones((1, d), jnp.float32), "ln2_b": jnp.zeros((1, d), jnp.float32),
        "ln3_g": jnp.ones((1, d), jnp.float32), "ln3_b": jnp.zeros((1, d), jnp.float32),
    }


def init_params(key, src_vocab, tgt_vocab, d_model, nhead, dff, n_enc, n_dec, max_len):
    ks = jax.random.split(key, 4 + n_enc + n_dec)
    # pad the vocab head to a multiple of 128 lanes (lane-dense output store)
    n_pad = ((tgt_vocab + 127) // 128) * 128
    w_out = _dense(ks[2], (d_model, tgt_vocab))
    w_out_pad = jnp.zeros((d_model, n_pad), jnp.float32).at[:, :tgt_vocab].set(w_out)
    b_out_pad = jnp.zeros((1, n_pad), jnp.float32)
    return {
        "src_emb": _dense(ks[0], (src_vocab, d_model), scale=1.0),
        "tgt_emb": _dense(ks[1], (tgt_vocab, d_model), scale=1.0),
        "pe": sinusoidal_pe(max_len, d_model),
        "w_out_pad": w_out_pad,
        "b_out_pad": b_out_pad,
        "enc_layers": [init_enc_layer(ks[4 + i], d_model, dff, nhead)
                       for i in range(n_enc)],
        "dec_layers": [init_dec_layer(ks[4 + n_enc + i], d_model, dff, nhead)
                       for i in range(n_dec)],
    }


# ----------------------------- main -------------------------------------------

if __name__ == "__main__":
    SRC_VOCAB, TGT_VOCAB = 64, 72
    D_MODEL, NHEAD, DFF = 32, 4, 64
    N_ENC, N_DEC = 2, 2
    B, S, T = 2, 8, 8

    key = jax.random.PRNGKey(0)
    k_param, k_src, k_tgt = jax.random.split(key, 3)
    params = init_params(k_param, SRC_VOCAB, TGT_VOCAB, D_MODEL, NHEAD, DFF,
                         N_ENC, N_DEC, max_len=64)

    src_ids = jax.random.randint(k_src, (B, S), 0, SRC_VOCAB, dtype=jnp.int32)
    tgt_ids = jax.random.randint(k_tgt, (B, T), 0, TGT_VOCAB, dtype=jnp.int32)

    # additive float masks (0 = keep, -inf = masked), matching masked_fill semantics
    src_mask = jnp.zeros((S, S), jnp.float32)
    causal = jnp.triu(jnp.ones((T, T), jnp.float32), k=1)
    tgt_mask = jnp.where(causal > 0, -jnp.inf, 0.0).astype(jnp.float32)
    memory_mask = jnp.zeros((T, S), jnp.float32)   # decoder memory_mask=None in torch

    fwd = jax.jit(functools.partial(transformer_forward,
                                    nhead=NHEAD, d_model=D_MODEL,
                                    tgt_vocab=TGT_VOCAB))
    logits = fwd(params, src_ids, tgt_ids, src_mask, tgt_mask, memory_mask)
    jax.block_until_ready(logits)

    assert logits.shape == (B, T, TGT_VOCAB)
    assert bool(jnp.all(jnp.isfinite(logits)))
    print("KERNEL_OK")
</pallas_src>

<mosaic_0001>
module attributes {stable_mosaic.version = 11 : i64} {
  func.func @_fused_forward_kernel(%arg0: memref<1x128xf32, #tpu.memory_space<vmem>>, %arg1: memref<1x64xf32, #tpu.memory_space<vmem>>, %arg2: memref<1x32xf32, #tpu.memory_space<vmem>>, %arg3: memref<1x64xf32, #tpu.memory_space<vmem>>, %arg4: memref<1x32xf32, #tpu.memory_space<vmem>>, %arg5: memref<1x32xf32, #tpu.memory_space<vmem>>, %arg6: memref<32x64xf32, #tpu.memory_space<vmem>>, %arg7: memref<32x32xf32, #tpu.memory_space<vmem>>, %arg8: memref<32x32xf32, #tpu.memory_space<vmem>>, %arg9: memref<1x32xf32, #tpu.memory_space<vmem>>, %arg10: memref<1x32xf32, #tpu.memory_space<vmem>>, %arg11: memref<1x32xf32, #tpu.memory_space<vmem>>, %arg12: memref<1x32xf32, #tpu.memory_space<vmem>>, %arg13: memref<1x32xf32, #tpu.memory_space<vmem>>, %arg14: memref<1x32xf32, #tpu.memory_space<vmem>>, %arg15: memref<1x32xf32, #tpu.memory_space<vmem>>, %arg16: memref<1x96xf32, #tpu.memory_space<vmem>>, %arg17: memref<32x32xf32, #tpu.memory_space<vmem>>, %arg18: memref<32x96xf32, #tpu.memory_space<vmem>>, %arg19: memref<32x64xf32, #tpu.memory_space<vmem>>, %arg20: memref<64x32xf32, #tpu.memory_space<vmem>>, %arg21: memref<1x64xf32, #tpu.memory_space<vmem>>, %arg22: memref<1x32xf32, #tpu.memory_space<vmem>>, %arg23: memref<1x64xf32, #tpu.memory_space<vmem>>, %arg24: memref<1x32xf32, #tpu.memory_space<vmem>>, %arg25: memref<1x32xf32, #tpu.memory_space<vmem>>, %arg26: memref<32x64xf32, #tpu.memory_space<vmem>>, %arg27: memref<32x32xf32, #tpu.memory_space<vmem>>, %arg28: memref<32x32xf32, #tpu.memory_space<vmem>>, %arg29: memref<1x32xf32, #tpu.memory_space<vmem>>, %arg30: memref<1x32xf32, #tpu.memory_space<vmem>>, %arg31: memref<1x32xf32, #tpu.memory_space<vmem>>, %arg32: memref<1x32xf32, #tpu.memory_space<vmem>>, %arg33: memref<1x32xf32, #tpu.memory_space<vmem>>, %arg34: memref<1x32xf32, #tpu.memory_space<vmem>>, %arg35: memref<1x32xf32, #tpu.memory_space<vmem>>, %arg36: memref<1x96xf32, #tpu.memory_space<vmem>>, %arg37: memref<32x32xf32, #tpu.memory_space<vmem>>, %arg38: memref<32x96xf32, #tpu.memory_space<vmem>>, %arg39: memref<32x64xf32, #tpu.memory_space<vmem>>, %arg40: memref<64x32xf32, #tpu.memory_space<vmem>>, %arg41: memref<1x64xf32, #tpu.memory_space<vmem>>, %arg42: memref<1x32xf32, #tpu.memory_space<vmem>>, %arg43: memref<1x32xf32, #tpu.memory_space<vmem>>, %arg44: memref<1x96xf32, #tpu.memory_space<vmem>>, %arg45: memref<1x32xf32, #tpu.memory_space<vmem>>, %arg46: memref<1x32xf32, #tpu.memory_space<vmem>>, %arg47: memref<1x32xf32, #tpu.memory_space<vmem>>, %arg48: memref<1x32xf32, #tpu.memory_space<vmem>>, %arg49: memref<32x64xf32, #tpu.memory_space<vmem>>, %arg50: memref<64x32xf32, #tpu.memory_space<vmem>>, %arg51: memref<32x32xf32, #tpu.memory_space<vmem>>, %arg52: memref<32x96xf32, #tpu.memory_space<vmem>>, %arg53: memref<1x64xf32, #tpu.memory_space<vmem>>, %arg54: memref<1x32xf32, #tpu.memory_space<vmem>>, %arg55: memref<1x32xf32, #tpu.memory_space<vmem>>, %arg56: memref<1x96xf32, #tpu.memory_space<vmem>>, %arg57: memref<1x32xf32, #tpu.memory_space<vmem>>, %arg58: memref<1x32xf32, #tpu.memory_space<vmem>>, %arg59: memref<1x32xf32, #tpu.memory_space<vmem>>, %arg60: memref<1x32xf32, #tpu.memory_space<vmem>>, %arg61: memref<32x64xf32, #tpu.memory_space<vmem>>, %arg62: memref<64x32xf32, #tpu.memory_space<vmem>>, %arg63: memref<32x32xf32, #tpu.memory_space<vmem>>, %arg64: memref<32x96xf32, #tpu.memory_space<vmem>>, %arg65: memref<16x16xf32, #tpu.memory_space<vmem>>, %arg66: memref<16x16xf32, #tpu.memory_space<vmem>>, %arg67: memref<16x32xf32, #tpu.memory_space<vmem>>, %arg68: memref<16x32xf32, #tpu.memory_space<vmem>>, %arg69: memref<16x16xf32, #tpu.memory_space<vmem>>, %arg70: memref<32x128xf32, #tpu.memory_space<vmem>>, %arg71: memref<16x128xf32, #tpu.memory_space<vmem>>) attributes {dimension_semantics = [], scalar_prefetch = 0 : i64, scratch_operands = 0 : i64, tpu.core_type = #tpu.core_type<tc>} {
    %c0 = arith.constant 0 : index
    %c0_0 = arith.constant 0 : index
    %0 = vector.load %arg0[%c0, %c0_0] : memref<1x128xf32, #tpu.memory_space<vmem>>, vector<1x128xf32>
    %c0_1 = arith.constant 0 : index
    %c0_2 = arith.constant 0 : index
    %1 = vector.load %arg1[%c0_1, %c0_2] : memref<1x64xf32, #tpu.memory_space<vmem>>, vector<1x64xf32>
    %c0_3 = arith.constant 0 : index
    %c0_4 = arith.constant 0 : index
    %2 = vector.load %arg2[%c0_3, %c0_4] : memref<1x32xf32, #tpu.memory_space<vmem>>, vector<1x32xf32>
    %c0_5 = arith.constant 0 : index
    %c0_6 = arith.constant 0 : index
    %3 = vector.load %arg3[%c0_5, %c0_6] : memref<1x64xf32, #tpu.memory_space<vmem>>, vector<1x64xf32>
    %c0_7 = arith.constant 0 : index
    %c0_8 = arith.constant 0 : index
    %4 = vector.load %arg4[%c0_7, %c0_8] : memref<1x32xf32, #tpu.memory_space<vmem>>, vector<1x32xf32>
    %c0_9 = arith.constant 0 : index
    %c0_10 = arith.constant 0 : index
    %5 = vector.load %arg5[%c0_9, %c0_10] : memref<1x32xf32, #tpu.memory_space<vmem>>, vector<1x32xf32>
    %c0_11 = arith.constant 0 : index
    %c0_12 = arith.constant 0 : index
    %6 = vector.load %arg6[%c0_11, %c0_12] : memref<32x64xf32, #tpu.memory_space<vmem>>, vector<32x64xf32>
    %c0_13 = arith.constant 0 : index
    %c0_14 = arith.constant 0 : index
    %7 = vector.load %arg7[%c0_13, %c0_14] : memref<32x32xf32, #tpu.memory_space<vmem>>, vector<32x32xf32>
    %c0_15 = arith.constant 0 : index
    %c0_16 = arith.constant 0 : index
    %8 = vector.load %arg8[%c0_15, %c0_16] : memref<32x32xf32, #tpu.memory_space<vmem>>, vector<32x32xf32>
    %c0_17 = arith.constant 0 : index
    %c0_18 = arith.constant 0 : index
    %9 = vector.load %arg9[%c0_17, %c0_18] : memref<1x32xf32, #tpu.memory_space<vmem>>, vector<1x32xf32>
    %c0_19 = arith.constant 0 : index
    %c0_20 = arith.constant 0 : index
    %10 = vector.load %arg10[%c0_19, %c0_20] : memref<1x32xf32, #tpu.memory_space<vmem>>, vector<1x32xf32>
    %c0_21 = arith.constant 0 : index
    %c0_22 = arith.constant 0 : index
    %11 = vector.load %arg11[%c0_21, %c0_22] : memref<1x32xf32, #tpu.memory_space<vmem>>, vector<1x32xf32>
    %c0_23 = arith.constant 0 : index
    %c0_24 = arith.constant 0 : index
    %12 = vector.load %arg12[%c0_23, %c0_24] : memref<1x32xf32, #tpu.memory_space<vmem>>, vector<1x32xf32>
    %c0_25 = arith.constant 0 : index
    %c0_26 = arith.constant 0 : index
    %13 = vector.load %arg13[%c0_25, %c0_26] : memref<1x32xf32, #tpu.memory_space<vmem>>, vector<1x32xf32>
    %c0_27 = arith.constant 0 : index
    %c0_28 = arith.constant 0 : index
    %14 = vector.load %arg14[%c0_27, %c0_28] : memref<1x32xf32, #tpu.memory_space<vmem>>, vector<1x32xf32>
    %c0_29 = arith.constant 0 : index
    %c0_30 = arith.constant 0 : index
    %15 = vector.load %arg15[%c0_29, %c0_30] : memref<1x32xf32, #tpu.memory_space<vmem>>, vector<1x32xf32>
    %c0_31 = arith.constant 0 : index
    %c0_32 = arith.constant 0 : index
    %16 = vector.load %arg16[%c0_31, %c0_32] : memref<1x96xf32, #tpu.memory_space<vmem>>, vector<1x96xf32>
    %c0_33 = arith.constant 0 : index
    %c0_34 = arith.constant 0 : index
    %17 = vector.load %arg17[%c0_33, %c0_34] : memref<32x32xf32, #tpu.memory_space<vmem>>, vector<32x32xf32>
    %c0_35 = arith.constant 0 : index
    %c0_36 = arith.constant 0 : index
    %18 = vector.load %arg18[%c0_35, %c0_36] : memref<32x96xf32, #tpu.memory_space<vmem>>, vector<32x96xf32>
    %c0_37 = arith.constant 0 : index
    %c0_38 = arith.constant 0 : index
    %19 = vector.load %arg19[%c0_37, %c0_38] : memref<32x64xf32, #tpu.memory_space<vmem>>, vector<32x64xf32>
    %c0_39 = arith.constant 0 : index
    %c0_40 = arith.constant 0 : index
    %20 = vector.load %arg20[%c0_39, %c0_40] : memref<64x32xf32, #tpu.memory_space<vmem>>, vector<64x32xf32>
    %c0_41 = arith.constant 0 : index
    %c0_42 = arith.constant 0 : index
    %21 = vector.load %arg21[%c0_41, %c0_42] : memref<1x64xf32, #tpu.memory_space<vmem>>, vector<1x64xf32>
    %c0_43 = arith.constant 0 : index
    %c0_44 = arith.constant 0 : index
    %22 = vector.load %arg22[%c0_43, %c0_44] : memref<1x32xf32, #tpu.memory_space<vmem>>, vector<1x32xf32>
    %c0_45 = arith.constant 0 : index
    %c0_46 = arith.constant 0 : index
    %23 = vector.load %arg23[%c0_45, %c0_46] : memref<1x64xf32, #tpu.memory_space<vmem>>, vector<1x64xf32>
    %c0_47 = arith.constant 0 : index
    %c0_48 = arith.constant 0 : index
    %24 = vector.load %arg24[%c0_47, %c0_48] : memref<1x32xf32, #tpu.memory_space<vmem>>, vector<1x32xf32>
    %c0_49 = arith.constant 0 : index
    %c0_50 = arith.constant 0 : index
    %25 = vector.load %arg25[%c0_49, %c0_50] : memref<1x32xf32, #tpu.memory_space<vmem>>, vector<1x32xf32>
    %c0_51 = arith.constant 0 : index
    %c0_52 = arith.constant 0 : index
    %26 = vector.load %arg26[%c0_51, %c0_52] : memref<32x64xf32, #tpu.memory_space<vmem>>, vector<32x64xf32>
    %c0_53 = arith.constant 0 : index
    %c0_54 = arith.constant 0 : index
    %27 = vector.load %arg27[%c0_53, %c0_54] : memref<32x32xf32, #tpu.memory_space<vmem>>, vector<32x32xf32>
    %c0_55 = arith.constant 0 : index
    %c0_56 = arith.constant 0 : index
    %28 = vector.load %arg28[%c0_55, %c0_56] : memref<32x32xf32, #tpu.memory_space<vmem>>, vector<32x32xf32>
    %c0_57 = arith.constant 0 : index
    %c0_58 = arith.constant 0 : index
    %29 = vector.load %arg29[%c0_57, %c0_58] : memref<1x32xf32, #tpu.memory_space<vmem>>, vector<1x32xf32>
    %c0_59 = arith.constant 0 : index
    %c0_60 = arith.constant 0 : index
    %30 = vector.load %arg30[%c0_59, %c0_60] : memref<1x32xf32, #tpu.memory_space<vmem>>, vector<1x32xf32>
    %c0_61 = arith.constant 0 : index
    %c0_62 = arith.constant 0 : index
    %31 = vector.load %arg31[%c0_61, %c0_62] : memref<1x32xf32, #tpu.memory_space<vmem>>, vector<1x32xf32>
    %c0_63 = arith.constant 0 : index
    %c0_64 = arith.constant 0 : index
    %32 = vector.load %arg32[%c0_63, %c0_64] : memref<1x32xf32, #tpu.memory_space<vmem>>, vector<1x32xf32>
    %c0_65 = arith.constant 0 : index
    %c0_66 = arith.constant 0 : index
    %33 = vector.load %arg33[%c0_65, %c0_66] : memref<1x32xf32, #tpu.memory_space<vmem>>, vector<1x32xf32>
    %c0_67 = arith.constant 0 : index
    %c0_68 = arith.constant 0 : index
    %34 = vector.load %arg34[%c0_67, %c0_68] : memref<1x32xf32, #tpu.memory_space<vmem>>, vector<1x32xf32>
    %c0_69 = arith.constant 0 : index
    %c0_70 = arith.constant 0 : index
    %35 = vector.load %arg35[%c0_69, %c0_70] : memref<1x32xf32, #tpu.memory_space<vmem>>, vector<1x32xf32>
    %c0_71 = arith.constant 0 : index
    %c0_72 = arith.constant 0 : index
    %36 = vector.load %arg36[%c0_71, %c0_72] : memref<1x96xf32, #tpu.memory_space<vmem>>, vector<1x96xf32>
    %c0_73 = arith.constant 0 : index
    %c0_74 = arith.constant 0 : index
    %37 = vector.load %arg37[%c0_73, %c0_74] : memref<32x32xf32, #tpu.memory_space<vmem>>, vector<32x32xf32>
    %c0_75 = arith.constant 0 : index
    %c0_76 = arith.constant 0 : index
    %38 = vector.load %arg38[%c0_75, %c0_76] : memref<32x96xf32, #tpu.memory_space<vmem>>, vector<32x96xf32>
    %c0_77 = arith.constant 0 : index
    %c0_78 = arith.constant 0 : index
    %39 = vector.load %arg39[%c0_77, %c0_78] : memref<32x64xf32, #tpu.memory_space<vmem>>, vector<32x64xf32>
    %c0_79 = arith.constant 0 : index
    %c0_80 = arith.constant 0 : index
    %40 = vector.load %arg40[%c0_79, %c0_80] : memref<64x32xf32, #tpu.memory_space<vmem>>, vector<64x32xf32>
    %c0_81 = arith.constant 0 : index
    %c0_82 = arith.constant 0 : index
    %41 = vector.load %arg41[%c0_81, %c0_82] : memref<1x64xf32, #tpu.memory_space<vmem>>, vector<1x64xf32>
    %c0_83 = arith.constant 0 : index
    %c0_84 = arith.constant 0 : index
    %42 = vector.load %arg42[%c0_83, %c0_84] : memref<1x32xf32, #tpu.memory_space<vmem>>, vector<1x32xf32>
    %c0_85 = arith.constant 0 : index
    %c0_86 = arith.constant 0 : index
    %43 = vector.load %arg43[%c0_85, %c0_86] : memref<1x32xf32, #tpu.memory_space<vmem>>, vector<1x32xf32>
    %c0_87 = arith.constant 0 : index
    %c0_88 = arith.constant 0 : index
    %44 = vector.load %arg44[%c0_87, %c0_88] : memref<1x96xf32, #tpu.memory_space<vmem>>, vector<1x96xf32>
    %c0_89 = arith.constant 0 : index
    %c0_90 = arith.constant 0 : index
    %45 = vector.load %arg45[%c0_89, %c0_90] : memref<1x32xf32, #tpu.memory_space<vmem>>, vector<1x32xf32>
    %c0_91 = arith.constant 0 : index
    %c0_92 = arith.constant 0 : index
    %46 = vector.load %arg46[%c0_91, %c0_92] : memref<1x32xf32, #tpu.memory_space<vmem>>, vector<1x32xf32>
    %c0_93 = arith.constant 0 : index
    %c0_94 = arith.constant 0 : index
    %47 = vector.load %arg47[%c0_93, %c0_94] : memref<1x32xf32, #tpu.memory_space<vmem>>, vector<1x32xf32>
    %c0_95 = arith.constant 0 : index
    %c0_96 = arith.constant 0 : index
    %48 = vector.load %arg48[%c0_95, %c0_96] : memref<1x32xf32, #tpu.memory_space<vmem>>, vector<1x32xf32>
    %c0_97 = arith.constant 0 : index
    %c0_98 = arith.constant 0 : index
    %49 = vector.load %arg49[%c0_97, %c0_98] : memref<32x64xf32, #tpu.memory_space<vmem>>, vector<32x64xf32>
    %c0_99 = arith.constant 0 : index
    %c0_100 = arith.constant 0 : index
    %50 = vector.load %arg50[%c0_99, %c0_100] : memref<64x32xf32, #tpu.memory_space<vmem>>, vector<64x32xf32>
    %c0_101 = arith.constant 0 : index
    %c0_102 = arith.constant 0 : index
    %51 = vector.load %arg51[%c0_101, %c0_102] : memref<32x32xf32, #tpu.memory_space<vmem>>, vector<32x32xf32>
    %c0_103 = arith.constant 0 : index
    %c0_104 = arith.constant 0 : index
    %52 = vector.load %arg52[%c0_103, %c0_104] : memref<32x96xf32, #tpu.memory_space<vmem>>, vector<32x96xf32>
    %c0_105 = arith.constant 0 : index
    %c0_106 = arith.constant 0 : index
    %53 = vector.load %arg53[%c0_105, %c0_106] : memref<1x64xf32, #tpu.memory_space<vmem>>, vector<1x64xf32>
    %c0_107 = arith.constant 0 : index
    %c0_108 = arith.constant 0 : index
    %54 = vector.load %arg54[%c0_107, %c0_108] : memref<1x32xf32, #tpu.memory_space<vmem>>, vector<1x32xf32>
    %c0_109 = arith.constant 0 : index
    %c0_110 = arith.constant 0 : index
    %55 = vector.load %arg55[%c0_109, %c0_110] : memref<1x32xf32, #tpu.memory_space<vmem>>, vector<1x32xf32>
    %c0_111 = arith.constant 0 : index
    %c0_112 = arith.constant 0 : index
    %56 = vector.load %arg56[%c0_111, %c0_112] : memref<1x96xf32, #tpu.memory_space<vmem>>, vector<1x96xf32>
    %c0_113 = arith.constant 0 : index
    %c0_114 = arith.constant 0 : index
    %57 = vector.load %arg57[%c0_113, %c0_114] : memref<1x32xf32, #tpu.memory_space<vmem>>, vector<1x32xf32>
    %c0_115 = arith.constant 0 : index
    %c0_116 = arith.constant 0 : index
    %58 = vector.load %arg58[%c0_115, %c0_116] : memref<1x32xf32, #tpu.memory_space<vmem>>, vector<1x32xf32>
    %c0_117 = arith.constant 0 : index
    %c0_118 = arith.constant 0 : index
    %59 = vector.load %arg59[%c0_117, %c0_118] : memref<1x32xf32, #tpu.memory_space<vmem>>, vector<1x32xf32>
    %c0_119 = arith.constant 0 : index
    %c0_120 = arith.constant 0 : index
    %60 = vector.load %arg60[%c0_119, %c0_120] : memref<1x32xf32, #tpu.memory_space<vmem>>, vector<1x32xf32>
    %c0_121 = arith.constant 0 : index
    %c0_122 = arith.constant 0 : index
    %61 = vector.load %arg61[%c0_121, %c0_122] : memref<32x64xf32, #tpu.memory_space<vmem>>, vector<32x64xf32>
    %c0_123 = arith.constant 0 : index
    %c0_124 = arith.constant 0 : index
    %62 = vector.load %arg62[%c0_123, %c0_124] : memref<64x32xf32, #tpu.memory_space<vmem>>, vector<64x32xf32>
    %c0_125 = arith.constant 0 : index
    %c0_126 = arith.constant 0 : index
    %63 = vector.load %arg63[%c0_125, %c0_126] : memref<32x32xf32, #tpu.memory_space<vmem>>, vector<32x32xf32>
    %c0_127 = arith.constant 0 : index
    %c0_128 = arith.constant 0 : index
    %64 = vector.load %arg64[%c0_127, %c0_128] : memref<32x96xf32, #tpu.memory_space<vmem>>, vector<32x96xf32>
    %c0_129 = arith.constant 0 : index
    %c0_130 = arith.constant 0 : index
    %65 = vector.load %arg65[%c0_129, %c0_130] : memref<16x16xf32, #tpu.memory_space<vmem>>, vector<16x16xf32>
    %c0_131 = arith.constant 0 : index
    %c0_132 = arith.constant 0 : index
    %66 = vector.load %arg66[%c0_131, %c0_132] : memref<16x16xf32, #tpu.memory_space<vmem>>, vector<16x16xf32>
    %c0_133 = arith.constant 0 : index
    %c0_134 = arith.constant 0 : index
    %67 = vector.load %arg67[%c0_133, %c0_134] : memref<16x32xf32, #tpu.memory_space<vmem>>, vector<16x32xf32>
    %c0_135 = arith.constant 0 : index
    %c0_136 = arith.constant 0 : index
    %68 = vector.load %arg68[%c0_135, %c0_136] : memref<16x32xf32, #tpu.memory_space<vmem>>, vector<16x32xf32>
    %c0_137 = arith.constant 0 : index
    %c0_138 = arith.constant 0 : index
    %69 = vector.load %arg69[%c0_137, %c0_138] : memref<16x16xf32, #tpu.memory_space<vmem>>, vector<16x16xf32>
    %c0_139 = arith.constant 0 : index
    %c0_140 = arith.constant 0 : index
    %70 = vector.load %arg70[%c0_139, %c0_140] : memref<32x128xf32, #tpu.memory_space<vmem>>, vector<32x128xf32>
    %cst = arith.constant dense<0.000000e+00> : vector<16x96xf32>
    %71 = tpu.matmul %67, %52, %cst {dimension_numbers = #tpu.dot_dimension_numbers<[1], [0], [0], [1], [0, 0, 1, 1], [], []>} : vector<16x32xf32>, vector<32x96xf32>, vector<16x96xf32> -> vector<16x96xf32>
    %72 = vector.broadcast %44 : vector<1x96xf32> to vector<16x96xf32>
    %73 = arith.addf %71, %72 : vector<16x96xf32>
    %74 = vector.extract_strided_slice %73 {offsets = [0, 0], sizes = [16, 32], strides = [1, 1]} : vector<16x96xf32> to vector<16x32xf32>
    %75 = vector.extract_strided_slice %73 {offsets = [0, 32], sizes = [16, 32], strides = [1, 1]} : vector<16x96xf32> to vector<16x32xf32>
    %76 = vector.extract_strided_slice %73 {offsets = [0, 64], sizes = [16, 32], strides = [1, 1]} : vector<16x96xf32> to vector<16x32xf32>
    %77 = vector.extract_strided_slice %74 {offsets = [0, 0], sizes = [16, 8], strides = [1, 1]} : vector<16x32xf32> to vector<16x8xf32>
    %78 = vector.extract_strided_slice %75 {offsets = [0, 0], sizes = [16, 8], strides = [1, 1]} : vector<16x32xf32> to vector<16x8xf32>
    %cst_141 = arith.constant dense<0.000000e+00> : vector<16x16xf32>
    %79 = tpu.matmul %77, %78, %cst_141 {dimension_numbers = #tpu.dot_dimension_numbers<[1], [1], [0], [0], [0, 0, 1, 0], [], []>} : vector<16x8xf32>, vector<16x8xf32>, vector<16x16xf32> -> vector<16x16xf32>
    %80 = arith.addf %79, %66 : vector<16x16xf32>
    %cst_142 = arith.constant dense<0xFF800000> : vector<16xf32>
    %81 = vector.multi_reduction <maximumf>, %80, %cst_142 [1] : vector<16x16xf32> to vector<16xf32>
    %82 = vector.shape_cast %81 : vector<16xf32> to vector<16x1xf32>
    %83 = vector.broadcast %82 : vector<16x1xf32> to vector<16x16xf32>
    %84 = arith.subf %80, %83 : vector<16x16xf32>
    %85 = math.exp %84 : vector<16x16xf32>
    %cst_143 = arith.constant dense<0.000000e+00> : vector<16xf32>
    %86 = vector.multi_reduction <add>, %85, %cst_143 [1] : vector<16x16xf32> to vector<16xf32>
    %87 = vector.shape_cast %86 : vector<16xf32> to vector<16x1xf32>
    %88 = vector.broadcast %87 : vector<16x1xf32> to vector<16x16xf32>
    %89 = arith.divf %85, %88 : vector<16x16xf32>
    %90 = vector.extract_strided_slice %76 {offsets = [0, 0], sizes = [16, 8], strides = [1, 1]} : vector<16x32xf32> to vector<16x8xf32>
    %cst_144 = arith.constant dense<0.000000e+00> : vector<16x8xf32>
    %91 = tpu.matmul %89, %90, %cst_144 {dimension_numbers = #tpu.dot_dimension_numbers<[1], [0], [0], [1], [0, 0, 1, 1], [], []>} : vector<16x16xf32>, vector<16x8xf32>, vector<16x8xf32> -> vector<16x8xf32>
    %92 = vector.extract_strided_slice %74 {offsets = [0, 8], sizes = [16, 8], strides = [1, 1]} : vector<16x32xf32> to vector<16x8xf32>
    %93 = vector.extract_strided_slice %75 {offsets = [0, 8], sizes = [16, 8], strides = [1, 1]} : vector<16x32xf32> to vector<16x8xf32>
    %cst_145 = arith.constant dense<0.000000e+00> : vector<16x16xf32>
    %94 = tpu.matmul %92, %93, %cst_145 {dimension_numbers = #tpu.dot_dimension_numbers<[1], [1], [0], [0], [0, 0, 1, 0], [], []>} : vector<16x8xf32>, vector<16x8xf32>, vector<16x16xf32> -> vector<16x16xf32>
    %95 = arith.addf %94, %66 : vector<16x16xf32>
    %cst_146 = arith.constant dense<0xFF800000> : vector<16xf32>
    %96 = vector.multi_reduction <maximumf>, %95, %cst_146 [1] : vector<16x16xf32> to vector<16xf32>
    %97 = vector.shape_cast %96 : vector<16xf32> to vector<16x1xf32>
    %98 = vector.broadcast %97 : vector<16x1xf32> to vector<16x16xf32>
    %99 = arith.subf %95, %98 : vector<16x16xf32>
    %100 = math.exp %99 : vector<16x16xf32>
    %cst_147 = arith.constant dense<0.000000e+00> : vector<16xf32>
    %101 = vector.multi_reduction <add>, %100, %cst_147 [1] : vector<16x16xf32> to vector<16xf32>
    %102 = vector.shape_cast %101 : vector<16xf32> to vector<16x1xf32>
    %103 = vector.broadcast %102 : vector<16x1xf32> to vector<16x16xf32>
    %104 = arith.divf %100, %103 : vector<16x16xf32>
    %105 = vector.extract_strided_slice %76 {offsets = [0, 8], sizes = [16, 8], strides = [1, 1]} : vector<16x32xf32> to vector<16x8xf32>
    %cst_148 = arith.constant dense<0.000000e+00> : vector<16x8xf32>
    %106 = tpu.matmul %104, %105, %cst_148 {dimension_numbers = #tpu.dot_dimension_numbers<[1], [0], [0], [1], [0, 0, 1, 1], [], []>} : vector<16x16xf32>, vector<16x8xf32>, vector<16x8xf32> -> vector<16x8xf32>
    %107 = vector.extract_strided_slice %74 {offsets = [0, 16], sizes = [16, 8], strides = [1, 1]} : vector<16x32xf32> to vector<16x8xf32>
    %108 = vector.extract_strided_slice %75 {offsets = [0, 16], sizes = [16, 8], strides = [1, 1]} : vector<16x32xf32> to vector<16x8xf32>
    %cst_149 = arith.constant dense<0.000000e+00> : vector<16x16xf32>
    %109 = tpu.matmul %107, %108, %cst_149 {dimension_numbers = #tpu.dot_dimension_numbers<[1], [1], [0], [0], [0, 0, 1, 0], [], []>} : vector<16x8xf32>, vector<16x8xf32>, vector<16x16xf32> -> vector<16x16xf32>
    %110 = arith.addf %109, %66 : vector<16x16xf32>
    %cst_150 = arith.constant dense<0xFF800000> : vector<16xf32>
    %111 = vector.multi_reduction <maximumf>, %110, %cst_150 [1] : vector<16x16xf32> to vector<16xf32>
    %112 = vector.shape_cast %111 : vector<16xf32> to vector<16x1xf32>
    %113 = vector.broadcast %112 : vector<16x1xf32> to vector<16x16xf32>
    %114 = arith.subf %110, %113 : vector<16x16xf32>
    %115 = math.exp %114 : vector<16x16xf32>
    %cst_151 = arith.constant dense<0.000000e+00> : vector<16xf32>
    %116 = vector.multi_reduction <add>, %115, %cst_151 [1] : vector<16x16xf32> to vector<16xf32>
    %117 = vector.shape_cast %116 : vector<16xf32> to vector<16x1xf32>
    %118 = vector.broadcast %117 : vector<16x1xf32> to vector<16x16xf32>
    %119 = arith.divf %115, %118 : vector<16x16xf32>
    %120 = vector.extract_strided_slice %76 {offsets = [0, 16], sizes = [16, 8], strides = [1, 1]} : vector<16x32xf32> to vector<16x8xf32>
    %cst_152 = arith.constant dense<0.000000e+00> : vector<16x8xf32>
    %121 = tpu.matmul %119, %120, %cst_152 {dimension_numbers = #tpu.dot_dimension_numbers<[1], [0], [0], [1], [0, 0, 1, 1], [], []>} : vector<16x16xf32>, vector<16x8xf32>, vector<16x8xf32> -> vector<16x8xf32>
    %122 = vector.extract_strided_slice %74 {offsets = [0, 24], sizes = [16, 8], strides = [1, 1]} : vector<16x32xf32> to vector<16x8xf32>
    %123 = vector.extract_strided_slice %75 {offsets = [0, 24], sizes = [16, 8], strides = [1, 1]} : vector<16x32xf32> to vector<16x8xf32>
    %cst_153 = arith.constant dense<0.000000e+00> : vector<16x16xf32>
    %124 = tpu.matmul %122, %123, %cst_153 {dimension_numbers = #tpu.dot_dimension_numbers<[1], [1], [0], [0], [0, 0, 1, 0], [], []>} : vector<16x8xf32>, vector<16x8xf32>, vector<16x16xf32> -> vector<16x16xf32>
    %125 = arith.addf %124, %66 : vector<16x16xf32>
    %cst_154 = arith.constant dense<0xFF800000> : vector<16xf32>
    %126 = vector.multi_reduction <maximumf>, %125, %cst_154 [1] : vector<16x16xf32> to vector<16xf32>
    %127 = vector.shape_cast %126 : vector<16xf32> to vector<16x1xf32>
    %128 = vector.broadcast %127 : vector<16x1xf32> to vector<16x16xf32>
    %129 = arith.subf %125, %128 : vector<16x16xf32>
    %130 = math.exp %129 : vector<16x16xf32>
    %cst_155 = arith.constant dense<0.000000e+00> : vector<16xf32>
    %131 = vector.multi_reduction <add>, %130, %cst_155 [1] : vector<16x16xf32> to vector<16xf32>
    %132 = vector.shape_cast %131 : vector<16xf32> to vector<16x1xf32>
    %133 = vector.broadcast %132 : vector<16x1xf32> to vector<16x16xf32>
    %134 = arith.divf %130, %133 : vector<16x16xf32>
    %135 = vector.extract_strided_slice %76 {offsets = [0, 24], sizes = [16, 8], strides = [1, 1]} : vector<16x32xf32> to vector<16x8xf32>
    %cst_156 = arith.constant dense<0.000000e+00> : vector<16x8xf32>
    %136 = tpu.matmul %134, %135, %cst_156 {dimension_numbers = #tpu.dot_dimension_numbers<[1], [0], [0], [1], [0, 0, 1, 1], [], []>} : vector<16x16xf32>, vector<16x8xf32>, vector<16x8xf32> -> vector<16x8xf32>
    %137 = tpu.concatenate %91, %106, %121, %136 in 1 : vector<16x8xf32>, vector<16x8xf32>, vector<16x8xf32>, vector<16x8xf32> -> vector<16x32xf32>
    %cst_157 = arith.constant dense<0.000000e+00> : vector<16x32xf32>
    %138 = tpu.matmul %137, %51, %cst_157 {dimension_numbers = #tpu.dot_dimension_numbers<[1], [0], [0], [1], [0, 0, 1, 1], [], []>} : vector<16x32xf32>, vector<32x32xf32>, vector<16x32xf32> -> vector<16x32xf32>
    %139 = vector.broadcast %43 : vector<1x32xf32> to vector<16x32xf32>
    %140 = arith.addf %138, %139 : vector<16x32xf32>
    %141 = arith.addf %67, %140 : vector<16x32xf32>
    %cst_158 = arith.constant dense<0.000000e+00> : vector<16xf32>
    %142 = vector.multi_reduction <add>, %141, %cst_158 [1] : vector<16x32xf32> to vector<16xf32>
    %143 = vector.shape_cast %142 : vector<16xf32> to vector<16x1xf32>
    %cst_159 = arith.constant 3.200000e+01 : f32
    %144 = vector.broadcast %cst_159 : f32 to vector<16x1xf32>
    %145 = arith.divf %143, %144 : vector<16x1xf32>
    %146 = vector.broadcast %145 : vector<16x1xf32> to vector<16x32xf32>
    %147 = arith.subf %141, %146 : vector<16x32xf32>
    %148 = arith.mulf %147, %147 : vector<16x32xf32>
    %cst_160 = arith.constant dense<0.000000e+00> : vector<16xf32>
    %149 = vector.multi_reduction <add>, %148, %cst_160 [1] : vector<16x32xf32> to vector<16xf32>
    %150 = vector.shape_cast %149 : vector<16xf32> to vector<16x1xf32>
    %cst_161 = arith.constant 3.200000e+01 : f32
    %151 = vector.broadcast %cst_161 : f32 to vector<16x1xf32>
    %152 = arith.divf %150, %151 : vector<16x1xf32>
    %cst_162 = arith.constant 9.99999974E-6 : f32
    %153 = vector.broadcast %cst_162 : f32 to vector<16x1xf32>
    %154 = arith.addf %152, %153 : vector<16x1xf32>
    %155 = math.rsqrt %154 : vector<16x1xf32>
    %156 = vector.broadcast %155 : vector<16x1xf32> to vector<16x32xf32>
    %157 = arith.mulf %147, %156 : vector<16x32xf32>
    %158 = vector.broadcast %46 : vector<1x32xf32> to vector<16x32xf32>
    %159 = arith.mulf %157, %158 : vector<16x32xf32>
    %160 = vector.broadcast %45 : vector<1x32xf32> to vector<16x32xf32>
    %161 = arith.addf %159, %160 : vector<16x32xf32>
    %cst_163 = arith.constant dense<0.000000e+00> : vector<16x64xf32>
    %162 = tpu.matmul %161, %49, %cst_163 {dimension_numbers = #tpu.dot_dimension_numbers<[1], [0], [0], [1], [0, 0, 1, 1], [], []>} : vector<16x32xf32>, vector<32x64xf32>, vector<16x64xf32> -> vector<16x64xf32>
    %163 = vector.broadcast %41 : vector<1x64xf32> to vector<16x64xf32>
    %164 = arith.addf %162, %163 : vector<16x64xf32>
    %cst_164 = arith.constant 0.000000e+00 : f32
    %165 = vector.broadcast %cst_164 : f32 to vector<16x64xf32>
    %166 = arith.maximumf %164, %165 : vector<16x64xf32>
    %cst_165 = arith.constant dense<0.000000e+00> : vector<16x32xf32>
    %167 = tpu.matmul %166, %50, %cst_165 {dimension_numbers = #tpu.dot_dimension_numbers<[1], [0], [0], [1], [0, 0, 1, 1], [], []>} : vector<16x64xf32>, vector<64x32xf32>, vector<16x32xf32> -> vector<16x32xf32>
    %168 = vector.broadcast %42 : vector<1x32xf32> to vector<16x32xf32>
    %169 = arith.addf %167, %168 : vector<16x32xf32>
    %170 = arith.addf %161, %169 : vector<16x32xf32>
    %cst_166 = arith.constant dense<0.000000e+00> : vector<16xf32>
    %171 = vector.multi_reduction <add>, %170, %cst_166 [1] : vector<16x32xf32> to vector<16xf32>
    %172 = vector.shape_cast %171 : vector<16xf32> to vector<16x1xf32>
    %cst_167 = arith.constant 3.200000e+01 : f32
    %173 = vector.broadcast %cst_167 : f32 to vector<16x1xf32>
    %174 = arith.divf %172, %173 : vector<16x1xf32>
    %175 = vector.broadcast %174 : vector<16x1xf32> to vector<16x32xf32>
    %176 = arith.subf %170, %175 : vector<16x32xf32>
    %177 = arith.mulf %176, %176 : vector<16x32xf32>
    %cst_168 = arith.constant dense<0.000000e+00> : vector<16xf32>
    %178 = vector.multi_reduction <add>, %177, %cst_168 [1] : vector<16x32xf32> to vector<16xf32>
    %179 = vector.shape_cast %178 : vector<16xf32> to vector<16x1xf32>
    %cst_169 = arith.constant 3.200000e+01 : f32
    %180 = vector.broadcast %cst_169 : f32 to vector<16x1xf32>
    %181 = arith.divf %179, %180 : vector<16x1xf32>
    %cst_170 = arith.constant 9.99999974E-6 : f32
    %182 = vector.broadcast %cst_170 : f32 to vector<16x1xf32>
    %183 = arith.addf %181, %182 : vector<16x1xf32>
    %184 = math.rsqrt %183 : vector<16x1xf32>
    %185 = vector.broadcast %184 : vector<16x1xf32> to vector<16x32xf32>
    %186 = arith.mulf %176, %185 : vector<16x32xf32>
    %187 = vector.broadcast %48 : vector<1x32xf32> to vector<16x32xf32>
    %188 = arith.mulf %186, %187 : vector<16x32xf32>
    %189 = vector.broadcast %47 : vector<1x32xf32> to vector<16x32xf32>
    %190 = arith.addf %188, %189 : vector<16x32xf32>
    %cst_171 = arith.constant dense<0.000000e+00> : vector<16x96xf32>
    %191 = tpu.matmul %190, %64, %cst_171 {dimension_numbers = #tpu.dot_dimension_numbers<[1], [0], [0], [1], [0, 0, 1, 1], [], []>} : vector<16x32xf32>, vector<32x96xf32>, vector<16x96xf32> -> vector<16x96xf32>
    %192 = vector.broadcast %56 : vector<1x96xf32> to vector<16x96xf32>
    %193 = arith.addf %191, %192 : vector<16x96xf32>
    %194 = vector.extract_strided_slice %193 {offsets = [0, 0], sizes = [16, 32], strides = [1, 1]} : vector<16x96xf32> to vector<16x32xf32>
    %195 = vector.extract_strided_slice %193 {offsets = [0, 32], sizes = [16, 32], strides = [1, 1]} : vector<16x96xf32> to vector<16x32xf32>
    %196 = vector.extract_strided_slice %193 {offsets = [0, 64], sizes = [16, 32], strides = [1, 1]} : vector<16x96xf32> to vector<16x32xf32>
    %197 = vector.extract_strided_slice %194 {offsets = [0, 0], sizes = [16, 8], strides = [1, 1]} : vector<16x32xf32> to vector<16x8xf32>
    %198 = vector.extract_strided_slice %195 {offsets = [0, 0], sizes = [16, 8], strides = [1, 1]} : vector<16x32xf32> to vector<16x8xf32>
    %cst_172 = arith.constant dense<0.000000e+00> : vector<16x16xf32>
    %199 = tpu.matmul %197, %198, %cst_172 {dimension_numbers = #tpu.dot_dimension_numbers<[1], [1], [0], [0], [0, 0, 1, 0], [], []>} : vector<16x8xf32>, vector<16x8xf32>, vector<16x16xf32> -> vector<16x16xf32>
    %200 = arith.addf %199, %66 : vector<16x16xf32>
    %cst_173 = arith.constant dense<0xFF800000> : vector<16xf32>
    %201 = vector.multi_reduction <maximumf>, %200, %cst_173 [1] : vector<16x16xf32> to vector<16xf32>
    %202 = vector.shape_cast %201 : vector<16xf32> to vector<16x1xf32>
    %203 = vector.broadcast %202 : vector<16x1xf32> to vector<16x16xf32>
    %204 = arith.subf %200, %203 : vector<16x16xf32>
    %205 = math.exp %204 : vector<16x16xf32>
    %cst_174 = arith.constant dense<0.000000e+00> : vector<16xf32>
    %206 = vector.multi_reduction <add>, %205, %cst_174 [1] : vector<16x16xf32> to vector<16xf32>
    %207 = vector.shape_cast %206 : vector<16xf32> to vector<16x1xf32>
    %208 = vector.broadcast %207 : vector<16x1xf32> to vector<16x16xf32>
    %209 = arith.divf %205, %208 : vector<16x16xf32>
    %210 = vector.extract_strided_slice %196 {offsets = [0, 0], sizes = [16, 8], strides = [1, 1]} : vector<16x32xf32> to vector<16x8xf32>
    %cst_175 = arith.constant dense<0.000000e+00> : vector<16x8xf32>
    %211 = tpu.matmul %209, %210, %cst_175 {dimension_numbers = #tpu.dot_dimension_numbers<[1], [0], [0], [1], [0, 0, 1, 1], [], []>} : vector<16x16xf32>, vector<16x8xf32>, vector<16x8xf32> -> vector<16x8xf32>
    %212 = vector.extract_strided_slice %194 {offsets = [0, 8], sizes = [16, 8], strides = [1, 1]} : vector<16x32xf32> to vector<16x8xf32>
    %213 = vector.extract_strided_slice %195 {offsets = [0, 8], sizes = [16, 8], strides = [1, 1]} : vector<16x32xf32> to vector<16x8xf32>
    %cst_176 = arith.constant dense<0.000000e+00> : vector<16x16xf32>
    %214 = tpu.matmul %212, %213, %cst_176 {dimension_numbers = #tpu.dot_dimension_numbers<[1], [1], [0], [0], [0, 0, 1, 0], [], []>} : vector<16x8xf32>, vector<16x8xf32>, vector<16x16xf32> -> vector<16x16xf32>
    %215 = arith.addf %214, %66 : vector<16x16xf32>
    %cst_177 = arith.constant dense<0xFF800000> : vector<16xf32>
    %216 = vector.multi_reduction <maximumf>, %215, %cst_177 [1] : vector<16x16xf32> to vector<16xf32>
    %217 = vector.shape_cast %216 : vector<16xf32> to vector<16x1xf32>
    %218 = vector.broadcast %217 : vector<16x1xf32> to vector<16x16xf32>
    %219 = arith.subf %215, %218 : vector<16x16xf32>
    %220 = math.exp %219 : vector<16x16xf32>
    %cst_178 = arith.constant dense<0.000000e+00> : vector<16xf32>
    %221 = vector.multi_reduction <add>, %220, %cst_178 [1] : vector<16x16xf32> to vector<16xf32>
    %222 = vector.shape_cast %221 : vector<16xf32> to vector<16x1xf32>
    %223 = vector.broadcast %222 : vector<16x1xf32> to vector<16x16xf32>
    %224 = arith.divf %220, %223 : vector<16x16xf32>
    %225 = vector.extract_strided_slice %196 {offsets = [0, 8], sizes = [16, 8], strides = [1, 1]} : vector<16x32xf32> to vector<16x8xf32>
    %cst_179 = arith.constant dense<0.000000e+00> : vector<16x8xf32>
    %226 = tpu.matmul %224, %225, %cst_179 {dimension_numbers = #tpu.dot_dimension_numbers<[1], [0], [0], [1], [0, 0, 1, 1], [], []>} : vector<16x16xf32>, vector<16x8xf32>, vector<16x8xf32> -> vector<16x8xf32>
    %227 = vector.extract_strided_slice %194 {offsets = [0, 16], sizes = [16, 8], strides = [1, 1]} : vector<16x32xf32> to vector<16x8xf32>
    %228 = vector.extract_strided_slice %195 {offsets = [0, 16], sizes = [16, 8], strides = [1, 1]} : vector<16x32xf32> to vector<16x8xf32>
    %cst_180 = arith.constant dense<0.000000e+00> : vector<16x16xf32>
    %229 = tpu.matmul %227, %228, %cst_180 {dimension_numbers = #tpu.dot_dimension_numbers<[1], [1], [0], [0], [0, 0, 1, 0], [], []>} : vector<16x8xf32>, vector<16x8xf32>, vector<16x16xf32> -> vector<16x16xf32>
    %230 = arith.addf %229, %66 : vector<16x16xf32>
    %cst_181 = arith.constant dense<0xFF800000> : vector<16xf32>
    %231 = vector.multi_reduction <maximumf>, %230, %cst_181 [1] : vector<16x16xf32> to vector<16xf32>
    %232 = vector.shape_cast %231 : vector<16xf32> to vector<16x1xf32>
    %233 = vector.broadcast %232 : vector<16x1xf32> to vector<16x16xf32>
    %234 = arith.subf %230, %233 : vector<16x16xf32>
    %235 = math.exp %234 : vector<16x16xf32>
    %cst_182 = arith.constant dense<0.000000e+00> : vector<16xf32>
    %236 = vector.multi_reduction <add>, %235, %cst_182 [1] : vector<16x16xf32> to vector<16xf32>
    %237 = vector.shape_cast %236 : vector<16xf32> to vector<16x1xf32>
    %238 = vector.broadcast %237 : vector<16x1xf32> to vector<16x16xf32>
    %239 = arith.divf %235, %238 : vector<16x16xf32>
    %240 = vector.extract_strided_slice %196 {offsets = [0, 16], sizes = [16, 8], strides = [1, 1]} : vector<16x32xf32> to vector<16x8xf32>
    %cst_183 = arith.constant dense<0.000000e+00> : vector<16x8xf32>
    %241 = tpu.matmul %239, %240, %cst_183 {dimension_numbers = #tpu.dot_dimension_numbers<[1], [0], [0], [1], [0, 0, 1, 1], [], []>} : vector<16x16xf32>, vector<16x8xf32>, vector<16x8xf32> -> vector<16x8xf32>
    %242 = vector.extract_strided_slice %194 {offsets = [0, 24], sizes = [16, 8], strides = [1, 1]} : vector<16x32xf32> to vector<16x8xf32>
    %243 = vector.extract_strided_slice %195 {offsets = [0, 24], sizes = [16, 8], strides = [1, 1]} : vector<16x32xf32> to vector<16x8xf32>
    %cst_184 = arith.constant dense<0.000000e+00> : vector<16x16xf32>
    %244 = tpu.matmul %242, %243, %cst_184 {dimension_numbers = #tpu.dot_dimension_numbers<[1], [1], [0], [0], [0, 0, 1, 0], [], []>} : vector<16x8xf32>, vector<16x8xf32>, vector<16x16xf32> -> vector<16x16xf32>
    %245 = arith.addf %244, %66 : vector<16x16xf32>
    %cst_185 = arith.constant dense<0xFF800000> : vector<16xf32>
    %246 = vector.multi_reduction <maximumf>, %245, %cst_185 [1] : vector<16x16xf32> to vector<16xf32>
    %247 = vector.shape_cast %246 : vector<16xf32> to vector<16x1xf32>
    %248 = vector.broadcast %247 : vector<16x1xf32> to vector<16x16xf32>
    %249 = arith.subf %245, %248 : vector<16x16xf32>
    %250 = math.exp %249 : vector<16x16xf32>
    %cst_186 = arith.constant dense<0.000000e+00> : vector<16xf32>
    %251 = vector.multi_reduction <add>, %250, %cst_186 [1] : vector<16x16xf32> to vector<16xf32>
    %252 = vector.shape_cast %251 : vector<16xf32> to vector<16x1xf32>
    %253 = vector.broadcast %252 : vector<16x1xf32> to vector<16x16xf32>
    %254 = arith.divf %250, %253 : vector<16x16xf32>
    %255 = vector.extract_strided_slice %196 {offsets = [0, 24], sizes = [16, 8], strides = [1, 1]} : vector<16x32xf32> to vector<16x8xf32>
    %cst_187 = arith.constant dense<0.000000e+00> : vector<16x8xf32>
    %256 = tpu.matmul %254, %255, %cst_187 {dimension_numbers = #tpu.dot_dimension_numbers<[1], [0], [0], [1], [0, 0, 1, 1], [], []>} : vector<16x16xf32>, vector<16x8xf32>, vector<16x8xf32> -> vector<16x8xf32>
    %257 = tpu.concatenate %211, %226, %241, %256 in 1 : vector<16x8xf32>, vector<16x8xf32>, vector<16x8xf32>, vector<16x8xf32> -> vector<16x32xf32>
    %cst_188 = arith.constant dense<0.000000e+00> : vector<16x32xf32>
    %258 = tpu.matmul %257, %63, %cst_188 {dimension_numbers = #tpu.dot_dimension_numbers<[1], [0], [0], [1], [0, 0, 1, 1], [], []>} : vector<16x32xf32>, vector<32x32xf32>, vector<16x32xf32> -> vector<16x32xf32>
    %259 = vector.broadcast %55 : vector<1x32xf32> to vector<16x32xf32>
    %260 = arith.addf %258, %259 : vector<16x32xf32>
    %261 = arith.addf %190, %260 : vector<16x32xf32>
    %cst_189 = arith.constant dense<0.000000e+00> : vector<16xf32>
    %262 = vector.multi_reduction <add>, %261, %cst_189 [1] : vector<16x32xf32> to vector<16xf32>
    %263 = vector.shape_cast %262 : vector<16xf32> to vector<16x1xf32>
    %cst_190 = arith.constant 3.200000e+01 : f32
    %264 = vector.broadcast %cst_190 : f32 to vector<16x1xf32>
    %265 = arith.divf %263, %264 : vector<16x1xf32>
    %266 = vector.broadcast %265 : vector<16x1xf32> to vector<16x32xf32>
    %267 = arith.subf %261, %266 : vector<16x32xf32>
    %268 = arith.mulf %267, %267 : vector<16x32xf32>
    %cst_191 = arith.constant dense<0.000000e+00> : vector<16xf32>
    %269 = vector.multi_reduction <add>, %268, %cst_191 [1] : vector<16x32xf32> to vector<16xf32>
    %270 = vector.shape_cast %269 : vector<16xf32> to vector<16x1xf32>
    %cst_192 = arith.constant 3.200000e+01 : f32
    %271 = vector.broadcast %cst_192 : f32 to vector<16x1xf32>
    %272 = arith.divf %270, %271 : vector<16x1xf32>
    %cst_193 = arith.constant 9.99999974E-6 : f32
    %273 = vector.broadcast %cst_193 : f32 to vector<16x1xf32>
    %274 = arith.addf %272, %273 : vector<16x1xf32>
    %275 = math.rsqrt %274 : vector<16x1xf32>
    %276 = vector.broadcast %275 : vector<16x1xf32> to vector<16x32xf32>
    %277 = arith.mulf %267, %276 : vector<16x32xf32>
    %278 = vector.broadcast %58 : vector<1x32xf32> to vector<16x32xf32>
    %279 = arith.mulf %277, %278 : vector<16x32xf32>
    %280 = vector.broadcast %57 : vector<1x32xf32> to vector<16x32xf32>
    %281 = arith.addf %279, %280 : vector<16x32xf32>
    %cst_194 = arith.constant dense<0.000000e+00> : vector<16x64xf32>
    %282 = tpu.matmul %281, %61, %cst_194 {dimension_numbers = #tpu.dot_dimension_numbers<[1], [0], [0], [1], [0, 0, 1, 1], [], []>} : vector<16x32xf32>, vector<32x64xf32>, vector<16x64xf32> -> vector<16x64xf32>
    %283 = vector.broadcast %53 : vector<1x64xf32> to vector<16x64xf32>
    %284 = arith.addf %282, %283 : vector<16x64xf32>
    %cst_195 = arith.constant 0.000000e+00 : f32
    %285 = vector.broadcast %cst_195 : f32 to vector<16x64xf32>
    %286 = arith.maximumf %284, %285 : vector<16x64xf32>
    %cst_196 = arith.constant dense<0.000000e+00> : vector<16x32xf32>
    %287 = tpu.matmul %286, %62, %cst_196 {dimension_numbers = #tpu.dot_dimension_numbers<[1], [0], [0], [1], [0, 0, 1, 1], [], []>} : vector<16x64xf32>, vector<64x32xf32>, vector<16x32xf32> -> vector<16x32xf32>
    %288 = vector.broadcast %54 : vector<1x32xf32> to vector<16x32xf32>
    %289 = arith.addf %287, %288 : vector<16x32xf32>
    %290 = arith.addf %281, %289 : vector<16x32xf32>
    %cst_197 = arith.constant dense<0.000000e+00> : vector<16xf32>
    %291 = vector.multi_reduction <add>, %290, %cst_197 [1] : vector<16x32xf32> to vector<16xf32>
    %292 = vector.shape_cast %291 : vector<16xf32> to vector<16x1xf32>
    %cst_198 = arith.constant 3.200000e+01 : f32
    %293 = vector.broadcast %cst_198 : f32 to vector<16x1xf32>
    %294 = arith.divf %292, %293 : vector<16x1xf32>
    %295 = vector.broadcast %294 : vector<16x1xf32> to vector<16x32xf32>
    %296 = arith.subf %290, %295 : vector<16x32xf32>
    %297 = arith.mulf %296, %296 : vector<16x32xf32>
    %cst_199 = arith.constant dense<0.000000e+00> : vector<16xf32>
    %298 = vector.multi_reduction <add>, %297, %cst_199 [1] : vector<16x32xf32> to vector<16xf32>
    %299 = vector.shape_cast %298 : vector<16xf32> to vector<16x1xf32>
    %cst_200 = arith.constant 3.200000e+01 : f32
    %300 = vector.broadcast %cst_200 : f32 to vector<16x1xf32>
    %301 = arith.divf %299, %300 : vector<16x1xf32>
    %cst_201 = arith.constant 9.99999974E-6 : f32
    %302 = vector.broadcast %cst_201 : f32 to vector<16x1xf32>
    %303 = arith.addf %301, %302 : vector<16x1xf32>
    %304 = math.rsqrt %303 : vector<16x1xf32>
    %305 = vector.broadcast %304 : vector<16x1xf32> to vector<16x32xf32>
    %306 = arith.mulf %296, %305 : vector<16x32xf32>
    %307 = vector.broadcast %60 : vector<1x32xf32> to vector<16x32xf32>
    %308 = arith.mulf %306, %307 : vector<16x32xf32>
    %309 = vector.broadcast %59 : vector<1x32xf32> to vector<16x32xf32>
    %310 = arith.addf %308, %309 : vector<16x32xf32>
    %cst_202 = arith.constant dense<0.000000e+00> : vector<16x96xf32>
    %311 = tpu.matmul %68, %18, %cst_202 {dimension_numbers = #tpu.dot_dimension_numbers<[1], [0], [0], [1], [0, 0, 1, 1], [], []>} : vector<16x32xf32>, vector<32x96xf32>, vector<16x96xf32> -> vector<16x96xf32>
    %312 = vector.broadcast %16 : vector<1x96xf32> to vector<16x96xf32>
    %313 = arith.addf %311, %312 : vector<16x96xf32>
    %314 = vector.extract_strided_slice %313 {offsets = [0, 0], sizes = [16, 32], strides = [1, 1]} : vector<16x96xf32> to vector<16x32xf32>
    %315 = vector.extract_strided_slice %313 {offsets = [0, 32], sizes = [16, 32], strides = [1, 1]} : vector<16x96xf32> to vector<16x32xf32>
    %316 = vector.extract_strided_slice %313 {offsets = [0, 64], sizes = [16, 32], strides = [1, 1]} : vector<16x96xf32> to vector<16x32xf32>
    %317 = vector.extract_strided_slice %314 {offsets = [0, 0], sizes = [16, 8], strides = [1, 1]} : vector<16x32xf32> to vector<16x8xf32>
    %318 = vector.extract_strided_slice %315 {offsets = [0, 0], sizes = [16, 8], strides = [1, 1]} : vector<16x32xf32> to vector<16x8xf32>
    %cst_203 = arith.constant dense<0.000000e+00> : vector<16x16xf32>
    %319 = tpu.matmul %317, %318, %cst_203 {dimension_numbers = #tpu.dot_dimension_numbers<[1], [1], [0], [0], [0, 0, 1, 0], [], []>} : vector<16x8xf32>, vector<16x8xf32>, vector<16x16xf32> -> vector<16x16xf32>
    %320 = arith.addf %319, %69 : vector<16x16xf32>
    %cst_204 = arith.constant dense<0xFF800000> : vector<16xf32>
    %321 = vector.multi_reduction <maximumf>, %320, %cst_204 [1] : vector<16x16xf32> to vector<16xf32>
    %322 = vector.shape_cast %321 : vector<16xf32> to vector<16x1xf32>
    %323 = vector.broadcast %322 : vector<16x1xf32> to vector<16x16xf32>
    %324 = arith.subf %320, %323 : vector<16x16xf32>
    %325 = math.exp %324 : vector<16x16xf32>
    %cst_205 = arith.constant dense<0.000000e+00> : vector<16xf32>
    %326 = vector.multi_reduction <add>, %325, %cst_205 [1] : vector<16x16xf32> to vector<16xf32>
    %327 = vector.shape_cast %326 : vector<16xf32> to vector<16x1xf32>
    %328 = vector.broadcast %327 : vector<16x1xf32> to vector<16x16xf32>
    %329 = arith.divf %325, %328 : vector<16x16xf32>
    %330 = vector.extract_strided_slice %316 {offsets = [0, 0], sizes = [16, 8], strides = [1, 1]} : vector<16x32xf32> to vector<16x8xf32>
    %cst_206 = arith.constant dense<0.000000e+00> : vector<16x8xf32>
    %331 = tpu.matmul %329, %330, %cst_206 {dimension_numbers = #tpu.dot_dimension_numbers<[1], [0], [0], [1], [0, 0, 1, 1], [], []>} : vector<16x16xf32>, vector<16x8xf32>, vector<16x8xf32> -> vector<16x8xf32>
    %332 = vector.extract_strided_slice %314 {offsets = [0, 8], sizes = [16, 8], strides = [1, 1]} : vector<16x32xf32> to vector<16x8xf32>
    %333 = vector.extract_strided_slice %315 {offsets = [0, 8], sizes = [16, 8], strides = [1, 1]} : vector<16x32xf32> to vector<16x8xf32>
    %cst_207 = arith.constant dense<0.000000e+00> : vector<16x16xf32>
    %334 = tpu.matmul %332, %333, %cst_207 {dimension_numbers = #tpu.dot_dimension_numbers<[1], [1], [0], [0], [0, 0, 1, 0], [], []>} : vector<16x8xf32>, vector<16x8xf32>, vector<16x16xf32> -> vector<16x16xf32>
    %335 = arith.addf %334, %69 : vector<16x16xf32>
    %cst_208 = arith.constant dense<0xFF800000> : vector<16xf32>
    %336 = vector.multi_reduction <maximumf>, %335, %cst_208 [1] : vector<16x16xf32> to vector<16xf32>
    %337 = vector.shape_cast %336 : vector<16xf32> to vector<16x1xf32>
    %338 = vector.broadcast %337 : vector<16x1xf32> to vector<16x16xf32>
    %339 = arith.subf %335, %338 : vector<16x16xf32>
    %340 = math.exp %339 : vector<16x16xf32>
    %cst_209 = arith.constant dense<0.000000e+00> : vector<16xf32>
    %341 = vector.multi_reduction <add>, %340, %cst_209 [1] : vector<16x16xf32> to vector<16xf32>
    %342 = vector.shape_cast %341 : vector<16xf32> to vector<16x1xf32>
    %343 = vector.broadcast %342 : vector<16x1xf32> to vector<16x16xf32>
    %344 = arith.divf %340, %343 : vector<16x16xf32>
    %345 = vector.extract_strided_slice %316 {offsets = [0, 8], sizes = [16, 8], strides = [1, 1]} : vector<16x32xf32> to vector<16x8xf32>
    %cst_210 = arith.constant dense<0.000000e+00> : vector<16x8xf32>
    %346 = tpu.matmul %344, %345, %cst_210 {dimension_numbers = #tpu.dot_dimension_numbers<[1], [0], [0], [1], [0, 0, 1, 1], [], []>} : vector<16x16xf32>, vector<16x8xf32>, vector<16x8xf32> -> vector<16x8xf32>
    %347 = vector.extract_strided_slice %314 {offsets = [0, 16], sizes = [16, 8], strides = [1, 1]} : vector<16x32xf32> to vector<16x8xf32>
    %348 = vector.extract_strided_slice %315 {offsets = [0, 16], sizes = [16, 8], strides = [1, 1]} : vector<16x32xf32> to vector<16x8xf32>
    %cst_211 = arith.constant dense<0.000000e+00> : vector<16x16xf32>
    %349 = tpu.matmul %347, %348, %cst_211 {dimension_numbers = #tpu.dot_dimension_numbers<[1], [1], [0], [0], [0, 0, 1, 0], [], []>} : vector<16x8xf32>, vector<16x8xf32>, vector<16x16xf32> -> vector<16x16xf32>
    %350 = arith.addf %349, %69 : vector<16x16xf32>
    %cst_212 = arith.constant dense<0xFF800000> : vector<16xf32>
    %351 = vector.multi_reduction <maximumf>, %350, %cst_212 [1] : vector<16x16xf32> to vector<16xf32>
    %352 = vector.shape_cast %351 : vector<16xf32> to vector<16x1xf32>
    %353 = vector.broadcast %352 : vector<16x1xf32> to vector<16x16xf32>
    %354 = arith.subf %350, %353 : vector<16x16xf32>
    %355 = math.exp %354 : vector<16x16xf32>
    %cst_213 = arith.constant dense<0.000000e+00> : vector<16xf32>
    %356 = vector.multi_reduction <add>, %355, %cst_213 [1] : vector<16x16xf32> to vector<16xf32>
    %357 = vector.shape_cast %356 : vector<16xf32> to vector<16x1xf32>
    %358 = vector.broadcast %357 : vector<16x1xf32> to vector<16x16xf32>
    %359 = arith.divf %355, %358 : vector<16x16xf32>
    %360 = vector.extract_strided_slice %316 {offsets = [0, 16], sizes = [16, 8], strides = [1, 1]} : vector<16x32xf32> to vector<16x8xf32>
    %cst_214 = arith.constant dense<0.000000e+00> : vector<16x8xf32>
    %361 = tpu.matmul %359, %360, %cst_214 {dimension_numbers = #tpu.dot_dimension_numbers<[1], [0], [0], [1], [0, 0, 1, 1], [], []>} : vector<16x16xf32>, vector<16x8xf32>, vector<16x8xf32> -> vector<16x8xf32>
    %362 = vector.extract_strided_slice %314 {offsets = [0, 24], sizes = [16, 8], strides = [1, 1]} : vector<16x32xf32> to vector<16x8xf32>
    %363 = vector.extract_strided_slice %315 {offsets = [0, 24], sizes = [16, 8], strides = [1, 1]} : vector<16x32xf32> to vector<16x8xf32>
    %cst_215 = arith.constant dense<0.000000e+00> : vector<16x16xf32>
    %364 = tpu.matmul %362, %363, %cst_215 {dimension_numbers = #tpu.dot_dimension_numbers<[1], [1], [0], [0], [0, 0, 1, 0], [], []>} : vector<16x8xf32>, vector<16x8xf32>, vector<16x16xf32> -> vector<16x16xf32>
    %365 = arith.addf %364, %69 : vector<16x16xf32>
    %cst_216 = arith.constant dense<0xFF800000> : vector<16xf32>
    %366 = vector.multi_reduction <maximumf>, %365, %cst_216 [1] : vector<16x16xf32> to vector<16xf32>
    %367 = vector.shape_cast %366 : vector<16xf32> to vector<16x1xf32>
    %368 = vector.broadcast %367 : vector<16x1xf32> to vector<16x16xf32>
    %369 = arith.subf %365, %368 : vector<16x16xf32>
    %370 = math.exp %369 : vector<16x16xf32>
    %cst_217 = arith.constant dense<0.000000e+00> : vector<16xf32>
    %371 = vector.multi_reduction <add>, %370, %cst_217 [1] : vector<16x16xf32> to vector<16xf32>
    %372 = vector.shape_cast %371 : vector<16xf32> to vector<16x1xf32>
    %373 = vector.broadcast %372 : vector<16x1xf32> to vector<16x16xf32>
    %374 = arith.divf %370, %373 : vector<16x16xf32>
    %375 = vector.extract_strided_slice %316 {offsets = [0, 24], sizes = [16, 8], strides = [1, 1]} : vector<16x32xf32> to vector<16x8xf32>
    %cst_218 = arith.constant dense<0.000000e+00> : vector<16x8xf32>
    %376 = tpu.matmul %374, %375, %cst_218 {dimension_numbers = #tpu.dot_dimension_numbers<[1], [0], [0], [1], [0, 0, 1, 1], [], []>} : vector<16x16xf32>, vector<16x8xf32>, vector<16x8xf32> -> vector<16x8xf32>
    %377 = tpu.concatenate %331, %346, %361, %376 in 1 : vector<16x8xf32>, vector<16x8xf32>, vector<16x8xf32>, vector<16x8xf32> -> vector<16x32xf32>
    %cst_219 = arith.constant dense<0.000000e+00> : vector<16x32xf32>
    %378 = tpu.matmul %377, %17, %cst_219 {dimension_numbers = #tpu.dot_dimension_numbers<[1], [0], [0], [1], [0, 0, 1, 1], [], []>} : vector<16x32xf32>, vector<32x32xf32>, vector<16x32xf32> -> vector<16x32xf32>
    %379 = vector.broadcast %15 : vector<1x32xf32> to vector<16x32xf32>
    %380 = arith.addf %378, %379 : vector<16x32xf32>
    %381 = arith.addf %68, %380 : vector<16x32xf32>
    %cst_220 = arith.constant dense<0.000000e+00> : vector<16xf32>
    %382 = vector.multi_reduction <add>, %381, %cst_220 [1] : vector<16x32xf32> to vector<16xf32>
    %383 = vector.shape_cast %382 : vector<16xf32> to vector<16x1xf32>
    %cst_221 = arith.constant 3.200000e+01 : f32
    %384 = vector.broadcast %cst_221 : f32 to vector<16x1xf32>
    %385 = arith.divf %383, %384 : vector<16x1xf32>
    %386 = vector.broadcast %385 : vector<16x1xf32> to vector<16x32xf32>
    %387 = arith.subf %381, %386 : vector<16x32xf32>
    %388 = arith.mulf %387, %387 : vector<16x32xf32>
    %cst_222 = arith.constant dense<0.000000e+00> : vector<16xf32>
    %389 = vector.multi_reduction <add>, %388, %cst_222 [1] : vector<16x32xf32> to vector<16xf32>
    %390 = vector.shape_cast %389 : vector<16xf32> to vector<16x1xf32>
    %cst_223 = arith.constant 3.200000e+01 : f32
    %391 = vector.broadcast %cst_223 : f32 to vector<16x1xf32>
    %392 = arith.divf %390, %391 : vector<16x1xf32>
    %cst_224 = arith.constant 9.99999974E-6 : f32
    %393 = vector.broadcast %cst_224 : f32 to vector<16x1xf32>
    %394 = arith.addf %392, %393 : vector<16x1xf32>
    %395 = math.rsqrt %394 : vector<16x1xf32>
    %396 = vector.broadcast %395 : vector<16x1xf32> to vector<16x32xf32>
    %397 = arith.mulf %387, %396 : vector<16x32xf32>
    %398 = vector.broadcast %10 : vector<1x32xf32> to vector<16x32xf32>
    %399 = arith.mulf %397, %398 : vector<16x32xf32>
    %400 = vector.broadcast %9 : vector<1x32xf32> to vector<16x32xf32>
    %401 = arith.addf %399, %400 : vector<16x32xf32>
    %cst_225 = arith.constant dense<0.000000e+00> : vector<16x32xf32>
    %402 = tpu.matmul %401, %8, %cst_225 {dimension_numbers = #tpu.dot_dimension_numbers<[1], [0], [0], [1], [0, 0, 1, 1], [], []>} : vector<16x32xf32>, vector<32x32xf32>, vector<16x32xf32> -> vector<16x32xf32>
    %403 = vector.broadcast %5 : vector<1x32xf32> to vector<16x32xf32>
    %404 = arith.addf %402, %403 : vector<16x32xf32>
    %cst_226 = arith.constant dense<0.000000e+00> : vector<16x64xf32>
    %405 = tpu.matmul %310, %6, %cst_226 {dimension_numbers = #tpu.dot_dimension_numbers<[1], [0], [0], [1], [0, 0, 1, 1], [], []>} : vector<16x32xf32>, vector<32x64xf32>, vector<16x64xf32> -> vector<16x64xf32>
    %406 = vector.broadcast %3 : vector<1x64xf32> to vector<16x64xf32>
    %407 = arith.addf %405, %406 : vector<16x64xf32>
    %408 = vector.extract_strided_slice %407 {offsets = [0, 0], sizes = [16, 32], strides = [1, 1]} : vector<16x64xf32> to vector<16x32xf32>
    %409 = vector.extract_strided_slice %407 {offsets = [0, 32], sizes = [16, 32], strides = [1, 1]} : vector<16x64xf32> to vector<16x32xf32>
    %410 = vector.extract_strided_slice %404 {offsets = [0, 0], sizes = [16, 8], strides = [1, 1]} : vector<16x32xf32> to vector<16x8xf32>
    %411 = vector.extract_strided_slice %408 {offsets = [0, 0], sizes = [16, 8], strides = [1, 1]} : vector<16x32xf32> to vector<16x8xf32>
    %cst_227 = arith.constant dense<0.000000e+00> : vector<16x16xf32>
    %412 = tpu.matmul %410, %411, %cst_227 {dimension_numbers = #tpu.dot_dimension_numbers<[1], [1], [0], [0], [0, 0, 1, 0], [], []>} : vector<16x8xf32>, vector<16x8xf32>, vector<16x16xf32> -> vector<16x16xf32>
    %413 = arith.addf %412, %65 : vector<16x16xf32>
    %cst_228 = arith.constant dense<0xFF800000> : vector<16xf32>
    %414 = vector.multi_reduction <maximumf>, %413, %cst_228 [1] : vector<16x16xf32> to vector<16xf32>
    %415 = vector.shape_cast %414 : vector<16xf32> to vector<16x1xf32>
    %416 = vector.broadcast %415 : vector<16x1xf32> to vector<16x16xf32>
    %417 = arith.subf %413, %416 : vector<16x16xf32>
    %418 = math.exp %417 : vector<16x16xf32>
    %cst_229 = arith.constant dense<0.000000e+00> : vector<16xf32>
    %419 = vector.multi_reduction <add>, %418, %cst_229 [1] : vector<16x16xf32> to vector<16xf32>
    %420 = vector.shape_cast %419 : vector<16xf32> to vector<16x1xf32>
    %421 = vector.broadcast %420 : vector<16x1xf32> to vector<16x16xf32>
    %422 = arith.divf %418, %421 : vector<16x16xf32>
    %423 = vector.extract_strided_slice %409 {offsets = [0, 0], sizes = [16, 8], strides = [1, 1]} : vector<16x32xf32> to vector<16x8xf32>
    %cst_230 = arith.constant dense<0.000000e+00> : vector<16x8xf32>
    %424 = tpu.matmul %422, %423, %cst_230 {dimension_numbers = #tpu.dot_dimension_numbers<[1], [0], [0], [1], [0, 0, 1, 1], [], []>} : vector<16x16xf32>, vector<16x8xf32>, vector<16x8xf32> -> vector<16x8xf32>
    %425 = vector.extract_strided_slice %404 {offsets = [0, 8], sizes = [16, 8], strides = [1, 1]} : vector<16x32xf32> to vector<16x8xf32>
    %426 = vector.extract_strided_slice %408 {offsets = [0, 8], sizes = [16, 8], strides = [1, 1]} : vector<16x32xf32> to vector<16x8xf32>
    %cst_231 = arith.constant dense<0.000000e+00> : vector<16x16xf32>
    %427 = tpu.matmul %425, %426, %cst_231 {dimension_numbers = #tpu.dot_dimension_numbers<[1], [1], [0], [0], [0, 0, 1, 0], [], []>} : vector<16x8xf32>, vector<16x8xf32>, vector<16x16xf32> -> vector<16x16xf32>
    %428 = arith.addf %427, %65 : vector<16x16xf32>
    %cst_232 = arith.constant dense<0xFF800000> : vector<16xf32>
    %429 = vector.multi_reduction <maximumf>, %428, %cst_232 [1] : vector<16x16xf32> to vector<16xf32>
    %430 = vector.shape_cast %429 : vector<16xf32> to vector<16x1xf32>
    %431 = vector.broadcast %430 : vector<16x1xf32> to vector<16x16xf32>
    %432 = arith.subf %428, %431 : vector<16x16xf32>
    %433 = math.exp %432 : vector<16x16xf32>
    %cst_233 = arith.constant dense<0.000000e+00> : vector<16xf32>
    %434 = vector.multi_reduction <add>, %433, %cst_233 [1] : vector<16x16xf32> to vector<16xf32>
    %435 = vector.shape_cast %434 : vector<16xf32> to vector<16x1xf32>
    %436 = vector.broadcast %435 : vector<16x1xf32> to vector<16x16xf32>
    %437 = arith.divf %433, %436 : vector<16x16xf32>
    %438 = vector.extract_strided_slice %409 {offsets = [0, 8], sizes = [16, 8], strides = [1, 1]} : vector<16x32xf32> to vector<16x8xf32>
    %cst_234 = arith.constant dense<0.000000e+00> : vector<16x8xf32>
    %439 = tpu.matmul %437, %438, %cst_234 {dimension_numbers = #tpu.dot_dimension_numbers<[1], [0], [0], [1], [0, 0, 1, 1], [], []>} : vector<16x16xf32>, vector<16x8xf32>, vector<16x8xf32> -> vector<16x8xf32>
    %440 = vector.extract_strided_slice %404 {offsets = [0, 16], sizes = [16, 8], strides = [1, 1]} : vector<16x32xf32> to vector<16x8xf32>
    %441 = vector.extract_strided_slice %408 {offsets = [0, 16], sizes = [16, 8], strides = [1, 1]} : vector<16x32xf32> to vector<16x8xf32>
    %cst_235 = arith.constant dense<0.000000e+00> : vector<16x16xf32>
    %442 = tpu.matmul %440, %441, %cst_235 {dimension_numbers = #tpu.dot_dimension_numbers<[1], [1], [0], [0], [0, 0, 1, 0], [], []>} : vector<16x8xf32>, vector<16x8xf32>, vector<16x16xf32> -> vector<16x16xf32>
    %443 = arith.addf %442, %65 : vector<16x16xf32>
    %cst_236 = arith.constant dense<0xFF800000> : vector<16xf32>
    %444 = vector.multi_reduction <maximumf>, %443, %cst_236 [1] : vector<16x16xf32> to vector<16xf32>
    %445 = vector.shape_cast %444 : vector<16xf32> to vector<16x1xf32>
    %446 = vector.broadcast %445 : vector<16x1xf32> to vector<16x16xf32>
    %447 = arith.subf %443, %446 : vector<16x16xf32>
    %448 = math.exp %447 : vector<16x16xf32>
    %cst_237 = arith.constant dense<0.000000e+00> : vector<16xf32>
    %449 = vector.multi_reduction <add>, %448, %cst_237 [1] : vector<16x16xf32> to vector<16xf32>
    %450 = vector.shape_cast %449 : vector<16xf32> to vector<16x1xf32>
    %451 = vector.broadcast %450 : vector<16x1xf32> to vector<16x16xf32>
    %452 = arith.divf %448, %451 : vector<16x16xf32>
    %453 = vector.extract_strided_slice %409 {offsets = [0, 16], sizes = [16, 8], strides = [1, 1]} : vector<16x32xf32> to vector<16x8xf32>
    %cst_238 = arith.constant dense<0.000000e+00> : vector<16x8xf32>
    %454 = tpu.matmul %452, %453, %cst_238 {dimension_numbers = #tpu.dot_dimension_numbers<[1], [0], [0], [1], [0, 0, 1, 1], [], []>} : vector<16x16xf32>, vector<16x8xf32>, vector<16x8xf32> -> vector<16x8xf32>
    %455 = vector.extract_strided_slice %404 {offsets = [0, 24], sizes = [16, 8], strides = [1, 1]} : vector<16x32xf32> to vector<16x8xf32>
    %456 = vector.extract_strided_slice %408 {offsets = [0, 24], sizes = [16, 8], strides = [1, 1]} : vector<16x32xf32> to vector<16x8xf32>
    %cst_239 = arith.constant dense<0.000000e+00> : vector<16x16xf32>
    %457 = tpu.matmul %455, %456, %cst_239 {dimension_numbers = #tpu.dot_dimension_numbers<[1], [1], [0], [0], [0, 0, 1, 0], [], []>} : vector<16x8xf32>, vector<16x8xf32>, vector<16x16xf32> -> vector<16x16xf32>
    %458 = arith.addf %457, %65 : vector<16x16xf32>
    %cst_240 = arith.constant dense<0xFF800000> : vector<16xf32>
    %459 = vector.multi_reduction <maximumf>, %458, %cst_240 [1] : vector<16x16xf32> to vector<16xf32>
    %460 = vector.shape_cast %459 : vector<16xf32> to vector<16x1xf32>
    %461 = vector.broadcast %460 : vector<16x1xf32> to vector<16x16xf32>
    %462 = arith.subf %458, %461 : vector<16x16xf32>
    %463 = math.exp %462 : vector<16x16xf32>
    %cst_241 = arith.constant dense<0.000000e+00> : vector<16xf32>
    %464 = vector.multi_reduction <add>, %463, %cst_241 [1] : vector<16x16xf32> to vector<16xf32>
    %465 = vector.shape_cast %464 : vector<16xf32> to vector<16x1xf32>
    %466 = vector.broadcast %465 : vector<16x1xf32> to vector<16x16xf32>
    %467 = arith.divf %463, %466 : vector<16x16xf32>
    %468 = vector.extract_strided_slice %409 {offsets = [0, 24], sizes = [16, 8], strides = [1, 1]} : vector<16x32xf32> to vector<16x8xf32>
    %cst_242 = arith.constant dense<0.000000e+00> : vector<16x8xf32>
    %469 = tpu.matmul %467, %468, %cst_242 {dimension_numbers = #tpu.dot_dimension_numbers<[1], [0], [0], [1], [0, 0, 1, 1], [], []>} : vector<16x16xf32>, vector<16x8xf32>, vector<16x8xf32> -> vector<16x8xf32>
    %470 = tpu.concatenate %424, %439, %454, %469 in 1 : vector<16x8xf32>, vector<16x8xf32>, vector<16x8xf32>, vector<16x8xf32> -> vector<16x32xf32>
    %cst_243 = arith.constant dense<0.000000e+00> : vector<16x32xf32>
    %471 = tpu.matmul %470, %7, %cst_243 {dimension_numbers = #tpu.dot_dimension_numbers<[1], [0], [0], [1], [0, 0, 1, 1], [], []>} : vector<16x32xf32>, vector<32x32xf32>, vector<16x32xf32> -> vector<16x32xf32>
    %472 = vector.broadcast %4 : vector<1x32xf32> to vector<16x32xf32>
    %473 = arith.addf %471, %472 : vector<16x32xf32>
    %474 = arith.addf %401, %473 : vector<16x32xf32>
    %cst_244 = arith.constant dense<0.000000e+00> : vector<16xf32>
    %475 = vector.multi_reduction <add>, %474, %cst_244 [1] : vector<16x32xf32> to vector<16xf32>
    %476 = vector.shape_cast %475 : vector<16xf32> to vector<16x1xf32>
    %cst_245 = arith.constant 3.200000e+01 : f32
    %477 = vector.broadcast %cst_245 : f32 to vector<16x1xf32>
    %478 = arith.divf %476, %477 : vector<16x1xf32>
    %479 = vector.broadcast %478 : vector<16x1xf32> to vector<16x32xf32>
    %480 = arith.subf %474, %479 : vector<16x32xf32>
    %481 = arith.mulf %480, %480 : vector<16x32xf32>
    %cst_246 = arith.constant dense<0.000000e+00> : vector<16xf32>
    %482 = vector.multi_reduction <add>, %481, %cst_246 [1] : vector<16x32xf32> to vector<16xf32>
    %483 = vector.shape_cast %482 : vector<16xf32> to vector<16x1xf32>
    %cst_247 = arith.constant 3.200000e+01 : f32
    %484 = vector.broadcast %cst_247 : f32 to vector<16x1xf32>
    %485 = arith.divf %483, %484 : vector<16x1xf32>
    %cst_248 = arith.constant 9.99999974E-6 : f32
    %486 = vector.broadcast %cst_248 : f32 to vector<16x1xf32>
    %487 = arith.addf %485, %486 : vector<16x1xf32>
    %488 = math.rsqrt %487 : vector<16x1xf32>
    %489 = vector.broadcast %488 : vector<16x1xf32> to vector<16x32xf32>
    %490 = arith.mulf %480, %489 : vector<16x32xf32>
    %491 = vector.broadcast %12 : vector<1x32xf32> to vector<16x32xf32>
    %492 = arith.mulf %490, %491 : vector<16x32xf32>
    %493 = vector.broadcast %11 : vector<1x32xf32> to vector<16x32xf32>
    %494 = arith.addf %492, %493 : vector<16x32xf32>
    %cst_249 = arith.constant dense<0.000000e+00> : vector<16x64xf32>
    %495 = tpu.matmul %494, %19, %cst_249 {dimension_numbers = #tpu.dot_dimension_numbers<[1], [0], [0], [1], [0, 0, 1, 1], [], []>} : vector<16x32xf32>, vector<32x64xf32>, vector<16x64xf32> -> vector<16x64xf32>
    %496 = vector.broadcast %1 : vector<1x64xf32> to vector<16x64xf32>
    %497 = arith.addf %495, %496 : vector<16x64xf32>
    %cst_250 = arith.constant 0.000000e+00 : f32
    %498 = vector.broadcast %cst_250 : f32 to vector<16x64xf32>
    %499 = arith.maximumf %497, %498 : vector<16x64xf32>
    %cst_251 = arith.constant dense<0.000000e+00> : vector<16x32xf32>
    %500 = tpu.matmul %499, %20, %cst_251 {dimension_numbers = #tpu.dot_dimension_numbers<[1], [0], [0], [1], [0, 0, 1, 1], [], []>} : vector<16x64xf32>, vector<64x32xf32>, vector<16x32xf32> -> vector<16x32xf32>
    %501 = vector.broadcast %2 : vector<1x32xf32> to vector<16x32xf32>
    %502 = arith.addf %500, %501 : vector<16x32xf32>
    %503 = arith.addf %494, %502 : vector<16x32xf32>
    %cst_252 = arith.constant dense<0.000000e+00> : vector<16xf32>
    %504 = vector.multi_reduction <add>, %503, %cst_252 [1] : vector<16x32xf32> to vector<16xf32>
    %505 = vector.shape_cast %504 : vector<16xf32> to vector<16x1xf32>
    %cst_253 = arith.constant 3.200000e+01 : f32
    %506 = vector.broadcast %cst_253 : f32 to vector<16x1xf32>
    %507 = arith.divf %505, %506 : vector<16x1xf32>
    %508 = vector.broadcast %507 : vector<16x1xf32> to vector<16x32xf32>
    %509 = arith.subf %503, %508 : vector<16x32xf32>
    %510 = arith.mulf %509, %509 : vector<16x32xf32>
    %cst_254 = arith.constant dense<0.000000e+00> : vector<16xf32>
    %511 = vector.multi_reduction <add>, %510, %cst_254 [1] : vector<16x32xf32> to vector<16xf32>
    %512 = vector.shape_cast %511 : vector<16xf32> to vector<16x1xf32>
    %cst_255 = arith.constant 3.200000e+01 : f32
    %513 = vector.broadcast %cst_255 : f32 to vector<16x1xf32>
    %514 = arith.divf %512, %513 : vector<16x1xf32>
    %cst_256 = arith.constant 9.99999974E-6 : f32
    %515 = vector.broadcast %cst_256 : f32 to vector<16x1xf32>
    %516 = arith.addf %514, %515 : vector<16x1xf32>
    %517 = math.rsqrt %516 : vector<16x1xf32>
    %518 = vector.broadcast %517 : vector<16x1xf32> to vector<16x32xf32>
    %519 = arith.mulf %509, %518 : vector<16x32xf32>
    %520 = vector.broadcast %14 : vector<1x32xf32> to vector<16x32xf32>
    %521 = arith.mulf %519, %520 : vector<16x32xf32>
    %522 = vector.broadcast %13 : vector<1x32xf32> to vector<16x32xf32>
    %523 = arith.addf %521, %522 : vector<16x32xf32>
    %cst_257 = arith.constant dense<0.000000e+00> : vector<16x96xf32>
    %524 = tpu.matmul %523, %38, %cst_257 {dimension_numbers = #tpu.dot_dimension_numbers<[1], [0], [0], [1], [0, 0, 1, 1], [], []>} : vector<16x32xf32>, vector<32x96xf32>, vector<16x96xf32> -> vector<16x96xf32>
    %525 = vector.broadcast %36 : vector<1x96xf32> to vector<16x96xf32>
    %526 = arith.addf %524, %525 : vector<16x96xf32>
    %527 = vector.extract_strided_slice %526 {offsets = [0, 0], sizes = [16, 32], strides = [1, 1]} : vector<16x96xf32> to vector<16x32xf32>
    %528 = vector.extract_strided_slice %526 {offsets = [0, 32], sizes = [16, 32], strides = [1, 1]} : vector<16x96xf32> to vector<16x32xf32>
    %529 = vector.extract_strided_slice %526 {offsets = [0, 64], sizes = [16, 32], strides = [1, 1]} : vector<16x96xf32> to vector<16x32xf32>
    %530 = vector.extract_strided_slice %527 {offsets = [0, 0], sizes = [16, 8], strides = [1, 1]} : vector<16x32xf32> to vector<16x8xf32>
    %531 = vector.extract_strided_slice %528 {offsets = [0, 0], sizes = [16, 8], strides = [1, 1]} : vector<16x32xf32> to vector<16x8xf32>
    %cst_258 = arith.constant dense<0.000000e+00> : vector<16x16xf32>
    %532 = tpu.matmul %530, %531, %cst_258 {dimension_numbers = #tpu.dot_dimension_numbers<[1], [1], [0], [0], [0, 0, 1, 0], [], []>} : vector<16x8xf32>, vector<16x8xf32>, vector<16x16xf32> -> vector<16x16xf32>
    %533 = arith.addf %532, %69 : vector<16x16xf32>
    %cst_259 = arith.constant dense<0xFF800000> : vector<16xf32>
    %534 = vector.multi_reduction <maximumf>, %533, %cst_259 [1] : vector<16x16xf32> to vector<16xf32>
    %535 = vector.shape_cast %534 : vector<16xf32> to vector<16x1xf32>
    %536 = vector.broadcast %535 : vector<16x1xf32> to vector<16x16xf32>
    %537 = arith.subf %533, %536 : vector<16x16xf32>
    %538 = math.exp %537 : vector<16x16xf32>
    %cst_260 = arith.constant dense<0.000000e+00> : vector<16xf32>
    %539 = vector.multi_reduction <add>, %538, %cst_260 [1] : vector<16x16xf32> to vector<16xf32>
    %540 = vector.shape_cast %539 : vector<16xf32> to vector<16x1xf32>
    %541 = vector.broadcast %540 : vector<16x1xf32> to vector<16x16xf32>
    %542 = arith.divf %538, %541 : vector<16x16xf32>
    %543 = vector.extract_strided_slice %529 {offsets = [0, 0], sizes = [16, 8], strides = [1, 1]} : vector<16x32xf32> to vector<16x8xf32>
    %cst_261 = arith.constant dense<0.000000e+00> : vector<16x8xf32>
    %544 = tpu.matmul %542, %543, %cst_261 {dimension_numbers = #tpu.dot_dimension_numbers<[1], [0], [0], [1], [0, 0, 1, 1], [], []>} : vector<16x16xf32>, vector<16x8xf32>, vector<16x8xf32> -> vector<16x8xf32>
    %545 = vector.extract_strided_slice %527 {offsets = [0, 8], sizes = [16, 8], strides = [1, 1]} : vector<16x32xf32> to vector<16x8xf32>
    %546 = vector.extract_strided_slice %528 {offsets = [0, 8], sizes = [16, 8], strides = [1, 1]} : vector<16x32xf32> to vector<16x8xf32>
    %cst_262 = arith.constant dense<0.000000e+00> : vector<16x16xf32>
    %547 = tpu.matmul %545, %546, %cst_262 {dimension_numbers = #tpu.dot_dimension_numbers<[1], [1], [0], [0], [0, 0, 1, 0], [], []>} : vector<16x8xf32>, vector<16x8xf32>, vector<16x16xf32> -> vector<16x16xf32>
    %548 = arith.addf %547, %69 : vector<16x16xf32>
    %cst_263 = arith.constant dense<0xFF800000> : vector<16xf32>
    %549 = vector.multi_reduction <maximumf>, %548, %cst_263 [1] : vector<16x16xf32> to vector<16xf32>
    %550 = vector.shape_cast %549 : vector<16xf32> to vector<16x1xf32>
    %551 = vector.broadcast %550 : vector<16x1xf32> to vector<16x16xf32>
    %552 = arith.subf %548, %551 : vector<16x16xf32>
    %553 = math.exp %552 : vector<16x16xf32>
    %cst_264 = arith.constant dense<0.000000e+00> : vector<16xf32>
    %554 = vector.multi_reduction <add>, %553, %cst_264 [1] : vector<16x16xf32> to vector<16xf32>
    %555 = vector.shape_cast %554 : vector<16xf32> to vector<16x1xf32>
    %556 = vector.broadcast %555 : vector<16x1xf32> to vector<16x16xf32>
    %557 = arith.divf %553, %556 : vector<16x16xf32>
    %558 = vector.extract_strided_slice %529 {offsets = [0, 8], sizes = [16, 8], strides = [1, 1]} : vector<16x32xf32> to vector<16x8xf32>
    %cst_265 = arith.constant dense<0.000000e+00> : vector<16x8xf32>
    %559 = tpu.matmul %557, %558, %cst_265 {dimension_numbers = #tpu.dot_dimension_numbers<[1], [0], [0], [1], [0, 0, 1, 1], [], []>} : vector<16x16xf32>, vector<16x8xf32>, vector<16x8xf32> -> vector<16x8xf32>
    %560 = vector.extract_strided_slice %527 {offsets = [0, 16], sizes = [16, 8], strides = [1, 1]} : vector<16x32xf32> to vector<16x8xf32>
    %561 = vector.extract_strided_slice %528 {offsets = [0, 16], sizes = [16, 8], strides = [1, 1]} : vector<16x32xf32> to vector<16x8xf32>
    %cst_266 = arith.constant dense<0.000000e+00> : vector<16x16xf32>
    %562 = tpu.matmul %560, %561, %cst_266 {dimension_numbers = #tpu.dot_dimension_numbers<[1], [1], [0], [0], [0, 0, 1, 0], [], []>} : vector<16x8xf32>, vector<16x8xf32>, vector<16x16xf32> -> vector<16x16xf32>
    %563 = arith.addf %562, %69 : vector<16x16xf32>
    %cst_267 = arith.constant dense<0xFF800000> : vector<16xf32>
    %564 = vector.multi_reduction <maximumf>, %563, %cst_267 [1] : vector<16x16xf32> to vector<16xf32>
    %565 = vector.shape_cast %564 : vector<16xf32> to vector<16x1xf32>
    %566 = vector.broadcast %565 : vector<16x1xf32> to vector<16x16xf32>
    %567 = arith.subf %563, %566 : vector<16x16xf32>
    %568 = math.exp %567 : vector<16x16xf32>
    %cst_268 = arith.constant dense<0.000000e+00> : vector<16xf32>
    %569 = vector.multi_reduction <add>, %568, %cst_268 [1] : vector<16x16xf32> to vector<16xf32>
    %570 = vector.shape_cast %569 : vector<16xf32> to vector<16x1xf32>
    %571 = vector.broadcast %570 : vector<16x1xf32> to vector<16x16xf32>
    %572 = arith.divf %568, %571 : vector<16x16xf32>
    %573 = vector.extract_strided_slice %529 {offsets = [0, 16], sizes = [16, 8], strides = [1, 1]} : vector<16x32xf32> to vector<16x8xf32>
    %cst_269 = arith.constant dense<0.000000e+00> : vector<16x8xf32>
    %574 = tpu.matmul %572, %573, %cst_269 {dimension_numbers = #tpu.dot_dimension_numbers<[1], [0], [0], [1], [0, 0, 1, 1], [], []>} : vector<16x16xf32>, vector<16x8xf32>, vector<16x8xf32> -> vector<16x8xf32>
    %575 = vector.extract_strided_slice %527 {offsets = [0, 24], sizes = [16, 8], strides = [1, 1]} : vector<16x32xf32> to vector<16x8xf32>
    %576 = vector.extract_strided_slice %528 {offsets = [0, 24], sizes = [16, 8], strides = [1, 1]} : vector<16x32xf32> to vector<16x8xf32>
    %cst_270 = arith.constant dense<0.000000e+00> : vector<16x16xf32>
    %577 = tpu.matmul %575, %576, %cst_270 {dimension_numbers = #tpu.dot_dimension_numbers<[1], [1], [0], [0], [0, 0, 1, 0], [], []>} : vector<16x8xf32>, vector<16x8xf32>, vector<16x16xf32> -> vector<16x16xf32>
    %578 = arith.addf %577, %69 : vector<16x16xf32>
    %cst_271 = arith.constant dense<0xFF800000> : vector<16xf32>
    %579 = vector.multi_reduction <maximumf>, %578, %cst_271 [1] : vector<16x16xf32> to vector<16xf32>
    %580 = vector.shape_cast %579 : vector<16xf32> to vector<16x1xf32>
    %581 = vector.broadcast %580 : vector<16x1xf32> to vector<16x16xf32>
    %582 = arith.subf %578, %581 : vector<16x16xf32>
    %583 = math.exp %582 : vector<16x16xf32>
    %cst_272 = arith.constant dense<0.000000e+00> : vector<16xf32>
    %584 = vector.multi_reduction <add>, %583, %cst_272 [1] : vector<16x16xf32> to vector<16xf32>
    %585 = vector.shape_cast %584 : vector<16xf32> to vector<16x1xf32>
    %586 = vector.broadcast %585 : vector<16x1xf32> to vector<16x16xf32>
    %587 = arith.divf %583, %586 : vector<16x16xf32>
    %588 = vector.extract_strided_slice %529 {offsets = [0, 24], sizes = [16, 8], strides = [1, 1]} : vector<16x32xf32> to vector<16x8xf32>
    %cst_273 = arith.constant dense<0.000000e+00> : vector<16x8xf32>
    %589 = tpu.matmul %587, %588, %cst_273 {dimension_numbers = #tpu.dot_dimension_numbers<[1], [0], [0], [1], [0, 0, 1, 1], [], []>} : vector<16x16xf32>, vector<16x8xf32>, vector<16x8xf32> -> vector<16x8xf32>
    %590 = tpu.concatenate %544, %559, %574, %589 in 1 : vector<16x8xf32>, vector<16x8xf32>, vector<16x8xf32>, vector<16x8xf32> -> vector<16x32xf32>
    %cst_274 = arith.constant dense<0.000000e+00> : vector<16x32xf32>
    %591 = tpu.matmul %590, %37, %cst_274 {dimension_numbers = #tpu.dot_dimension_numbers<[1], [0], [0], [1], [0, 0, 1, 1], [], []>} : vector<16x32xf32>, vector<32x32xf32>, vector<16x32xf32> -> vector<16x32xf32>
    %592 = vector.broadcast %35 : vector<1x32xf32> to vector<16x32xf32>
    %593 = arith.addf %591, %592 : vector<16x32xf32>
    %594 = arith.addf %523, %593 : vector<16x32xf32>
    %cst_275 = arith.constant dense<0.000000e+00> : vector<16xf32>
    %595 = vector.multi_reduction <add>, %594, %cst_275 [1] : vector<16x32xf32> to vector<16xf32>
    %596 = vector.shape_cast %595 : vector<16xf32> to vector<16x1xf32>
    %cst_276 = arith.constant 3.200000e+01 : f32
    %597 = vector.broadcast %cst_276 : f32 to vector<16x1xf32>
    %598 = arith.divf %596, %597 : vector<16x1xf32>
    %599 = vector.broadcast %598 : vector<16x1xf32> to vector<16x32xf32>
    %600 = arith.subf %594, %599 : vector<16x32xf32>
    %601 = arith.mulf %600, %600 : vector<16x32xf32>
    %cst_277 = arith.constant dense<0.000000e+00> : vector<16xf32>
    %602 = vector.multi_reduction <add>, %601, %cst_277 [1] : vector<16x32xf32> to vector<16xf32>
    %603 = vector.shape_cast %602 : vector<16xf32> to vector<16x1xf32>
    %cst_278 = arith.constant 3.200000e+01 : f32
    %604 = vector.broadcast %cst_278 : f32 to vector<16x1xf32>
    %605 = arith.divf %603, %604 : vector<16x1xf32>
    %cst_279 = arith.constant 9.99999974E-6 : f32
    %606 = vector.broadcast %cst_279 : f32 to vector<16x1xf32>
    %607 = arith.addf %605, %606 : vector<16x1xf32>
    %608 = math.rsqrt %607 : vector<16x1xf32>
    %609 = vector.broadcast %608 : vector<16x1xf32> to vector<16x32xf32>
    %610 = arith.mulf %600, %609 : vector<16x32xf32>
    %611 = vector.broadcast %30 : vector<1x32xf32> to vector<16x32xf32>
    %612 = arith.mulf %610, %611 : vector<16x32xf32>
    %613 = vector.broadcast %29 : vector<1x32xf32> to vector<16x32xf32>
    %614 = arith.addf %612, %613 : vector<16x32xf32>
    %cst_280 = arith.constant dense<0.000000e+00> : vector<16x32xf32>
    %615 = tpu.matmul %614, %28, %cst_280 {dimension_numbers = #tpu.dot_dimension_numbers<[1], [0], [0], [1], [0, 0, 1, 1], [], []>} : vector<16x32xf32>, vector<32x32xf32>, vector<16x32xf32> -> vector<16x32xf32>
    %616 = vector.broadcast %25 : vector<1x32xf32> to vector<16x32xf32>
    %617 = arith.addf %615, %616 : vector<16x32xf32>
    %cst_281 = arith.constant dense<0.000000e+00> : vector<16x64xf32>
    %618 = tpu.matmul %310, %26, %cst_281 {dimension_numbers = #tpu.dot_dimension_numbers<[1], [0], [0], [1], [0, 0, 1, 1], [], []>} : vector<16x32xf32>, vector<32x64xf32>, vector<16x64xf32> -> vector<16x64xf32>
    %619 = vector.broadcast %23 : vector<1x64xf32> to vector<16x64xf32>
    %620 = arith.addf %618, %619 : vector<16x64xf32>
    %621 = vector.extract_strided_slice %620 {offsets = [0, 0], sizes = [16, 32], strides = [1, 1]} : vector<16x64xf32> to vector<16x32xf32>
    %622 = vector.extract_strided_slice %620 {offsets = [0, 32], sizes = [16, 32], strides = [1, 1]} : vector<16x64xf32> to vector<16x32xf32>
    %623 = vector.extract_strided_slice %617 {offsets = [0, 0], sizes = [16, 8], strides = [1, 1]} : vector<16x32xf32> to vector<16x8xf32>
    %624 = vector.extract_strided_slice %621 {offsets = [0, 0], sizes = [16, 8], strides = [1, 1]} : vector<16x32xf32> to vector<16x8xf32>
    %cst_282 = arith.constant dense<0.000000e+00> : vector<16x16xf32>
    %625 = tpu.matmul %623, %624, %cst_282 {dimension_numbers = #tpu.dot_dimension_numbers<[1], [1], [0], [0], [0, 0, 1, 0], [], []>} : vector<16x8xf32>, vector<16x8xf32>, vector<16x16xf32> -> vector<16x16xf32>
    %626 = arith.addf %625, %65 : vector<16x16xf32>
    %cst_283 = arith.constant dense<0xFF800000> : vector<16xf32>
    %627 = vector.multi_reduction <maximumf>, %626, %cst_283 [1] : vector<16x16xf32> to vector<16xf32>
    %628 = vector.shape_cast %627 : vector<16xf32> to vector<16x1xf32>
    %629 = vector.broadcast %628 : vector<16x1xf32> to vector<16x16xf32>
    %630 = arith.subf %626, %629 : vector<16x16xf32>
    %631 = math.exp %630 : vector<16x16xf32>
    %cst_284 = arith.constant dense<0.000000e+00> : vector<16xf32>
    %632 = vector.multi_reduction <add>, %631, %cst_284 [1] : vector<16x16xf32> to vector<16xf32>
    %633 = vector.shape_cast %632 : vector<16xf32> to vector<16x1xf32>
    %634 = vector.broadcast %633 : vector<16x1xf32> to vector<16x16xf32>
    %635 = arith.divf %631, %634 : vector<16x16xf32>
    %636 = vector.extract_strided_slice %622 {offsets = [0, 0], sizes = [16, 8], strides = [1, 1]} : vector<16x32xf32> to vector<16x8xf32>
    %cst_285 = arith.constant dense<0.000000e+00> : vector<16x8xf32>
    %637 = tpu.matmul %635, %636, %cst_285 {dimension_numbers = #tpu.dot_dimension_numbers<[1], [0], [0], [1], [0, 0, 1, 1], [], []>} : vector<16x16xf32>, vector<16x8xf32>, vector<16x8xf32> -> vector<16x8xf32>
    %638 = vector.extract_strided_slice %617 {offsets = [0, 8], sizes = [16, 8], strides = [1, 1]} : vector<16x32xf32> to vector<16x8xf32>
    %639 = vector.extract_strided_slice %621 {offsets = [0, 8], sizes = [16, 8], strides = [1, 1]} : vector<16x32xf32> to vector<16x8xf32>
    %cst_286 = arith.constant dense<0.000000e+00> : vector<16x16xf32>
    %640 = tpu.matmul %638, %639, %cst_286 {dimension_numbers = #tpu.dot_dimension_numbers<[1], [1], [0], [0], [0, 0, 1, 0], [], []>} : vector<16x8xf32>, vector<16x8xf32>, vector<16x16xf32> -> vector<16x16xf32>
    %641 = arith.addf %640, %65 : vector<16x16xf32>
    %cst_287 = arith.constant dense<0xFF800000> : vector<16xf32>
    %642 = vector.multi_reduction <maximumf>, %641, %cst_287 [1] : vector<16x16xf32> to vector<16xf32>
    %643 = vector.shape_cast %642 : vector<16xf32> to vector<16x1xf32>
    %644 = vector.broadcast %643 : vector<16x1xf32> to vector<16x16xf32>
    %645 = arith.subf %641, %644 : vector<16x16xf32>
    %646 = math.exp %645 : vector<16x16xf32>
    %cst_288 = arith.constant dense<0.000000e+00> : vector<16xf32>
    %647 = vector.multi_reduction <add>, %646, %cst_288 [1] : vector<16x16xf32> to vector<16xf32>
    %648 = vector.shape_cast %647 : vector<16xf32> to vector<16x1xf32>
    %649 = vector.broadcast %648 : vector<16x1xf32> to vector<16x16xf32>
    %650 = arith.divf %646, %649 : vector<16x16xf32>
    %651 = vector.extract_strided_slice %622 {offsets = [0, 8], sizes = [16, 8], strides = [1, 1]} : vector<16x32xf32> to vector<16x8xf32>
    %cst_289 = arith.constant dense<0.000000e+00> : vector<16x8xf32>
    %652 = tpu.matmul %650, %651, %cst_289 {dimension_numbers = #tpu.dot_dimension_numbers<[1], [0], [0], [1], [0, 0, 1, 1], [], []>} : vector<16x16xf32>, vector<16x8xf32>, vector<16x8xf32> -> vector<16x8xf32>
    %653 = vector.extract_strided_slice %617 {offsets = [0, 16], sizes = [16, 8], strides = [1, 1]} : vector<16x32xf32> to vector<16x8xf32>
    %654 = vector.extract_strided_slice %621 {offsets = [0, 16], sizes = [16, 8], strides = [1, 1]} : vector<16x32xf32> to vector<16x8xf32>
    %cst_290 = arith.constant dense<0.000000e+00> : vector<16x16xf32>
    %655 = tpu.matmul %653, %654, %cst_290 {dimension_numbers = #tpu.dot_dimension_numbers<[1], [1], [0], [0], [0, 0, 1, 0], [], []>} : vector<16x8xf32>, vector<16x8xf32>, vector<16x16xf32> -> vector<16x16xf32>
    %656 = arith.addf %655, %65 : vector<16x16xf32>
    %cst_291 = arith.constant dense<0xFF800000> : vector<16xf32>
    %657 = vector.multi_reduction <maximumf>, %656, %cst_291 [1] : vector<16x16xf32> to vector<16xf32>
    %658 = vector.shape_cast %657 : vector<16xf32> to vector<16x1xf32>
    %659 = vector.broadcast %658 : vector<16x1xf32> to vector<16x16xf32>
    %660 = arith.subf %656, %659 : vector<16x16xf32>
    %661 = math.exp %660 : vector<16x16xf32>
    %cst_292 = arith.constant dense<0.000000e+00> : vector<16xf32>
    %662 = vector.multi_reduction <add>, %661, %cst_292 [1] : vector<16x16xf32> to vector<16xf32>
    %663 = vector.shape_cast %662 : vector<16xf32> to vector<16x1xf32>
    %664 = vector.broadcast %663 : vector<16x1xf32> to vector<16x16xf32>
    %665 = arith.divf %661, %664 : vector<16x16xf32>
    %666 = vector.extract_strided_slice %622 {offsets = [0, 16], sizes = [16, 8], strides = [1, 1]} : vector<16x32xf32> to vector<16x8xf32>
    %cst_293 = arith.constant dense<0.000000e+00> : vector<16x8xf32>
    %667 = tpu.matmul %665, %666, %cst_293 {dimension_numbers = #tpu.dot_dimension_numbers<[1], [0], [0], [1], [0, 0, 1, 1], [], []>} : vector<16x16xf32>, vector<16x8xf32>, vector<16x8xf32> -> vector<16x8xf32>
    %668 = vector.extract_strided_slice %617 {offsets = [0, 24], sizes = [16, 8], strides = [1, 1]} : vector<16x32xf32> to vector<16x8xf32>
    %669 = vector.extract_strided_slice %621 {offsets = [0, 24], sizes = [16, 8], strides = [1, 1]} : vector<16x32xf32> to vector<16x8xf32>
    %cst_294 = arith.constant dense<0.000000e+00> : vector<16x16xf32>
    %670 = tpu.matmul %668, %669, %cst_294 {dimension_numbers = #tpu.dot_dimension_numbers<[1], [1], [0], [0], [0, 0, 1, 0], [], []>} : vector<16x8xf32>, vector<16x8xf32>, vector<16x16xf32> -> vector<16x16xf32>
    %671 = arith.addf %670, %65 : vector<16x16xf32>
    %cst_295 = arith.constant dense<0xFF800000> : vector<16xf32>
    %672 = vector.multi_reduction <maximumf>, %671, %cst_295 [1] : vector<16x16xf32> to vector<16xf32>
    %673 = vector.shape_cast %672 : vector<16xf32> to vector<16x1xf32>
    %674 = vector.broadcast %673 : vector<16x1xf32> to vector<16x16xf32>
    %675 = arith.subf %671, %674 : vector<16x16xf32>
    %676 = math.exp %675 : vector<16x16xf32>
    %cst_296 = arith.constant dense<0.000000e+00> : vector<16xf32>
    %677 = vector.multi_reduction <add>, %676, %cst_296 [1] : vector<16x16xf32> to vector<16xf32>
    %678 = vector.shape_cast %677 : vector<16xf32> to vector<16x1xf32>
    %679 = vector.broadcast %678 : vector<16x1xf32> to vector<16x16xf32>
    %680 = arith.divf %676, %679 : vector<16x16xf32>
    %681 = vector.extract_strided_slice %622 {offsets = [0, 24], sizes = [16, 8], strides = [1, 1]} : vector<16x32xf32> to vector<16x8xf32>
    %cst_297 = arith.constant dense<0.000000e+00> : vector<16x8xf32>
    %682 = tpu.matmul %680, %681, %cst_297 {dimension_numbers = #tpu.dot_dimension_numbers<[1], [0], [0], [1], [0, 0, 1, 1], [], []>} : vector<16x16xf32>, vector<16x8xf32>, vector<16x8xf32> -> vector<16x8xf32>
    %683 = tpu.concatenate %637, %652, %667, %682 in 1 : vector<16x8xf32>, vector<16x8xf32>, vector<16x8xf32>, vector<16x8xf32> -> vector<16x32xf32>
    %cst_298 = arith.constant dense<0.000000e+00> : vector<16x32xf32>
    %684 = tpu.matmul %683, %27, %cst_298 {dimension_numbers = #tpu.dot_dimension_numbers<[1], [0], [0], [1], [0, 0, 1, 1], [], []>} : vector<16x32xf32>, vector<32x32xf32>, vector<16x32xf32> -> vector<16x32xf32>
    %685 = vector.broadcast %24 : vector<1x32xf32> to vector<16x32xf32>
    %686 = arith.addf %684, %685 : vector<16x32xf32>
    %687 = arith.addf %614, %686 : vector<16x32xf32>
    %cst_299 = arith.constant dense<0.000000e+00> : vector<16xf32>
    %688 = vector.multi_reduction <add>, %687, %cst_299 [1] : vector<16x32xf32> to vector<16xf32>
    %689 = vector.shape_cast %688 : vector<16xf32> to vector<16x1xf32>
    %cst_300 = arith.constant 3.200000e+01 : f32
    %690 = vector.broadcast %cst_300 : f32 to vector<16x1xf32>
    %691 = arith.divf %689, %690 : vector<16x1xf32>
    %692 = vector.broadcast %691 : vector<16x1xf32> to vector<16x32xf32>
    %693 = arith.subf %687, %692 : vector<16x32xf32>
    %694 = arith.mulf %693, %693 : vector<16x32xf32>
    %cst_301 = arith.constant dense<0.000000e+00> : vector<16xf32>
    %695 = vector.multi_reduction <add>, %694, %cst_301 [1] : vector<16x32xf32> to vector<16xf32>
    %696 = vector.shape_cast %695 : vector<16xf32> to vector<16x1xf32>
    %cst_302 = arith.constant 3.200000e+01 : f32
    %697 = vector.broadcast %cst_302 : f32 to vector<16x1xf32>
    %698 = arith.divf %696, %697 : vector<16x1xf32>
    %cst_303 = arith.constant 9.99999974E-6 : f32
    %699 = vector.broadcast %cst_303 : f32 to vector<16x1xf32>
    %700 = arith.addf %698, %699 : vector<16x1xf32>
    %701 = math.rsqrt %700 : vector<16x1xf32>
    %702 = vector.broadcast %701 : vector<16x1xf32> to vector<16x32xf32>
    %703 = arith.mulf %693, %702 : vector<16x32xf32>
    %704 = vector.broadcast %32 : vector<1x32xf32> to vector<16x32xf32>
    %705 = arith.mulf %703, %704 : vector<16x32xf32>
    %706 = vector.broadcast %31 : vector<1x32xf32> to vector<16x32xf32>
    %707 = arith.addf %705, %706 : vector<16x32xf32>
    %cst_304 = arith.constant dense<0.000000e+00> : vector<16x64xf32>
    %708 = tpu.matmul %707, %39, %cst_304 {dimension_numbers = #tpu.dot_dimension_numbers<[1], [0], [0], [1], [0, 0, 1, 1], [], []>} : vector<16x32xf32>, vector<32x64xf32>, vector<16x64xf32> -> vector<16x64xf32>
    %709 = vector.broadcast %21 : vector<1x64xf32> to vector<16x64xf32>
    %710 = arith.addf %708, %709 : vector<16x64xf32>
    %cst_305 = arith.constant 0.000000e+00 : f32
    %711 = vector.broadcast %cst_305 : f32 to vector<16x64xf32>
    %712 = arith.maximumf %710, %711 : vector<16x64xf32>
    %cst_306 = arith.constant dense<0.000000e+00> : vector<16x32xf32>
    %713 = tpu.matmul %712, %40, %cst_306 {dimension_numbers = #tpu.dot_dimension_numbers<[1], [0], [0], [1], [0, 0, 1, 1], [], []>} : vector<16x64xf32>, vector<64x32xf32>, vector<16x32xf32> -> vector<16x32xf32>
    %714 = vector.broadcast %22 : vector<1x32xf32> to vector<16x32xf32>
    %715 = arith.addf %713, %714 : vector<16x32xf32>
    %716 = arith.addf %707, %715 : vector<16x32xf32>
    %cst_307 = arith.constant dense<0.000000e+00> : vector<16xf32>
    %717 = vector.multi_reduction <add>, %716, %cst_307 [1] : vector<16x32xf32> to vector<16xf32>
    %718 = vector.shape_cast %717 : vector<16xf32> to vector<16x1xf32>
    %cst_308 = arith.constant 3.200000e+01 : f32
    %719 = vector.broadcast %cst_308 : f32 to vector<16x1xf32>
    %720 = arith.divf %718, %719 : vector<16x1xf32>
    %721 = vector.broadcast %720 : vector<16x1xf32> to vector<16x32xf32>
    %722 = arith.subf %716, %721 : vector<16x32xf32>
    %723 = arith.mulf %722, %722 : vector<16x32xf32>
    %cst_309 = arith.constant dense<0.000000e+00> : vector<16xf32>
    %724 = vector.multi_reduction <add>, %723, %cst_309 [1] : vector<16x32xf32> to vector<16xf32>
    %725 = vector.shape_cast %724 : vector<16xf32> to vector<16x1xf32>
    %cst_310 = arith.constant 3.200000e+01 : f32
    %726 = vector.broadcast %cst_310 : f32 to vector<16x1xf32>
    %727 = arith.divf %725, %726 : vector<16x1xf32>
    %cst_311 = arith.constant 9.99999974E-6 : f32
    %728 = vector.broadcast %cst_311 : f32 to vector<16x1xf32>
    %729 = arith.addf %727, %728 : vector<16x1xf32>
    %730 = math.rsqrt %729 : vector<16x1xf32>
    %731 = vector.broadcast %730 : vector<16x1xf32> to vector<16x32xf32>
    %732 = arith.mulf %722, %731 : vector<16x32xf32>
    %733 = vector.broadcast %34 : vector<1x32xf32> to vector<16x32xf32>
    %734 = arith.mulf %732, %733 : vector<16x32xf32>
    %735 = vector.broadcast %33 : vector<1x32xf32> to vector<16x32xf32>
    %736 = arith.addf %734, %735 : vector<16x32xf32>
    %cst_312 = arith.constant dense<0.000000e+00> : vector<16x128xf32>
    %737 = tpu.matmul %736, %70, %cst_312 {dimension_numbers = #tpu.dot_dimension_numbers<[1], [0], [0], [1], [0, 0, 1, 1], [], []>} : vector<16x32xf32>, vector<32x128xf32>, vector<16x128xf32> -> vector<16x128xf32>
    %738 = vector.broadcast %0 : vector<1x128xf32> to vector<16x128xf32>
    %739 = arith.addf %737, %738 : vector<16x128xf32>
    %c0_313 = arith.constant 0 : index
    %c0_314 = arith.constant 0 : index
    %740 = vector.load %arg71[%c0_313, %c0_314] : memref<16x128xf32, #tpu.memory_space<vmem>>, vector<16x128xf32>
    tpu.vector_store %arg71[%c0_313, %c0_314], %739 {strides = array<i32>} : memref<16x128xf32, #tpu.memory_space<vmem>>, vector<16x128xf32>,
    return
  }
}

</mosaic_0001>

<bundles_post_ra>
// kernel: tile.18
= control target key start
LH: loop header
LB: loop body
LE: loop exit
PB: predicated region body
PF: predicated region fallthrough
CT: control target
= control target key end

     0   :  { %s154_s0 = inlined_call_operand.vmem [shape: f32[8,8], index: 0, kind: input, shape index: {}]   ;;  %s155_s1 = inlined_call_operand.vmem [shape: f32[2,8,2,8], index: 1, kind: output, shape index: {}]  }
   0x1   :  { %v4_v0 = vld [vmem:[%s154_s0] ss:$0 sm:$0xff]  ;;  %v51_v1 = vld [vmem:[%s154_s0 + $0x1] ss:$0 sm:$0xff]  ;;  %v54_v2 = vld [vmem:[%s154_s0 + $0x2] ss:$0 sm:$0xff] }
   0x2   :  { %5 = vst [vmem:[%s155_s1] sm:$0x3] %v4_v0  ;;  %50 = vst [vmem:[%s155_s1 + $0x10] sm:$0x3] %v4_v0  ;;  %v57_v3 = vld [vmem:[%s154_s0 + $0x3] ss:$0 sm:$0xff] }
   0x3   :  { %52 = vst [vmem:[%s155_s1 + $0x2] sm:$0x3] %v51_v1  ;;  %53 = vst [vmem:[%s155_s1 + $0x12] sm:$0x3] %v51_v1  ;;  %v60_v4 = vld [vmem:[%s154_s0 + $0x4] ss:$0 sm:$0xff] }
   0x4   :  { %55 = vst [vmem:[%s155_s1 + $0x4] sm:$0x3] %v54_v2  ;;  %56 = vst [vmem:[%s155_s1 + $0x14] sm:$0x3] %v54_v2  ;;  %v63_v5 = vld [vmem:[%s154_s0 + $0x5] ss:$0 sm:$0xff] }
   0x5   :  { %58 = vst [vmem:[%s155_s1 + $0x6] sm:$0x3] %v57_v3  ;;  %59 = vst [vmem:[%s155_s1 + $0x16] sm:$0x3] %v57_v3  ;;  %v66_v6 = vld [vmem:[%s154_s0 + $0x6] ss:$0 sm:$0xff] }
   0x6   :  { %61 = vst [vmem:[%s155_s1 + $0x8] sm:$0x3] %v60_v4  ;;  %62 = vst [vmem:[%s155_s1 + $0x18] sm:$0x3] %v60_v4  ;;  %v69_v7 = vld [vmem:[%s154_s0 + $0x7] ss:$0 sm:$0xff] }
   0x7   :  { %64 = vst [vmem:[%s155_s1 + $0xa] sm:$0x3] %v63_v5  ;;  %65 = vst [vmem:[%s155_s1 + $0x1a] sm:$0x3] %v63_v5 }
   0x8   :  { %67 = vst [vmem:[%s155_s1 + $0xc] sm:$0x3] %v66_v6  ;;  %68 = vst [vmem:[%s155_s1 + $0x1c] sm:$0x3] %v66_v6 }
   0x9   :  { %70 = vst [vmem:[%s155_s1 + $0xe] sm:$0x3] %v69_v7  ;;  %71 = vst [vmem:[%s155_s1 + $0x1e] sm:$0x3] %v69_v7 }

// kernel: eq.36
= control target key start
LH: loop header
LB: loop body
LE: loop exit
PB: predicated region body
PF: predicated region fallthrough
CT: control target
= control target key end

     0   :  { %vm7_vm0 = vcmask 64512   ;;  %vm13_vm1 = vcmask 130112   ;;  %s39_s0 = inlined_call_operand.vmem [shape: s32[2,8], index: 0, kind: input, shape index: {}]   ;;  %s40_s1 = inlined_call_operand.vmem [shape: s32[16], index: 1, kind: output, shape index: {}]  }
   0x1   :  { %v4_v0 = vld [vmem:[%s39_s0] sm:$0x3]  ;;  %s22_s0 = smov 8  }
   0x2   :  { %5 = vst [vmem:[#allocation1] sm:$0x3] %v4_v0 }
   0x9   :  { %v10_v1 = vld [vmem:[#allocation1 + $0x1] sm:$0x1]   ;;  %v6_v2 = vld [vmem:[#allocation1] sm:$0x1]  }
   0xa   :  { %11 = vrot.lane.b32.xlu0 %v10_v1, %s22_s0  ;;  %8 = vst.msk [vmem:[#allocation0] sm:$0x1] %vm7_vm0, %v6_v2  }
  0x7c   :  { %v12_v3 = vpop.permute.xlu0 %11  }
  0x7d   :  { %14 = vst.msk [vmem:[#allocation0] sm:$0x1] %vm13_vm1, %v12_v3  }
  0x84   :  { %v18_v4 = vld [vmem:[#allocation0] sm:$0x1] }
  0x85   :  { %20 = vst [vmem:[%s40_s1] sm:$0x1] %v18_v4 }

// kernel: tile.19
= control target key start
LH: loop header
LB: loop body
LE: loop exit
PB: predicated region body
PF: predicated region fallthrough
CT: control target
= control target key end

     0   :  { %vm82_vm0 = vcmask 1047556   ;;  %vm84_vm1 = vcmask 64512   ;;  %vm103_vm2 = vcmask 130112   ;;  %s225_s0 = inlined_call_operand.vmem [shape: f32[2,8,2,8], index: 0, kind: input, shape index: {}]   ;;  %s226_s1 = inlined_call_operand.vmem [shape: f32[16,16], index: 1, kind: output, shape index: {}]  }
   0x1   :  { %v138_v0 = vld [vmem:[%s225_s0 + $0xe] sm:$0x3]  ;;  %v139_v1 = vld [vmem:[%s225_s0 + $0xc] sm:$0x3]  ;;  %v140_v2 = vld [vmem:[%s225_s0 + $0xa] sm:$0x3] }
   0x2   :  { %48 = vst [vmem:[#allocation0 + $0x38] sm:$0x3] %v138_v0  ;;  %53 = vst [vmem:[#allocation0 + $0x30] sm:$0x3] %v139_v1  ;;  %v141_v3 = vld [vmem:[%s225_s0 + $0x8] sm:$0x3] }
   0x3   :  { %58 = vst [vmem:[#allocation0 + $0x28] sm:$0x3] %v140_v2  ;;  %v142_v4 = vld [vmem:[%s225_s0 + $0x6] sm:$0x3]  ;;  %v143_v5 = vld [vmem:[%s225_s0 + $0x4] sm:$0x3] }
   0x4   :  { %63 = vst [vmem:[#allocation0 + $0x20] sm:$0x3] %v141_v3  ;;  %68 = vst [vmem:[#allocation0 + $0x18] sm:$0x3] %v142_v4  ;;  %v144_v6 = vld [vmem:[%s225_s0 + $0x2] sm:$0x3] }
   0x5   :  { %73 = vst [vmem:[#allocation0 + $0x10] sm:$0x3] %v143_v5  ;;  %v78_v7 = vld [vmem:[%s225_s0] sm:$0x3]  ;;  %77 = vst [vmem:[#allocation0 + $0x8] sm:$0x3] %v144_v6 }
   0x6   :  { %79 = vst [vmem:[#allocation0] sm:$0x3] %v78_v7  ;;  %v130_v8 = vld [vmem:[%s225_s0 + $0x1e] sm:$0x3]  ;;  %v131_v9 = vld [vmem:[%s225_s0 + $0x1c] sm:$0x3] }
   0x7   :  { %v132_v10 = vld [vmem:[%s225_s0 + $0x1a] sm:$0x3]  ;;  %8 = vst [vmem:[#allocation0 + $0x78] sm:$0x3] %v130_v8  ;;  %13 = vst [vmem:[#allocation0 + $0x70] sm:$0x3] %v131_v9 }
   0x8   :  { %18 = vst [vmem:[#allocation0 + $0x68] sm:$0x3] %v132_v10  ;;  %v133_v11 = vld [vmem:[%s225_s0 + $0x18] sm:$0x3]  ;;  %v134_v12 = vld [vmem:[%s225_s0 + $0x16] sm:$0x3] }
   0x9   :  { %v135_v13 = vld [vmem:[%s225_s0 + $0x14] sm:$0x3]  ;;  %23 = vst [vmem:[#allocation0 + $0x60] sm:$0x3] %v133_v11  ;;  %28 = vst [vmem:[#allocation0 + $0x58] sm:$0x3] %v134_v12 }
   0xa   :  { %33 = vst [vmem:[#allocation0 + $0x50] sm:$0x3] %v135_v13  ;;  %v136_v14 = vld [vmem:[%s225_s0 + $0x12] sm:$0x3]  ;;  %v137_v15 = vld [vmem:[%s225_s0 + $0x10] sm:$0x3] }
   0xb   :  { %38 = vst [vmem:[#allocation0 + $0x48] sm:$0x3] %v136_v14  ;;  %43 = vst [vmem:[#allocation0 + $0x40] sm:$0x3] %v137_v15  ;;  %s148_s0 = smov 8  }
   0xc   :  { %v98_v16 = vld [vmem:[#allocation0 + $0x1] ss:$8 sm:$0xf0]   ;;  %v81_v17 = vld [vmem:[#allocation0] ss:$8 sm:$0xf0]  }
   0xd   :  { %v96_v18 = vld [vmem:[#allocation0 + $0x1] ss:$8 sm:$0xf]   ;;  %v80_v19 = vld [vmem:[#allocation0] ss:$8 sm:$0xf]  }
   0xe   :  { %v100_v20 = vsel %vm82_vm0, %v98_v16, %v96_v18  ;;  %v83_v21 = vsel %vm82_vm0, %v81_v17, %v80_v19 }
   0xf   :  { %101 = vrot.lane.b32.xlu0 %v100_v20, %s148_s0  ;;  %85 = vst.msk [vmem:[%s226_s1] sm:$0xff] %vm84_vm1, %v83_v21  }
  0x10   :  { %v108_v22 = vld [vmem:[#allocation0 + $0x41] ss:$8 sm:$0xf0]   ;;  %v89_v23 = vld [vmem:[#allocation0 + $0x40] ss:$8 sm:$0xf0]  }
  0x12   :  { %v106_v24 = vld [vmem:[#allocation0 + $0x41] ss:$8 sm:$0xf]   ;;  %v87_v25 = vld [vmem:[#allocation0 + $0x40] ss:$8 sm:$0xf]  }
  0x13   :  { %v110_v26 = vsel %vm82_vm0, %v108_v22, %v106_v24  ;;  %v91_v27 = vsel %vm82_vm0, %v89_v23, %v87_v25 }
  0x14   :  { %145 = vst.msk [vmem:[%s226_s1 + $0x8] sm:$0xff] %vm84_vm1, %v91_v27   ;;  %111 = vrot.lane.b32.xlu0 %v110_v26, %s148_s0 }
  0x81   :  { %v102_v28 = vpop.permute.xlu0 %101  }
  0x82   :  { %104 = vst.msk [vmem:[%s226_s1] sm:$0xff] %vm103_vm2, %v102_v28  }
  0x86   :  { %v112_v29 = vpop.permute.xlu0 %111  }
  0x87   :  { %146 = vst.msk [vmem:[%s226_s1 + $0x8] sm:$0xff] %vm103_vm2, %v112_v29  }

// kernel: transformer_forward.1
= control target key start
LH: loop header
LB: loop body
LE: loop exit
PB: predicated region body
PF: predicated region fallthrough
CT: control target
= control target key end

     0   :  { %s11201_s6 = smov 1   ;;  %s11202_s10 = smov 2   ;;  %s12815_s0 = inlined_call_operand.smem [shape: u32[72], index: -1, kind: input, shape index: {}] }
   0x1   :  { %s11324_s5 = sld [smem:[%s12815_s0]]   ;;  %s11203_s14 = smov 3  }
   0x2   :  { %s11329_s9 = sld [smem:[%s12815_s0 + %s11201_s6]]   ;;  %s11204_s18 = smov 4  }
   0x3   :  { %s11334_s13 = sld [smem:[%s12815_s0 + %s11202_s10]]   ;;  %s11205_s22 = smov 5  }
   0x4   :  { %s11339_s17 = sld [smem:[%s12815_s0 + %s11203_s14]]   ;;  %s11206_s26 = smov 6  }
   0x5   :  { %s11344_s21 = sld [smem:[%s12815_s0 + %s11204_s18]]   ;;  %s11207_s30 = smov 7  }
   0x6   :  { %s11349_s25 = sld [smem:[%s12815_s0 + %s11205_s22]]   ;;  %s11208_s4 = smov 8  }
   0x7   :  { %12855 = sst [smem:[#allocation63_spill]] %s11324_s5  ;;  %s11209_s10 = smov 9  }
   0x8   :  { %12856 = sst [smem:[#allocation64_spill]] %s11329_s9  ;;  %s11210_s15 = smov 10  }
   0x9   :  { %12857 = sst [smem:[#allocation65_spill]] %s11334_s13  ;;  %s11211_s20 = smov 11  }
   0xa   :  { %12858 = sst [smem:[#allocation66_spill]] %s11339_s17  ;;  %s11213_s1 = smov 13  }
   0xb   :  { %12859 = sst [smem:[#allocation67_spill]] %s11344_s21  ;;  %s11214_s7 = smov 14  }
   0xc   :  { %12860 = sst [smem:[#allocation68_spill]] %s11349_s25  ;;  %s11216_s22 = smov 16  }
   0xd   :  { %s11354_s29 = sld [smem:[%s12815_s0 + %s11206_s26]]   ;;  %s11212_s26 = smov 12  }
   0xe   :  { %s11359_s3 = sld [smem:[%s12815_s0 + %s11207_s30]]   ;;  %s11217_s28 = smov 17  }
   0xf   :  { %s11364_s8 = sld [smem:[%s12815_s0 + %s11208_s4]]  }
  0x10   :  { %s11369_s14 = sld [smem:[%s12815_s0 + %s11209_s10]]  }
  0x11   :  { %s11374_s19 = sld [smem:[%s12815_s0 + %s11210_s15]]   ;;  %s11215_s15 = smov 15  }
  0x12   :  { %s11379_s24 = sld [smem:[%s12815_s0 + %s11211_s20]]  }
  0x13   :  { %12861 = sst [smem:[#allocation69_spill]] %s11354_s29 }
  0x14   :  { %12862 = sst [smem:[#allocation70_spill]] %s11359_s3 }
  0x15   :  { %12863 = sst [smem:[#allocation71_spill]] %s11364_s8 }
  0x16   :  { %12864 = sst [smem:[#allocation72_spill]] %s11369_s14 }
  0x17   :  { %12865 = sst [smem:[#allocation73_spill]] %s11374_s19 }
  0x18   :  { %12866 = sst [smem:[#allocation74_spill]] %s11379_s24 }
  0x19   :  { %s11384_s30 = sld [smem:[%s12815_s0 + %s11212_s26]]  }
  0x1a   :  { %s11389_s6 = sld [smem:[%s12815_s0 + %s11213_s1]]  }
  0x1b   :  { %s11394_s12 = sld [smem:[%s12815_s0 + %s11214_s7]]   ;;  %s11218_s7 = smov 18  }
  0x1c   :  { %s11399_s20 = sld [smem:[%s12815_s0 + %s11215_s15]]   ;;  %s11219_s15 = smov 19  }
  0x1d   :  { %s11404_s27 = sld [smem:[%s12815_s0 + %s11216_s22]]   ;;  %s11220_s22 = smov 20  }
  0x1e   :  { %s11409_s4 = sld [smem:[%s12815_s0 + %s11217_s28]]   ;;  %s11221_s28 = smov 21  }
  0x1f   :  { %12867 = sst [smem:[#allocation75_spill]] %s11384_s30 }
  0x20   :  { %12868 = sst [smem:[#allocation76_spill]] %s11389_s6 }
  0x21   :  { %12869 = sst [smem:[#allocation77_spill]] %s11394_s12 }
  0x22   :  { %12870 = sst [smem:[#allocation78_spill]] %s11399_s20 }
  0x23   :  { %12871 = sst [smem:[#allocation79_spill]] %s11404_s27 }
  0x24   :  { %12872 = sst [smem:[#allocation80_spill]] %s11409_s4 }
  0x25   :  { %s11414_s5 = sld [smem:[%s12815_s0 + %s11218_s7]]   ;;  %s11222_s7 = smov 22  }
  0x26   :  { %s11419_s6 = sld [smem:[%s12815_s0 + %s11219_s15]]   ;;  %s11223_s15 = smov 23  }
  0x27   :  { %s11424_s12 = sld [smem:[%s12815_s0 + %s11220_s22]]   ;;  %s11224_s22 = smov 24  }
  0x28   :  { %s11429_s13 = sld [smem:[%s12815_s0 + %s11221_s28]]   ;;  %s11225_s28 = smov 25  }
  0x29   :  { %s11434_s9 = sld [smem:[%s12815_s0 + %s11222_s7]]   ;;  %s11226_s7 = smov 26  }
  0x2a   :  { %s11439_s24 = sld [smem:[%s12815_s0 + %s11223_s15]]   ;;  %s11227_s15 = smov 27  }
  0x2b   :  { %12873 = sst [smem:[#allocation81_spill]] %s11414_s5 }
  0x2c   :  { %12874 = sst [smem:[#allocation82_spill]] %s11419_s6 }
  0x2d   :  { %12875 = sst [smem:[#allocation83_spill]] %s11424_s12 }
  0x2e   :  { %12876 = sst [smem:[#allocation84_spill]] %s11429_s13 }
  0x2f   :  { %s11444_s30 = sld [smem:[%s12815_s0 + %s11224_s22]]   ;;  %s11228_s22 = smov 28  }
  0x30   :  { %s11449_s13 = sld [smem:[%s12815_s0 + %s11225_s28]]   ;;  %s11229_s28 = smov 29  }
  0x31   :  { %s11454_s12 = sld [smem:[%s12815_s0 + %s11226_s7]]   ;;  %s11230_s7 = smov 30  }
  0x32   :  { %s11459_s6 = sld [smem:[%s12815_s0 + %s11227_s15]]   ;;  %s11231_s15 = smov 31  }
  0x33   :  { %s11464_s21 = sld [smem:[%s12815_s0 + %s11228_s22]]   ;;  %s11232_s22 = smov 32  }
  0x34   :  { %s11469_s3 = sld [smem:[%s12815_s0 + %s11229_s28]]   ;;  %s11233_s28 = smov 33  }
  0x35   :  { %12877 = sst [smem:[#allocation85_spill]] %s11444_s30 }
  0x36   :  { %s11489_s25 = sld [smem:[%s12815_s0 + %s11233_s28]]   ;;  %s11237_s28 = smov 37  }
  0x37   :  { %12878 = sst [smem:[#allocation86_spill]] %s11454_s12 }
  0x38   :  { %12879 = sst [smem:[#allocation87_spill]] %s11459_s6 }
  0x39   :  { %12880 = sst [smem:[#allocation88_spill]] %s11464_s21 }
  0x3a   :  { %12881 = sst [smem:[#allocation89_spill]] %s11469_s3 }
  0x3b   :  { %s11474_s12 = sld [smem:[%s12815_s0 + %s11230_s7]]   ;;  %s11234_s7 = smov 34  }
  0x3c   :  { %s11479_s6 = sld [smem:[%s12815_s0 + %s11231_s15]]   ;;  %s11235_s15 = smov 35  }
  0x3d   :  { %s11484_s21 = sld [smem:[%s12815_s0 + %s11232_s22]]   ;;  %s11236_s22 = smov 36  }
  0x3e   :  { %12883 = sst [smem:[#allocation91_spill]] %s11489_s25 }
  0x3f   :  { %s11494_s17 = sld [smem:[%s12815_s0 + %s11234_s7]]   ;;  %s11238_s7 = smov 38  }
  0x40   :  { %s11499_s14 = sld [smem:[%s12815_s0 + %s11235_s15]]   ;;  %s11239_s15 = smov 39  }
  0x41   :  { %s11504_s19 = sld [smem:[%s12815_s0 + %s11236_s22]]   ;;  %s11240_s22 = smov 40  }
  0x42   :  { %12882 = sst [smem:[#allocation90_spill]] %s11479_s6 }
  0x43   :  { %s11509_s8 = sld [smem:[%s12815_s0 + %s11237_s28]]   ;;  %s11241_s28 = smov 41  }
  0x44   :  { %s11514_s29 = sld [smem:[%s12815_s0 + %s11238_s7]]   ;;  %s11242_s7 = smov 42  }
  0x45   :  { %s11519_s20 = sld [smem:[%s12815_s0 + %s11239_s15]]   ;;  %s11243_s15 = smov 43  }
  0x46   :  { %12884 = sst [smem:[#allocation92_spill]] %s11499_s14 }
  0x47   :  { %s11524_s4 = sld [smem:[%s12815_s0 + %s11240_s22]]   ;;  %s11244_s22 = smov 44  }
  0x49   :  { %12885 = sst [smem:[#allocation93_spill]] %s11509_s8 }
  0x4a   :  { %12886 = sst [smem:[#allocation94_spill]] %s11514_s29 }
  0x4b   :  { %12887 = sst [smem:[#allocation95_spill]] %s11519_s20 }
  0x4c   :  { %s11529_s8 = sld [smem:[%s12815_s0 + %s11241_s28]]   ;;  %s11245_s28 = smov 45  }
  0x4d   :  { %12888 = sst [smem:[#allocation96_spill]] %s11524_s4 }
  0x4e   :  { %s11534_s29 = sld [smem:[%s12815_s0 + %s11242_s7]]   ;;  %s11246_s7 = smov 46  }
  0x4f   :  { %s11539_s20 = sld [smem:[%s12815_s0 + %s11243_s15]]   ;;  %s11247_s15 = smov 47  }
  0x50   :  { %s11544_s4 = sld [smem:[%s12815_s0 + %s11244_s22]]   ;;  %s11248_s22 = smov 48  }
  0x51   :  { %s11549_s27 = sld [smem:[%s12815_s0 + %s11245_s28]]   ;;  %s11249_s28 = smov 49  }
  0x52   :  { %12889 = sst [smem:[#allocation97_spill]] %s11529_s8 }
  0x53   :  { %s11554_s5 = sld [smem:[%s12815_s0 + %s11246_s7]]   ;;  %s11250_s7 = smov 50  }
  0x54   :  { %s11564_s8 = sld [smem:[%s12815_s0 + %s11248_s22]]   ;;  %s11252_s22 = smov 52  }
  0x55   :  { %12890 = sst [smem:[#allocation98_spill]] %s11539_s20 }
  0x56   :  { %s11559_s20 = sld [smem:[%s12815_s0 + %s11247_s15]]   ;;  %s11251_s15 = smov 51  }
  0x57   :  { %12891 = sst [smem:[#allocation99_spill]] %s11549_s27 }
  0x58   :  { %s11569_s27 = sld [smem:[%s12815_s0 + %s11249_s28]]   ;;  %s11253_s28 = smov 53  }
  0x59   :  { %s11574_s14 = sld [smem:[%s12815_s0 + %s11250_s7]]   ;;  %s11254_s7 = smov 54  }
  0x5a   :  { %s11584_s25 = sld [smem:[%s12815_s0 + %s11252_s22]]   ;;  %s11256_s22 = smov 56  }
  0x5c   :  { %12892 = sst [smem:[#allocation100_spill]] %s11559_s20 }
  0x5d   :  { %s11579_s20 = sld [smem:[%s12815_s0 + %s11251_s15]]   ;;  %s11255_s15 = smov 55  }
  0x5e   :  { %12893 = sst [smem:[#allocation101_spill]] %s11569_s27 }
  0x5f   :  { %12894 = sst [smem:[#allocation102_spill]] %s11574_s14 }
  0x60   :  { %12896 = sst [smem:[#allocation104_spill]] %s11584_s25 }
  0x61   :  { %s11589_s27 = sld [smem:[%s12815_s0 + %s11253_s28]]   ;;  %s11257_s28 = smov 57  }
  0x62   :  { %s11594_s14 = sld [smem:[%s12815_s0 + %s11254_s7]]   ;;  %s11258_s7 = smov 58  }
  0x63   :  { %12895 = sst [smem:[#allocation103_spill]] %s11579_s20 }
  0x64   :  { %s11599_s20 = sld [smem:[%s12815_s0 + %s11255_s15]]   ;;  %s11259_s15 = smov 59  }
  0x65   :  { %s11604_s25 = sld [smem:[%s12815_s0 + %s11256_s22]]   ;;  %s11260_s22 = smov 60  }
  0x66   :  { %s11614_s6 = sld [smem:[%s12815_s0 + %s11258_s7]]   ;;  %s11262_s7 = smov 62  }
  0x67   :  { %12897 = sst [smem:[#allocation105_spill]] %s11589_s27 }
  0x68   :  { %s11609_s27 = sld [smem:[%s12815_s0 + %s11257_s28]]   ;;  %s11261_s28 = smov 61  }
  0x69   :  { %s11624_s3 = sld [smem:[%s12815_s0 + %s11260_s22]]   ;;  %s11264_s22 = smov 64  }
  0x6a   :  { %12898 = sst [smem:[#allocation106_spill]] %s11599_s20 }
  0x6b   :  { %s11619_s20 = sld [smem:[%s12815_s0 + %s11259_s15]]   ;;  %s11263_s15 = smov 63  }
  0x6c   :  { %s11634_s30 = sld [smem:[%s12815_s0 + %s11262_s7]]   ;;  %s11266_s7 = smov 66  }
  0x6e   :  { %12899 = sst [smem:[#allocation107_spill]] %s11609_s27 }
  0x6f   :  { %12901 = sst [smem:[#allocation109_spill]] %s11624_s3 }
  0x70   :  { %s11629_s27 = sld [smem:[%s12815_s0 + %s11261_s28]]   ;;  %s11265_s28 = smov 65  }
  0x71   :  { %12900 = sst [smem:[#allocation108_spill]] %s11619_s20 }
  0x72   :  { %12903 = sst [smem:[#allocation111_spill]] %s11634_s30 }
  0x73   :  { %s11639_s20 = sld [smem:[%s12815_s0 + %s11263_s15]]   ;;  %s11267_s15 = smov 67  }
  0x74   :  { %s11644_s3 = sld [smem:[%s12815_s0 + %s11264_s22]]   ;;  %s11268_s22 = smov 68  }
  0x75   :  { %s11654_s30 = sld [smem:[%s12815_s0 + %s11266_s7]]   ;;  %s11270_s7 = smov 70  }
  0x76   :  { %12902 = sst [smem:[#allocation110_spill]] %s11629_s27 }
  0x77   :  { %s11649_s27 = sld [smem:[%s12815_s0 + %s11265_s28]]   ;;  %s11269_s28 = smov 69  }
  0x79   :  { %12904 = sst [smem:[#allocation112_spill]] %s11639_s20 }
  0x7a   :  { %12905 = sst [smem:[#allocation113_spill]] %s11644_s3 }
  0x7b   :  { %12907 = sst [smem:[#allocation115_spill]] %s11654_s30 }
  0x7c   :  { %s11659_s20 = sld [smem:[%s12815_s0 + %s11267_s15]]   ;;  %s11271_s15 = smov 71  }
  0x7d   :  { %12906 = sst [smem:[#allocation114_spill]] %s11649_s27 }
  0x7e   :  { %s11664_s3 = sld [smem:[%s12815_s0 + %s11268_s22]]  }
  0x7f   :  { %s11669_s27 = sld [smem:[%s12815_s0 + %s11269_s28]]  }
  0x80   :  { %s11674_s30 = sld [smem:[%s12815_s0 + %s11270_s7]]  }
  0x82   :  { %12908 = sst [smem:[#allocation116_spill]] %s11659_s20 }
  0x83   :  { %s11679_s20 = sld [smem:[%s12815_s0 + %s11271_s15]]  }
  0x84   :  { %148 = vsyncpa [#allocation3], 0 }
  0x85   :  { %149 = vsyncpa [#allocation6], 0 }
  0x86   :  { %150 = vsyncpa [#allocation9], 0 }
  0x87   :  { %151 = vsyncpa [#allocation12], 0 }
  0x88   :  { %152 = vsyncpa [#allocation15], 0 }
  0x89   :  { %153 = vsyncpa [#allocation18], 0 }
  0x8a   :  { %154 = vsyncpa [#allocation21], 0 }
  0x8b   :  { %155 = vsyncpa [#allocation24], 0 }
  0x8c   :  { %156 = vsyncpa [#allocation27], 0 }
  0x8d   :  { %157 = vsyncpa [#allocation30], 0 }
  0x8e   :  { %158 = vsyncpa [#allocation33], 0 }
  0x8f   :  { %159 = vsyncpa [#allocation36], 0 }
  0x90   :  { %160 = vsyncpa [#allocation39], 0 }
  0x91   :  { %161 = vsyncpa [#allocation42], 0 }
  0x92   :  { %162 = vsyncpa [#allocation45], 0 }
  0x93   :  { %163 = vsyncpa [#allocation4], 0  ;;  %s11272_s0 = smov [#allocation5]   ;;  %s11273_s23 = smov [#allocation8]  }
  0x94   :  { %s224_s22 = sshll.u32 %s11272_s0, 4  ;;  %s244_s26 = sshll.u32 %s11273_s23, 4  ;;  %s225_s22 = int_to_ptr.vmem [resolvable:$true] %s224_s22  ;;  %s245_s26 = int_to_ptr.vmem [resolvable:$true] %s244_s26 }
  0x95   :  { %s10531_s28 = scalar_lea.hbm %s11439_s24, 16 }
  0x96   :  { %p10532_p0 = scmp.ne.s32.totalorder %s11439_s24, %s10531_s28  ;;  %p10535_p1 = scmp.lt.u32.totalorder %s10531_s28, %s11439_s24 }
  0x98   :  { %p10537_p2 = pnand %p10535_p1, %p10532_p0 }
  0x9a   :  { %10540 = shalt.err (!%p10537_p2)
}
  0x9b   :  { %s10541_s1 = scalar_lea.vmem %s225_s22, 16  ;;  %s10545_s2 = scalar_lea.vmem %s225_s22, 32 }
  0x9c   :  { %p10542_p3 = scmp.ne.s32.totalorder %s225_s22, %s10541_s1  ;;  %p10546_p4 = scmp.lt.s32.totalorder %s225_s22, %s225_s22 }
  0x9d   :  { %p10547_p5 = scmp.lt.s32.totalorder %s10545_s2, %s10541_s1 }
  0x9f   :  { %p10548_p6 = por %p10547_p5, %p10546_p4 }
  0xa1   :  { %p10549_p7 = pnand %p10548_p6, %p10542_p3 }
  0xa3   :  { %10552 = shalt.err (!%p10549_p7)
}
  0xa4   :  { %227 = dma.hbm_to_vmem [thread:$0]  %s11439_s24, 16, %s225_s22, [#allocation6]  }
  0xa5   :  { %s10553_s7 = scalar_lea.hbm %s11449_s13, 16 }
  0xa6   :  { %p10554_p8 = scmp.ne.s32.totalorder %s11449_s13, %s10553_s7  ;;  %p10557_p9 = scmp.lt.u32.totalorder %s10553_s7, %s11449_s13 }
  0xa8   :  { %p10559_p10 = pnand %p10557_p9, %p10554_p8 }
  0xaa   :  { %10562 = shalt.err (!%p10559_p10)
}
  0xab   :  { %s10563_s10 = scalar_lea.vmem %s245_s26, 16  ;;  %s10567_s11 = scalar_lea.vmem %s245_s26, 32 }
  0xac   :  { %p10564_p11 = scmp.ne.s32.totalorder %s245_s26, %s10563_s10  ;;  %p10568_p12 = scmp.lt.s32.totalorder %s245_s26, %s245_s26 }
  0xad   :  { %p10569_p13 = scmp.lt.s32.totalorder %s10567_s11, %s10563_s10 }
  0xaf   :  { %p10570_p0 = por %p10569_p13, %p10568_p12 }
  0xb1   :  { %p10571_p1 = pnand %p10570_p0, %p10564_p11 }
  0xb3   :  { %10574 = shalt.err (!%p10571_p1)
}
  0xb4   :  { %247 = dma.hbm_to_vmem [thread:$0]  %s11449_s13, 16, %s245_s26, [#allocation9]  }
  0xb5   :  { %s11274_s15 = smov [#allocation11]   ;;  %s11275_s16 = smov [#allocation14]  }
  0xb6   :  { %s270_s24 = sshll.u32 %s11274_s15, 4  ;;  %s290_s18 = sshll.u32 %s11275_s16, 4  ;;  %s271_s24 = int_to_ptr.vmem [resolvable:$true] %s270_s24  ;;  %s291_s18 = int_to_ptr.vmem [resolvable:$true] %s290_s18 }
  0xb7   :  { %s10575_s0 = scalar_lea.hbm %s11474_s12, 16 }
  0xb8   :  { %p10576_p2 = scmp.ne.s32.totalorder %s11474_s12, %s10575_s0  ;;  %p10579_p3 = scmp.lt.u32.totalorder %s10575_s0, %s11474_s12 }
  0xba   :  { %p10581_p4 = pnand %p10579_p3, %p10576_p2 }
  0xbc   :  { %10584 = shalt.err (!%p10581_p4)
}
  0xbd   :  { %s10585_s22 = scalar_lea.vmem %s271_s24, 16  ;;  %s10589_s23 = scalar_lea.vmem %s271_s24, 32 }
  0xbe   :  { %p10586_p5 = scmp.ne.s32.totalorder %s271_s24, %s10585_s22  ;;  %p10590_p6 = scmp.lt.s32.totalorder %s271_s24, %s271_s24 }
  0xbf   :  { %p10591_p7 = scmp.lt.s32.totalorder %s10589_s23, %s10585_s22 }
  0xc1   :  { %p10592_p8 = por %p10591_p7, %p10590_p6 }
  0xc3   :  { %p10593_p9 = pnand %p10592_p8, %p10586_p5 }
  0xc5   :  { %10596 = shalt.err (!%p10593_p9)
}
  0xc6   :  { %273 = dma.hbm_to_vmem [thread:$0]  %s11474_s12, 16, %s271_s24, [#allocation12]  }
  0xc7   :  { %s10597_s13 = scalar_lea.hbm %s11484_s21, 16 }
  0xc8   :  { %p10598_p10 = scmp.ne.s32.totalorder %s11484_s21, %s10597_s13  ;;  %p10601_p11 = scmp.lt.u32.totalorder %s10597_s13, %s11484_s21 }
  0xca   :  { %p10603_p12 = pnand %p10601_p11, %p10598_p10 }
  0xcc   :  { %10606 = shalt.err (!%p10603_p12)
}
  0xcd   :  { %s10607_s26 = scalar_lea.vmem %s291_s18, 16  ;;  %s10611_s28 = scalar_lea.vmem %s291_s18, 32 }
  0xce   :  { %p10608_p13 = scmp.ne.s32.totalorder %s291_s18, %s10607_s26  ;;  %p10612_p0 = scmp.lt.s32.totalorder %s291_s18, %s291_s18 }
  0xcf   :  { %p10613_p1 = scmp.lt.s32.totalorder %s10611_s28, %s10607_s26 }
  0xd1   :  { %p10614_p2 = por %p10613_p1, %p10612_p0 }
  0xd3   :  { %p10615_p3 = pnand %p10614_p2, %p10608_p13 }
  0xd5   :  { %10618 = shalt.err (!%p10615_p3)
}
  0xd6   :  { %293 = dma.hbm_to_vmem [thread:$0]  %s11484_s21, 16, %s291_s18, [#allocation15]  }
  0xd7   :  { %s11276_s1 = smov [#allocation17]   ;;  %s11277_s2 = smov [#allocation20]  }
  0xd8   :  { %s310_s12 = sshll.u32 %s11276_s1, 4  ;;  %s330_s7 = sshll.u32 %s11277_s2, 4  ;;  %s311_s12 = int_to_ptr.vmem [resolvable:$true] %s310_s12  ;;  %s331_s7 = int_to_ptr.vmem [resolvable:$true] %s330_s7 }
  0xd9   :  { %s10619_s10 = scalar_lea.hbm %s11494_s17, 16 }
  0xda   :  { %p10620_p4 = scmp.ne.s32.totalorder %s11494_s17, %s10619_s10  ;;  %p10623_p5 = scmp.lt.u32.totalorder %s10619_s10, %s11494_s17 }
  0xdc   :  { %p10625_p6 = pnand %p10623_p5, %p10620_p4 }
  0xde   :  { %10628 = shalt.err (!%p10625_p6)
}
  0xdf   :  { %s10629_s11 = scalar_lea.vmem %s311_s12, 16  ;;  %s10633_s15 = scalar_lea.vmem %s311_s12, 32 }
  0xe0   :  { %p10630_p7 = scmp.ne.s32.totalorder %s311_s12, %s10629_s11  ;;  %p10634_p8 = scmp.lt.s32.totalorder %s311_s12, %s311_s12 }
  0xe1   :  { %p10635_p9 = scmp.lt.s32.totalorder %s10633_s15, %s10629_s11 }
  0xe3   :  { %p10636_p10 = por %p10635_p9, %p10634_p8 }
  0xe5   :  { %p10637_p11 = pnand %p10636_p10, %p10630_p7 }
  0xe7   :  { %10640 = shalt.err (!%p10637_p11)
}
  0xe8   :  { %313 = dma.hbm_to_vmem [thread:$0]  %s11494_s17, 16, %s311_s12, [#allocation18]  }
  0xe9   :  { %s10641_s21 = scalar_lea.hbm %s11504_s19, 16 }
  0xea   :  { %p10642_p12 = scmp.ne.s32.totalorder %s11504_s19, %s10641_s21  ;;  %p10645_p13 = scmp.lt.u32.totalorder %s10641_s21, %s11504_s19 }
  0xec   :  { %p10647_p0 = pnand %p10645_p13, %p10642_p12 }
  0xee   :  { %10650 = shalt.err (!%p10647_p0)
}
  0xef   :  { %s10651_s24 = scalar_lea.vmem %s331_s7, 16  ;;  %s10655_s16 = scalar_lea.vmem %s331_s7, 32 }
  0xf0   :  { %p10652_p1 = scmp.ne.s32.totalorder %s331_s7, %s10651_s24  ;;  %p10656_p2 = scmp.lt.s32.totalorder %s331_s7, %s331_s7 }
  0xf1   :  { %p10657_p3 = scmp.lt.s32.totalorder %s10655_s16, %s10651_s24 }
  0xf3   :  { %p10658_p4 = por %p10657_p3, %p10656_p2 }
  0xf5   :  { %p10659_p5 = pnand %p10658_p4, %p10652_p1 }
  0xf7   :  { %10662 = shalt.err (!%p10659_p5)
}
  0xf8   :  { %333 = dma.hbm_to_vmem [thread:$0]  %s11504_s19, 16, %s331_s7, [#allocation21]  }
  0xf9   :  { %s11278_s18 = smov [#allocation23]   ;;  %s11279_s0 = smov [#allocation26]  }
  0xfa   :  { %s358_s17 = sshll.u32 %s11278_s18, 4  ;;  %s378_s22 = sshll.u32 %s11279_s0, 4  ;;  %s359_s17 = int_to_ptr.vmem [resolvable:$true] %s358_s17  ;;  %s379_s22 = int_to_ptr.vmem [resolvable:$true] %s378_s22 }
  0xfb   :  { %s10663_s23 = scalar_lea.hbm %s11534_s29, 16 }
  0xfc   :  { %p10664_p6 = scmp.ne.s32.totalorder %s11534_s29, %s10663_s23  ;;  %p10667_p7 = scmp.lt.u32.totalorder %s10663_s23, %s11534_s29 }
  0xfe   :  { %p10669_p8 = pnand %p10667_p7, %p10664_p6 }
 0x100   :  { %10672 = shalt.err (!%p10669_p8)
}
 0x101   :  { %s10673_s13 = scalar_lea.vmem %s359_s17, 16  ;;  %s10677_s26 = scalar_lea.vmem %s359_s17, 32 }
 0x102   :  { %p10674_p9 = scmp.ne.s32.totalorder %s359_s17, %s10673_s13  ;;  %p10678_p10 = scmp.lt.s32.totalorder %s359_s17, %s359_s17 }
 0x103   :  { %p10679_p11 = scmp.lt.s32.totalorder %s10677_s26, %s10673_s13 }
 0x105   :  { %p10680_p12 = por %p10679_p11, %p10678_p10 }
 0x107   :  { %p10681_p13 = pnand %p10680_p12, %p10674_p9 }
 0x109   :  { %10684 = shalt.err (!%p10681_p13)
}
 0x10a   :  { %361 = dma.hbm_to_vmem [thread:$0]  %s11534_s29, 16, %s359_s17, [#allocation24]  }
 0x10b   :  { %s10685_s19 = scalar_lea.hbm %s11544_s4, 16 }
 0x10c   :  { %p10686_p0 = scmp.ne.s32.totalorder %s11544_s4, %s10685_s19  ;;  %p10689_p1 = scmp.lt.u32.totalorder %s10685_s19, %s11544_s4 }
 0x10e   :  { %p10691_p2 = pnand %p10689_p1, %p10686_p0 }
 0x110   :  { %10694 = shalt.err (!%p10691_p2)
}
 0x111   :  { %s10695_s28 = scalar_lea.vmem %s379_s22, 16  ;;  %s10699_s1 = scalar_lea.vmem %s379_s22, 32 }
 0x112   :  { %p10696_p3 = scmp.ne.s32.totalorder %s379_s22, %s10695_s28  ;;  %p10700_p4 = scmp.lt.s32.totalorder %s379_s22, %s379_s22 }
 0x113   :  { %p10701_p5 = scmp.lt.s32.totalorder %s10699_s1, %s10695_s28 }
 0x115   :  { %p10702_p6 = por %p10701_p5, %p10700_p4 }
 0x117   :  { %p10703_p7 = pnand %p10702_p6, %p10696_p3 }
 0x119   :  { %10706 = shalt.err (!%p10703_p7)
}
 0x11a   :  { %381 = dma.hbm_to_vmem [thread:$0]  %s11544_s4, 16, %s379_s22, [#allocation27]  }
 0x11b   :  { %s11280_s12 = smov [#allocation29]   ;;  %s11281_s2 = smov [#allocation32]  }
 0x11c   :  { %s398_s29 = sshll.u32 %s11280_s12, 4  ;;  %s418_s7 = sshll.u32 %s11281_s2, 4  ;;  %s399_s29 = int_to_ptr.vmem [resolvable:$true] %s398_s29  ;;  %s419_s7 = int_to_ptr.vmem [resolvable:$true] %s418_s7 }
 0x11d   :  { %s10707_s10 = scalar_lea.hbm %s11554_s5, 16 }
 0x11e   :  { %p10708_p8 = scmp.ne.s32.totalorder %s11554_s5, %s10707_s10  ;;  %p10711_p9 = scmp.lt.u32.totalorder %s10707_s10, %s11554_s5 }
 0x120   :  { %p10713_p10 = pnand %p10711_p9, %p10708_p8 }
 0x122   :  { %10716 = shalt.err (!%p10713_p10)
}
 0x123   :  { %s10717_s11 = scalar_lea.vmem %s399_s29, 16  ;;  %s10721_s15 = scalar_lea.vmem %s399_s29, 32 }
 0x124   :  { %p10718_p11 = scmp.ne.s32.totalorder %s399_s29, %s10717_s11  ;;  %p10722_p12 = scmp.lt.s32.totalorder %s399_s29, %s399_s29 }
 0x125   :  { %p10723_p13 = scmp.lt.s32.totalorder %s10721_s15, %s10717_s11 }
 0x127   :  { %p10724_p0 = por %p10723_p13, %p10722_p12 }
 0x129   :  { %p10725_p1 = pnand %p10724_p0, %p10718_p11 }
 0x12b   :  { %10728 = shalt.err (!%p10725_p1)
}
 0x12c   :  { %401 = dma.hbm_to_vmem [thread:$0]  %s11554_s5, 16, %s399_s29, [#allocation30]  }
 0x12d   :  { %s10729_s4 = scalar_lea.hbm %s11564_s8, 16 }
 0x12e   :  { %p10730_p2 = scmp.ne.s32.totalorder %s11564_s8, %s10729_s4  ;;  %p10733_p3 = scmp.lt.u32.totalorder %s10729_s4, %s11564_s8 }
 0x130   :  { %p10735_p4 = pnand %p10733_p3, %p10730_p2 }
 0x132   :  { %10738 = shalt.err (!%p10735_p4)
}
 0x133   :  { %s10739_s21 = scalar_lea.vmem %s419_s7, 16  ;;  %s10743_s24 = scalar_lea.vmem %s419_s7, 32 }
 0x134   :  { %p10740_p5 = scmp.ne.s32.totalorder %s419_s7, %s10739_s21  ;;  %p10744_p6 = scmp.lt.s32.totalorder %s419_s7, %s419_s7 }
 0x135   :  { %p10745_p7 = scmp.lt.s32.totalorder %s10743_s24, %s10739_s21 }
 0x137   :  { %p10746_p8 = por %p10745_p7, %p10744_p6 }
 0x139   :  { %p10747_p9 = pnand %p10746_p8, %p10740_p5 }
 0x13b   :  { %10750 = shalt.err (!%p10747_p9)
}
 0x13c   :  { %421 = dma.hbm_to_vmem [thread:$0]  %s11564_s8, 16, %s419_s7, [#allocation33]  }
 0x13d   :  { %s11282_s16 = smov [#allocation35]   ;;  %s11283_s18 = smov [#allocation38]  }
 0x13e   :  { %s446_s5 = sshll.u32 %s11282_s16, 4  ;;  %s466_s17 = sshll.u32 %s11283_s18, 4  ;;  %s447_s5 = int_to_ptr.vmem [resolvable:$true] %s446_s5  ;;  %s467_s17 = int_to_ptr.vmem [resolvable:$true] %s466_s17 }
 0x13f   :  { %s10751_s0 = scalar_lea.hbm %s11594_s14, 16 }
 0x140   :  { %p10752_p10 = scmp.ne.s32.totalorder %s11594_s14, %s10751_s0  ;;  %p10755_p11 = scmp.lt.u32.totalorder %s10751_s0, %s11594_s14 }
 0x142   :  { %p10757_p12 = pnand %p10755_p11, %p10752_p10 }
 0x144   :  { %10760 = shalt.err (!%p10757_p12)
}
 0x145   :  { %s10761_s22 = scalar_lea.vmem %s447_s5, 16  ;;  %s10765_s23 = scalar_lea.vmem %s447_s5, 32 }
 0x146   :  { %p10762_p13 = scmp.ne.s32.totalorder %s447_s5, %s10761_s22  ;;  %p10766_p0 = scmp.lt.s32.totalorder %s447_s5, %s447_s5 }
 0x147   :  { %p10767_p1 = scmp.lt.s32.totalorder %s10765_s23, %s10761_s22 }
 0x149   :  { %p10768_p2 = por %p10767_p1, %p10766_p0 }
 0x14b   :  { %p10769_p3 = pnand %p10768_p2, %p10762_p13 }
 0x14d   :  { %10772 = shalt.err (!%p10769_p3)
}
 0x14e   :  { %449 = dma.hbm_to_vmem [thread:$0]  %s11594_s14, 16, %s447_s5, [#allocation36]  }
 0x14f   :  { %s10773_s8 = scalar_lea.hbm %s11604_s25, 16 }
 0x150   :  { %p10774_p4 = scmp.ne.s32.totalorder %s11604_s25, %s10773_s8  ;;  %p10777_p5 = scmp.lt.u32.totalorder %s10773_s8, %s11604_s25 }
 0x152   :  { %p10779_p6 = pnand %p10777_p5, %p10774_p4 }
 0x154   :  { %10782 = shalt.err (!%p10779_p6)
}
 0x155   :  { %s10783_s13 = scalar_lea.vmem %s467_s17, 16  ;;  %s10787_s26 = scalar_lea.vmem %s467_s17, 32 }
 0x156   :  { %p10784_p7 = scmp.ne.s32.totalorder %s467_s17, %s10783_s13  ;;  %p10788_p8 = scmp.lt.s32.totalorder %s467_s17, %s467_s17 }
 0x157   :  { %p10789_p9 = scmp.lt.s32.totalorder %s10787_s26, %s10783_s13 }
 0x159   :  { %p10790_p10 = por %p10789_p9, %p10788_p8 }
 0x15b   :  { %p10791_p11 = pnand %p10790_p10, %p10784_p7 }
 0x15d   :  { %10794 = shalt.err (!%p10791_p11)
}
 0x15e   :  { %469 = dma.hbm_to_vmem [thread:$0]  %s11604_s25, 16, %s467_s17, [#allocation39]  }
 0x15f   :  { %s11284_s19 = smov [#allocation41]   ;;  %s11285_s28 = smov [#allocation2]  }
 0x160   :  { %s486_s14 = sshll.u32 %s11284_s19, 4  ;;  %s214_s1 = sshll.u32 %s11285_s28, 4  ;;  %s487_s14 = int_to_ptr.vmem [resolvable:$true] %s486_s14  ;;  %s215_s1 = int_to_ptr.vmem [resolvable:$true] %s214_s1 }
 0x161   :  { %s10795_s12 = scalar_lea.hbm %s11614_s6, 16 }
 0x162   :  { %p10796_p12 = scmp.ne.s32.totalorder %s11614_s6, %s10795_s12  ;;  %p10799_p13 = scmp.lt.u32.totalorder %s10795_s12, %s11614_s6 }
 0x164   :  { %p10801_p0 = pnand %p10799_p13, %p10796_p12 }
 0x166   :  { %10804 = shalt.err (!%p10801_p0)
}
 0x167   :  { %s10805_s29 = scalar_lea.vmem %s487_s14, 16  ;;  %s10809_s2 = scalar_lea.vmem %s487_s14, 32 }
 0x168   :  { %p10806_p1 = scmp.ne.s32.totalorder %s487_s14, %s10805_s29  ;;  %p10810_p2 = scmp.lt.s32.totalorder %s487_s14, %s487_s14 }
 0x169   :  { %p10811_p3 = scmp.lt.s32.totalorder %s10809_s2, %s10805_s29 }
 0x16b   :  { %p10812_p4 = por %p10811_p3, %p10810_p2 }
 0x16d   :  { %p10813_p5 = pnand %p10812_p4, %p10806_p1 }
 0x16f   :  { %10816 = shalt.err (!%p10813_p5)
}
 0x170   :  { %489 = dma.hbm_to_vmem [thread:$0]  %s11614_s6, 16, %s487_s14, [#allocation42]  }
 0x171   :  { %s10817_s25 = scalar_lea.hbm %s11434_s9, 16 }
 0x172   :  { %p10818_p6 = scmp.ne.s32.totalorder %s11434_s9, %s10817_s25  ;;  %p10821_p7 = scmp.lt.u32.totalorder %s10817_s25, %s11434_s9 }
 0x174   :  { %p10823_p8 = pnand %p10821_p7, %p10818_p6 }
 0x176   :  { %10826 = shalt.err (!%p10823_p8)
}
 0x177   :  { %s10827_s7 = scalar_lea.vmem %s215_s1, 16  ;;  %s10831_s10 = scalar_lea.vmem %s215_s1, 32 }
 0x178   :  { %p10828_p9 = scmp.ne.s32.totalorder %s215_s1, %s10827_s7  ;;  %p10832_p10 = scmp.lt.s32.totalorder %s215_s1, %s215_s1 }
 0x179   :  { %p10833_p11 = scmp.lt.s32.totalorder %s10831_s10, %s10827_s7 }
 0x17b   :  { %p10834_p12 = por %p10833_p11, %p10832_p10 }
 0x17d   :  { %p10835_p13 = pnand %p10834_p12, %p10828_p9 }
 0x17f   :  { %10838 = shalt.err (!%p10835_p13)
}
 0x180   :  { %s12909_s11 = sld [smem:[#allocation85_spill]]  ;;  %s11286_s15 = smov [#allocation7]  }
 0x181   :  { %217 = dma.hbm_to_vmem [thread:$0]  %s11434_s9, 16, %s215_s1, [#allocation3]  }
 0x182   :  { %s234_s6 = sshll.u32 %s11286_s15, 4  ;;  %s11287_s4 = smov [#allocation10]   ;;  %s235_s6 = int_to_ptr.vmem [resolvable:$true] %s234_s6 }
 0x183   :  { %s260_s21 = sshll.u32 %s11287_s4, 4  ;;  %s261_s21 = int_to_ptr.vmem [resolvable:$true] %s260_s21 }
 0x186   :  { %s10839_s24 = scalar_lea.hbm %s12909_s11, 16 }
 0x187   :  { %p10840_p0 = scmp.ne.s32.totalorder %s12909_s11, %s10839_s24  ;;  %p10843_p1 = scmp.lt.u32.totalorder %s10839_s24, %s12909_s11 }
 0x189   :  { %p10845_p2 = pnand %p10843_p1, %p10840_p0 }
 0x18b   :  { %10848 = shalt.err (!%p10845_p2)
}
 0x18c   :  { %s10849_s16 = scalar_lea.vmem %s235_s6, 16  ;;  %s10853_s5 = scalar_lea.vmem %s235_s6, 32 }
 0x18d   :  { %p10850_p3 = scmp.ne.s32.totalorder %s235_s6, %s10849_s16  ;;  %p10854_p4 = scmp.lt.s32.totalorder %s235_s6, %s235_s6 }
 0x18e   :  { %p10855_p5 = scmp.lt.s32.totalorder %s10853_s5, %s10849_s16 }
 0x190   :  { %p10856_p6 = por %p10855_p5, %p10854_p4 }
 0x192   :  { %p10857_p7 = pnand %p10856_p6, %p10850_p3 }
 0x194   :  { %10860 = shalt.err (!%p10857_p7)
}
 0x195   :  { %s12910_s9 = sld [smem:[#allocation89_spill]] }
 0x196   :  { %237 = dma.hbm_to_vmem [thread:$0]  %s12909_s11, 16, %s235_s6, [#allocation6]  }
 0x19b   :  { %s10861_s18 = scalar_lea.hbm %s12910_s9, 16 }
 0x19c   :  { %p10862_p8 = scmp.ne.s32.totalorder %s12910_s9, %s10861_s18  ;;  %p10865_p9 = scmp.lt.u32.totalorder %s10861_s18, %s12910_s9 }
 0x19e   :  { %p10867_p10 = pnand %p10865_p9, %p10862_p8 }
 0x1a0   :  { %10870 = shalt.err (!%p10867_p10)
}
 0x1a1   :  { %s10871_s17 = scalar_lea.vmem %s261_s21, 16  ;;  %s10875_s0 = scalar_lea.vmem %s261_s21, 32 }
 0x1a2   :  { %p10872_p11 = scmp.ne.s32.totalorder %s261_s21, %s10871_s17  ;;  %p10876_p12 = scmp.lt.s32.totalorder %s261_s21, %s261_s21 }
 0x1a3   :  { %p10877_p13 = scmp.lt.s32.totalorder %s10875_s0, %s10871_s17 }
 0x1a5   :  { %p10878_p0 = por %p10877_p13, %p10876_p12 }
 0x1a7   :  { %p10879_p1 = pnand %p10878_p0, %p10872_p11 }
 0x1a9   :  { %10882 = shalt.err (!%p10879_p1)
}
 0x1aa   :  { %s12911_s22 = sld [smem:[#allocation90_spill]]  ;;  %s11288_s23 = smov [#allocation13]  }
 0x1ab   :  { %263 = dma.hbm_to_vmem [thread:$0]  %s12910_s9, 16, %s261_s21, [#allocation9]  }
 0x1ac   :  { %s280_s8 = sshll.u32 %s11288_s23, 4  ;;  %s11289_s13 = smov [#allocation16]   ;;  %s281_s8 = int_to_ptr.vmem [resolvable:$true] %s280_s8 }
 0x1ad   :  { %s300_s26 = sshll.u32 %s11289_s13, 4  ;;  %s301_s26 = int_to_ptr.vmem [resolvable:$true] %s300_s26 }
 0x1b0   :  { %s10883_s19 = scalar_lea.hbm %s12911_s22, 16 }
 0x1b1   :  { %p10884_p2 = scmp.ne.s32.totalorder %s12911_s22, %s10883_s19  ;;  %p10887_p3 = scmp.lt.u32.totalorder %s10883_s19, %s12911_s22 }
 0x1b3   :  { %p10889_p4 = pnand %p10887_p3, %p10884_p2 }
 0x1b5   :  { %10892 = shalt.err (!%p10889_p4)
}
 0x1b6   :  { %s10893_s14 = scalar_lea.vmem %s281_s8, 16  ;;  %s10897_s28 = scalar_lea.vmem %s281_s8, 32 }
 0x1b7   :  { %p10894_p5 = scmp.ne.s32.totalorder %s281_s8, %s10893_s14  ;;  %p10898_p6 = scmp.lt.s32.totalorder %s281_s8, %s281_s8 }
 0x1b8   :  { %p10899_p7 = scmp.lt.s32.totalorder %s10897_s28, %s10893_s14 }
 0x1ba   :  { %p10900_p8 = por %p10899_p7, %p10898_p6 }
 0x1bc   :  { %p10901_p9 = pnand %p10900_p8, %p10894_p5 }
 0x1be   :  { %10904 = shalt.err (!%p10901_p9)
}
 0x1bf   :  { %s12912_s1 = sld [smem:[#allocation91_spill]] }
 0x1c0   :  { %283 = dma.hbm_to_vmem [thread:$0]  %s12911_s22, 16, %s281_s8, [#allocation12]  }
 0x1c5   :  { %s10905_s12 = scalar_lea.hbm %s12912_s1, 16 }
 0x1c6   :  { %p10906_p10 = scmp.ne.s32.totalorder %s12912_s1, %s10905_s12  ;;  %p10909_p11 = scmp.lt.u32.totalorder %s10905_s12, %s12912_s1 }
 0x1c8   :  { %p10911_p12 = pnand %p10909_p11, %p10906_p10 }
 0x1ca   :  { %10914 = shalt.err (!%p10911_p12)
}
 0x1cb   :  { %s10915_s29 = scalar_lea.vmem %s301_s26, 16  ;;  %s10919_s2 = scalar_lea.vmem %s301_s26, 32 }
 0x1cc   :  { %p10916_p13 = scmp.ne.s32.totalorder %s301_s26, %s10915_s29  ;;  %p10920_p0 = scmp.lt.s32.totalorder %s301_s26, %s301_s26 }
 0x1cd   :  { %p10921_p1 = scmp.lt.s32.totalorder %s10919_s2, %s10915_s29 }
 0x1cf   :  { %p10922_p2 = por %p10921_p1, %p10920_p0 }
 0x1d1   :  { %p10923_p3 = pnand %p10922_p2, %p10916_p13 }
 0x1d3   :  { %10926 = shalt.err (!%p10923_p3)
}
 0x1d4   :  { %s12913_s25 = sld [smem:[#allocation92_spill]]  ;;  %s11290_s7 = smov [#allocation19]  }
 0x1d5   :  { %303 = dma.hbm_to_vmem [thread:$0]  %s12912_s1, 16, %s301_s26, [#allocation15]  }
 0x1d6   :  { %s320_s10 = sshll.u32 %s11290_s7, 4  ;;  %s11291_s11 = smov [#allocation22]   ;;  %s321_s10 = int_to_ptr.vmem [resolvable:$true] %s320_s10 }
 0x1d7   :  { %s348_s15 = sshll.u32 %s11291_s11, 4  ;;  %s349_s15 = int_to_ptr.vmem [resolvable:$true] %s348_s15 }
 0x1da   :  { %s10927_s6 = scalar_lea.hbm %s12913_s25, 16 }
 0x1db   :  { %p10928_p4 = scmp.ne.s32.totalorder %s12913_s25, %s10927_s6  ;;  %p10931_p5 = scmp.lt.u32.totalorder %s10927_s6, %s12913_s25 }
 0x1dd   :  { %p10933_p6 = pnand %p10931_p5, %p10928_p4 }
 0x1df   :  { %10936 = shalt.err (!%p10933_p6)
}
 0x1e0   :  { %s10937_s4 = scalar_lea.vmem %s321_s10, 16  ;;  %s10941_s21 = scalar_lea.vmem %s321_s10, 32 }
 0x1e1   :  { %p10938_p7 = scmp.ne.s32.totalorder %s321_s10, %s10937_s4  ;;  %p10942_p8 = scmp.lt.s32.totalorder %s321_s10, %s321_s10 }
 0x1e2   :  { %p10943_p9 = scmp.lt.s32.totalorder %s10941_s21, %s10937_s4 }
 0x1e4   :  { %p10944_p10 = por %p10943_p9, %p10942_p8 }
 0x1e6   :  { %p10945_p11 = pnand %p10944_p10, %p10938_p7 }
 0x1e8   :  { %10948 = shalt.err (!%p10945_p11)
}
 0x1e9   :  { %s12914_s24 = sld [smem:[#allocation97_spill]] }
 0x1ea   :  { %323 = dma.hbm_to_vmem [thread:$0]  %s12913_s25, 16, %s321_s10, [#allocation18]  }
 0x1ef   :  { %s10949_s16 = scalar_lea.hbm %s12914_s24, 16 }
 0x1f0   :  { %p10950_p12 = scmp.ne.s32.totalorder %s12914_s24, %s10949_s16  ;;  %p10953_p13 = scmp.lt.u32.totalorder %s10949_s16, %s12914_s24 }
 0x1f2   :  { %p10955_p0 = pnand %p10953_p13, %p10950_p12 }
 0x1f4   :  { %10958 = shalt.err (!%p10955_p0)
}
 0x1f5   :  { %s10959_s5 = scalar_lea.vmem %s349_s15, 16  ;;  %s10963_s9 = scalar_lea.vmem %s349_s15, 32 }
 0x1f6   :  { %p10960_p1 = scmp.ne.s32.totalorder %s349_s15, %s10959_s5  ;;  %p10964_p2 = scmp.lt.s32.totalorder %s349_s15, %s349_s15 }
 0x1f7   :  { %p10965_p3 = scmp.lt.s32.totalorder %s10963_s9, %s10959_s5 }
 0x1f9   :  { %p10966_p4 = por %p10965_p3, %p10964_p2 }
 0x1fb   :  { %p10967_p5 = pnand %p10966_p4, %p10960_p1 }
 0x1fd   :  { %10970 = shalt.err (!%p10967_p5)
}
 0x1fe   :  { %s12915_s18 = sld [smem:[#allocation98_spill]]  ;;  %s11292_s17 = smov [#allocation25]  }
 0x1ff   :  { %351 = dma.hbm_to_vmem [thread:$0]  %s12914_s24, 16, %s349_s15, [#allocation21]  }
 0x200   :  { %s368_s0 = sshll.u32 %s11292_s17, 4  ;;  %s11293_s22 = smov [#allocation28]   ;;  %s369_s0 = int_to_ptr.vmem [resolvable:$true] %s368_s0 }
 0x201   :  { %s388_s23 = sshll.u32 %s11293_s22, 4  ;;  %s389_s23 = int_to_ptr.vmem [resolvable:$true] %s388_s23 }
 0x204   :  { %s10971_s8 = scalar_lea.hbm %s12915_s18, 16 }
 0x205   :  { %p10972_p6 = scmp.ne.s32.totalorder %s12915_s18, %s10971_s8  ;;  %p10975_p7 = scmp.lt.u32.totalorder %s10971_s8, %s12915_s18 }
 0x207   :  { %p10977_p8 = pnand %p10975_p7, %p10972_p6 }
 0x209   :  { %10980 = shalt.err (!%p10977_p8)
}
 0x20a   :  { %s10981_s13 = scalar_lea.vmem %s369_s0, 16  ;;  %s10985_s26 = scalar_lea.vmem %s369_s0, 32 }
 0x20b   :  { %p10982_p9 = scmp.ne.s32.totalorder %s369_s0, %s10981_s13  ;;  %p10986_p10 = scmp.lt.s32.totalorder %s369_s0, %s369_s0 }
 0x20c   :  { %p10987_p11 = scmp.lt.s32.totalorder %s10985_s26, %s10981_s13 }
 0x20e   :  { %p10988_p12 = por %p10987_p11, %p10986_p10 }
 0x210   :  { %p10989_p13 = pnand %p10988_p12, %p10982_p9 }
 0x212   :  { %10992 = shalt.err (!%p10989_p13)
}
 0x213   :  { %s12916_s19 = sld [smem:[#allocation99_spill]] }
 0x214   :  { %371 = dma.hbm_to_vmem [thread:$0]  %s12915_s18, 16, %s369_s0, [#allocation24]  }
 0x219   :  { %s10993_s14 = scalar_lea.hbm %s12916_s19, 16 }
 0x21a   :  { %p10994_p0 = scmp.ne.s32.totalorder %s12916_s19, %s10993_s14  ;;  %p10997_p1 = scmp.lt.u32.totalorder %s10993_s14, %s12916_s19 }
 0x21c   :  { %p10999_p2 = pnand %p10997_p1, %p10994_p0 }
 0x21e   :  { %11002 = shalt.err (!%p10999_p2)
}
 0x21f   :  { %s11003_s28 = scalar_lea.vmem %s389_s23, 16  ;;  %s11007_s1 = scalar_lea.vmem %s389_s23, 32 }
 0x220   :  { %p11004_p3 = scmp.ne.s32.totalorder %s389_s23, %s11003_s28  ;;  %p11008_p4 = scmp.lt.s32.totalorder %s389_s23, %s389_s23 }
 0x221   :  { %p11009_p5 = scmp.lt.s32.totalorder %s11007_s1, %s11003_s28 }
 0x223   :  { %p11010_p6 = por %p11009_p5, %p11008_p4 }
 0x225   :  { %p11011_p7 = pnand %p11010_p6, %p11004_p3 }
 0x227   :  { %11014 = shalt.err (!%p11011_p7)
}
 0x228   :  { %s12917_s12 = sld [smem:[#allocation100_spill]]  ;;  %s11294_s29 = smov [#allocation31]  }
 0x229   :  { %391 = dma.hbm_to_vmem [thread:$0]  %s12916_s19, 16, %s389_s23, [#allocation27]  }
 0x22a   :  { %s408_s2 = sshll.u32 %s11294_s29, 4  ;;  %s11295_s25 = smov [#allocation34]   ;;  %s409_s2 = int_to_ptr.vmem [resolvable:$true] %s408_s2 }
 0x22b   :  { %s436_s7 = sshll.u32 %s11295_s25, 4  ;;  %s437_s7 = int_to_ptr.vmem [resolvable:$true] %s436_s7 }
 0x22e   :  { %s11015_s10 = scalar_lea.hbm %s12917_s12, 16 }
 0x22f   :  { %p11016_p8 = scmp.ne.s32.totalorder %s12917_s12, %s11015_s10  ;;  %p11019_p9 = scmp.lt.u32.totalorder %s11015_s10, %s12917_s12 }
 0x231   :  { %p11021_p10 = pnand %p11019_p9, %p11016_p8 }
 0x233   :  { %11024 = shalt.err (!%p11021_p10)
}
 0x234   :  { %s11025_s11 = scalar_lea.vmem %s409_s2, 16  ;;  %s11029_s15 = scalar_lea.vmem %s409_s2, 32 }
 0x235   :  { %p11026_p11 = scmp.ne.s32.totalorder %s409_s2, %s11025_s11  ;;  %p11030_p12 = scmp.lt.s32.totalorder %s409_s2, %s409_s2 }
 0x236   :  { %p11031_p13 = scmp.lt.s32.totalorder %s11029_s15, %s11025_s11 }
 0x238   :  { %p11032_p0 = por %p11031_p13, %p11030_p12 }
 0x23a   :  { %p11033_p1 = pnand %p11032_p0, %p11026_p11 }
 0x23c   :  { %11036 = shalt.err (!%p11033_p1)
}
 0x23d   :  { %s12918_s6 = sld [smem:[#allocation105_spill]] }
 0x23e   :  { %411 = dma.hbm_to_vmem [thread:$0]  %s12917_s12, 16, %s409_s2, [#allocation30]  }
 0x243   :  { %s11037_s4 = scalar_lea.hbm %s12918_s6, 16 }
 0x244   :  { %p11038_p2 = scmp.ne.s32.totalorder %s12918_s6, %s11037_s4  ;;  %p11041_p3 = scmp.lt.u32.totalorder %s11037_s4, %s12918_s6 }
 0x246   :  { %p11043_p4 = pnand %p11041_p3, %p11038_p2 }
 0x248   :  { %11046 = shalt.err (!%p11043_p4)
}
 0x249   :  { %s11047_s21 = scalar_lea.vmem %s437_s7, 16  ;;  %s11051_s24 = scalar_lea.vmem %s437_s7, 32 }
 0x24a   :  { %p11048_p5 = scmp.ne.s32.totalorder %s437_s7, %s11047_s21  ;;  %p11052_p6 = scmp.lt.s32.totalorder %s437_s7, %s437_s7 }
 0x24b   :  { %p11053_p7 = scmp.lt.s32.totalorder %s11051_s24, %s11047_s21 }
 0x24d   :  { %p11054_p8 = por %p11053_p7, %p11052_p6 }
 0x24f   :  { %p11055_p9 = pnand %p11054_p8, %p11048_p5 }
 0x251   :  { %11058 = shalt.err (!%p11055_p9)
}
 0x252   :  { %s12919_s16 = sld [smem:[#allocation106_spill]]  ;;  %s11296_s5 = smov [#allocation37]  }
 0x253   :  { %439 = dma.hbm_to_vmem [thread:$0]  %s12918_s6, 16, %s437_s7, [#allocation33]  }
 0x254   :  { %s456_s9 = sshll.u32 %s11296_s5, 4  ;;  %s11297_s18 = smov [#allocation40]   ;;  %s457_s9 = int_to_ptr.vmem [resolvable:$true] %s456_s9 }
 0x255   :  { %s476_s17 = sshll.u32 %s11297_s18, 4  ;;  %s477_s17 = int_to_ptr.vmem [resolvable:$true] %s476_s17 }
 0x258   :  { %s11059_s0 = scalar_lea.hbm %s12919_s16, 16 }
 0x259   :  { %p11060_p10 = scmp.ne.s32.totalorder %s12919_s16, %s11059_s0  ;;  %p11063_p11 = scmp.lt.u32.totalorder %s11059_s0, %s12919_s16 }
 0x25b   :  { %p11065_p12 = pnand %p11063_p11, %p11060_p10 }
 0x25d   :  { %11068 = shalt.err (!%p11065_p12)
}
 0x25e   :  { %s11069_s22 = scalar_lea.vmem %s457_s9, 16  ;;  %s11073_s23 = scalar_lea.vmem %s457_s9, 32 }
 0x25f   :  { %p11070_p13 = scmp.ne.s32.totalorder %s457_s9, %s11069_s22  ;;  %p11074_p0 = scmp.lt.s32.totalorder %s457_s9, %s457_s9 }
 0x260   :  { %p11075_p1 = scmp.lt.s32.totalorder %s11073_s23, %s11069_s22 }
 0x262   :  { %p11076_p2 = por %p11075_p1, %p11074_p0 }
 0x264   :  { %p11077_p3 = pnand %p11076_p2, %p11070_p13 }
 0x266   :  { %11080 = shalt.err (!%p11077_p3)
}
 0x267   :  { %s12920_s8 = sld [smem:[#allocation107_spill]] }
 0x268   :  { %459 = dma.hbm_to_vmem [thread:$0]  %s12919_s16, 16, %s457_s9, [#allocation36]  }
 0x26d   :  { %s11081_s13 = scalar_lea.hbm %s12920_s8, 16 }
 0x26e   :  { %p11082_p4 = scmp.ne.s32.totalorder %s12920_s8, %s11081_s13  ;;  %p11085_p5 = scmp.lt.u32.totalorder %s11081_s13, %s12920_s8 }
 0x270   :  { %p11087_p6 = pnand %p11085_p5, %p11082_p4 }
 0x272   :  { %11090 = shalt.err (!%p11087_p6)
}
 0x273   :  { %s11091_s26 = scalar_lea.vmem %s477_s17, 16  ;;  %s11095_s19 = scalar_lea.vmem %s477_s17, 32 }
 0x274   :  { %p11092_p7 = scmp.ne.s32.totalorder %s477_s17, %s11091_s26  ;;  %p11096_p8 = scmp.lt.s32.totalorder %s477_s17, %s477_s17 }
 0x275   :  { %p11097_p9 = scmp.lt.s32.totalorder %s11095_s19, %s11091_s26 }
 0x277   :  { %p11098_p10 = por %p11097_p9, %p11096_p8 }
 0x279   :  { %p11099_p11 = pnand %p11098_p10, %p11092_p7 }
 0x27b   :  { %11102 = shalt.err (!%p11099_p11)
}
 0x27c   :  { %s12921_s14 = sld [smem:[#allocation108_spill]]  ;;  %s11298_s28 = smov [#allocation43]  }
 0x27d   :  { %479 = dma.hbm_to_vmem [thread:$0]  %s12920_s8, 16, %s477_s17, [#allocation39]  }
 0x27e   :  { %s496_s1 = sshll.u32 %s11298_s28, 4  ;;  %s11299_s12 = smov [#allocation44]   ;;  %s497_s1 = int_to_ptr.vmem [resolvable:$true] %s496_s1 }
 0x27f   :  { %s506_s29 = sshll.u32 %s11299_s12, 4  ;;  %s507_s29 = int_to_ptr.vmem [resolvable:$true] %s506_s29 }
 0x282   :  { %s11103_s2 = scalar_lea.hbm %s12921_s14, 16 }
 0x283   :  { %p11104_p12 = scmp.ne.s32.totalorder %s12921_s14, %s11103_s2  ;;  %p11107_p13 = scmp.lt.u32.totalorder %s11103_s2, %s12921_s14 }
 0x285   :  { %p11109_p0 = pnand %p11107_p13, %p11104_p12 }
 0x287   :  { %11112 = shalt.err (!%p11109_p0)
}
 0x288   :  { %s11113_s25 = scalar_lea.vmem %s497_s1, 16  ;;  %s11117_s7 = scalar_lea.vmem %s497_s1, 32 }
 0x289   :  { %p11114_p1 = scmp.ne.s32.totalorder %s497_s1, %s11113_s25  ;;  %p11118_p2 = scmp.lt.s32.totalorder %s497_s1, %s497_s1 }
 0x28a   :  { %p11119_p3 = scmp.lt.s32.totalorder %s11117_s7, %s11113_s25 }
 0x28c   :  { %p11120_p4 = por %p11119_p3, %p11118_p2 }
 0x28e   :  { %p11121_p5 = pnand %p11120_p4, %p11114_p1 }
 0x290   :  { %11124 = shalt.err (!%p11121_p5)
}
 0x291   :  { %s12922_s10 = sld [smem:[#allocation109_spill]] }
 0x292   :  { %499 = dma.hbm_to_vmem [thread:$0]  %s12921_s14, 16, %s497_s1, [#allocation42]  }
 0x297   :  { %s11125_s11 = scalar_lea.hbm %s12922_s10, 16 }
 0x298   :  { %p11126_p6 = scmp.ne.s32.totalorder %s12922_s10, %s11125_s11  ;;  %p11129_p7 = scmp.lt.u32.totalorder %s11125_s11, %s12922_s10 }
 0x29a   :  { %p11131_p8 = pnand %p11129_p7, %p11126_p6 }
 0x29c   :  { %11134 = shalt.err (!%p11131_p8)
}
 0x29d   :  { %s11135_s15 = scalar_lea.vmem %s507_s29, 16  ;;  %s11139_s6 = scalar_lea.vmem %s507_s29, 32 }
 0x29e   :  { %p11136_p9 = scmp.ne.s32.totalorder %s507_s29, %s11135_s15  ;;  %p11140_p10 = scmp.lt.s32.totalorder %s507_s29, %s507_s29 }
 0x29f   :  { %p11141_p11 = scmp.lt.s32.totalorder %s11139_s6, %s11135_s15 }
 0x2a1   :  { %p11142_p12 = por %p11141_p11, %p11140_p10 }
 0x2a3   :  { %p11143_p13 = pnand %p11142_p12, %p11136_p9 }
 0x2a5   :  { %11146 = shalt.err (!%p11143_p13)
}
 0x2a6   :  { %509 = dma.hbm_to_vmem [thread:$0]  %s12922_s10, 16, %s507_s29, [#allocation45]  }
 0x2a7   :  { %11169 = dma.done.wait [#allocation3], 16  }
 0x2a8   :  { %11170 = vsyncadd [#allocation3], 4294967280 }
 0x2a9   :  { %11171 = dma.done.wait [#allocation6], 32  }
 0x2aa   :  { %11172 = vsyncadd [#allocation6], 4294967264 }
 0x2ab   :  { %11173 = dma.done.wait [#allocation9], 32  }
 0x2ac   :  { %11174 = vsyncadd [#allocation9], 4294967264 }
 0x2ad   :  { %11175 = dma.done.wait [#allocation12], 32  }
 0x2ae   :  { %11176 = vsyncadd [#allocation12], 4294967264 }
 0x2af   :  { %11177 = dma.done.wait [#allocation15], 32  }
 0x2b0   :  { %11178 = vsyncadd [#allocation15], 4294967264 }
 0x2b1   :  { %11179 = dma.done.wait [#allocation18], 32  }
 0x2b2   :  { %11180 = vsyncadd [#allocation18], 4294967264 }
 0x2b3   :  { %11181 = dma.done.wait [#allocation21], 32  }
 0x2b4   :  { %11182 = vsyncadd [#allocation21], 4294967264 }
 0x2b5   :  { %11183 = dma.done.wait [#allocation24], 32  }
 0x2b6   :  { %11184 = vsyncadd [#allocation24], 4294967264 }
 0x2b7   :  { %11185 = dma.done.wait [#allocation27], 32  }
 0x2b8   :  { %11186 = vsyncadd [#allocation27], 4294967264 }
 0x2b9   :  { %11187 = dma.done.wait [#allocation30], 32  }
 0x2ba   :  { %11188 = vsyncadd [#allocation30], 4294967264 }
 0x2bb   :  { %11189 = dma.done.wait [#allocation33], 32  }
 0x2bc   :  { %11190 = vsyncadd [#allocation33], 4294967264 }
 0x2bd   :  { %11191 = dma.done.wait [#allocation36], 32  }
 0x2be   :  { %11192 = vsyncadd [#allocation36], 4294967264 }
 0x2bf   :  { %11193 = dma.done.wait [#allocation39], 32  }
 0x2c0   :  { %11194 = vsyncadd [#allocation39], 4294967264 }
 0x2c1   :  { %11195 = dma.done.wait [#allocation42], 32  }
 0x2c2   :  { %11196 = vsyncadd [#allocation42], 4294967264 }
 0x2c3   :  { %11197 = dma.done.wait [#allocation45], 16  }
 0x2c4   :  { %11198 = vsyncadd [#allocation45], 4294967280  ;;  %s12923_s4 = sld [smem:[#allocation104_spill]]  ;;  %s12924_s21 = sld [smem:[#allocation116_spill]]  ;;  %vm781_vm0 = vcmask 261120   ;;  %vm869_vm1 = vcmask 64512  }
 0x2c5   :  { %v8292_v8 = vld [vmem:[#allocation26] ss:$0 sm:$0xff]  ;;  %s12925_s24 = sld [smem:[#allocation115_spill]]  ;;  %s11300_s16 = smov 96   ;;  %vm11821_vm2 = vmpackc.low %vm869_vm1, %vm869_vm1  ;;  %vm953_vm3 = vcmask 130048   ;;  %vm1691_vm4 = vcmask 195584  }
 0x2c6   :  { %s11301_s5 = smov 64   ;;  %s11302_s9 = smov 88   ;;  %vm1921_vm5 = vcmask 523264  }
 0x2c7   :  { %s11303_s18 = smov 120   ;;  %s11304_s17 = smov 56  }
 0x2c8   :  { %s11305_s0 = smov 80   ;;  %s11306_s22 = smov 112  }
 0x2c9   :  { %s11307_s23 = smov 72   ;;  %s11308_s8 = smov 104  }
 0x2ca   :  { %v729_v0 = vld [vmem:[%s12923_s4] sm:$0xff]  ;;  %v730_v1 = vld [vmem:[%s12923_s4 + $0x8] sm:$0xff]  ;;  %v731_v2 = vld [vmem:[%s12923_s4 + $0x10] sm:$0xff]  ;;  %s11309_s13 = smov 48   ;;  %s11310_s26 = smov 8  }
 0x2cb   :  { %v9492_v3 = vpack.c.bf16 %v730_v1, %v729_v0  ;;  %v732_v4 = vld [vmem:[%s12923_s4 + $0x18] sm:$0xff]  ;;  %v11798_v5 = vld [vmem:[%s12924_s21] sm:$0xff]  ;;  %v11803_v7 = vld [vmem:[%s12924_s21 + $0x8] sm:$0xff]  ;;  %s11311_s19 = smov 40   ;;  %s11312_s14 = smov 16  }
 0x2cc   :  { %v9496_v6 = vpack.c.bf16 %v732_v4, %v731_v2  ;;  %8879 = vmatprep.mubr.msk.f32.mxu0 %vm781_vm0, %v11798_v5  ;;  %v11832_v19 = vld [vmem:[%s12925_s24 + $0x8] sm:$0xff]  ;;  %v11835_v20 = vld [vmem:[%s12925_s24] sm:$0xff]  ;;  %s12928_s28 = sld [smem:[#allocation103_spill]]  ;;  %s11313_s1 = smov 24  }
 0x2cd   :  { %9493 = vmatprep.subr.bf16.mxu0 %v9492_v3  ;;  %s12929_s12 = sld [smem:[#allocation101_spill]]  ;;  %s12930_s29 = sld [smem:[#allocation102_spill]] }
 0x2ce   :  { %9495 = vmatpush3.bf16.msra.mxu0 %v9492_v3  ;;  %s12931_s2 = sld [smem:[#allocation113_spill]]  ;;  %s12932_s25 = sld [smem:[#allocation112_spill]] }
 0x2cf   :  { %9497 = vmatprep.subr.bf16.mxu0 %v9496_v6  ;;  %s12933_s7 = sld [smem:[#allocation110_spill]]  ;;  %s12934_s10 = sld [smem:[#allocation81_spill]] }
 0x2d0   :  { %s12935_s11 = sld [smem:[#allocation111_spill]]  ;;  %s12938_s6 = sld [smem:[#allocation78_spill]] }
 0x2d1   :  { %s12936_s15 = sld [smem:[#allocation79_spill]]  ;;  %s12939_s4 = sld [smem:[#allocation69_spill]] }
 0x2d2   :  { %9499 = vmatpush3.bf16.msra.mxu0 %v9496_v6  ;;  %s12940_s21 = sld [smem:[#allocation71_spill]] }
 0x2d5   :  { %8880 = vmatmul.mubr.msk.f32.vlgmr.msra.gmra.mrb[0].mxu0 %vm781_vm0, %v11803_v7 }
 0x3a8   :  { %v8881_v9 = vpop.f32.mrb[0].mxu0 }
 0x3a9   :  { %v11807_v10 = vadd.f32 %v8881_v9, %v8292_v8  ;;  %v854_v11 = vpop.f32.mrb[1].mxu0 }
 0x3aa   :  { %v11809_v12 = vadd.f32 %v8292_v8, %v854_v11 }
 0x3ac   :  { %8886 = vmatprep.mubr.msk.f32.mxu1 %vm869_vm1, %v11809_v12  ;;  %v11815_v13 = vpack.i.bf16 %v11807_v10, %v11809_v12 }
 0x3ae   :  { %10064 = vrot.lane.b32.xlu0 %v11815_v13, %s11300_s16 }
 0x420   :  { %v10065_v14 = vpop.permute.xlu0 %10064 }
 0x421   :  { %v10067_v15 = vunpack.i.h.bf16 %v10065_v14  ;;  %v10066_v16 = vunpack.i.l.bf16 %v10065_v14 }
 0x423   :  { %v9500_v18 = vpack.c.bf16 %v10067_v15, %v10066_v16 }
 0x425   :  { %9502 = vmatprep.subr.msk.bf16.mxu1 %vm11821_vm2, %v9500_v18 }
 0x426   :  { %9505 = vmatpush3.bf16.xpose.msk.msra.mxu1 %vm11821_vm2, %v9500_v18 }
 0x42d   :  { %8887 = vmatmul.mubr.msk.f32.vlgmr.msra.gmra.mrb[0].mxu1 %vm869_vm1, %v11807_v10 }
 0x500   :  { %v8888_v21 = vpop.f32.mrb[0].mxu1 }
 0x501   :  { %v950_v22 = vadd.f32 %v8888_v21, %v11832_v19  ;;  %v944_v23 = vpop.f32.mrb[1].mxu1 }
 0x502   :  { %v945_v24 = vadd.f32 %v944_v23, %v11835_v20 }
 0x503   :  { %v957_v25 = vsel %vm953_vm3, %v950_v22, -inf }
 0x504   :  { %958 = vmax.xlane.f32.xlu1 %v957_v25  ;;  %v954_v26 = vsel %vm953_vm3, %v945_v24, -inf }
 0x505   :  { %955 = vmax.xlane.f32.xlu0 %v954_v26 }
 0x515   :  { %10069 = vrot.lane.b32.xlu1 %v11815_v13, %s11301_s5 }
 0x519   :  { %10074 = vrot.lane.b32.xlu1 %v11815_v13, %s11302_s9 }
 0x51b   :  { %1065 = vrot.lane.b32.xlu0 %v11807_v10, %s11303_s18 }
 0x591   :  { %v959_v27 = vpop.xlane.xlu1 %958 }
 0x592   :  { %v961_v28 = vsub.f32 %v950_v22, %v959_v27  ;;  %v956_v29 = vpop.xlane.xlu0 %955 }
 0x593   :  { %v960_v30 = vsub.f32 %v945_v24, %v956_v29 }
 0x594   :  { %v964_v31 = vmul.f32 1.442695, %v961_v28 }
 0x595   :  { %v962_v32 = vmul.f32 1.442695, %v960_v30  ;;  %v10070_v33 = vpop.permute.xlu1 %10069 }
 0x596   :  { %10293 = vpow2.f32 %v964_v31  ;;  %v10072_v34 = vunpack.i.h.bf16 %v10070_v33  ;;  %v10071_v35 = vunpack.i.l.bf16 %v10070_v33  ;;  %v1066_v52 = vpop.permute.xlu0 %1065 }
 0x597   :  { %10295 = vpow2.f32 %v962_v32 }
 0x598   :  { %v9506_v36 = vpack.c.bf16 %v10072_v34, %v10071_v35 }
 0x599   :  { %v10075_v37 = vpop.permute.xlu1 %10074 }
 0x59a   :  { %v10077_v38 = vunpack.i.h.bf16 %v10075_v37  ;;  %v10076_v39 = vunpack.i.l.bf16 %v10075_v37  ;;  %9507 = vmatprep.subr.bf16.mxu1 %v9506_v36 }
 0x59b   :  { %9509 = vmatpush3.bf16.msra.mxu1 %v9506_v36 }
 0x59c   :  { %v9510_v40 = vpack.c.bf16 %v10077_v38, %v10076_v39 }
 0x59e   :  { %9512 = vmatprep.subr.msk.bf16.mxu1 %vm11821_vm2, %v9510_v40 }
 0x5a0   :  { %v10294_v41 = vpop.eup %10293 }
 0x5a1   :  { %v969_v42 = vsel %vm953_vm3, %v10294_v41, 0.0  ;;  %v10296_v43 = vpop.eup %10295 }
 0x5a2   :  { %970 = vadd.xlane.f32.xlu1 %v969_v42  ;;  %v966_v44 = vsel %vm953_vm3, %v10296_v43, 0.0 }
 0x5a6   :  { %967 = vadd.xlane.f32.xlu1 %v966_v44 }
 0x5b7   :  { %1063 = vrot.lane.b32.xlu1 %v11809_v12, %s11303_s18 }
 0x62f   :  { %v971_v45 = vpop.xlane.xlu1 %970 }
 0x630   :  { %10297 = vrcp.f32 %v971_v45 }
 0x633   :  { %v968_v46 = vpop.xlane.xlu1 %967 }
 0x634   :  { %10299 = vrcp.f32 %v968_v46 }
 0x637   :  { %v1064_v51 = vpop.permute.xlu1 %1063 }
 0x63a   :  { %v10298_v47 = vpop.eup %10297 }
 0x63b   :  { %v975_v50 = vmul.f32 %v10298_v47, %v10294_v41 }
 0x63e   :  { %v10300_v48 = vpop.eup %10299 }
 0x63f   :  { %v973_v49 = vmul.f32 %v10300_v48, %v10296_v43 }
 0x641   :  { %8893 = vmatprep.mubr.msk.f32.mxu1 %vm953_vm3, %v973_v49 }
 0x642   :  { %8894 = vmatmul.mubr.msk.f32.vlgmr.msra.gmra.mrb[2].mxu1 %vm953_vm3, %v975_v50 }
 0x643   :  { %9515 = vmatpush3.bf16.xpose.msk.msra.mxu1 %vm11821_vm2, %v9510_v40  ;;  %8900 = vmatprep.mubr.msk.f32.mxu1 %vm869_vm1, %v1064_v51 }
 0x64a   :  { %8901 = vmatmul.mubr.msk.f32.vlgmr.msra.gmra.mrb[4].mxu1 %vm869_vm1, %v1066_v52 }
 0x715   :  { %v11859_v53 = vpop.f32.mrb[2].mxu1 }
 0x716   :  { %v11861_v54 = vpop.f32.mrb[3].mxu1 }
 0x71d   :  { %v8902_v55 = vpop.f32.mrb[4].mxu1 }
 0x71e   :  { %v1151_v56 = vadd.f32 %v8902_v55, %v11832_v19  ;;  %v1145_v57 = vpop.f32.mrb[5].mxu1 }
 0x71f   :  { %v1146_v58 = vadd.f32 %v1145_v57, %v11835_v20 }
 0x720   :  { %v1157_v59 = vsel %vm953_vm3, %v1151_v56, -inf }
 0x721   :  { %1158 = vmax.xlane.f32.xlu0 %v1157_v59  ;;  %v1154_v60 = vsel %vm953_vm3, %v1146_v58, -inf }
 0x722   :  { %1155 = vmax.xlane.f32.xlu1 %v1154_v60 }
 0x733   :  { %10079 = vrot.lane.b32.xlu1 %v11815_v13, %s11304_s17 }
 0x737   :  { %10084 = vrot.lane.b32.xlu0 %v11815_v13, %s11305_s0  ;;  %1263 = vrot.lane.b32.xlu1 %v11809_v12, %s11306_s22 }
 0x7ae   :  { %v1159_v61 = vpop.xlane.xlu0 %1158 }
 0x7af   :  { %v1161_v62 = vsub.f32 %v1151_v56, %v1159_v61  ;;  %v1156_v63 = vpop.xlane.xlu1 %1155 }
 0x7b0   :  { %v1160_v0 = vsub.f32 %v1146_v58, %v1156_v63 }
 0x7b1   :  { %v1164_v1 = vmul.f32 1.442695, %v1161_v62 }
 0x7b2   :  { %v1162_v2 = vmul.f32 1.442695, %v1160_v0  ;;  %v10085_v3 = vpop.permute.xlu0 %10084 }
 0x7b3   :  { %10301 = vpow2.f32 %v1164_v1  ;;  %v10080_v4 = vpop.permute.xlu1 %10079  ;;  %v10087_v6 = vunpack.i.h.bf16 %v10085_v3  ;;  %v10086_v8 = vunpack.i.l.bf16 %v10085_v3 }
 0x7b4   :  { %v10082_v9 = vunpack.i.h.bf16 %v10080_v4  ;;  %v10081_v11 = vunpack.i.l.bf16 %v10080_v4  ;;  %10303 = vpow2.f32 %v1162_v2 }
 0x7b5   :  { %v9520_v15 = vpack.c.bf16 %v10087_v6, %v10086_v8 }
 0x7b6   :  { %v9516_v14 = vpack.c.bf16 %v10082_v9, %v10081_v11 }
 0x7b7   :  { %v1264_v23 = vpop.permute.xlu1 %1263 }
 0x7b8   :  { %9517 = vmatprep.subr.bf16.mxu0 %v9516_v14 }
 0x7b9   :  { %9519 = vmatpush3.bf16.msra.mxu0 %v9516_v14 }
 0x7ba   :  { %9522 = vmatprep.subr.msk.bf16.mxu0 %vm11821_vm2, %v9520_v15 }
 0x7bd   :  { %v10302_v16 = vpop.eup %10301 }
 0x7be   :  { %v1169_v18 = vsel %vm953_vm3, %v10302_v16, 0.0  ;;  %v10304_v21 = vpop.eup %10303 }
 0x7bf   :  { %1170 = vadd.xlane.f32.xlu1 %v1169_v18  ;;  %v1166_v22 = vsel %vm953_vm3, %v10304_v21, 0.0 }
 0x7c3   :  { %1167 = vadd.xlane.f32.xlu1 %v1166_v22 }
 0x7d4   :  { %1265 = vrot.lane.b32.xlu1 %v11807_v10, %s11306_s22 }
 0x84c   :  { %v1171_v24 = vpop.xlane.xlu1 %1170 }
 0x84d   :  { %10305 = vrcp.f32 %v1171_v24 }
 0x850   :  { %v1168_v25 = vpop.xlane.xlu1 %1167 }
 0x851   :  { %10307 = vrcp.f32 %v1168_v25 }
 0x854   :  { %v1266_v30 = vpop.permute.xlu1 %1265 }
 0x857   :  { %v10306_v26 = vpop.eup %10305 }
 0x858   :  { %v1175_v29 = vmul.f32 %v10306_v26, %v10302_v16 }
 0x85b   :  { %v10308_v27 = vpop.eup %10307 }
 0x85c   :  { %v1173_v28 = vmul.f32 %v10308_v27, %v10304_v21 }
 0x85e   :  { %8907 = vmatprep.mubr.msk.f32.mxu0 %vm953_vm3, %v1173_v28 }
 0x85f   :  { %8908 = vmatmul.mubr.msk.f32.vlgmr.msra.gmra.mrb[2].mxu0 %vm953_vm3, %v1175_v29 }
 0x860   :  { %9525 = vmatpush3.bf16.xpose.msk.msra.mxu0 %vm11821_vm2, %v9520_v15  ;;  %8914 = vmatprep.mubr.msk.f32.mxu0 %vm869_vm1, %v1264_v23 }
 0x867   :  { %8915 = vmatmul.mubr.msk.f32.vlgmr.msra.gmra.mrb[4].mxu0 %vm869_vm1, %v1266_v30 }
 0x932   :  { %v11885_v31 = vpop.f32.mrb[2].mxu0 }
 0x933   :  { %v11887_v32 = vpop.f32.mrb[3].mxu0 }
 0x93a   :  { %v8916_v33 = vpop.f32.mrb[4].mxu0 }
 0x93b   :  { %v1351_v34 = vadd.f32 %v8916_v33, %v11832_v19  ;;  %v1345_v35 = vpop.f32.mrb[5].mxu0 }
 0x93c   :  { %v1346_v36 = vadd.f32 %v1345_v35, %v11835_v20 }
 0x93d   :  { %v1357_v37 = vsel %vm953_vm3, %v1351_v34, -inf }
 0x93e   :  { %1358 = vmax.xlane.f32.xlu0 %v1357_v37  ;;  %v1354_v38 = vsel %vm953_vm3, %v1346_v36, -inf  ;;  %v726_v37 = vld [vmem:[%s12928_s28 + $0x8] sm:$0xff] }
 0x93f   :  { %1355 = vmax.xlane.f32.xlu1 %v1354_v38 }
 0x9cb   :  { %v1359_v39 = vpop.xlane.xlu0 %1358 }
 0x9cc   :  { %v1361_v40 = vsub.f32 %v1351_v34, %v1359_v39  ;;  %v1356_v41 = vpop.xlane.xlu1 %1355  ;;  %v727_v39 = vld [vmem:[%s12928_s28 + $0x10] sm:$0xff] }
 0x9cd   :  { %v1360_v42 = vsub.f32 %v1346_v36, %v1356_v41  ;;  %v725_v36 = vld [vmem:[%s12928_s28] sm:$0xff] }
 0x9ce   :  { %v1364_v43 = vmul.f32 1.442695, %v1361_v40  ;;  %v9540_v38 = vpack.c.bf16 %v726_v37, %v725_v36  ;;  %v728_v40 = vld [vmem:[%s12928_s28 + $0x18] sm:$0xff]  ;;  %v8322_v36 = vld [vmem:[#allocation29] ss:$0 sm:$0xff]  ;;  %s12942_s28 = sld [smem:[#allocation72_spill]] }
 0x9cf   :  { %v1362_v44 = vmul.f32 1.442695, %v1360_v42  ;;  %v9544_v41 = vpack.c.bf16 %v728_v40, %v727_v39 }
 0x9d0   :  { %10309 = vpow2.f32 %v1364_v43 }
 0x9d1   :  { %10311 = vpow2.f32 %v1362_v44 }
 0x9da   :  { %v10310_v45 = vpop.eup %10309 }
 0x9db   :  { %v10312_v46 = vpop.eup %10311  ;;  %v1369_v47 = vsel %vm953_vm3, %v10310_v45, 0.0 }
 0x9dc   :  { %1370 = vadd.xlane.f32.xlu1 %v1369_v47  ;;  %v1366_v48 = vsel %vm953_vm3, %v10312_v46, 0.0 }
 0x9dd   :  { %1367 = vadd.xlane.f32.xlu0 %v1366_v48 }
 0x9ed   :  { %10094 = vrot.lane.b32.xlu1 %v11815_v13, %s11307_s23 }
 0x9f1   :  { %1463 = vrot.lane.b32.xlu1 %v11809_v12, %s11308_s8 }
 0x9f3   :  { %10089 = vrot.lane.b32.xlu0 %v11815_v13, %s11309_s13 }
 0x9f7   :  { %1465 = vrot.lane.b32.xlu0 %v11807_v10, %s11308_s8 }
 0xa69   :  { %v1371_v49 = vpop.xlane.xlu1 %1370 }
 0xa6a   :  { %10313 = vrcp.f32 %v1371_v49  ;;  %v1368_v50 = vpop.xlane.xlu0 %1367 }
 0xa6b   :  { %10315 = vrcp.f32 %v1368_v50 }
 0xa6d   :  { %v10095_v51 = vpop.permute.xlu1 %10094 }
 0xa6e   :  { %v10090_v52 = vpop.permute.xlu0 %10089  ;;  %v10097_v55 = vunpack.i.h.bf16 %v10095_v51  ;;  %v10096_v56 = vunpack.i.l.bf16 %v10095_v51 }
 0xa6f   :  { %v10092_v57 = vunpack.i.h.bf16 %v10090_v52  ;;  %v10091_v58 = vunpack.i.l.bf16 %v10090_v52 }
 0xa70   :  { %v9530_v60 = vpack.c.bf16 %v10097_v55, %v10096_v56 }
 0xa71   :  { %v9526_v59 = vpack.c.bf16 %v10092_v57, %v10091_v58  ;;  %v1464_v63 = vpop.permute.xlu1 %1463  ;;  %v8319_v58 = vld [vmem:[#allocation25] ss:$0 sm:$0xff] }
 0xa72   :  { %v1466_v0 = vpop.permute.xlu0 %1465 }
 0xa73   :  { %9527 = vmatprep.subr.bf16.mxu1 %v9526_v59 }
 0xa74   :  { %v10314_v12 = vpop.eup %10313  ;;  %9529 = vmatpush3.bf16.msra.mxu1 %v9526_v59 }
 0xa75   :  { %v10316_v61 = vpop.eup %10315  ;;  %9532 = vmatprep.subr.msk.bf16.mxu1 %vm11821_vm2, %v9530_v60  ;;  %v1375_v62 = vmul.f32 %v10314_v12, %v10310_v45 }
 0xa76   :  { %v1373_v10 = vmul.f32 %v10316_v61, %v10312_v46 }
 0xa78   :  { %8921 = vmatprep.mubr.msk.f32.mxu1 %vm953_vm3, %v1373_v10 }
 0xa79   :  { %8922 = vmatmul.mubr.msk.f32.vlgmr.msra.gmra.mrb[6].mxu1 %vm953_vm3, %v1375_v62 }
 0xa7a   :  { %8928 = vmatprep.mubr.msk.f32.mxu1 %vm869_vm1, %v1464_v63 }
 0xa7d   :  { %9535 = vmatpush3.bf16.xpose.msk.msra.mxu1 %vm11821_vm2, %v9530_v60 }
 0xa84   :  { %8929 = vmatmul.mubr.msk.f32.vlgmr.msra.gmra.mrb[8].mxu1 %vm869_vm1, %v1466_v0 }
 0xb4c   :  { %v8923_v1 = vpop.f32.mrb[6].mxu1 }
 0xb4d   :  { %v1454_v2 = vpop.f32.mrb[7].mxu1 }
 0xb57   :  { %v8930_v3 = vpop.f32.mrb[8].mxu1 }
 0xb58   :  { %v1551_v4 = vadd.f32 %v8930_v3, %v11832_v19  ;;  %v1545_v6 = vpop.f32.mrb[9].mxu1 }
 0xb59   :  { %v1546_v8 = vadd.f32 %v1545_v6, %v11835_v20 }
 0xb5a   :  { %v1557_v9 = vsel %vm953_vm3, %v1551_v4, -inf }
 0xb5b   :  { %1558 = vmax.xlane.f32.xlu0 %v1557_v9  ;;  %v1554_v11 = vsel %vm953_vm3, %v1546_v8, -inf  ;;  %v713_v9 = vld [vmem:[%s12929_s12] sm:$0xff] }
 0xb5c   :  { %1555 = vmax.xlane.f32.xlu1 %v1554_v11  ;;  %v714_v11 = vld [vmem:[%s12929_s12 + $0x8] sm:$0xff] }
 0xbe8   :  { %v1559_v14 = vpop.xlane.xlu0 %1558 }
 0xbe9   :  { %v1561_v15 = vsub.f32 %v1551_v4, %v1559_v14  ;;  %v1556_v16 = vpop.xlane.xlu1 %1555  ;;  %v715_v14 = vld [vmem:[%s12929_s12 + $0x10] sm:$0xff] }
 0xbea   :  { %v1560_v18 = vsub.f32 %v1546_v8, %v1556_v16  ;;  %v716_v16 = vld [vmem:[%s12929_s12 + $0x18] sm:$0xff]  ;;  %s12943_s12 = sld [smem:[#allocation66_spill]] }
 0xbeb   :  { %v1564_v21 = vmul.f32 1.442695, %v1561_v15  ;;  %v9548_v15 = vpack.c.bf16 %v714_v11, %v713_v9  ;;  %v758_v9 = vld [vmem:[%s12931_s2 + $0x8] sm:$0xff]  ;;  %v759_v11 = vld [vmem:[%s12931_s2 + $0x10] sm:$0xff] }
 0xbec   :  { %v1562_v22 = vmul.f32 1.442695, %v1560_v18  ;;  %v9552_v18 = vpack.c.bf16 %v716_v16, %v715_v14 }
 0xbed   :  { %10317 = vpow2.f32 %v1564_v21  ;;  %9549 = vmatprep.subr.bf16.mxu1 %v9548_v15  ;;  %v717_v21 = vld [vmem:[%s12930_s29] sm:$0xff] }
 0xbee   :  { %10319 = vpow2.f32 %v1562_v22  ;;  %9551 = vmatpush3.bf16.msra.mxu1 %v9548_v15  ;;  %v718_v22 = vld [vmem:[%s12930_s29 + $0x8] sm:$0xff]  ;;  %v760_v15 = vld [vmem:[%s12931_s2 + $0x18] sm:$0xff] }
 0xbef   :  { %9553 = vmatprep.subr.bf16.mxu1 %v9552_v18  ;;  %v9576_v16 = vpack.c.bf16 %v760_v15, %v759_v11 }
 0xbf2   :  { %9555 = vmatpush3.bf16.msra.mxu1 %v9552_v18 }
 0xbf7   :  { %v10318_v23 = vpop.eup %10317 }
 0xbf8   :  { %v10320_v24 = vpop.eup %10319  ;;  %v1569_v25 = vsel %vm953_vm3, %v10318_v23, 0.0 }
 0xbf9   :  { %1570 = vadd.xlane.f32.xlu1 %v1569_v25  ;;  %v1566_v26 = vsel %vm953_vm3, %v10320_v24, 0.0  ;;  %v720_v25 = vld [vmem:[%s12930_s29 + $0x18] sm:$0xff] }
 0xbfa   :  { %1567 = vadd.xlane.f32.xlu0 %v1566_v26 }
 0xc0a   :  { %1665 = vrot.lane.b32.xlu1 %v11887_v32, %s11310_s26 }
 0xc0e   :  { %1667 = vrot.lane.b32.xlu1 %v11885_v31, %s11310_s26 }
 0xc10   :  { %10099 = vrot.lane.b32.xlu0 %v11815_v13, %s11311_s19 }
 0xc12   :  { %1675 = vrot.lane.b32.xlu1 %v8923_v1, %s11312_s14 }
 0xc14   :  { %1673 = vrot.lane.b32.xlu0 %v1454_v2, %s11312_s14 }
 0xc86   :  { %v1571_v27 = vpop.xlane.xlu1 %1570 }
 0xc87   :  { %10321 = vrcp.f32 %v1571_v27  ;;  %v1568_v28 = vpop.xlane.xlu0 %1567  ;;  %v721_v27 = vld [vmem:[%s12930_s29 + $0x20] sm:$0xff] }
 0xc88   :  { %10323 = vrcp.f32 %v1568_v28  ;;  %v722_v28 = vld [vmem:[%s12930_s29 + $0x28] sm:$0xff] }
 0xc8a   :  { %v1666_v44 = vpop.permute.xlu1 %1665 }
 0xc8b   :  { %v10100_v29 = vpop.permute.xlu0 %10099  ;;  %v1687_v48 = vsel %vm869_vm1, %v11861_v54, %v1666_v44 }
 0xc8c   :  { %v10102_v30 = vunpack.i.h.bf16 %v10100_v29  ;;  %v10101_v32 = vunpack.i.l.bf16 %v10100_v29  ;;  %v9564_v29 = vpack.c.bf16 %v722_v28, %v721_v27  ;;  %v8330_v27 = vld [vmem:[#allocation32] ss:$0 sm:$0xff] }
 0xc8e   :  { %v9536_v31 = vpack.c.bf16 %v10102_v30, %v10101_v32  ;;  %v1668_v45 = vpop.permute.xlu1 %1667 }
 0xc8f   :  { %v1674_v47 = vpop.permute.xlu0 %1673  ;;  %v1688_v50 = vsel %vm869_vm1, %v11859_v53, %v1668_v45  ;;  %v723_v45 = vld [vmem:[%s12930_s29 + $0x30] sm:$0xff] }
 0xc90   :  { %9537 = vmatprep.subr.bf16.mxu0 %v9536_v31  ;;  %v1689_v51 = vsel %vm953_vm3, %v1687_v48, %v1674_v47  ;;  %v8324_v48 = vld [vmem:[#allocation22] ss:$0 sm:$0xff] }
 0xc91   :  { %v10322_v33 = vpop.eup %10321  ;;  %9539 = vmatpush3.bf16.msra.mxu0 %v9536_v31 }
 0xc92   :  { %v10324_v13 = vpop.eup %10323  ;;  %v1575_v35 = vmul.f32 %v10322_v33, %v10318_v23  ;;  %9541 = vmatprep.subr.bf16.mxu0 %v9540_v38  ;;  %v1676_v46 = vpop.permute.xlu1 %1675  ;;  %v719_v23 = vld [vmem:[%s12930_s29 + $0x10] sm:$0xff] }
 0xc93   :  { %v1573_v34 = vmul.f32 %v10324_v13, %v10320_v24  ;;  %v1690_v55 = vsel %vm953_vm3, %v1688_v50, %v1676_v46  ;;  %v9556_v24 = vpack.c.bf16 %v718_v22, %v717_v21  ;;  %v9560_v26 = vpack.c.bf16 %v720_v25, %v719_v23  ;;  %v724_v46 = vld [vmem:[%s12930_s29 + $0x38] sm:$0xff]  ;;  %s12944_s29 = sld [smem:[#allocation68_spill]] }
 0xc94   :  { %v9568_v47 = vpack.c.bf16 %v724_v46, %v723_v45 }
 0xc95   :  { %8935 = vmatprep.mubr.msk.f32.mxu0 %vm953_vm3, %v1573_v34 }
 0xc96   :  { %8936 = vmatmul.mubr.msk.f32.vlgmr.msra.gmra.mrb[6].mxu0 %vm953_vm3, %v1575_v35 }
 0xc97   :  { %9543 = vmatpush3.bf16.msra.mxu0 %v9540_v38  ;;  %v8323_v38 = vld [vmem:[#allocation28] ss:$0 sm:$0xff] }
 0xc98   :  { %9545 = vmatprep.subr.bf16.mxu0 %v9544_v41 }
 0xc9b   :  { %9547 = vmatpush3.bf16.msra.mxu0 %v9544_v41 }
 0xc9c   :  { %9557 = vmatprep.subr.bf16.mxu0 %v9556_v24 }
 0xd69   :  { %v8937_v42 = vpop.f32.mrb[6].mxu0 }
 0xd6a   :  { %1683 = vrot.lane.b32.xlu1 %v8937_v42, %s11313_s1  ;;  %v1654_v43 = vpop.f32.mrb[7].mxu0 }
 0xd6b   :  { %1681 = vrot.lane.b32.xlu0 %v1654_v43, %s11313_s1 }
 0xddc   :  { %v1684_v49 = vpop.permute.xlu1 %1683 }
 0xddd   :  { %v1682_v52 = vpop.permute.xlu0 %1681  ;;  %v1693_v57 = vsel %vm1691_vm4, %v1690_v55, %v1684_v49 }
 0xdde   :  { %v1692_v56 = vsel %vm1691_vm4, %v1689_v51, %v1682_v52 }
 0xddf   :  { %8946 = vmatprep.mubr.msk.f32.mxu0 %vm781_vm0, %v1692_v56 }
 0xde0   :  { %8947 = vmatmul.mubr.msk.f32.vlgmr.msra.gmra.mrb[8].mxu0 %vm781_vm0, %v1693_v57  ;;  %v8327_v57 = vld [vmem:[#allocation23] ss:$0 sm:$0xff] }
 0xde1   :  { %9559 = vmatpush3.bf16.msra.mxu0 %v9556_v24 }
 0xde2   :  { %9561 = vmatprep.subr.bf16.mxu0 %v9560_v26 }
 0xde5   :  { %9563 = vmatpush3.bf16.msra.mxu0 %v9560_v26 }
 0xde6   :  { %9565 = vmatprep.subr.bf16.mxu0 %v9564_v29 }
 0xde9   :  { %9567 = vmatpush3.bf16.msra.mxu0 %v9564_v29 }
 0xdea   :  { %9569 = vmatprep.subr.bf16.mxu0 %v9568_v47 }
 0xded   :  { %9571 = vmatpush3.bf16.msra.mxu0 %v9568_v47 }
 0xeb3   :  { %v8948_v59 = vpop.f32.mrb[8].mxu0 }
 0xeb4   :  { %v1778_v54 = vadd.f32 %v8948_v59, %v8319_v58  ;;  %v1772_v60 = vpop.f32.mrb[9].mxu0 }
 0xeb5   :  { %v1773_v12 = vadd.f32 %v8319_v58, %v1772_v60 }
 0xeb6   :  { %v1782_v53 = vadd.f32 %v1778_v54, %v11803_v7 }
 0xeb7   :  { %v1781_v61 = vadd.f32 %v1773_v12, %v11798_v5 }
 0xeb8   :  { %v1786_v10 = vsel %vm781_vm0, %v1782_v53, 0.0 }
 0xeb9   :  { %1787 = vadd.xlane.f32.xlu1 %v1786_v10  ;;  %v1783_v62 = vsel %vm781_vm0, %v1781_v61, 0.0 }
 0xeba   :  { %1784 = vadd.xlane.f32.xlu0 %v1783_v62 }
 0xf46   :  { %v1788_v63 = vpop.xlane.xlu1 %1787 }
 0xf47   :  { %v1791_v0 = vmul.f32 0.03125, %v1788_v63  ;;  %v1785_v1 = vpop.xlane.xlu0 %1784 }
 0xf48   :  { %v1790_v2 = vmul.f32 0.03125, %v1785_v1 }
 0xf49   :  { %v1793_v3 = vsub.f32 %v1782_v53, %v1791_v0 }
 0xf4a   :  { %v1792_v4 = vsub.f32 %v1781_v61, %v1790_v2 }
 0xf4b   :  { %v1795_v7 = vmul.f32 %v1793_v3, %v1793_v3 }
 0xf4c   :  { %v1794_v6 = vmul.f32 %v1792_v4, %v1792_v4 }
 0xf4d   :  { %v1799_v8 = vsel %vm781_vm0, %v1795_v7, 0.0 }
 0xf4e   :  { %v1796_v5 = vsel %vm781_vm0, %v1794_v6, 0.0 }
 0xf4f   :  { %1797 = vadd.xlane.f32.xlu0 %v1796_v5 }
 0xf53   :  { %1800 = vadd.xlane.f32.xlu0 %v1799_v8  ;;  %v757_v8 = vld [vmem:[%s12931_s2] sm:$0xff]  ;;  %s12945_s2 = sld [smem:[#allocation114_spill]] }
 0xf54   :  { %v9572_v14 = vpack.c.bf16 %v758_v9, %v757_v8 }
 0xf56   :  { %9573 = vmatprep.subr.bf16.mxu1 %v9572_v14 }
 0xfdc   :  { %v1798_v30 = vpop.xlane.xlu0 %1797 }
 0xfdd   :  { %v1802_v32 = vmul.f32 0.03125, %v1798_v30 }
 0xfdf   :  { %v1804_v31 = vadd.f32 1e-05, %v1802_v32  ;;  %v8331_v32 = vld [vmem:[#allocation31] ss:$0 sm:$0xff] }
 0xfe0   :  { %v1801_v33 = vpop.xlane.xlu0 %1800 }
 0xfe1   :  { %10325 = vrsqrt.f32 %v1804_v31  ;;  %v1803_v13 = vmul.f32 0.03125, %v1801_v33 }
 0xfe3   :  { %v1805_v34 = vadd.f32 1e-05, %v1803_v13 }
 0xfe5   :  { %10327 = vrsqrt.f32 %v1805_v34 }
 0xfeb   :  { %v10326_v35 = vpop.eup %10325 }
 0xfec   :  { %v1808_v37 = vmul.f32 %v10326_v35, %v1792_v4  ;;  %v8332_v35 = vld [vmem:[#allocation38] ss:$0 sm:$0xff] }
 0xfee   :  { %v1816_v39 = vmul.f32 %v8322_v36, %v1808_v37 }
 0xfef   :  { %v10328_v40 = vpop.eup %10327 }
 0xff0   :  { %v1809_v41 = vmul.f32 %v10328_v40, %v1793_v3  ;;  %v1824_v42 = vadd.f32 %v8323_v38, %v1816_v39 }
 0xff2   :  { %v1817_v43 = vmul.f32 %v8322_v36, %v1809_v41  ;;  %8957 = vmatprep.mubr.msk.f32.mxu1 %vm781_vm0, %v1824_v42 }
 0xff4   :  { %v1825_v44 = vadd.f32 %v8323_v38, %v1817_v43 }
 0xff6   :  { %8958 = vmatmul.mubr.msk.f32.vlgmr.msra.gmra.mrb[10].mxu1 %vm781_vm0, %v1825_v44 }
 0xff7   :  { %9575 = vmatpush3.bf16.msra.mxu1 %v9572_v14 }
 0xff8   :  { %9577 = vmatprep.subr.bf16.mxu1 %v9576_v16 }
 0xffb   :  { %9579 = vmatpush3.bf16.msra.mxu1 %v9576_v16 }
0x10c9   :  { %v8959_v49 = vpop.f32.mrb[10].mxu1 }
0x10ca   :  { %v1910_v50 = vadd.f32 %v8959_v49, %v8324_v48  ;;  %v1904_v51 = vpop.f32.mrb[11].mxu1 }
0x10cb   :  { %v1905_v52 = vadd.f32 %v8324_v48, %v1904_v51 }
0x10cc   :  { %v1914_v56 = vmax.f32 %v1910_v50, 0.0 }
0x10cd   :  { %v1913_v55 = vmax.f32 %v1905_v52, 0.0 }
0x10cf   :  { %8976 = vmatprep.mubr.msk.f32.mxu0 %vm1921_vm5, %v1913_v55 }
0x10d0   :  { %8977 = vmatmul.mubr.msk.f32.vlgmr.msra.gmra.mrb[10].mxu0 %vm1921_vm5, %v1914_v56 }
0x11a3   :  { %v8978_v58 = vpop.f32.mrb[10].mxu0 }
0x11a4   :  { %v2000_v59 = vadd.f32 %v8978_v58, %v8327_v57  ;;  %v1994_v54 = vpop.f32.mrb[11].mxu0 }
0x11a5   :  { %v1995_v60 = vadd.f32 %v8327_v57, %v1994_v54 }
0x11a6   :  { %v2004_v12 = vadd.f32 %v2000_v59, %v1825_v44 }
0x11a7   :  { %v2003_v53 = vadd.f32 %v1995_v60, %v1824_v42 }
0x11a8   :  { %v2008_v61 = vsel %vm781_vm0, %v2004_v12, 0.0 }
0x11a9   :  { %2009 = vadd.xlane.f32.xlu0 %v2008_v61  ;;  %v2005_v10 = vsel %vm781_vm0, %v2003_v53, 0.0 }
0x11aa   :  { %2006 = vadd.xlane.f32.xlu1 %v2005_v10 }
0x1236   :  { %v2010_v62 = vpop.xlane.xlu0 %2009 }
0x1237   :  { %v2012_v63 = vmul.f32 0.03125, %v2010_v62  ;;  %v2007_v0 = vpop.xlane.xlu1 %2006 }
0x1238   :  { %v2011_v1 = vmul.f32 0.03125, %v2007_v0 }
0x1239   :  { %v2014_v2 = vsub.f32 %v2004_v12, %v2012_v63 }
0x123a   :  { %v2013_v3 = vsub.f32 %v2003_v53, %v2011_v1 }
0x123b   :  { %v2016_v4 = vmul.f32 %v2014_v2, %v2014_v2 }
0x123c   :  { %v2015_v6 = vmul.f32 %v2013_v3, %v2013_v3 }
0x123d   :  { %v2020_v5 = vsel %vm781_vm0, %v2016_v4, 0.0 }
0x123e   :  { %2021 = vadd.xlane.f32.xlu0 %v2020_v5  ;;  %v2017_v7 = vsel %vm781_vm0, %v2015_v6, 0.0 }
0x123f   :  { %2018 = vadd.xlane.f32.xlu1 %v2017_v7 }
0x12cb   :  { %v2022_v18 = vpop.xlane.xlu0 %2021 }
0x12cc   :  { %v2024_v21 = vmul.f32 0.03125, %v2022_v18  ;;  %v2019_v22 = vpop.xlane.xlu1 %2018 }
0x12cd   :  { %v2023_v23 = vmul.f32 0.03125, %v2019_v22 }
0x12ce   :  { %v2026_v24 = vadd.f32 1e-05, %v2024_v21 }
0x12cf   :  { %v2025_v25 = vadd.f32 1e-05, %v2023_v23 }
0x12d0   :  { %10329 = vrsqrt.f32 %v2026_v24 }
0x12d1   :  { %10331 = vrsqrt.f32 %v2025_v25 }
0x12da   :  { %v10330_v26 = vpop.eup %10329 }
0x12db   :  { %v10332_v28 = vpop.eup %10331  ;;  %v2030_v29 = vmul.f32 %v10330_v26, %v2014_v2 }
0x12dc   :  { %v2029_v30 = vmul.f32 %v10332_v28, %v2013_v3 }
0x12dd   :  { %v2038_v31 = vmul.f32 %v8330_v27, %v2030_v29 }
0x12de   :  { %v2037_v33 = vmul.f32 %v8330_v27, %v2029_v30 }
0x12df   :  { %v11975_v34 = vadd.f32 %v8331_v32, %v2038_v31 }
0x12e0   :  { %v11973_v13 = vadd.f32 %v8331_v32, %v2037_v33 }
0x12e2   :  { %8987 = vmatprep.mubr.msk.f32.mxu1 %vm781_vm0, %v11973_v13 }
0x12e3   :  { %8988 = vmatmul.mubr.msk.f32.vlgmr.msra.gmra.mrb[12].mxu1 %vm781_vm0, %v11975_v34 }
0x13b6   :  { %v8989_v36 = vpop.f32.mrb[12].mxu1 }
0x13b7   :  { %v11981_v37 = vadd.f32 %v8989_v36, %v8332_v35  ;;  %v2125_v38 = vpop.f32.mrb[13].mxu1 }
0x13b8   :  { %v11983_v39 = vadd.f32 %v8332_v35, %v2125_v38 }
0x13ba   :  { %8994 = vmatprep.mubr.msk.f32.mxu1 %vm869_vm1, %v11983_v39  ;;  %v11989_v40 = vpack.i.bf16 %v11981_v37, %v11983_v39 }
0x13bc   :  { %10109 = vrot.lane.b32.xlu0 %v11989_v40, %s11302_s9  ;;  %10104 = vrot.lane.b32.xlu1 %v11989_v40, %s11300_s16 }
0x13c0   :  { %2332 = vrot.lane.b32.xlu1 %v11983_v39, %s11303_s18 }
0x13c4   :  { %2334 = vrot.lane.b32.xlu1 %v11981_v37, %s11303_s18 }
0x142e   :  { %v10110_v41 = vpop.permute.xlu0 %10109  ;;  %v10105_v42 = vpop.permute.xlu1 %10104 }
0x142f   :  { %v10112_v43 = vunpack.i.h.bf16 %v10110_v41  ;;  %v10111_v44 = vunpack.i.l.bf16 %v10110_v41  ;;  %v10107_v45 = vunpack.i.h.bf16 %v10105_v42  ;;  %v10106_v46 = vunpack.i.l.bf16 %v10105_v42 }
0x1431   :  { %v9580_v47 = vpack.c.bf16 %v10107_v45, %v10106_v46  ;;  %v9590_v48 = vpack.c.bf16 %v10112_v43, %v10111_v44 }
0x1432   :  { %v2333_v49 = vpop.permute.xlu1 %2332 }
0x1433   :  { %9582 = vmatprep.subr.msk.bf16.mxu1 %vm11821_vm2, %v9580_v47 }
0x1434   :  { %9585 = vmatpush3.bf16.xpose.msk.msra.mxu1 %vm11821_vm2, %v9580_v47 }
0x1435   :  { %9592 = vmatprep.subr.msk.bf16.mxu1 %vm11821_vm2, %v9590_v48 }
0x1436   :  { %v2335_v50 = vpop.permute.xlu1 %2334 }
0x143b   :  { %8995 = vmatmul.mubr.msk.f32.vlgmr.msra.gmra.mrb[14].mxu1 %vm869_vm1, %v11981_v37 }
0x143c   :  { %9595 = vmatpush3.bf16.xpose.msk.msra.mxu1 %vm11821_vm2, %v9590_v48  ;;  %9008 = vmatprep.mubr.msk.f32.mxu1 %vm869_vm1, %v2333_v49 }
0x1443   :  { %9009 = vmatmul.mubr.msk.f32.vlgmr.msra.gmra.mrb[16].mxu1 %vm869_vm1, %v2335_v50 }
0x150e   :  { %v8996_v51 = vpop.f32.mrb[14].mxu1 }
0x150f   :  { %v2220_v52 = vadd.f32 %v8996_v51, %v11832_v19  ;;  %v2214_v55 = vpop.f32.mrb[15].mxu1 }
0x1510   :  { %v2215_v56 = vadd.f32 %v2214_v55, %v11835_v20 }
0x1511   :  { %v2226_v57 = vsel %vm953_vm3, %v2220_v52, -inf }
0x1512   :  { %2227 = vmax.xlane.f32.xlu1 %v2226_v57  ;;  %v2223_v58 = vsel %vm953_vm3, %v2215_v56, -inf }
0x1513   :  { %2224 = vmax.xlane.f32.xlu0 %v2223_v58  ;;  %v10525_v58 = vld [vmem:[%s12925_s24 + $0x8] sm:$0xff] }
0x1516   :  { %v9010_v59 = vpop.f32.mrb[16].mxu1 }
0x1517   :  { %v2414_v54 = vpop.f32.mrb[17].mxu1  ;;  %v2420_v12 = vadd.f32 %v9010_v59, %v11832_v19 }
0x1518   :  { %v2415_v60 = vadd.f32 %v2414_v54, %v11835_v20 }
0x1519   :  { %v2426_v61 = vsel %vm953_vm3, %v2420_v12, -inf }
0x151a   :  { %v2423_v53 = vsel %vm953_vm3, %v2415_v60, -inf }
0x151b   :  { %2424 = vmax.xlane.f32.xlu0 %v2423_v53 }
0x151f   :  { %2427 = vmax.xlane.f32.xlu0 %v2426_v61 }
0x1523   :  { %10114 = vrot.lane.b32.xlu1 %v11989_v40, %s11301_s5 }
0x159f   :  { %v2228_v10 = vpop.xlane.xlu1 %2227 }
0x15a0   :  { %v2230_v62 = vsub.f32 %v2220_v52, %v2228_v10  ;;  %v2225_v63 = vpop.xlane.xlu0 %2224 }
0x15a1   :  { %v2229_v0 = vsub.f32 %v2215_v56, %v2225_v63 }
0x15a2   :  { %v2233_v1 = vmul.f32 1.442695, %v2230_v62 }
0x15a3   :  { %v2231_v2 = vmul.f32 1.442695, %v2229_v0  ;;  %v10115_v3 = vpop.permute.xlu1 %10114 }
0x15a4   :  { %10333 = vpow2.f32 %v2233_v1  ;;  %v10117_v20 = vunpack.i.h.bf16 %v10115_v3  ;;  %v10116_v4 = vunpack.i.l.bf16 %v10115_v3 }
0x15a5   :  { %10335 = vpow2.f32 %v2231_v2 }
0x15a6   :  { %v9586_v19 = vpack.c.bf16 %v10117_v20, %v10116_v4 }
0x15a8   :  { %9587 = vmatprep.subr.bf16.mxu0 %v9586_v19  ;;  %v2425_v6 = vpop.xlane.xlu0 %2424 }
0x15a9   :  { %9589 = vmatpush3.bf16.msra.mxu0 %v9586_v19  ;;  %v2429_v21 = vsub.f32 %v2415_v60, %v2425_v6  ;;  %v10526_v60 = vld [vmem:[%s12925_s24] sm:$0xff]  ;;  %s12941_s24 = sld [smem:[#allocation73_spill]] }
0x15ab   :  { %v2431_v22 = vmul.f32 1.442695, %v2429_v21 }
0x15ac   :  { %v2428_v5 = vpop.xlane.xlu0 %2427 }
0x15ad   :  { %v2430_v7 = vsub.f32 %v2420_v12, %v2428_v5 }
0x15ae   :  { %v10334_v8 = vpop.eup %10333 }
0x15af   :  { %v10336_v9 = vpop.eup %10335  ;;  %v2433_v11 = vmul.f32 1.442695, %v2430_v7  ;;  %v2238_v14 = vsel %vm953_vm3, %v10334_v8, 0.0 }
0x15b0   :  { %2239 = vadd.xlane.f32.xlu0 %v2238_v14  ;;  %v2235_v15 = vsel %vm953_vm3, %v10336_v9, 0.0 }
0x15b1   :  { %10337 = vpow2.f32 %v2433_v11  ;;  %2236 = vadd.xlane.f32.xlu1 %v2235_v15 }
0x15b2   :  { %10339 = vpow2.f32 %v2431_v22 }
0x15bb   :  { %v10338_v16 = vpop.eup %10337 }
0x15bc   :  { %v2438_v18 = vsel %vm953_vm3, %v10338_v16, 0.0  ;;  %v10340_v23 = vpop.eup %10339 }
0x15bd   :  { %2439 = vadd.xlane.f32.xlu0 %v2438_v18  ;;  %v2435_v24 = vsel %vm953_vm3, %v10340_v23, 0.0 }
0x15c2   :  { %10124 = vrot.lane.b32.xlu1 %v11989_v40, %s11305_s0 }
0x15d3   :  { %10119 = vrot.lane.b32.xlu0 %v11989_v40, %s11304_s17 }
0x15d7   :  { %2534 = vrot.lane.b32.xlu0 %v11981_v37, %s11306_s22 }
0x15e6   :  { %2436 = vadd.xlane.f32.xlu1 %v2435_v24 }
0x15f7   :  { %2532 = vrot.lane.b32.xlu1 %v11983_v39, %s11306_s22 }
0x163d   :  { %v2240_v25 = vpop.xlane.xlu0 %2239 }
0x163e   :  { %10341 = vrcp.f32 %v2240_v25  ;;  %v2237_v26 = vpop.xlane.xlu1 %2236 }
0x163f   :  { %10343 = vrcp.f32 %v2237_v26 }
0x1642   :  { %v10125_v31 = vpop.permute.xlu1 %10124 }
0x1643   :  { %v10127_v35 = vunpack.i.h.bf16 %v10125_v31  ;;  %v10126_v36 = vunpack.i.l.bf16 %v10125_v31 }
0x1645   :  { %v9600_v43 = vpack.c.bf16 %v10127_v35, %v10126_v36 }
0x1648   :  { %v10342_v27 = vpop.eup %10341 }
0x1649   :  { %v10344_v28 = vpop.eup %10343  ;;  %v2244_v32 = vmul.f32 %v10342_v27, %v10334_v8 }
0x164a   :  { %v2440_v29 = vpop.xlane.xlu0 %2439  ;;  %v2242_v30 = vmul.f32 %v10344_v28, %v10336_v9 }
0x164b   :  { %10345 = vrcp.f32 %v2440_v29 }
0x164c   :  { %9001 = vmatprep.mubr.msk.f32.mxu0 %vm953_vm3, %v2242_v30 }
0x164d   :  { %9002 = vmatmul.mubr.msk.f32.vlgmr.msra.gmra.mrb[12].mxu0 %vm953_vm3, %v2244_v32 }
0x164e   :  { %v10120_v33 = vpop.permute.xlu0 %10119 }
0x164f   :  { %v10122_v38 = vunpack.i.h.bf16 %v10120_v33  ;;  %v10121_v41 = vunpack.i.l.bf16 %v10120_v33 }
0x1651   :  { %v9596_v42 = vpack.c.bf16 %v10122_v38, %v10121_v41 }
0x1652   :  { %v2535_v50 = vpop.permute.xlu0 %2534 }
0x1653   :  { %9597 = vmatprep.subr.bf16.mxu0 %v9596_v42 }
0x1654   :  { %9599 = vmatpush3.bf16.msra.mxu0 %v9596_v42 }
0x1655   :  { %9602 = vmatprep.subr.msk.bf16.mxu0 %vm11821_vm2, %v9600_v43  ;;  %v10346_v45 = vpop.eup %10345 }
0x1656   :  { %v2444_v48 = vmul.f32 %v10346_v45, %v10338_v16 }
0x1673   :  { %v2437_v44 = vpop.xlane.xlu1 %2436 }
0x1674   :  { %10347 = vrcp.f32 %v2437_v44 }
0x1677   :  { %v2533_v49 = vpop.permute.xlu1 %2532 }
0x167e   :  { %v10348_v46 = vpop.eup %10347 }
0x167f   :  { %v2442_v47 = vmul.f32 %v10348_v46, %v10340_v23 }
0x1681   :  { %9015 = vmatprep.mubr.msk.f32.mxu0 %vm953_vm3, %v2442_v47 }
0x1682   :  { %9016 = vmatmul.mubr.msk.f32.vlgmr.msra.gmra.mrb[14].mxu0 %vm953_vm3, %v2444_v48 }
0x1683   :  { %9605 = vmatpush3.bf16.xpose.msk.msra.mxu0 %vm11821_vm2, %v9600_v43  ;;  %9022 = vmatprep.mubr.msk.f32.mxu0 %vm869_vm1, %v2533_v49 }
0x168a   :  { %9023 = vmatmul.mubr.msk.f32.vlgmr.msra.gmra.mrb[16].mxu0 %vm869_vm1, %v2535_v50 }
0x1720   :  { %v12043_v51 = vpop.f32.mrb[12].mxu0 }
0x1721   :  { %v12045_v52 = vpop.f32.mrb[13].mxu0 }
0x1755   :  { %v12047_v55 = vpop.f32.mrb[14].mxu0 }
0x1756   :  { %v12049_v56 = vpop.f32.mrb[15].mxu0 }
0x175d   :  { %v9024_v57 = vpop.f32.mrb[16].mxu0 }
0x175e   :  { %v2620_v59 = vadd.f32 %v10525_v58, %v9024_v57  ;;  %v2614_v54 = vpop.f32.mrb[17].mxu0 }
0x175f   :  { %v2615_v12 = vadd.f32 %v10526_v60, %v2614_v54  ;;  %v753_v54 = vld [vmem:[%s12932_s25] sm:$0xff] }
0x1760   :  { %v2626_v53 = vsel %vm953_vm3, %v2620_v59, -inf }
0x1761   :  { %2627 = vmax.xlane.f32.xlu0 %v2626_v53  ;;  %v2623_v61 = vsel %vm953_vm3, %v2615_v12, -inf }
0x1762   :  { %2624 = vmax.xlane.f32.xlu1 %v2623_v61  ;;  %v756_v61 = vld [vmem:[%s12932_s25 + $0x18] sm:$0xff] }
0x17ee   :  { %v2628_v10 = vpop.xlane.xlu0 %2627 }
0x17ef   :  { %v2630_v62 = vsub.f32 %v2620_v59, %v2628_v10  ;;  %v2625_v63 = vpop.xlane.xlu1 %2624 }
0x17f0   :  { %v2629_v0 = vsub.f32 %v2615_v12, %v2625_v63  ;;  %v755_v12 = vld [vmem:[%s12932_s25 + $0x10] sm:$0xff] }
0x17f1   :  { %v2633_v1 = vmul.f32 1.442695, %v2630_v62  ;;  %v9624_v10 = vpack.c.bf16 %v756_v61, %v755_v12 }
0x17f2   :  { %v2631_v2 = vmul.f32 1.442695, %v2629_v0 }
0x17f3   :  { %10349 = vpow2.f32 %v2633_v1 }
0x17f4   :  { %10351 = vpow2.f32 %v2631_v2 }
0x17fd   :  { %v10350_v3 = vpop.eup %10349 }
0x17fe   :  { %v10352_v20 = vpop.eup %10351  ;;  %v2638_v4 = vsel %vm953_vm3, %v10350_v3, 0.0 }
0x17ff   :  { %2639 = vadd.xlane.f32.xlu1 %v2638_v4  ;;  %v2635_v19 = vsel %vm953_vm3, %v10352_v20, 0.0 }
0x1800   :  { %2636 = vadd.xlane.f32.xlu0 %v2635_v19 }
0x1810   :  { %10134 = vrot.lane.b32.xlu1 %v11989_v40, %s11307_s23 }
0x1814   :  { %2732 = vrot.lane.b32.xlu1 %v11983_v39, %s11308_s8 }
0x1816   :  { %10129 = vrot.lane.b32.xlu0 %v11989_v40, %s11309_s13 }
0x181a   :  { %2734 = vrot.lane.b32.xlu0 %v11981_v37, %s11308_s8 }
0x188c   :  { %v2640_v6 = vpop.xlane.xlu1 %2639 }
0x188d   :  { %10353 = vrcp.f32 %v2640_v6  ;;  %v2637_v5 = vpop.xlane.xlu0 %2636 }
0x188e   :  { %10355 = vrcp.f32 %v2637_v5 }
0x1890   :  { %v10135_v7 = vpop.permute.xlu1 %10134 }
0x1891   :  { %v10130_v8 = vpop.permute.xlu0 %10129  ;;  %v10137_v9 = vunpack.i.h.bf16 %v10135_v7  ;;  %v10136_v11 = vunpack.i.l.bf16 %v10135_v7 }
0x1892   :  { %v10132_v14 = vunpack.i.h.bf16 %v10130_v8  ;;  %v10131_v15 = vunpack.i.l.bf16 %v10130_v8 }
0x1893   :  { %v9610_v18 = vpack.c.bf16 %v10137_v9, %v10136_v11  ;;  %v8359_v11 = vld [vmem:[#allocation37] ss:$0 sm:$0xff] }
0x1894   :  { %v9606_v16 = vpack.c.bf16 %v10132_v14, %v10131_v15  ;;  %v2733_v23 = vpop.permute.xlu1 %2732 }
0x1895   :  { %v2735_v24 = vpop.permute.xlu0 %2734 }
0x1896   :  { %9607 = vmatprep.subr.bf16.mxu1 %v9606_v16 }
0x1897   :  { %v10354_v39 = vpop.eup %10353  ;;  %9609 = vmatpush3.bf16.msra.mxu1 %v9606_v16 }
0x1898   :  { %v10356_v21 = vpop.eup %10355  ;;  %9612 = vmatprep.subr.msk.bf16.mxu1 %vm11821_vm2, %v9610_v18  ;;  %v2644_v22 = vmul.f32 %v10354_v39, %v10350_v3 }
0x1899   :  { %v2642_v37 = vmul.f32 %v10356_v21, %v10352_v20 }
0x189b   :  { %9029 = vmatprep.mubr.msk.f32.mxu1 %vm953_vm3, %v2642_v37 }
0x189c   :  { %9030 = vmatmul.mubr.msk.f32.vlgmr.msra.gmra.mrb[18].mxu1 %vm953_vm3, %v2644_v22 }
0x189d   :  { %9036 = vmatprep.mubr.msk.f32.mxu1 %vm869_vm1, %v2733_v23 }
0x18a0   :  { %9615 = vmatpush3.bf16.xpose.msk.msra.mxu1 %vm11821_vm2, %v9610_v18 }
0x18a7   :  { %9037 = vmatmul.mubr.msk.f32.vlgmr.msra.gmra.mrb[20].mxu1 %vm869_vm1, %v2735_v24 }
0x196f   :  { %v9031_v25 = vpop.f32.mrb[18].mxu1 }
0x1970   :  { %v2723_v26 = vpop.f32.mrb[19].mxu1 }
0x197a   :  { %v9038_v27 = vpop.f32.mrb[20].mxu1 }
0x197b   :  { %v2820_v28 = vadd.f32 %v10525_v58, %v9038_v27  ;;  %v2814_v29 = vpop.f32.mrb[21].mxu1 }
0x197c   :  { %v2815_v30 = vadd.f32 %v10526_v60, %v2814_v29  ;;  %v754_v60 = vld [vmem:[%s12932_s25 + $0x8] sm:$0xff]  ;;  %v741_v29 = vld [vmem:[%s12933_s7] sm:$0xff]  ;;  %s12946_s25 = sld [smem:[#allocation70_spill]] }
0x197d   :  { %v2826_v32 = vsel %vm953_vm3, %v2820_v28, -inf  ;;  %v9620_v53 = vpack.c.bf16 %v754_v60, %v753_v54  ;;  %v8362_v60 = vld [vmem:[#allocation41] ss:$0 sm:$0xff] }
0x197e   :  { %2827 = vmax.xlane.f32.xlu0 %v2826_v32  ;;  %v2823_v31 = vsel %vm953_vm3, %v2815_v30, -inf  ;;  %v743_v32 = vld [vmem:[%s12933_s7 + $0x10] sm:$0xff] }
0x197f   :  { %2824 = vmax.xlane.f32.xlu1 %v2823_v31 }
0x1a0b   :  { %v2828_v33 = vpop.xlane.xlu0 %2827 }
0x1a0c   :  { %v2830_v35 = vsub.f32 %v2820_v28, %v2828_v33  ;;  %v2825_v36 = vpop.xlane.xlu1 %2824  ;;  %v744_v33 = vld [vmem:[%s12933_s7 + $0x18] sm:$0xff] }
0x1a0d   :  { %v2829_v38 = vsub.f32 %v2815_v30, %v2825_v36  ;;  %v742_v30 = vld [vmem:[%s12933_s7 + $0x8] sm:$0xff]  ;;  %v644_v36 = vld [vmem:[%s12934_s10] sm:$0xff]  ;;  %s12947_s7 = sld [smem:[#allocation67_spill]] }
0x1a0e   :  { %v2833_v41 = vmul.f32 1.442695, %v2830_v35  ;;  %v9628_v31 = vpack.c.bf16 %v742_v30, %v741_v29  ;;  %v9632_v35 = vpack.c.bf16 %v744_v33, %v743_v32  ;;  %v12181_v33 = vld [vmem:[%s11669_s27 + $0x8] sm:$0xff] }
0x1a0f   :  { %v2831_v42 = vmul.f32 1.442695, %v2829_v38  ;;  %v645_v38 = vld [vmem:[%s12934_s10 + $0x8] sm:$0xff] }
0x1a10   :  { %10357 = vpow2.f32 %v2833_v41  ;;  %9629 = vmatprep.subr.bf16.mxu1 %v9628_v31  ;;  %v9652_v41 = vpack.c.bf16 %v645_v38, %v644_v36 }
0x1a11   :  { %10359 = vpow2.f32 %v2831_v42  ;;  %9631 = vmatpush3.bf16.msra.mxu1 %v9628_v31  ;;  %v745_v42 = vld [vmem:[%s12935_s11] sm:$0xff] }
0x1a12   :  { %9633 = vmatprep.subr.bf16.mxu1 %v9632_v35 }
0x1a15   :  { %9635 = vmatpush3.bf16.msra.mxu1 %v9632_v35  ;;  %v12184_v35 = vld [vmem:[%s11669_s27] sm:$0xff] }
0x1a16   :  { %9653 = vmatprep.subr.bf16.mxu1 %v9652_v41 }
0x1a1a   :  { %v10358_v43 = vpop.eup %10357 }
0x1a1b   :  { %v10360_v44 = vpop.eup %10359  ;;  %v2838_v45 = vsel %vm953_vm3, %v10358_v43, 0.0 }
0x1a1c   :  { %2839 = vadd.xlane.f32.xlu1 %v2838_v45  ;;  %v2835_v46 = vsel %vm953_vm3, %v10360_v44, 0.0 }
0x1a1d   :  { %2836 = vadd.xlane.f32.xlu0 %v2835_v46  ;;  %v748_v46 = vld [vmem:[%s12935_s11 + $0x18] sm:$0xff] }
0x1a2d   :  { %2934 = vrot.lane.b32.xlu1 %v12049_v56, %s11310_s26 }
0x1a31   :  { %2936 = vrot.lane.b32.xlu1 %v12047_v55, %s11310_s26 }
0x1a33   :  { %10139 = vrot.lane.b32.xlu0 %v11989_v40, %s11311_s19 }
0x1a35   :  { %2944 = vrot.lane.b32.xlu1 %v9031_v25, %s11312_s14 }
0x1a37   :  { %2942 = vrot.lane.b32.xlu0 %v2723_v26, %s11312_s14 }
0x1aa9   :  { %v2840_v47 = vpop.xlane.xlu1 %2839 }
0x1aaa   :  { %10361 = vrcp.f32 %v2840_v47  ;;  %v2837_v48 = vpop.xlane.xlu0 %2836 }
0x1aab   :  { %10363 = vrcp.f32 %v2837_v48  ;;  %v749_v48 = vld [vmem:[%s12935_s11 + $0x20] sm:$0xff] }
0x1aad   :  { %v2935_v0 = vpop.permute.xlu1 %2934 }
0x1aae   :  { %v10140_v49 = vpop.permute.xlu0 %10139  ;;  %v2956_v20 = vsel %vm869_vm1, %v12045_v52, %v2935_v0  ;;  %v646_v0 = vld [vmem:[%s12934_s10 + $0x10] sm:$0xff] }
0x1aaf   :  { %v10142_v50 = vunpack.i.h.bf16 %v10140_v49  ;;  %v10141_v56 = vunpack.i.l.bf16 %v10140_v49  ;;  %v750_v49 = vld [vmem:[%s12935_s11 + $0x28] sm:$0xff] }
0x1ab1   :  { %v9616_v57 = vpack.c.bf16 %v10142_v50, %v10141_v56  ;;  %v2937_v1 = vpop.permute.xlu1 %2936  ;;  %v9644_v50 = vpack.c.bf16 %v750_v49, %v749_v48 }
0x1ab2   :  { %v2943_v3 = vpop.permute.xlu0 %2942  ;;  %v2957_v19 = vsel %vm869_vm1, %v12043_v51, %v2937_v1  ;;  %v647_v1 = vld [vmem:[%s12934_s10 + $0x18] sm:$0xff]  ;;  %s12948_s10 = sld [smem:[#allocation82_spill]] }
0x1ab3   :  { %9617 = vmatprep.subr.bf16.mxu0 %v9616_v57  ;;  %v2958_v6 = vsel %vm953_vm3, %v2956_v20, %v2943_v3  ;;  %v9656_v20 = vpack.c.bf16 %v647_v1, %v646_v0 }
0x1ab4   :  { %v10362_v55 = vpop.eup %10361  ;;  %9619 = vmatpush3.bf16.msra.mxu0 %v9616_v57 }
0x1ab5   :  { %v10364_v40 = vpop.eup %10363  ;;  %v2844_v59 = vmul.f32 %v10362_v55, %v10358_v43  ;;  %9621 = vmatprep.subr.bf16.mxu0 %v9620_v53  ;;  %v2945_v2 = vpop.permute.xlu1 %2944  ;;  %v746_v43 = vld [vmem:[%s12935_s11 + $0x8] sm:$0xff] }
0x1ab6   :  { %v2842_v58 = vmul.f32 %v10364_v40, %v10360_v44  ;;  %v2959_v7 = vsel %vm953_vm3, %v2957_v19, %v2945_v2  ;;  %v747_v44 = vld [vmem:[%s12935_s11 + $0x10] sm:$0xff]  ;;  %v9636_v45 = vpack.c.bf16 %v746_v43, %v745_v42  ;;  %v12137_v19 = vld [vmem:[%s11664_s3 + $0x8] sm:$0xff] }
0x1ab7   :  { %v9640_v47 = vpack.c.bf16 %v748_v46, %v747_v44 }
0x1ab8   :  { %9043 = vmatprep.mubr.msk.f32.mxu0 %vm953_vm3, %v2842_v58 }
0x1ab9   :  { %9044 = vmatmul.mubr.msk.f32.vlgmr.msra.gmra.mrb[18].mxu0 %vm953_vm3, %v2844_v59 }
0x1aba   :  { %9623 = vmatpush3.bf16.msra.mxu0 %v9620_v53  ;;  %v8363_v53 = vld [vmem:[#allocation40] ss:$0 sm:$0xff] }
0x1abb   :  { %9625 = vmatprep.subr.bf16.mxu0 %v9624_v10 }
0x1abe   :  { %9627 = vmatpush3.bf16.msra.mxu0 %v9624_v10 }
0x1abf   :  { %9637 = vmatprep.subr.bf16.mxu0 %v9636_v45 }
0x1b8c   :  { %v9045_v62 = vpop.f32.mrb[18].mxu0 }
0x1b8d   :  { %2952 = vrot.lane.b32.xlu1 %v9045_v62, %s11313_s1  ;;  %v2923_v63 = vpop.f32.mrb[19].mxu0 }
0x1b8e   :  { %2950 = vrot.lane.b32.xlu0 %v2923_v63, %s11313_s1 }
0x1bff   :  { %v2953_v4 = vpop.permute.xlu1 %2952 }
0x1c00   :  { %v2951_v5 = vpop.permute.xlu0 %2950  ;;  %v2961_v9 = vsel %vm1691_vm4, %v2959_v7, %v2953_v4  ;;  %v12130_v4 = vld [vmem:[%s11664_s3] sm:$0xff]  ;;  %s12937_s3 = sld [smem:[#allocation80_spill]] }
0x1c01   :  { %v2960_v8 = vsel %vm1691_vm4, %v2958_v6, %v2951_v5  ;;  %v751_v6 = vld [vmem:[%s12935_s11 + $0x30] sm:$0xff]  ;;  %v752_v5 = vld [vmem:[%s12935_s11 + $0x38] sm:$0xff]  ;;  %s12949_s11 = sld [smem:[#allocation83_spill]] }
0x1c02   :  { %9054 = vmatprep.mubr.msk.f32.mxu0 %vm781_vm0, %v2960_v8  ;;  %v9648_v7 = vpack.c.bf16 %v752_v5, %v751_v6  ;;  %v8364_v8 = vld [vmem:[#allocation34] ss:$0 sm:$0xff] }
0x1c03   :  { %9055 = vmatmul.mubr.msk.f32.vlgmr.msra.gmra.mrb[20].mxu0 %vm781_vm0, %v2961_v9 }
0x1c04   :  { %9639 = vmatpush3.bf16.msra.mxu0 %v9636_v45 }
0x1c05   :  { %9641 = vmatprep.subr.bf16.mxu0 %v9640_v47 }
0x1c08   :  { %9643 = vmatpush3.bf16.msra.mxu0 %v9640_v47 }
0x1c09   :  { %9645 = vmatprep.subr.bf16.mxu0 %v9644_v50 }
0x1c0c   :  { %9647 = vmatpush3.bf16.msra.mxu0 %v9644_v50 }
0x1c0d   :  { %9649 = vmatprep.subr.bf16.mxu0 %v9648_v7 }
0x1c10   :  { %9651 = vmatpush3.bf16.msra.mxu0 %v9648_v7 }
0x1cd6   :  { %v9056_v14 = vpop.f32.mrb[20].mxu0 }
0x1cd7   :  { %v3046_v52 = vadd.f32 %v9056_v14, %v8359_v11  ;;  %v3040_v15 = vpop.f32.mrb[21].mxu0 }
0x1cd8   :  { %v3041_v16 = vadd.f32 %v8359_v11, %v3040_v15 }
0x1cd9   :  { %v3050_v51 = vadd.f32 %v3046_v52, %v11975_v34 }
0x1cda   :  { %v3049_v18 = vadd.f32 %v3041_v16, %v11973_v13 }
0x1cdb   :  { %v3054_v39 = vsel %vm781_vm0, %v3050_v51, 0.0 }
0x1cdc   :  { %3055 = vadd.xlane.f32.xlu1 %v3054_v39  ;;  %v3051_v21 = vsel %vm781_vm0, %v3049_v18, 0.0 }
0x1cdd   :  { %3052 = vadd.xlane.f32.xlu0 %v3051_v21 }
0x1d69   :  { %v3056_v37 = vpop.xlane.xlu1 %3055 }
0x1d6a   :  { %v3058_v22 = vmul.f32 0.03125, %v3056_v37  ;;  %v3053_v23 = vpop.xlane.xlu0 %3052 }
0x1d6b   :  { %v3057_v24 = vmul.f32 0.03125, %v3053_v23 }
0x1d6c   :  { %v3060_v25 = vsub.f32 %v3050_v51, %v3058_v22  ;;  %v8372_v51 = vld [vmem:[%s12936_s15] ss:$0 sm:$0xff]  ;;  %s12950_s15 = sld [smem:[#allocation75_spill]] }
0x1d6d   :  { %v3059_v26 = vsub.f32 %v3049_v18, %v3057_v24 }
0x1d6e   :  { %v3062_v34 = vmul.f32 %v3060_v25, %v3060_v25 }
0x1d6f   :  { %v3061_v27 = vmul.f32 %v3059_v26, %v3059_v26 }
0x1d70   :  { %v3066_v28 = vsel %vm781_vm0, %v3062_v34, 0.0 }
0x1d71   :  { %v3063_v13 = vsel %vm781_vm0, %v3061_v27, 0.0 }
0x1d72   :  { %3064 = vadd.xlane.f32.xlu0 %v3063_v13 }
0x1d76   :  { %3067 = vadd.xlane.f32.xlu0 %v3066_v28 }
0x1dff   :  { %v3065_v56 = vpop.xlane.xlu0 %3064 }
0x1e00   :  { %v3069_v57 = vmul.f32 0.03125, %v3065_v56 }
0x1e02   :  { %v3071_v55 = vadd.f32 1e-05, %v3069_v57 }
0x1e03   :  { %v3068_v40 = vpop.xlane.xlu0 %3067 }
0x1e04   :  { %10365 = vrsqrt.f32 %v3071_v55  ;;  %v3070_v58 = vmul.f32 0.03125, %v3068_v40 }
0x1e06   :  { %v3072_v59 = vadd.f32 1e-05, %v3070_v58 }
0x1e08   :  { %10367 = vrsqrt.f32 %v3072_v59 }
0x1e0e   :  { %v10366_v54 = vpop.eup %10365 }
0x1e0f   :  { %v3075_v12 = vmul.f32 %v10366_v54, %v3059_v26 }
0x1e11   :  { %v3083_v61 = vmul.f32 %v8362_v60, %v3075_v12 }
0x1e12   :  { %v10368_v10 = vpop.eup %10367 }
0x1e13   :  { %v3076_v62 = vmul.f32 %v10368_v10, %v3060_v25  ;;  %v12121_v63 = vadd.f32 %v8363_v53, %v3083_v61 }
0x1e15   :  { %v3084_v2 = vmul.f32 %v8362_v60, %v3076_v62  ;;  %9065 = vmatprep.mubr.msk.f32.mxu1 %vm781_vm0, %v12121_v63 }
0x1e17   :  { %v12127_v3 = vadd.f32 %v8363_v53, %v3084_v2 }
0x1e19   :  { %9066 = vmatmul.mubr.msk.f32.vlgmr.msra.gmra.mrb[22].mxu1 %vm781_vm0, %v12127_v3 }
0x1e1a   :  { %9655 = vmatpush3.bf16.msra.mxu1 %v9652_v41  ;;  %9095 = vmatprep.mubr.msk.f32.mxu1 %vm781_vm0, %v12130_v4 }
0x1e1b   :  { %9657 = vmatprep.subr.bf16.mxu1 %v9656_v20 }
0x1e1e   :  { %9659 = vmatpush3.bf16.msra.mxu1 %v9656_v20 }
0x1e21   :  { %9096 = vmatmul.mubr.msk.f32.vlgmr.msra.gmra.mrb[24].mxu1 %vm781_vm0, %v12137_v19 }
0x1eec   :  { %v9067_v9 = vpop.f32.mrb[22].mxu1 }
0x1eed   :  { %v3177_v11 = vadd.f32 %v9067_v9, %v8364_v8  ;;  %v3171_v14 = vpop.f32.mrb[23].mxu1 }
0x1eee   :  { %v3172_v52 = vadd.f32 %v8364_v8, %v3171_v14 }
0x1eef   :  { %v3181_v16 = vmax.f32 %v3177_v11, 0.0 }
0x1ef0   :  { %v3180_v15 = vmax.f32 %v3172_v52, 0.0 }
0x1ef2   :  { %9084 = vmatprep.mubr.msk.f32.mxu0 %vm1921_vm5, %v3180_v15 }
0x1ef3   :  { %9085 = vmatmul.mubr.msk.f32.vlgmr.msra.gmra.mrb[22].mxu0 %vm1921_vm5, %v3181_v16 }
0x1ef4   :  { %v9097_v18 = vpop.f32.mrb[24].mxu1 }
0x1ef5   :  { %v12146_v39 = vadd.f32 %v9097_v18, %v8372_v51  ;;  %v3391_v21 = vpop.f32.mrb[25].mxu1 }
0x1ef6   :  { %v12148_v37 = vadd.f32 %v8372_v51, %v3391_v21 }
0x1ef8   :  { %9102 = vmatprep.mubr.msk.f32.mxu1 %vm869_vm1, %v12148_v37  ;;  %v12154_v22 = vpack.i.bf16 %v12146_v39, %v12148_v37 }
0x1efa   :  { %10149 = vrot.lane.b32.xlu0 %v12154_v22, %s11302_s9  ;;  %10144 = vrot.lane.b32.xlu1 %v12154_v22, %s11300_s16 }
0x1efe   :  { %3598 = vrot.lane.b32.xlu1 %v12148_v37, %s11303_s18 }
0x1f02   :  { %3600 = vrot.lane.b32.xlu1 %v12146_v39, %s11303_s18 }
0x1f6c   :  { %v10150_v23 = vpop.permute.xlu0 %10149  ;;  %v10145_v24 = vpop.permute.xlu1 %10144 }
0x1f6d   :  { %v10152_v25 = vunpack.i.h.bf16 %v10150_v23  ;;  %v10151_v26 = vunpack.i.l.bf16 %v10150_v23  ;;  %v10147_v27 = vunpack.i.h.bf16 %v10145_v24  ;;  %v10146_v13 = vunpack.i.l.bf16 %v10145_v24 }
0x1f6f   :  { %v9660_v34 = vpack.c.bf16 %v10147_v27, %v10146_v13  ;;  %v9670_v28 = vpack.c.bf16 %v10152_v25, %v10151_v26 }
0x1f70   :  { %v3599_v29 = vpop.permute.xlu1 %3598 }
0x1f71   :  { %9662 = vmatprep.subr.msk.bf16.mxu1 %vm11821_vm2, %v9660_v34 }
0x1f72   :  { %9665 = vmatpush3.bf16.xpose.msk.msra.mxu1 %vm11821_vm2, %v9660_v34 }
0x1f73   :  { %9672 = vmatprep.subr.msk.bf16.mxu1 %vm11821_vm2, %v9670_v28 }
0x1f74   :  { %v3601_v30 = vpop.permute.xlu1 %3600 }
0x1f79   :  { %9103 = vmatmul.mubr.msk.f32.vlgmr.msra.gmra.mrb[26].mxu1 %vm869_vm1, %v12146_v39 }
0x1f7a   :  { %9675 = vmatpush3.bf16.xpose.msk.msra.mxu1 %vm11821_vm2, %v9670_v28  ;;  %9116 = vmatprep.mubr.msk.f32.mxu1 %vm869_vm1, %v3599_v29 }
0x1f81   :  { %9117 = vmatmul.mubr.msk.f32.vlgmr.msra.gmra.mrb[28].mxu1 %vm869_vm1, %v3601_v30 }
0x1fc6   :  { %v12176_v32 = vpop.f32.mrb[22].mxu0 }
0x1fc7   :  { %v12178_v31 = vpop.f32.mrb[23].mxu0 }
0x204c   :  { %v9104_v36 = vpop.f32.mrb[26].mxu1 }
0x204d   :  { %v3486_v38 = vadd.f32 %v9104_v36, %v12181_v33  ;;  %v3480_v41 = vpop.f32.mrb[27].mxu1 }
0x204e   :  { %v3481_v42 = vadd.f32 %v3480_v41, %v12184_v35 }
0x204f   :  { %v3492_v43 = vsel %vm953_vm3, %v3486_v38, -inf }
0x2050   :  { %3493 = vmax.xlane.f32.xlu1 %v3492_v43  ;;  %v3489_v44 = vsel %vm953_vm3, %v3481_v42, -inf }
0x2051   :  { %3490 = vmax.xlane.f32.xlu0 %v3489_v44 }
0x2054   :  { %v9118_v45 = vpop.f32.mrb[28].mxu1 }
0x2055   :  { %v3680_v46 = vpop.f32.mrb[29].mxu1  ;;  %v3686_v48 = vadd.f32 %v9118_v45, %v12181_v33 }
0x2056   :  { %v3681_v47 = vadd.f32 %v3680_v46, %v12184_v35 }
0x2057   :  { %v3692_v50 = vsel %vm953_vm3, %v3686_v48, -inf }
0x2058   :  { %v3689_v49 = vsel %vm953_vm3, %v3681_v47, -inf }
0x2059   :  { %3690 = vmax.xlane.f32.xlu0 %v3689_v49 }
0x205d   :  { %3693 = vmax.xlane.f32.xlu0 %v3692_v50 }
0x2061   :  { %10154 = vrot.lane.b32.xlu1 %v12154_v22, %s11301_s5 }
0x20dd   :  { %v3494_v56 = vpop.xlane.xlu1 %3493 }
0x20de   :  { %v3496_v57 = vsub.f32 %v3486_v38, %v3494_v56  ;;  %v3491_v55 = vpop.xlane.xlu0 %3490 }
0x20df   :  { %v3495_v40 = vsub.f32 %v3481_v42, %v3491_v55 }
0x20e0   :  { %v3499_v58 = vmul.f32 1.442695, %v3496_v57 }
0x20e1   :  { %v3497_v59 = vmul.f32 1.442695, %v3495_v40  ;;  %v10155_v54 = vpop.permute.xlu1 %10154 }
0x20e2   :  { %10369 = vpow2.f32 %v3499_v58  ;;  %v10157_v60 = vunpack.i.h.bf16 %v10155_v54  ;;  %v10156_v12 = vunpack.i.l.bf16 %v10155_v54 }
0x20e3   :  { %10371 = vpow2.f32 %v3497_v59 }
0x20e4   :  { %v9666_v53 = vpack.c.bf16 %v10157_v60, %v10156_v12 }
0x20e6   :  { %9667 = vmatprep.subr.bf16.mxu0 %v9666_v53  ;;  %v3691_v61 = vpop.xlane.xlu0 %3690 }
0x20e7   :  { %9669 = vmatpush3.bf16.msra.mxu0 %v9666_v53  ;;  %v3695_v8 = vsub.f32 %v3681_v47, %v3691_v61 }
0x20e9   :  { %v3697_v9 = vmul.f32 1.442695, %v3695_v8 }
0x20ea   :  { %v3694_v10 = vpop.xlane.xlu0 %3693 }
0x20eb   :  { %v3696_v62 = vsub.f32 %v3686_v48, %v3694_v10 }
0x20ec   :  { %v10370_v0 = vpop.eup %10369 }
0x20ed   :  { %v10372_v1 = vpop.eup %10371  ;;  %v3699_v2 = vmul.f32 1.442695, %v3696_v62  ;;  %v3504_v20 = vsel %vm953_vm3, %v10370_v0, 0.0 }
0x20ee   :  { %3505 = vadd.xlane.f32.xlu0 %v3504_v20  ;;  %v3501_v6 = vsel %vm953_vm3, %v10372_v1, 0.0 }
0x20ef   :  { %10373 = vpow2.f32 %v3699_v2  ;;  %3502 = vadd.xlane.f32.xlu1 %v3501_v6 }
0x20f0   :  { %10375 = vpow2.f32 %v3697_v9 }
0x20f9   :  { %v10374_v5 = vpop.eup %10373 }
0x20fa   :  { %v3704_v7 = vsel %vm953_vm3, %v10374_v5, 0.0  ;;  %v10376_v11 = vpop.eup %10375 }
0x20fb   :  { %3705 = vadd.xlane.f32.xlu0 %v3704_v7  ;;  %v3701_v14 = vsel %vm953_vm3, %v10376_v11, 0.0 }
0x2100   :  { %10164 = vrot.lane.b32.xlu1 %v12154_v22, %s11305_s0 }
0x2111   :  { %10159 = vrot.lane.b32.xlu0 %v12154_v22, %s11304_s17 }
0x2115   :  { %3800 = vrot.lane.b32.xlu0 %v12146_v39, %s11306_s22 }
0x2124   :  { %3702 = vadd.xlane.f32.xlu1 %v3701_v14 }
0x2135   :  { %3798 = vrot.lane.b32.xlu1 %v12148_v37, %s11306_s22 }
0x217b   :  { %v3506_v52 = vpop.xlane.xlu0 %3505 }
0x217c   :  { %10377 = vrcp.f32 %v3506_v52  ;;  %v3503_v15 = vpop.xlane.xlu1 %3502 }
0x217d   :  { %10379 = vrcp.f32 %v3503_v15 }
0x2180   :  { %v10165_v24 = vpop.permute.xlu1 %10164 }
0x2181   :  { %v10167_v26 = vunpack.i.h.bf16 %v10165_v24  ;;  %v10166_v27 = vunpack.i.l.bf16 %v10165_v24 }
0x2183   :  { %v9680_v29 = vpack.c.bf16 %v10167_v26, %v10166_v27 }
0x2186   :  { %v10378_v16 = vpop.eup %10377 }
0x2187   :  { %v10380_v51 = vpop.eup %10379  ;;  %v3510_v23 = vmul.f32 %v10378_v16, %v10370_v0 }
0x2188   :  { %v3706_v18 = vpop.xlane.xlu0 %3705  ;;  %v3508_v21 = vmul.f32 %v10380_v51, %v10372_v1 }
0x2189   :  { %10381 = vrcp.f32 %v3706_v18 }
0x218a   :  { %9109 = vmatprep.mubr.msk.f32.mxu0 %vm953_vm3, %v3508_v21 }
0x218b   :  { %9110 = vmatmul.mubr.msk.f32.vlgmr.msra.gmra.mrb[24].mxu0 %vm953_vm3, %v3510_v23 }
0x218c   :  { %v10160_v25 = vpop.permute.xlu0 %10159 }
0x218d   :  { %v10162_v13 = vunpack.i.h.bf16 %v10160_v25  ;;  %v10161_v34 = vunpack.i.l.bf16 %v10160_v25 }
0x218f   :  { %v9676_v28 = vpack.c.bf16 %v10162_v13, %v10161_v34 }
0x2190   :  { %v3801_v44 = vpop.permute.xlu0 %3800 }
0x2191   :  { %9677 = vmatprep.subr.bf16.mxu0 %v9676_v28 }
0x2192   :  { %9679 = vmatpush3.bf16.msra.mxu0 %v9676_v28 }
0x2193   :  { %9682 = vmatprep.subr.msk.bf16.mxu0 %vm11821_vm2, %v9680_v29  ;;  %v10382_v36 = vpop.eup %10381 }
0x2194   :  { %v3710_v42 = vmul.f32 %v10382_v36, %v10374_v5 }
0x21b1   :  { %v3703_v30 = vpop.xlane.xlu1 %3702 }
0x21b2   :  { %10383 = vrcp.f32 %v3703_v30 }
0x21b5   :  { %v3799_v43 = vpop.permute.xlu1 %3798 }
0x21bc   :  { %v10384_v38 = vpop.eup %10383 }
0x21bd   :  { %v3708_v41 = vmul.f32 %v10384_v38, %v10376_v11 }
0x21bf   :  { %9123 = vmatprep.mubr.msk.f32.mxu0 %vm953_vm3, %v3708_v41 }
0x21c0   :  { %9124 = vmatmul.mubr.msk.f32.vlgmr.msra.gmra.mrb[26].mxu0 %vm953_vm3, %v3710_v42 }
0x21c1   :  { %9685 = vmatpush3.bf16.xpose.msk.msra.mxu0 %vm11821_vm2, %v9680_v29  ;;  %9130 = vmatprep.mubr.msk.f32.mxu0 %vm869_vm1, %v3799_v43 }
0x21c8   :  { %9131 = vmatmul.mubr.msk.f32.vlgmr.msra.gmra.mrb[28].mxu0 %vm869_vm1, %v3801_v44 }
0x225e   :  { %v12218_v45 = vpop.f32.mrb[24].mxu0 }
0x225f   :  { %v12220_v46 = vpop.f32.mrb[25].mxu0 }
0x2293   :  { %v12222_v47 = vpop.f32.mrb[26].mxu0 }
0x2294   :  { %v12224_v48 = vpop.f32.mrb[27].mxu0 }
0x229b   :  { %v9132_v49 = vpop.f32.mrb[28].mxu0 }
0x229c   :  { %v3886_v50 = vadd.f32 %v9132_v49, %v12181_v33  ;;  %v3880_v56 = vpop.f32.mrb[29].mxu0 }
0x229d   :  { %v3881_v57 = vadd.f32 %v3880_v56, %v12184_v35 }
0x229e   :  { %v3892_v55 = vsel %vm953_vm3, %v3886_v50, -inf }
0x229f   :  { %3893 = vmax.xlane.f32.xlu0 %v3892_v55  ;;  %v3889_v40 = vsel %vm953_vm3, %v3881_v57, -inf }
0x22a0   :  { %3890 = vmax.xlane.f32.xlu1 %v3889_v40  ;;  %v640_v40 = vld [vmem:[%s12937_s3] sm:$0xff] }
0x232c   :  { %v3894_v58 = vpop.xlane.xlu0 %3893 }
0x232d   :  { %v3896_v59 = vsub.f32 %v3886_v50, %v3894_v58  ;;  %v3891_v54 = vpop.xlane.xlu1 %3890  ;;  %v641_v58 = vld [vmem:[%s12937_s3 + $0x8] sm:$0xff] }
0x232e   :  { %v3895_v60 = vsub.f32 %v3881_v57, %v3891_v54  ;;  %v642_v54 = vld [vmem:[%s12937_s3 + $0x10] sm:$0xff] }
0x232f   :  { %v3899_v12 = vmul.f32 1.442695, %v3896_v59  ;;  %v9700_v59 = vpack.c.bf16 %v641_v58, %v640_v40 }
0x2330   :  { %v3897_v53 = vmul.f32 1.442695, %v3895_v60  ;;  %v643_v60 = vld [vmem:[%s12937_s3 + $0x18] sm:$0xff]  ;;  %s12951_s3 = sld [smem:[#allocation74_spill]] }
0x2331   :  { %10385 = vpow2.f32 %v3899_v12  ;;  %v9704_v12 = vpack.c.bf16 %v643_v60, %v642_v54 }
0x2332   :  { %10387 = vpow2.f32 %v3897_v53 }
0x233b   :  { %v10386_v61 = vpop.eup %10385 }
0x233c   :  { %v10388_v10 = vpop.eup %10387  ;;  %v3904_v62 = vsel %vm953_vm3, %v10386_v61, 0.0 }
0x233d   :  { %3905 = vadd.xlane.f32.xlu1 %v3904_v62  ;;  %v3901_v0 = vsel %vm953_vm3, %v10388_v10, 0.0 }
0x233e   :  { %3902 = vadd.xlane.f32.xlu0 %v3901_v0 }
0x234e   :  { %10174 = vrot.lane.b32.xlu1 %v12154_v22, %s11307_s23 }
0x2352   :  { %3998 = vrot.lane.b32.xlu1 %v12148_v37, %s11308_s8 }
0x2354   :  { %10169 = vrot.lane.b32.xlu0 %v12154_v22, %s11309_s13 }
0x2358   :  { %4000 = vrot.lane.b32.xlu0 %v12146_v39, %s11308_s8 }
0x23ca   :  { %v3906_v1 = vpop.xlane.xlu1 %3905 }
0x23cb   :  { %10389 = vrcp.f32 %v3906_v1  ;;  %v3903_v2 = vpop.xlane.xlu0 %3902 }
0x23cc   :  { %10391 = vrcp.f32 %v3903_v2 }
0x23ce   :  { %v10175_v20 = vpop.permute.xlu1 %10174 }
0x23cf   :  { %v10170_v6 = vpop.permute.xlu0 %10169  ;;  %v10177_v5 = vunpack.i.h.bf16 %v10175_v20  ;;  %v10176_v7 = vunpack.i.l.bf16 %v10175_v20 }
0x23d0   :  { %v10172_v8 = vunpack.i.h.bf16 %v10170_v6  ;;  %v10171_v9 = vunpack.i.l.bf16 %v10170_v6 }
0x23d1   :  { %v9690_v14 = vpack.c.bf16 %v10177_v5, %v10176_v7 }
0x23d2   :  { %v9686_v11 = vpack.c.bf16 %v10172_v8, %v10171_v9  ;;  %v3999_v16 = vpop.permute.xlu1 %3998 }
0x23d3   :  { %v4001_v51 = vpop.permute.xlu0 %4000 }
0x23d4   :  { %9687 = vmatprep.subr.bf16.mxu1 %v9686_v11 }
0x23d5   :  { %v10390_v37 = vpop.eup %10389  ;;  %9689 = vmatpush3.bf16.msra.mxu1 %v9686_v11 }
0x23d6   :  { %v10392_v52 = vpop.eup %10391  ;;  %9692 = vmatprep.subr.msk.bf16.mxu1 %vm11821_vm2, %v9690_v14  ;;  %v3910_v15 = vmul.f32 %v10390_v37, %v10386_v61 }
0x23d7   :  { %v3908_v39 = vmul.f32 %v10392_v52, %v10388_v10  ;;  %v8367_v10 = vld [vmem:[#allocation35] ss:$0 sm:$0xff] }
0x23d8   :  { %v3261_v62 = vadd.f32 %v8367_v10, %v12178_v31  ;;  %v3266_v0 = vadd.f32 %v12176_v32, %v8367_v10 }
0x23d9   :  { %9137 = vmatprep.mubr.msk.f32.mxu1 %vm953_vm3, %v3908_v39 }
0x23da   :  { %9138 = vmatmul.mubr.msk.f32.vlgmr.msra.gmra.mrb[30].mxu1 %vm953_vm3, %v3910_v15  ;;  %v3269_v1 = vadd.f32 %v3261_v62, %v12121_v63  ;;  %v3270_v2 = vadd.f32 %v3266_v0, %v12127_v3 }
0x23db   :  { %9144 = vmatprep.mubr.msk.f32.mxu1 %vm869_vm1, %v3999_v16 }
0x23dc   :  { %v3271_v20 = vsel %vm781_vm0, %v3269_v1, 0.0  ;;  %v3274_v6 = vsel %vm781_vm0, %v3270_v2, 0.0 }
0x23de   :  { %9695 = vmatpush3.bf16.xpose.msk.msra.mxu1 %vm11821_vm2, %v9690_v14 }
0x23e5   :  { %9145 = vmatmul.mubr.msk.f32.vlgmr.msra.gmra.mrb[32].mxu1 %vm869_vm1, %v4001_v51 }
0x24ad   :  { %v9139_v18 = vpop.f32.mrb[30].mxu1 }
0x24ae   :  { %v3989_v21 = vpop.f32.mrb[31].mxu1 }
0x24b8   :  { %v9146_v23 = vpop.f32.mrb[32].mxu1 }
0x24b9   :  { %v4086_v24 = vadd.f32 %v9146_v23, %v12181_v33  ;;  %v4080_v25 = vpop.f32.mrb[33].mxu1 }
0x24ba   :  { %v4081_v26 = vadd.f32 %v4080_v25, %v12184_v35 }
0x24bb   :  { %v4092_v27 = vsel %vm953_vm3, %v4086_v24, -inf }
0x24bc   :  { %4093 = vmax.xlane.f32.xlu0 %v4092_v27  ;;  %v4089_v13 = vsel %vm953_vm3, %v4081_v26, -inf }
0x24bd   :  { %4090 = vmax.xlane.f32.xlu1 %v4089_v13 }
0x2549   :  { %v4094_v34 = vpop.xlane.xlu0 %4093 }
0x254a   :  { %v4096_v28 = vsub.f32 %v4086_v24, %v4094_v34  ;;  %v4091_v29 = vpop.xlane.xlu1 %4090  ;;  %v8399_v24 = vld [vmem:[%s12938_s6] ss:$0 sm:$0xff]  ;;  %s12952_s6 = sld [smem:[#allocation64_spill]] }
0x254b   :  { %v4095_v30 = vsub.f32 %v4081_v26, %v4091_v29 }
0x254c   :  { %v4099_v36 = vmul.f32 1.442695, %v4096_v28 }
0x254d   :  { %v4097_v38 = vmul.f32 1.442695, %v4095_v30 }
0x254e   :  { %10393 = vpow2.f32 %v4099_v36 }
0x254f   :  { %10395 = vpow2.f32 %v4097_v38 }
0x2558   :  { %v10394_v41 = vpop.eup %10393 }
0x2559   :  { %v10396_v42 = vpop.eup %10395  ;;  %v4104_v33 = vsel %vm953_vm3, %v10394_v41, 0.0 }
0x255a   :  { %4105 = vadd.xlane.f32.xlu1 %v4104_v33  ;;  %v4101_v35 = vsel %vm953_vm3, %v10396_v42, 0.0 }
0x255b   :  { %4102 = vadd.xlane.f32.xlu0 %v4101_v35  ;;  %v8371_v35 = vld [vmem:[#allocation43] ss:$0 sm:$0xff] }
0x256b   :  { %4200 = vrot.lane.b32.xlu1 %v12224_v48, %s11310_s26 }
0x256f   :  { %4202 = vrot.lane.b32.xlu1 %v12222_v47, %s11310_s26 }
0x2571   :  { %10179 = vrot.lane.b32.xlu0 %v12154_v22, %s11311_s19 }
0x2573   :  { %4210 = vrot.lane.b32.xlu1 %v9139_v18, %s11312_s14 }
0x2575   :  { %4208 = vrot.lane.b32.xlu0 %v3989_v21, %s11312_s14 }
0x25e7   :  { %v4106_v43 = vpop.xlane.xlu1 %4105 }
0x25e8   :  { %10397 = vrcp.f32 %v4106_v43  ;;  %v4103_v44 = vpop.xlane.xlu0 %4102 }
0x25e9   :  { %10399 = vrcp.f32 %v4103_v44 }
0x25eb   :  { %v4201_v5 = vpop.permute.xlu1 %4200 }
0x25ec   :  { %v10180_v49 = vpop.permute.xlu0 %10179  ;;  %v4222_v11 = vsel %vm869_vm1, %v12220_v46, %v4201_v5  ;;  %v628_v5 = vld [vmem:[%s12940_s21] sm:$0xff] }
0x25ed   :  { %v10182_v50 = vunpack.i.h.bf16 %v10180_v49  ;;  %v10181_v48 = vunpack.i.l.bf16 %v10180_v49 }
0x25ef   :  { %v9696_v56 = vpack.c.bf16 %v10182_v50, %v10181_v48  ;;  %v4203_v7 = vpop.permute.xlu1 %4202  ;;  %v621_v50 = vld [vmem:[%s12939_s4 + $0x8] sm:$0xff] }
0x25f0   :  { %v4209_v9 = vpop.permute.xlu0 %4208  ;;  %v4223_v32 = vsel %vm869_vm1, %v12218_v45, %v4203_v7  ;;  %v629_v7 = vld [vmem:[%s12940_s21 + $0x8] sm:$0xff] }
0x25f1   :  { %9697 = vmatprep.subr.bf16.mxu0 %v9696_v56  ;;  %v4224_v63 = vsel %vm953_vm3, %v4222_v11, %v4209_v9  ;;  %v9708_v9 = vpack.c.bf16 %v629_v7, %v628_v5  ;;  %v631_v11 = vld [vmem:[%s12940_s21 + $0x18] sm:$0xff] }
0x25f2   :  { %v10398_v47 = vpop.eup %10397  ;;  %9699 = vmatpush3.bf16.msra.mxu0 %v9696_v56  ;;  %v622_v56 = vld [vmem:[%s12939_s4 + $0x10] sm:$0xff] }
0x25f3   :  { %v10400_v22 = vpop.eup %10399  ;;  %v4110_v55 = vmul.f32 %v10398_v47, %v10394_v41  ;;  %9701 = vmatprep.subr.bf16.mxu0 %v9700_v59  ;;  %v4211_v8 = vpop.permute.xlu1 %4210  ;;  %v8370_v41 = vld [vmem:[#allocation44] ss:$0 sm:$0xff]  ;;  %v623_v47 = vld [vmem:[%s12939_s4 + $0x18] sm:$0xff]  ;;  %9709 = vmatprep.subr.bf16.mxu1 %v9708_v9 }
0x25f4   :  { %v4108_v57 = vmul.f32 %v10400_v22, %v10396_v42  ;;  %v4225_v14 = vsel %vm953_vm3, %v4223_v32, %v4211_v8  ;;  %v9720_v22 = vpack.c.bf16 %v623_v47, %v622_v56  ;;  %v630_v8 = vld [vmem:[%s12940_s21 + $0x10] sm:$0xff]  ;;  %9711 = vmatpush3.bf16.msra.mxu1 %v9708_v9  ;;  %s12954_s21 = sld [smem:[#allocation94_spill]] }
0x25f6   :  { %9151 = vmatprep.mubr.msk.f32.mxu0 %vm953_vm3, %v4108_v57 }
0x25f7   :  { %9152 = vmatmul.mubr.msk.f32.vlgmr.msra.gmra.mrb[30].mxu0 %vm953_vm3, %v4110_v55 }
0x25f8   :  { %9703 = vmatpush3.bf16.msra.mxu0 %v9700_v59 }
0x25f9   :  { %9705 = vmatprep.subr.bf16.mxu0 %v9704_v12 }
0x25fc   :  { %9707 = vmatpush3.bf16.msra.mxu0 %v9704_v12 }
0x26ca   :  { %v9153_v53 = vpop.f32.mrb[30].mxu0 }
0x26cb   :  { %4218 = vrot.lane.b32.xlu1 %v9153_v53, %s11313_s1  ;;  %v4189_v61 = vpop.f32.mrb[31].mxu0 }
0x26cc   :  { %4216 = vrot.lane.b32.xlu0 %v4189_v61, %s11313_s1 }
0x26eb   :  { %3272 = vadd.xlane.f32.xlu0 %v3271_v20 }
0x26ef   :  { %3275 = vadd.xlane.f32.xlu1 %v3274_v6 }
0x273d   :  { %v4219_v31 = vpop.permute.xlu1 %4218 }
0x273e   :  { %v4217_v3 = vpop.permute.xlu0 %4216  ;;  %v4227_v52 = vsel %vm1691_vm4, %v4225_v14, %v4219_v31  ;;  %v9712_v31 = vpack.c.bf16 %v631_v11, %v630_v8 }
0x273f   :  { %v4226_v37 = vsel %vm1691_vm4, %v4224_v63, %v4217_v3 }
0x2740   :  { %9162 = vmatprep.mubr.msk.f32.mxu0 %vm781_vm0, %v4226_v37  ;;  %9713 = vmatprep.subr.bf16.mxu1 %v9712_v31 }
0x2741   :  { %9163 = vmatmul.mubr.msk.f32.vlgmr.msra.gmra.mrb[32].mxu0 %vm781_vm0, %v4227_v52  ;;  %9715 = vmatpush3.bf16.msra.mxu1 %v9712_v31 }
0x2778   :  { %v3273_v39 = vpop.xlane.xlu0 %3272 }
0x2779   :  { %v3277_v46 = vmul.f32 0.03125, %v3273_v39 }
0x277b   :  { %v3279_v15 = vsub.f32 %v3269_v1, %v3277_v46  ;;  %v8402_v46 = vld [vmem:[%s12941_s24] ss:$0 sm:$0xff]  ;;  %s12955_s24 = sld [smem:[#allocation77_spill]] }
0x277c   :  { %v3276_v51 = vpop.xlane.xlu1 %3275 }
0x277d   :  { %v3281_v16 = vmul.f32 %v3279_v15, %v3279_v15  ;;  %v3278_v27 = vmul.f32 0.03125, %v3276_v51 }
0x277f   :  { %v3283_v45 = vsel %vm781_vm0, %v3281_v16, 0.0  ;;  %v3280_v29 = vsub.f32 %v3270_v2, %v3278_v27  ;;  %v8403_v16 = vld [vmem:[%s12942_s28] ss:$0 sm:$0xff]  ;;  %s12956_s28 = sld [smem:[#allocation76_spill]] }
0x2780   :  { %3284 = vadd.xlane.f32.xlu1 %v3283_v45 }
0x2781   :  { %v3282_v43 = vmul.f32 %v3280_v29, %v3280_v29 }
0x2783   :  { %v3286_v49 = vsel %vm781_vm0, %v3282_v43, 0.0 }
0x280d   :  { %v3285_v18 = vpop.xlane.xlu1 %3284 }
0x280e   :  { %v3289_v21 = vmul.f32 0.03125, %v3285_v18 }
0x2810   :  { %v3291_v23 = vadd.f32 1e-05, %v3289_v21 }
0x2812   :  { %10401 = vrsqrt.f32 %v3291_v23 }
0x2814   :  { %v9164_v25 = vpop.f32.mrb[32].mxu0 }
0x2815   :  { %v4306_v26 = vpop.f32.mrb[33].mxu0  ;;  %v4312_v13 = vadd.f32 %v9164_v25, %v8399_v24  ;;  %v8407_v25 = vld [vmem:[%s12943_s12] ss:$0 sm:$0xff] }
0x2816   :  { %v4307_v34 = vadd.f32 %v8399_v24, %v4306_v26 }
0x2817   :  { %v4316_v30 = vadd.f32 %v4312_v13, %v12137_v19  ;;  %v620_v19 = vld [vmem:[%s12939_s4] sm:$0xff]  ;;  %s12953_s4 = sld [smem:[#allocation65_spill]] }
0x2818   :  { %v4315_v28 = vadd.f32 %v4307_v34, %v12130_v4  ;;  %v9716_v48 = vpack.c.bf16 %v621_v50, %v620_v19  ;;  %v12350_v50 = vld [vmem:[%s12945_s2 + $0x8] sm:$0xff] }
0x2819   :  { %v4320_v33 = vsel %vm781_vm0, %v4316_v30, 0.0 }
0x281a   :  { %v4317_v36 = vsel %vm781_vm0, %v4315_v28, 0.0  ;;  %9717 = vmatprep.subr.bf16.mxu0 %v9716_v48 }
0x281b   :  { %4318 = vadd.xlane.f32.xlu0 %v4317_v36  ;;  %9719 = vmatpush3.bf16.msra.mxu0 %v9716_v48  ;;  %v12353_v48 = vld [vmem:[%s12945_s2] sm:$0xff] }
0x281c   :  { %v10402_v38 = vpop.eup %10401  ;;  %9721 = vmatprep.subr.bf16.mxu0 %v9720_v22 }
0x281d   :  { %v3295_v42 = vmul.f32 %v10402_v38, %v3279_v15 }
0x281f   :  { %4321 = vadd.xlane.f32.xlu0 %v4320_v33  ;;  %v3303_v44 = vmul.f32 %v8370_v41, %v3295_v42  ;;  %9723 = vmatpush3.bf16.msra.mxu0 %v9720_v22  ;;  %v8404_v42 = vld [vmem:[%s12944_s29] ss:$0 sm:$0xff] }
0x2821   :  { %v12292_v4 = vadd.f32 %v8371_v35, %v3303_v44 }
0x2823   :  { %9184 = vmatprep.mubr.msk.f32.mxu0 %vm781_vm0, %v12292_v4  ;;  %3287 = vadd.xlane.f32.xlu0 %v3286_v49 }
0x28a8   :  { %v4319_v57 = vpop.xlane.xlu0 %4318 }
0x28a9   :  { %v4323_v55 = vmul.f32 0.03125, %v4319_v57 }
0x28ab   :  { %v4325_v40 = vsub.f32 %v4315_v28, %v4323_v55 }
0x28ac   :  { %v4322_v58 = vpop.xlane.xlu0 %4321 }
0x28ad   :  { %v4324_v59 = vmul.f32 0.03125, %v4322_v58  ;;  %v4327_v54 = vmul.f32 %v4325_v40, %v4325_v40 }
0x28af   :  { %v4326_v60 = vsub.f32 %v4316_v30, %v4324_v59  ;;  %v4329_v12 = vsel %vm781_vm0, %v4327_v54, 0.0 }
0x28b0   :  { %4330 = vadd.xlane.f32.xlu1 %v4329_v12  ;;  %v3288_v53 = vpop.xlane.xlu0 %3287 }
0x28b1   :  { %v3290_v61 = vmul.f32 0.03125, %v3288_v53  ;;  %v4328_v10 = vmul.f32 %v4326_v60, %v4326_v60 }
0x28b3   :  { %v3292_v62 = vadd.f32 1e-05, %v3290_v61  ;;  %v4332_v0 = vsel %vm781_vm0, %v4328_v10, 0.0 }
0x28b4   :  { %4333 = vadd.xlane.f32.xlu0 %v4332_v0 }
0x28b5   :  { %10403 = vrsqrt.f32 %v3292_v62 }
0x28bf   :  { %v10404_v1 = vpop.eup %10403 }
0x28c0   :  { %v3296_v2 = vmul.f32 %v10404_v1, %v3280_v29 }
0x28c2   :  { %v3304_v20 = vmul.f32 %v8370_v41, %v3296_v2 }
0x28c4   :  { %v12303_v6 = vadd.f32 %v8371_v35, %v3304_v20 }
0x28c6   :  { %9185 = vmatmul.mubr.msk.f32.vlgmr.msra.gmra.mrb[34].mxu0 %vm781_vm0, %v12303_v6 }
0x293d   :  { %v4331_v32 = vpop.xlane.xlu1 %4330 }
0x293e   :  { %v4335_v63 = vmul.f32 0.03125, %v4331_v32 }
0x2940   :  { %v4337_v3 = vadd.f32 1e-05, %v4335_v63 }
0x2941   :  { %v4334_v14 = vpop.xlane.xlu0 %4333 }
0x2942   :  { %10405 = vrsqrt.f32 %v4337_v3  ;;  %v4336_v37 = vmul.f32 0.03125, %v4334_v14 }
0x2944   :  { %v4338_v52 = vadd.f32 1e-05, %v4336_v37 }
0x2946   :  { %10407 = vrsqrt.f32 %v4338_v52 }
0x294c   :  { %v10406_v39 = vpop.eup %10405 }
0x294d   :  { %v4341_v15 = vmul.f32 %v10406_v39, %v4325_v40 }
0x294f   :  { %v4349_v45 = vmul.f32 %v8402_v46, %v4341_v15 }
0x2950   :  { %v10408_v51 = vpop.eup %10407 }
0x2951   :  { %v4342_v18 = vmul.f32 %v10408_v51, %v4326_v60  ;;  %v12313_v21 = vadd.f32 %v8403_v16, %v4349_v45 }
0x2953   :  { %v4350_v23 = vmul.f32 %v8402_v46, %v4342_v18  ;;  %9173 = vmatprep.mubr.msk.f32.mxu1 %vm781_vm0, %v12313_v21 }
0x2955   :  { %v12317_v24 = vadd.f32 %v8403_v16, %v4350_v23 }
0x2957   :  { %9174 = vmatmul.mubr.msk.f32.vlgmr.msra.gmra.mrb[34].mxu1 %vm781_vm0, %v12317_v24 }
0x2999   :  { %v9186_v26 = vpop.f32.mrb[34].mxu0 }
0x299a   :  { %v4530_v27 = vadd.f32 %v9186_v26, %v8407_v25  ;;  %v4524_v13 = vpop.f32.mrb[35].mxu0 }
0x299b   :  { %v4525_v34 = vadd.f32 %v8407_v25, %v4524_v13 }
0x299d   :  { %v12322_v28 = vpack.i.bf16 %v4530_v27, %v4525_v34  ;;  %v9724_v29 = vpack.c.bf16 %v4530_v27, %v4525_v34 }
0x299f   :  { %10184 = vrot.lane.b32.xlu1 %v12322_v28, %s11303_s18  ;;  %9726 = vmatprep.subr.msk.bf16.mxu1 %vm11821_vm2, %v9724_v29 }
0x29a0   :  { %9729 = vmatpush3.bf16.xpose.msk.msra.mxu1 %vm11821_vm2, %v9724_v29 }
0x2a11   :  { %v10185_v30 = vpop.permute.xlu1 %10184 }
0x2a12   :  { %v10187_v36 = vunpack.i.h.bf16 %v10185_v30  ;;  %v10186_v38 = vunpack.i.l.bf16 %v10185_v30 }
0x2a14   :  { %v9734_v41 = vpack.c.bf16 %v10187_v36, %v10186_v38 }
0x2a16   :  { %9736 = vmatprep.subr.msk.bf16.mxu1 %vm11821_vm2, %v9734_v41 }
0x2a2a   :  { %v9175_v33 = vpop.f32.mrb[34].mxu1 }
0x2a2b   :  { %v12333_v35 = vadd.f32 %v9175_v33, %v8404_v42  ;;  %v4437_v43 = vpop.f32.mrb[35].mxu1 }
0x2a2c   :  { %v12335_v44 = vadd.f32 %v8404_v42, %v4437_v43 }
0x2a2d   :  { %4731 = vrot.lane.b32.xlu1 %v12333_v35, %s11303_s18 }
0x2a2e   :  { %4729 = vrot.lane.b32.xlu0 %v12335_v44, %s11303_s18  ;;  %9191 = vmatprep.mubr.msk.f32.mxu1 %vm869_vm1, %v12335_v44 }
0x2a2f   :  { %9192 = vmatmul.mubr.msk.f32.vlgmr.msra.gmra.mrb[36].mxu1 %vm869_vm1, %v12333_v35 }
0x2a30   :  { %9739 = vmatpush3.bf16.xpose.msk.msra.mxu1 %vm11821_vm2, %v9734_v41 }
0x2a9f   :  { %v4732_v19 = vpop.permute.xlu1 %4731 }
0x2aa0   :  { %v4730_v49 = vpop.permute.xlu0 %4729 }
0x2aa1   :  { %9205 = vmatprep.mubr.msk.f32.mxu1 %vm869_vm1, %v4730_v49 }
0x2aa2   :  { %9206 = vmatmul.mubr.msk.f32.vlgmr.msra.gmra.mrb[38].mxu1 %vm869_vm1, %v4732_v19 }
0x2b02   :  { %v9193_v56 = vpop.f32.mrb[36].mxu1 }
0x2b03   :  { %v4617_v47 = vadd.f32 %v9193_v56, %v12350_v50  ;;  %v4611_v22 = vpop.f32.mrb[37].mxu1 }
0x2b04   :  { %v4612_v57 = vadd.f32 %v4611_v22, %v12353_v48 }
0x2b05   :  { %v4623_v55 = vsel %vm953_vm3, %v4617_v47, -inf }
0x2b06   :  { %4624 = vmax.xlane.f32.xlu0 %v4623_v55  ;;  %v4620_v40 = vsel %vm953_vm3, %v4612_v57, -inf }
0x2b07   :  { %4621 = vmax.xlane.f32.xlu1 %v4620_v40 }
0x2b75   :  { %v9207_v58 = vpop.f32.mrb[38].mxu1 }
0x2b76   :  { %v4817_v59 = vadd.f32 %v9207_v58, %v12350_v50  ;;  %v4811_v54 = vpop.f32.mrb[39].mxu1 }
0x2b77   :  { %v4812_v60 = vadd.f32 %v4811_v54, %v12353_v48 }
0x2b78   :  { %v4823_v12 = vsel %vm953_vm3, %v4817_v59, -inf }
0x2b79   :  { %4824 = vmax.xlane.f32.xlu1 %v4823_v12  ;;  %v4820_v53 = vsel %vm953_vm3, %v4812_v60, -inf }
0x2b7a   :  { %4821 = vmax.xlane.f32.xlu0 %v4820_v53 }
0x2b93   :  { %v4625_v61 = vpop.xlane.xlu0 %4624 }
0x2b94   :  { %v4627_v10 = vsub.f32 %v4617_v47, %v4625_v61  ;;  %v4622_v62 = vpop.xlane.xlu1 %4621 }
0x2b95   :  { %v4626_v0 = vsub.f32 %v4612_v57, %v4622_v62 }
0x2b96   :  { %v4630_v1 = vmul.f32 1.442695, %v4627_v10 }
0x2b97   :  { %v4628_v2 = vmul.f32 1.442695, %v4626_v0 }
0x2b98   :  { %10409 = vpow2.f32 %v4630_v1 }
0x2b99   :  { %10411 = vpow2.f32 %v4628_v2 }
0x2ba2   :  { %v10410_v20 = vpop.eup %10409 }
0x2ba3   :  { %v10412_v5 = vpop.eup %10411  ;;  %v4635_v7 = vsel %vm953_vm3, %v10410_v20, 0.0 }
0x2ba4   :  { %4636 = vadd.xlane.f32.xlu1 %v4635_v7  ;;  %v4632_v8 = vsel %vm953_vm3, %v10412_v5, 0.0 }
0x2ba5   :  { %4633 = vadd.xlane.f32.xlu0 %v4632_v8 }
0x2c06   :  { %v4825_v9 = vpop.xlane.xlu1 %4824 }
0x2c07   :  { %v4827_v11 = vsub.f32 %v4817_v59, %v4825_v9  ;;  %v4822_v31 = vpop.xlane.xlu0 %4821 }
0x2c08   :  { %v4826_v32 = vsub.f32 %v4812_v60, %v4822_v31 }
0x2c09   :  { %v4830_v63 = vmul.f32 1.442695, %v4827_v11 }
0x2c0a   :  { %v4828_v3 = vmul.f32 1.442695, %v4826_v32 }
0x2c0b   :  { %10413 = vpow2.f32 %v4830_v63 }
0x2c0c   :  { %10415 = vpow2.f32 %v4828_v3 }
0x2c15   :  { %v10414_v14 = vpop.eup %10413 }
0x2c16   :  { %v10416_v37 = vpop.eup %10415  ;;  %v4835_v52 = vsel %vm953_vm3, %v10414_v14, 0.0 }
0x2c17   :  { %4836 = vadd.xlane.f32.xlu1 %v4835_v52  ;;  %v4832_v39 = vsel %vm953_vm3, %v10416_v37, 0.0 }
0x2c18   :  { %4833 = vadd.xlane.f32.xlu0 %v4832_v39 }
0x2c28   :  { %10194 = vrot.lane.b32.xlu1 %v12322_v28, %s11302_s9 }
0x2c2c   :  { %10199 = vrot.lane.b32.xlu1 %v12322_v28, %s11306_s22 }
0x2c2e   :  { %10189 = vrot.lane.b32.xlu0 %v12322_v28, %s11300_s16 }
0x2c30   :  { %4931 = vrot.lane.b32.xlu1 %v12333_v35, %s11306_s22 }
0x2c31   :  { %v4637_v45 = vpop.xlane.xlu1 %4636 }
0x2c32   :  { %4929 = vrot.lane.b32.xlu0 %v12335_v44, %s11306_s22  ;;  %v4634_v46 = vpop.xlane.xlu0 %4633 }
0x2c33   :  { %10417 = vrcp.f32 %v4634_v46 }
0x2c34   :  { %10419 = vrcp.f32 %v4637_v45 }
0x2c3d   :  { %v10418_v15 = vpop.eup %10417 }
0x2c3e   :  { %v4639_v16 = vmul.f32 %v10418_v15, %v10412_v5  ;;  %v10420_v36 = vpop.eup %10419 }
0x2c3f   :  { %v4641_v43 = vmul.f32 %v10420_v36, %v10410_v20 }
0x2c40   :  { %9198 = vmatprep.mubr.msk.f32.mxu0 %vm953_vm3, %v4639_v16 }
0x2ca4   :  { %v4837_v51 = vpop.xlane.xlu1 %4836 }
0x2ca5   :  { %v4834_v18 = vpop.xlane.xlu0 %4833 }
0x2ca6   :  { %10421 = vrcp.f32 %v4834_v18 }
0x2ca7   :  { %10423 = vrcp.f32 %v4837_v51 }
0x2ca8   :  { %v10195_v23 = vpop.permute.xlu1 %10194 }
0x2ca9   :  { %v10190_v25 = vpop.permute.xlu0 %10189  ;;  %v10197_v26 = vunpack.i.h.bf16 %v10195_v23  ;;  %v10196_v27 = vunpack.i.l.bf16 %v10195_v23 }
0x2caa   :  { %v10192_v13 = vunpack.i.h.bf16 %v10190_v25  ;;  %v10191_v34 = vunpack.i.l.bf16 %v10190_v25 }
0x2cab   :  { %v9740_v42 = vpack.c.bf16 %v10197_v26, %v10196_v27 }
0x2cac   :  { %v10200_v29 = vpop.permute.xlu1 %10199  ;;  %v9730_v30 = vpack.c.bf16 %v10192_v13, %v10191_v34 }
0x2cad   :  { %v10202_v38 = vunpack.i.h.bf16 %v10200_v29  ;;  %v10201_v41 = vunpack.i.l.bf16 %v10200_v29  ;;  %v4930_v22 = vpop.permute.xlu0 %4929 }
0x2cae   :  { %9731 = vmatprep.subr.bf16.mxu0 %v9730_v30 }
0x2caf   :  { %9733 = vmatpush3.bf16.msra.mxu0 %v9730_v30  ;;  %v9744_v56 = vpack.c.bf16 %v10202_v38, %v10201_v41 }
0x2cb0   :  { %v10422_v33 = vpop.eup %10421  ;;  %9741 = vmatprep.subr.bf16.mxu0 %v9740_v42  ;;  %v4932_v57 = vpop.permute.xlu1 %4931 }
0x2cb1   :  { %v10424_v49 = vpop.eup %10423  ;;  %v4839_v19 = vmul.f32 %v10422_v33, %v10416_v37 }
0x2cb2   :  { %9199 = vmatmul.mubr.msk.f32.vlgmr.msra.gmra.mrb[36].mxu0 %vm953_vm3, %v4641_v43  ;;  %v4841_v47 = vmul.f32 %v10424_v49, %v10414_v14 }
0x2cb3   :  { %9743 = vmatpush3.bf16.msra.mxu0 %v9740_v42  ;;  %9212 = vmatprep.mubr.msk.f32.mxu0 %vm953_vm3, %v4839_v19 }
0x2cb4   :  { %9746 = vmatprep.subr.msk.bf16.mxu0 %vm11821_vm2, %v9744_v56 }
0x2cb6   :  { %9213 = vmatmul.mubr.msk.f32.vlgmr.msra.gmra.mrb[38].mxu0 %vm953_vm3, %v4841_v47 }
0x2cb7   :  { %9219 = vmatprep.mubr.msk.f32.mxu0 %vm869_vm1, %v4930_v22 }
0x2cbc   :  { %9749 = vmatpush3.bf16.xpose.msk.msra.mxu0 %vm11821_vm2, %v9744_v56 }
0x2cc3   :  { %9220 = vmatmul.mubr.msk.f32.vlgmr.msra.gmra.mrb[40].mxu0 %vm869_vm1, %v4932_v57 }
0x2d85   :  { %v12387_v55 = vpop.f32.mrb[36].mxu0 }
0x2d86   :  { %v12389_v40 = vpop.f32.mrb[37].mxu0 }
0x2d89   :  { %v12391_v58 = vpop.f32.mrb[38].mxu0 }
0x2d8a   :  { %v12393_v59 = vpop.f32.mrb[39].mxu0 }
0x2d96   :  { %v9221_v54 = vpop.f32.mrb[40].mxu0 }
0x2d97   :  { %v5017_v60 = vadd.f32 %v9221_v54, %v12350_v50  ;;  %v5011_v12 = vpop.f32.mrb[41].mxu0 }
0x2d98   :  { %v5012_v53 = vadd.f32 %v5011_v12, %v12353_v48 }
0x2d99   :  { %v5023_v61 = vsel %vm953_vm3, %v5017_v60, -inf }
0x2d9a   :  { %5024 = vmax.xlane.f32.xlu1 %v5023_v61  ;;  %v5020_v10 = vsel %vm953_vm3, %v5012_v53, -inf  ;;  %v624_v61 = vld [vmem:[%s12946_s25] sm:$0xff] }
0x2d9b   :  { %5021 = vmax.xlane.f32.xlu0 %v5020_v10  ;;  %v625_v10 = vld [vmem:[%s12946_s25 + $0x8] sm:$0xff] }
0x2dab   :  { %10204 = vrot.lane.b32.xlu1 %v12322_v28, %s11305_s0 }
0x2daf   :  { %5129 = vrot.lane.b32.xlu1 %v12335_v44, %s11308_s8 }
0x2db3   :  { %5131 = vrot.lane.b32.xlu1 %v12333_v35, %s11308_s8 }
0x2e27   :  { %v5025_v62 = vpop.xlane.xlu1 %5024 }
0x2e28   :  { %v5027_v0 = vsub.f32 %v5017_v60, %v5025_v62  ;;  %v5022_v1 = vpop.xlane.xlu0 %5021  ;;  %v626_v62 = vld [vmem:[%s12946_s25 + $0x10] sm:$0xff] }
0x2e29   :  { %v5026_v2 = vsub.f32 %v5012_v53, %v5022_v1 }
0x2e2a   :  { %v5030_v20 = vmul.f32 1.442695, %v5027_v0  ;;  %v9764_v0 = vpack.c.bf16 %v625_v10, %v624_v61  ;;  %v8437_v61 = vld [vmem:[%s12950_s15] ss:$0 sm:$0xff] }
0x2e2b   :  { %v5028_v5 = vmul.f32 1.442695, %v5026_v2  ;;  %v10205_v7 = vpop.permute.xlu1 %10204 }
0x2e2c   :  { %10425 = vpow2.f32 %v5030_v20  ;;  %v10207_v8 = vunpack.i.h.bf16 %v10205_v7  ;;  %v10206_v9 = vunpack.i.l.bf16 %v10205_v7 }
0x2e2d   :  { %10427 = vpow2.f32 %v5028_v5 }
0x2e2e   :  { %v9750_v11 = vpack.c.bf16 %v10207_v8, %v10206_v9 }
0x2e2f   :  { %v5130_v51 = vpop.permute.xlu1 %5129 }
0x2e30   :  { %9751 = vmatprep.subr.bf16.mxu1 %v9750_v11 }
0x2e31   :  { %9753 = vmatpush3.bf16.msra.mxu1 %v9750_v11 }
0x2e33   :  { %v5132_v18 = vpop.permute.xlu1 %5131 }
0x2e36   :  { %v10426_v31 = vpop.eup %10425 }
0x2e37   :  { %v5035_v44 = vsel %vm953_vm3, %v10426_v31, 0.0  ;;  %v10428_v32 = vpop.eup %10427 }
0x2e38   :  { %5036 = vadd.xlane.f32.xlu0 %v5035_v44  ;;  %v5032_v35 = vsel %vm953_vm3, %v10428_v32, 0.0 }
0x2e3c   :  { %5033 = vadd.xlane.f32.xlu0 %v5032_v35 }
0x2e52   :  { %10209 = vrot.lane.b32.xlu0 %v12322_v28, %s11308_s8 }
0x2ec5   :  { %v5037_v63 = vpop.xlane.xlu0 %5036 }
0x2ec6   :  { %10429 = vrcp.f32 %v5037_v63 }
0x2ec9   :  { %v5034_v3 = vpop.xlane.xlu0 %5033 }
0x2eca   :  { %10431 = vrcp.f32 %v5034_v3 }
0x2ecd   :  { %v10210_v14 = vpop.permute.xlu0 %10209 }
0x2ece   :  { %v10212_v37 = vunpack.i.h.bf16 %v10210_v14  ;;  %v10211_v52 = vunpack.i.l.bf16 %v10210_v14 }
0x2ed0   :  { %v9754_v39 = vpack.c.bf16 %v10212_v37, %v10211_v52  ;;  %v10430_v46 = vpop.eup %10429  ;;  %v8434_v37 = vld [vmem:[%s12947_s7] ss:$0 sm:$0xff] }
0x2ed1   :  { %v5041_v45 = vmul.f32 %v10430_v46, %v10426_v31 }
0x2ed2   :  { %9756 = vmatprep.subr.msk.bf16.mxu1 %vm11821_vm2, %v9754_v39 }
0x2ed4   :  { %v10432_v15 = vpop.eup %10431 }
0x2ed5   :  { %v5039_v16 = vmul.f32 %v10432_v15, %v10428_v32 }
0x2ed7   :  { %9226 = vmatprep.mubr.msk.f32.mxu1 %vm953_vm3, %v5039_v16 }
0x2ed8   :  { %9227 = vmatmul.mubr.msk.f32.vlgmr.msra.gmra.mrb[40].mxu1 %vm953_vm3, %v5041_v45 }
0x2ed9   :  { %9759 = vmatpush3.bf16.xpose.msk.msra.mxu1 %vm11821_vm2, %v9754_v39  ;;  %9233 = vmatprep.mubr.msk.f32.mxu1 %vm869_vm1, %v5130_v51 }
0x2ee0   :  { %9234 = vmatmul.mubr.msk.f32.vlgmr.msra.gmra.mrb[42].mxu1 %vm869_vm1, %v5132_v18 }
0x2fab   :  { %v9228_v23 = vpop.f32.mrb[40].mxu1 }
0x2fac   :  { %v5120_v25 = vpop.f32.mrb[41].mxu1 }
0x2fb3   :  { %v9235_v26 = vpop.f32.mrb[42].mxu1 }
0x2fb4   :  { %v5217_v27 = vadd.f32 %v9235_v26, %v12350_v50  ;;  %v5211_v13 = vpop.f32.mrb[43].mxu1 }
0x2fb5   :  { %v5212_v34 = vadd.f32 %v5211_v13, %v12353_v48 }
0x2fb6   :  { %v5223_v29 = vsel %vm953_vm3, %v5217_v27, -inf }
0x2fb7   :  { %5224 = vmax.xlane.f32.xlu1 %v5223_v29  ;;  %v5220_v30 = vsel %vm953_vm3, %v5212_v34, -inf  ;;  %v648_v29 = vld [vmem:[%s12948_s10] sm:$0xff] }
0x2fb8   :  { %5221 = vmax.xlane.f32.xlu0 %v5220_v30  ;;  %v649_v30 = vld [vmem:[%s12948_s10 + $0x8] sm:$0xff] }
0x2fc8   :  { %10214 = vrot.lane.b32.xlu1 %v12322_v28, %s11307_s23 }
0x2fcc   :  { %5333 = vrot.lane.b32.xlu1 %v12391_v58, %s11310_s26 }
0x2fd0   :  { %5339 = vrot.lane.b32.xlu1 %v5120_v25, %s11312_s14 }
0x3044   :  { %v5225_v36 = vpop.xlane.xlu1 %5224 }
0x3045   :  { %v5227_v38 = vsub.f32 %v5217_v27, %v5225_v36  ;;  %v5222_v50 = vpop.xlane.xlu0 %5221  ;;  %v9772_v36 = vpack.c.bf16 %v649_v30, %v648_v29  ;;  %v690_v29 = vld [vmem:[%s12954_s21 + $0x8] sm:$0xff] }
0x3046   :  { %v5226_v41 = vsub.f32 %v5212_v34, %v5222_v50  ;;  %v651_v50 = vld [vmem:[%s12948_s10 + $0x18] sm:$0xff] }
0x3047   :  { %v5230_v42 = vmul.f32 1.442695, %v5227_v38  ;;  %9773 = vmatprep.subr.bf16.mxu1 %v9772_v36  ;;  %v650_v38 = vld [vmem:[%s12948_s10 + $0x10] sm:$0xff] }
0x3048   :  { %v5228_v48 = vmul.f32 1.442695, %v5226_v41  ;;  %v10215_v33 = vpop.permute.xlu1 %10214  ;;  %9775 = vmatpush3.bf16.msra.mxu1 %v9772_v36  ;;  %v9776_v41 = vpack.c.bf16 %v651_v50, %v650_v38  ;;  %v691_v36 = vld [vmem:[%s12954_s21 + $0x10] sm:$0xff]  ;;  %v692_v38 = vld [vmem:[%s12954_s21 + $0x18] sm:$0xff] }
0x3049   :  { %v10217_v43 = vunpack.i.h.bf16 %v10215_v33  ;;  %v10216_v49 = vunpack.i.l.bf16 %v10215_v33  ;;  %v654_v33 = vld [vmem:[%s12949_s11 + $0x10] sm:$0xff]  ;;  %v9800_v50 = vpack.c.bf16 %v692_v38, %v691_v36 }
0x304a   :  { %10433 = vpow2.f32 %v5228_v48  ;;  %9777 = vmatprep.subr.bf16.mxu1 %v9776_v41  ;;  %v653_v48 = vld [vmem:[%s12949_s11 + $0x8] sm:$0xff] }
0x304b   :  { %v9760_v19 = vpack.c.bf16 %v10217_v43, %v10216_v49  ;;  %10435 = vpow2.f32 %v5230_v42  ;;  %v652_v42 = vld [vmem:[%s12949_s11] sm:$0xff]  ;;  %v655_v49 = vld [vmem:[%s12949_s11 + $0x18] sm:$0xff] }
0x304c   :  { %v5334_v7 = vpop.permute.xlu1 %5333  ;;  %9779 = vmatpush3.bf16.msra.mxu1 %v9776_v41  ;;  %v9780_v43 = vpack.c.bf16 %v653_v48, %v652_v42 }
0x304d   :  { %9761 = vmatprep.subr.bf16.mxu0 %v9760_v19  ;;  %v5354_v44 = vsel %vm869_vm1, %v12387_v55, %v5334_v7  ;;  %v658_v7 = vld [vmem:[%s12949_s11 + $0x30] sm:$0xff] }
0x304e   :  { %9763 = vmatpush3.bf16.msra.mxu0 %v9760_v19  ;;  %v9784_v19 = vpack.c.bf16 %v655_v49, %v654_v33 }
0x304f   :  { %9765 = vmatprep.subr.bf16.mxu0 %v9764_v0 }
0x3050   :  { %v5340_v9 = vpop.permute.xlu1 %5339 }
0x3054   :  { %v10434_v28 = vpop.eup %10433 }
0x3055   :  { %v5232_v56 = vsel %vm953_vm3, %v10434_v28, 0.0  ;;  %v10436_v47 = vpop.eup %10435 }
0x3056   :  { %5233 = vadd.xlane.f32.xlu0 %v5232_v56  ;;  %v5235_v22 = vsel %vm953_vm3, %v10436_v47, 0.0  ;;  %v657_v56 = vld [vmem:[%s12949_s11 + $0x28] sm:$0xff] }
0x305a   :  { %5236 = vadd.xlane.f32.xlu0 %v5235_v22 }
0x3070   :  { %5331 = vrot.lane.b32.xlu0 %v12393_v59, %s11310_s26  ;;  %v627_v59 = vld [vmem:[%s12946_s25 + $0x18] sm:$0xff] }
0x3071   :  { %v9768_v1 = vpack.c.bf16 %v627_v59, %v626_v62  ;;  %v8438_v59 = vld [vmem:[%s12951_s3] ss:$0 sm:$0xff] }
0x3074   :  { %5341 = vrot.lane.b32.xlu0 %v9228_v23, %s11312_s14 }
0x30e3   :  { %v5234_v57 = vpop.xlane.xlu0 %5233 }
0x30e4   :  { %10437 = vrcp.f32 %v5234_v57 }
0x30e7   :  { %v5237_v58 = vpop.xlane.xlu0 %5236 }
0x30e8   :  { %10439 = vrcp.f32 %v5237_v58 }
0x30eb   :  { %v5332_v5 = vpop.permute.xlu0 %5331 }
0x30ec   :  { %v5353_v11 = vsel %vm869_vm1, %v12389_v40, %v5332_v5 }
0x30ed   :  { %v5355_v35 = vsel %vm953_vm3, %v5353_v11, %v5340_v9  ;;  %v8439_v11 = vld [vmem:[%s12952_s6] ss:$0 sm:$0xff] }
0x30ee   :  { %v10438_v54 = vpop.eup %10437 }
0x30ef   :  { %v5239_v60 = vmul.f32 %v10438_v54, %v10434_v28  ;;  %v5342_v8 = vpop.permute.xlu0 %5341  ;;  %v656_v28 = vld [vmem:[%s12949_s11 + $0x20] sm:$0xff] }
0x30f0   :  { %v5356_v63 = vsel %vm953_vm3, %v5354_v44, %v5342_v8  ;;  %v659_v8 = vld [vmem:[%s12949_s11 + $0x38] sm:$0xff] }
0x30f1   :  { %9240 = vmatprep.mubr.msk.f32.mxu0 %vm953_vm3, %v5239_v60  ;;  %v9792_v9 = vpack.c.bf16 %v659_v8, %v658_v7 }
0x30f2   :  { %v10440_v12 = vpop.eup %10439 }
0x30f3   :  { %v5241_v53 = vmul.f32 %v10440_v12, %v10436_v47  ;;  %v9788_v47 = vpack.c.bf16 %v657_v56, %v656_v28  ;;  %v8445_v28 = vld [vmem:[%s12955_s24] ss:$0 sm:$0xff] }
0x30f5   :  { %9241 = vmatmul.mubr.msk.f32.vlgmr.msra.gmra.mrb[42].mxu0 %vm953_vm3, %v5241_v53 }
0x30f6   :  { %9767 = vmatpush3.bf16.msra.mxu0 %v9764_v0 }
0x30f7   :  { %9769 = vmatprep.subr.bf16.mxu0 %v9768_v1 }
0x30fa   :  { %9771 = vmatpush3.bf16.msra.mxu0 %v9768_v1 }
0x30fb   :  { %9781 = vmatprep.subr.bf16.mxu0 %v9780_v43 }
0x31c8   :  { %v9242_v2 = vpop.f32.mrb[42].mxu0 }
0x31c9   :  { %5349 = vrot.lane.b32.xlu0 %v9242_v2, %s11313_s1  ;;  %v5320_v20 = vpop.f32.mrb[43].mxu0 }
0x31ca   :  { %5347 = vrot.lane.b32.xlu1 %v5320_v20, %s11313_s1 }
0x323b   :  { %v5350_v31 = vpop.permute.xlu0 %5349 }
0x323c   :  { %v5348_v32 = vpop.permute.xlu1 %5347  ;;  %v5358_v14 = vsel %vm1691_vm4, %v5356_v63, %v5350_v31 }
0x323d   :  { %v5357_v3 = vsel %vm1691_vm4, %v5355_v35, %v5348_v32 }
0x323e   :  { %9251 = vmatprep.mubr.msk.f32.mxu0 %vm781_vm0, %v5357_v3 }
0x323f   :  { %9252 = vmatmul.mubr.msk.f32.vlgmr.msra.gmra.mrb[44].mxu0 %vm781_vm0, %v5358_v14  ;;  %v8442_v14 = vld [vmem:[%s12953_s4] ss:$0 sm:$0xff] }
0x3240   :  { %9783 = vmatpush3.bf16.msra.mxu0 %v9780_v43 }
0x3241   :  { %9785 = vmatprep.subr.bf16.mxu0 %v9784_v19 }
0x3244   :  { %9787 = vmatpush3.bf16.msra.mxu0 %v9784_v19 }
0x3245   :  { %9789 = vmatprep.subr.bf16.mxu0 %v9788_v47 }
0x3248   :  { %9791 = vmatpush3.bf16.msra.mxu0 %v9788_v47 }
0x3249   :  { %9793 = vmatprep.subr.bf16.mxu0 %v9792_v9 }
0x324c   :  { %9795 = vmatpush3.bf16.msra.mxu0 %v9792_v9 }
0x3312   :  { %v9253_v52 = vpop.f32.mrb[44].mxu0 }
0x3313   :  { %v5443_v40 = vadd.f32 %v9253_v52, %v8434_v37  ;;  %v5437_v39 = vpop.f32.mrb[45].mxu0 }
0x3314   :  { %v5438_v46 = vadd.f32 %v8434_v37, %v5437_v39 }
0x3315   :  { %v5447_v55 = vadd.f32 %v5443_v40, %v12317_v24 }
0x3316   :  { %v5446_v15 = vadd.f32 %v5438_v46, %v12313_v21 }
0x3317   :  { %v5451_v16 = vsel %vm781_vm0, %v5447_v55, 0.0 }
0x3318   :  { %5452 = vadd.xlane.f32.xlu0 %v5451_v16  ;;  %v5448_v45 = vsel %vm781_vm0, %v5446_v15, 0.0 }
0x3319   :  { %5449 = vadd.xlane.f32.xlu1 %v5448_v45 }
0x33a5   :  { %v5453_v51 = vpop.xlane.xlu0 %5452 }
0x33a6   :  { %v5455_v18 = vmul.f32 0.03125, %v5453_v51  ;;  %v5450_v23 = vpop.xlane.xlu1 %5449 }
0x33a7   :  { %v5454_v25 = vmul.f32 0.03125, %v5450_v23 }
0x33a8   :  { %v5457_v26 = vsub.f32 %v5447_v55, %v5455_v18 }
0x33a9   :  { %v5456_v27 = vsub.f32 %v5446_v15, %v5454_v25 }
0x33aa   :  { %v5459_v13 = vmul.f32 %v5457_v26, %v5457_v26 }
0x33ab   :  { %v5458_v24 = vmul.f32 %v5456_v27, %v5456_v27 }
0x33ac   :  { %v5463_v21 = vsel %vm781_vm0, %v5459_v13, 0.0 }
0x33ad   :  { %5464 = vadd.xlane.f32.xlu1 %v5463_v21  ;;  %v5460_v34 = vsel %vm781_vm0, %v5458_v24, 0.0 }
0x33ae   :  { %5461 = vadd.xlane.f32.xlu0 %v5460_v34  ;;  %v689_v34 = vld [vmem:[%s12954_s21] sm:$0xff] }
0x33af   :  { %v9796_v30 = vpack.c.bf16 %v690_v29, %v689_v34 }
0x33b1   :  { %9797 = vmatprep.subr.bf16.mxu1 %v9796_v30 }
0x343a   :  { %v5465_v22 = vpop.xlane.xlu1 %5464 }
0x343b   :  { %v5467_v57 = vmul.f32 0.03125, %v5465_v22  ;;  %v5462_v58 = vpop.xlane.xlu0 %5461 }
0x343c   :  { %v5466_v54 = vmul.f32 0.03125, %v5462_v58 }
0x343d   :  { %v5469_v60 = vadd.f32 1e-05, %v5467_v57  ;;  %v8446_v57 = vld [vmem:[%s12956_s28] ss:$0 sm:$0xff] }
0x343e   :  { %v5468_v12 = vadd.f32 1e-05, %v5466_v54 }
0x343f   :  { %10441 = vrsqrt.f32 %v5469_v60 }
0x3440   :  { %10443 = vrsqrt.f32 %v5468_v12 }
0x3449   :  { %v10442_v53 = vpop.eup %10441 }
0x344a   :  { %v10444_v10 = vpop.eup %10443  ;;  %v5473_v62 = vmul.f32 %v10442_v53, %v5457_v26  ;;  %v8447_v53 = vld [vmem:[#allocation20] ss:$0 sm:$0xff] }
0x344b   :  { %v5472_v0 = vmul.f32 %v10444_v10, %v5456_v27 }
0x344c   :  { %v5481_v1 = vmul.f32 %v8437_v61, %v5473_v62 }
0x344d   :  { %v5480_v2 = vmul.f32 %v8437_v61, %v5472_v0 }
0x344e   :  { %v5489_v5 = vadd.f32 %v8438_v59, %v5481_v1 }
0x344f   :  { %v5488_v20 = vadd.f32 %v8438_v59, %v5480_v2 }
0x3451   :  { %9262 = vmatprep.mubr.msk.f32.mxu1 %vm781_vm0, %v5488_v20 }
0x3452   :  { %9263 = vmatmul.mubr.msk.f32.vlgmr.msra.gmra.mrb[44].mxu1 %vm781_vm0, %v5489_v5 }
0x3453   :  { %9799 = vmatpush3.bf16.msra.mxu1 %v9796_v30 }
0x3454   :  { %9801 = vmatprep.subr.bf16.mxu1 %v9800_v50 }
0x3457   :  { %9803 = vmatpush3.bf16.msra.mxu1 %v9800_v50 }
0x3525   :  { %v9264_v31 = vpop.f32.mrb[44].mxu1 }
0x3526   :  { %v5574_v44 = vadd.f32 %v9264_v31, %v8439_v11  ;;  %v5568_v32 = vpop.f32.mrb[45].mxu1 }
0x3527   :  { %v5569_v35 = vadd.f32 %v8439_v11, %v5568_v32 }
0x3528   :  { %v5578_v3 = vmax.f32 %v5574_v44, 0.0 }
0x3529   :  { %v5577_v63 = vmax.f32 %v5569_v35, 0.0  ;;  %v12525_v35 = vld [vmem:[%s11669_s27 + $0x8] sm:$0xff] }
0x352b   :  { %9281 = vmatprep.mubr.msk.f32.mxu0 %vm1921_vm5, %v5577_v63 }
0x352c   :  { %9282 = vmatmul.mubr.msk.f32.vlgmr.msra.gmra.mrb[46].mxu0 %vm1921_vm5, %v5578_v3 }
0x35ff   :  { %v9283_v37 = vpop.f32.mrb[46].mxu0 }
0x3600   :  { %v5663_v52 = vadd.f32 %v9283_v37, %v8442_v14  ;;  %v5657_v40 = vpop.f32.mrb[47].mxu0 }
0x3601   :  { %v5658_v39 = vadd.f32 %v8442_v14, %v5657_v40  ;;  %v12529_v14 = vld [vmem:[%s11669_s27] sm:$0xff]  ;;  %s12957_s27 = sld [smem:[#allocation93_spill]] }
0x3602   :  { %v5667_v46 = vadd.f32 %v5663_v52, %v5489_v5 }
0x3603   :  { %v5666_v55 = vadd.f32 %v5658_v39, %v5488_v20 }
0x3604   :  { %v5671_v15 = vsel %vm781_vm0, %v5667_v46, 0.0 }
0x3605   :  { %5672 = vadd.xlane.f32.xlu1 %v5671_v15  ;;  %v5668_v16 = vsel %vm781_vm0, %v5666_v55, 0.0 }
0x3606   :  { %5669 = vadd.xlane.f32.xlu0 %v5668_v16 }
0x3692   :  { %v5673_v45 = vpop.xlane.xlu1 %5672 }
0x3693   :  { %v5675_v51 = vmul.f32 0.03125, %v5673_v45  ;;  %v5670_v18 = vpop.xlane.xlu0 %5669 }
0x3694   :  { %v5674_v23 = vmul.f32 0.03125, %v5670_v18 }
0x3695   :  { %v5677_v25 = vsub.f32 %v5667_v46, %v5675_v51 }
0x3696   :  { %v5676_v26 = vsub.f32 %v5666_v55, %v5674_v23 }
0x3697   :  { %v5679_v27 = vmul.f32 %v5677_v25, %v5677_v25 }
0x3698   :  { %v5678_v13 = vmul.f32 %v5676_v26, %v5676_v26 }
0x3699   :  { %v5683_v24 = vsel %vm781_vm0, %v5679_v27, 0.0 }
0x369a   :  { %5684 = vadd.xlane.f32.xlu1 %v5683_v24  ;;  %v5680_v21 = vsel %vm781_vm0, %v5678_v13, 0.0 }
0x369b   :  { %5681 = vadd.xlane.f32.xlu0 %v5680_v21 }
0x3727   :  { %v5685_v41 = vpop.xlane.xlu1 %5684 }
0x3728   :  { %v5687_v42 = vmul.f32 0.03125, %v5685_v41  ;;  %v5682_v48 = vpop.xlane.xlu0 %5681 }
0x3729   :  { %v5686_v33 = vmul.f32 0.03125, %v5682_v48 }
0x372a   :  { %v5689_v43 = vadd.f32 1e-05, %v5687_v42 }
0x372b   :  { %v5688_v49 = vadd.f32 1e-05, %v5686_v33 }
0x372c   :  { %10445 = vrsqrt.f32 %v5689_v43 }
0x372d   :  { %10447 = vrsqrt.f32 %v5688_v49 }
0x3736   :  { %v10446_v19 = vpop.eup %10445 }
0x3737   :  { %v10448_v56 = vpop.eup %10447  ;;  %v5693_v47 = vmul.f32 %v10446_v19, %v5677_v25 }
0x3738   :  { %v5692_v22 = vmul.f32 %v10448_v56, %v5676_v26 }
0x3739   :  { %v5701_v58 = vmul.f32 %v8445_v28, %v5693_v47 }
0x373a   :  { %v5700_v54 = vmul.f32 %v8445_v28, %v5692_v22 }
0x373b   :  { %v12488_v12 = vadd.f32 %v8446_v57, %v5701_v58 }
0x373c   :  { %v12486_v60 = vadd.f32 %v8446_v57, %v5700_v54 }
0x373e   :  { %9292 = vmatprep.mubr.msk.f32.mxu1 %vm781_vm0, %v12486_v60 }
0x373f   :  { %9293 = vmatmul.mubr.msk.f32.vlgmr.msra.gmra.mrb[46].mxu1 %vm781_vm0, %v12488_v12 }
0x3812   :  { %v9294_v61 = vpop.f32.mrb[46].mxu1 }
0x3813   :  { %v12494_v10 = vadd.f32 %v9294_v61, %v8447_v53  ;;  %v5788_v62 = vpop.f32.mrb[47].mxu1 }
0x3814   :  { %v12496_v0 = vadd.f32 %v8447_v53, %v5788_v62 }
0x3816   :  { %9299 = vmatprep.mubr.msk.f32.mxu1 %vm869_vm1, %v12496_v0  ;;  %v12502_v59 = vpack.i.bf16 %v12494_v10, %v12496_v0 }
0x3818   :  { %10224 = vrot.lane.b32.xlu1 %v12502_v59, %s11302_s9  ;;  %10219 = vrot.lane.b32.xlu0 %v12502_v59, %s11300_s16 }
0x381c   :  { %5995 = vrot.lane.b32.xlu1 %v12496_v0, %s11303_s18  ;;  %5997 = vrot.lane.b32.xlu0 %v12494_v10, %s11303_s18 }
0x388a   :  { %v10225_v1 = vpop.permute.xlu1 %10224  ;;  %v10220_v2 = vpop.permute.xlu0 %10219 }
0x388b   :  { %v10227_v20 = vunpack.i.h.bf16 %v10225_v1  ;;  %v10226_v5 = vunpack.i.l.bf16 %v10225_v1  ;;  %v10222_v7 = vunpack.i.h.bf16 %v10220_v2  ;;  %v10221_v8 = vunpack.i.l.bf16 %v10220_v2 }
0x388d   :  { %v9804_v9 = vpack.c.bf16 %v10222_v7, %v10221_v8  ;;  %v9814_v11 = vpack.c.bf16 %v10227_v20, %v10226_v5 }
0x388e   :  { %v5996_v31 = vpop.permute.xlu1 %5995  ;;  %v5998_v44 = vpop.permute.xlu0 %5997 }
0x388f   :  { %9806 = vmatprep.subr.msk.bf16.mxu1 %vm11821_vm2, %v9804_v9 }
0x3890   :  { %9809 = vmatpush3.bf16.xpose.msk.msra.mxu1 %vm11821_vm2, %v9804_v9 }
0x3891   :  { %9816 = vmatprep.subr.msk.bf16.mxu1 %vm11821_vm2, %v9814_v11 }
0x3897   :  { %9300 = vmatmul.mubr.msk.f32.vlgmr.msra.gmra.mrb[48].mxu1 %vm869_vm1, %v12494_v10 }
0x3898   :  { %9819 = vmatpush3.bf16.xpose.msk.msra.mxu1 %vm11821_vm2, %v9814_v11  ;;  %9313 = vmatprep.mubr.msk.f32.mxu1 %vm869_vm1, %v5996_v31 }
0x389f   :  { %9314 = vmatmul.mubr.msk.f32.vlgmr.msra.gmra.mrb[50].mxu1 %vm869_vm1, %v5998_v44 }
0x396a   :  { %v9301_v32 = vpop.f32.mrb[48].mxu1 }
0x396b   :  { %v5883_v63 = vadd.f32 %v12525_v35, %v9301_v32  ;;  %v5877_v3 = vpop.f32.mrb[49].mxu1 }
0x396c   :  { %v5878_v37 = vadd.f32 %v12529_v14, %v5877_v3 }
0x396d   :  { %v5889_v52 = vsel %vm953_vm3, %v5883_v63, -inf }
0x396e   :  { %5890 = vmax.xlane.f32.xlu0 %v5889_v52  ;;  %v5886_v40 = vsel %vm953_vm3, %v5878_v37, -inf }
0x396f   :  { %5887 = vmax.xlane.f32.xlu1 %v5886_v40 }
0x3972   :  { %v9315_v39 = vpop.f32.mrb[50].mxu1 }
0x3973   :  { %v6083_v46 = vadd.f32 %v12525_v35, %v9315_v39  ;;  %v6077_v55 = vpop.f32.mrb[51].mxu1 }
0x3974   :  { %v6078_v15 = vadd.f32 %v12529_v14, %v6077_v55 }
0x3975   :  { %v6089_v16 = vsel %vm953_vm3, %v6083_v46, -inf }
0x3976   :  { %6090 = vmax.xlane.f32.xlu1 %v6089_v16  ;;  %v6086_v45 = vsel %vm953_vm3, %v6078_v15, -inf }
0x3977   :  { %6087 = vmax.xlane.f32.xlu0 %v6086_v45 }
0x39fb   :  { %v5891_v51 = vpop.xlane.xlu0 %5890 }
0x39fc   :  { %v5893_v18 = vsub.f32 %v5883_v63, %v5891_v51  ;;  %v5888_v23 = vpop.xlane.xlu1 %5887 }
0x39fd   :  { %v5892_v25 = vsub.f32 %v5878_v37, %v5888_v23 }
0x39fe   :  { %v5896_v26 = vmul.f32 1.442695, %v5893_v18 }
0x39ff   :  { %v5894_v27 = vmul.f32 1.442695, %v5892_v25 }
0x3a00   :  { %10449 = vpow2.f32 %v5896_v26 }
0x3a01   :  { %10451 = vpow2.f32 %v5894_v27 }
0x3a03   :  { %v6091_v13 = vpop.xlane.xlu1 %6090 }
0x3a04   :  { %v6093_v24 = vsub.f32 %v6083_v46, %v6091_v13  ;;  %v6088_v21 = vpop.xlane.xlu0 %6087 }
0x3a05   :  { %v6092_v34 = vsub.f32 %v6078_v15, %v6088_v21 }
0x3a06   :  { %v6096_v29 = vmul.f32 1.442695, %v6093_v24 }
0x3a07   :  { %v6094_v30 = vmul.f32 1.442695, %v6092_v34 }
0x3a08   :  { %10453 = vpow2.f32 %v6096_v29 }
0x3a09   :  { %10455 = vpow2.f32 %v6094_v30 }
0x3a0a   :  { %v10450_v36 = vpop.eup %10449 }
0x3a0b   :  { %v10452_v38 = vpop.eup %10451  ;;  %v5901_v50 = vsel %vm953_vm3, %v10450_v36, 0.0 }
0x3a0c   :  { %5902 = vadd.xlane.f32.xlu1 %v5901_v50  ;;  %v5898_v41 = vsel %vm953_vm3, %v10452_v38, 0.0 }
0x3a0d   :  { %5899 = vadd.xlane.f32.xlu0 %v5898_v41 }
0x3a12   :  { %v10454_v42 = vpop.eup %10453 }
0x3a13   :  { %v10456_v48 = vpop.eup %10455  ;;  %v6101_v33 = vsel %vm953_vm3, %v10454_v42, 0.0 }
0x3a14   :  { %6102 = vadd.xlane.f32.xlu1 %v6101_v33  ;;  %v6098_v43 = vsel %vm953_vm3, %v10456_v48, 0.0 }
0x3a15   :  { %6099 = vadd.xlane.f32.xlu0 %v6098_v43 }
0x3a25   :  { %10234 = vrot.lane.b32.xlu1 %v12502_v59, %s11304_s17  ;;  %s12959_s17 = sld [smem:[#allocation88_spill]] }
0x3a29   :  { %10239 = vrot.lane.b32.xlu1 %v12502_v59, %s11305_s0 }
0x3a2b   :  { %10229 = vrot.lane.b32.xlu0 %v12502_v59, %s11301_s5  ;;  %s12958_s5 = sld [smem:[#allocation86_spill]] }
0x3a2d   :  { %6197 = vrot.lane.b32.xlu1 %v12494_v10, %s11306_s22 }
0x3a2f   :  { %6195 = vrot.lane.b32.xlu0 %v12496_v0, %s11306_s22 }
0x3a99   :  { %v5903_v19 = vpop.xlane.xlu1 %5902 }
0x3a9a   :  { %v5900_v49 = vpop.xlane.xlu0 %5899 }
0x3a9b   :  { %10457 = vrcp.f32 %v5900_v49 }
0x3a9c   :  { %10459 = vrcp.f32 %v5903_v19 }
0x3aa1   :  { %v6103_v28 = vpop.xlane.xlu1 %6102 }
0x3aa2   :  { %v6100_v56 = vpop.xlane.xlu0 %6099 }
0x3aa3   :  { %10461 = vrcp.f32 %v6100_v56 }
0x3aa4   :  { %10463 = vrcp.f32 %v6103_v28 }
0x3aa5   :  { %v10458_v47 = vpop.eup %10457  ;;  %v10235_v22 = vpop.permute.xlu1 %10234 }
0x3aa6   :  { %v10230_v57 = vpop.permute.xlu0 %10229  ;;  %v5905_v58 = vmul.f32 %v10458_v47, %v10452_v38  ;;  %v10237_v54 = vunpack.i.h.bf16 %v10235_v22  ;;  %v10236_v53 = vunpack.i.l.bf16 %v10235_v22  ;;  %v10460_v20 = vpop.eup %10459 }
0x3aa7   :  { %v10232_v61 = vunpack.i.h.bf16 %v10230_v57  ;;  %v10231_v62 = vunpack.i.l.bf16 %v10230_v57  ;;  %v5907_v11 = vmul.f32 %v10460_v20, %v10450_v36 }
0x3aa8   :  { %9306 = vmatprep.mubr.msk.f32.mxu0 %vm953_vm3, %v5905_v58  ;;  %v9820_v5 = vpack.c.bf16 %v10237_v54, %v10236_v53 }
0x3aa9   :  { %v9810_v1 = vpack.c.bf16 %v10232_v61, %v10231_v62  ;;  %v10240_v2 = vpop.permute.xlu1 %10239 }
0x3aaa   :  { %v10242_v7 = vunpack.i.h.bf16 %v10240_v2  ;;  %v10241_v8 = vunpack.i.l.bf16 %v10240_v2  ;;  %v6196_v3 = vpop.permute.xlu0 %6195 }
0x3aab   :  { %9811 = vmatprep.subr.bf16.mxu0 %v9810_v1 }
0x3aac   :  { %9813 = vmatpush3.bf16.msra.mxu0 %v9810_v1  ;;  %v9824_v32 = vpack.c.bf16 %v10242_v7, %v10241_v8 }
0x3aad   :  { %v10462_v9 = vpop.eup %10461  ;;  %9821 = vmatprep.subr.bf16.mxu0 %v9820_v5  ;;  %v6198_v37 = vpop.permute.xlu1 %6197 }
0x3aae   :  { %v10464_v31 = vpop.eup %10463  ;;  %v6105_v44 = vmul.f32 %v10462_v9, %v10456_v48 }
0x3aaf   :  { %9307 = vmatmul.mubr.msk.f32.vlgmr.msra.gmra.mrb[48].mxu0 %vm953_vm3, %v5907_v11  ;;  %v6107_v63 = vmul.f32 %v10464_v31, %v10454_v42 }
0x3ab0   :  { %9823 = vmatpush3.bf16.msra.mxu0 %v9820_v5  ;;  %9320 = vmatprep.mubr.msk.f32.mxu0 %vm953_vm3, %v6105_v44 }
0x3ab1   :  { %9826 = vmatprep.subr.msk.bf16.mxu0 %vm11821_vm2, %v9824_v32 }
0x3ab3   :  { %9321 = vmatmul.mubr.msk.f32.vlgmr.msra.gmra.mrb[50].mxu0 %vm953_vm3, %v6107_v63 }
0x3ab4   :  { %9327 = vmatprep.mubr.msk.f32.mxu0 %vm869_vm1, %v6196_v3 }
0x3ab9   :  { %9829 = vmatpush3.bf16.xpose.msk.msra.mxu0 %vm11821_vm2, %v9824_v32 }
0x3ac0   :  { %9328 = vmatmul.mubr.msk.f32.vlgmr.msra.gmra.mrb[52].mxu0 %vm869_vm1, %v6198_v37 }
0x3b82   :  { %v12562_v52 = vpop.f32.mrb[48].mxu0 }
0x3b83   :  { %v12564_v40 = vpop.f32.mrb[49].mxu0 }
0x3b86   :  { %v12566_v39 = vpop.f32.mrb[50].mxu0 }
0x3b87   :  { %v12568_v46 = vpop.f32.mrb[51].mxu0 }
0x3b93   :  { %v9329_v55 = vpop.f32.mrb[52].mxu0 }
0x3b94   :  { %v6283_v15 = vadd.f32 %v12525_v35, %v9329_v55  ;;  %v6277_v16 = vpop.f32.mrb[53].mxu0 }
0x3b95   :  { %v6278_v45 = vadd.f32 %v12529_v14, %v6277_v16 }
0x3b96   :  { %v6289_v51 = vsel %vm953_vm3, %v6283_v15, -inf }
0x3b97   :  { %6290 = vmax.xlane.f32.xlu1 %v6289_v51  ;;  %v6286_v18 = vsel %vm953_vm3, %v6278_v45, -inf  ;;  %v685_v51 = vld [vmem:[%s12957_s27] sm:$0xff] }
0x3b98   :  { %6287 = vmax.xlane.f32.xlu0 %v6286_v18  ;;  %v686_v18 = vld [vmem:[%s12957_s27 + $0x8] sm:$0xff] }
0x3ba8   :  { %10244 = vrot.lane.b32.xlu1 %v12502_v59, %s11309_s13 }
0x3bac   :  { %6395 = vrot.lane.b32.xlu1 %v12496_v0, %s11308_s8 }
0x3bb0   :  { %6397 = vrot.lane.b32.xlu1 %v12494_v10, %s11308_s8 }
0x3c24   :  { %v6291_v23 = vpop.xlane.xlu1 %6290 }
0x3c25   :  { %v6293_v25 = vsub.f32 %v6283_v15, %v6291_v23  ;;  %v6288_v26 = vpop.xlane.xlu0 %6287  ;;  %v9844_v23 = vpack.c.bf16 %v686_v18, %v685_v51 }
0x3c26   :  { %v6292_v27 = vsub.f32 %v6278_v45, %v6288_v26 }
0x3c27   :  { %v6296_v13 = vmul.f32 1.442695, %v6293_v25  ;;  %v688_v25 = vld [vmem:[%s12957_s27 + $0x18] sm:$0xff] }
0x3c28   :  { %v6294_v24 = vmul.f32 1.442695, %v6292_v27  ;;  %v10245_v21 = vpop.permute.xlu1 %10244  ;;  %v665_v27 = vld [vmem:[%s12958_s5] sm:$0xff] }
0x3c29   :  { %10465 = vpow2.f32 %v6296_v13  ;;  %v10247_v34 = vunpack.i.h.bf16 %v10245_v21  ;;  %v10246_v29 = vunpack.i.l.bf16 %v10245_v21  ;;  %v666_v13 = vld [vmem:[%s12958_s5 + $0x8] sm:$0xff] }
0x3c2a   :  { %10467 = vpow2.f32 %v6294_v24  ;;  %v9860_v24 = vpack.c.bf16 %v666_v13, %v665_v27  ;;  %v8478_v13 = vld [vmem:[#allocation10] ss:$0 sm:$0xff] }
0x3c2b   :  { %v9830_v30 = vpack.c.bf16 %v10247_v34, %v10246_v29 }
0x3c2c   :  { %v6396_v47 = vpop.permute.xlu1 %6395 }
0x3c2d   :  { %9831 = vmatprep.subr.bf16.mxu1 %v9830_v30 }
0x3c2e   :  { %9833 = vmatpush3.bf16.msra.mxu1 %v9830_v30 }
0x3c30   :  { %v6398_v22 = vpop.permute.xlu1 %6397 }
0x3c33   :  { %v10466_v36 = vpop.eup %10465 }
0x3c34   :  { %v6301_v0 = vsel %vm953_vm3, %v10466_v36, 0.0  ;;  %v10468_v38 = vpop.eup %10467 }
0x3c35   :  { %6302 = vadd.xlane.f32.xlu0 %v6301_v0  ;;  %v6298_v10 = vsel %vm953_vm3, %v10468_v38, 0.0 }
0x3c39   :  { %6299 = vadd.xlane.f32.xlu0 %v6298_v10  ;;  %v667_v10 = vld [vmem:[%s12958_s5 + $0x10] sm:$0xff] }
0x3c4f   :  { %10249 = vrot.lane.b32.xlu0 %v12502_v59, %s11307_s23 }
0x3cc2   :  { %v6303_v50 = vpop.xlane.xlu0 %6302 }
0x3cc3   :  { %10469 = vrcp.f32 %v6303_v50  ;;  %v668_v50 = vld [vmem:[%s12958_s5 + $0x18] sm:$0xff] }
0x3cc6   :  { %v6300_v41 = vpop.xlane.xlu0 %6299 }
0x3cc7   :  { %10471 = vrcp.f32 %v6300_v41 }
0x3cca   :  { %v10250_v42 = vpop.permute.xlu0 %10249 }
0x3ccb   :  { %v10252_v48 = vunpack.i.h.bf16 %v10250_v42  ;;  %v10251_v33 = vunpack.i.l.bf16 %v10250_v42 }
0x3ccd   :  { %v9834_v43 = vpack.c.bf16 %v10252_v48, %v10251_v33  ;;  %v10470_v49 = vpop.eup %10469 }
0x3cce   :  { %v6307_v56 = vmul.f32 %v10470_v49, %v10466_v36 }
0x3ccf   :  { %9836 = vmatprep.subr.msk.bf16.mxu1 %vm11821_vm2, %v9834_v43 }
0x3cd1   :  { %v10472_v19 = vpop.eup %10471 }
0x3cd2   :  { %v6305_v28 = vmul.f32 %v10472_v19, %v10468_v38  ;;  %v9864_v19 = vpack.c.bf16 %v668_v50, %v667_v10 }
0x3cd4   :  { %9334 = vmatprep.mubr.msk.f32.mxu1 %vm953_vm3, %v6305_v28  ;;  %v674_v28 = vld [vmem:[%s12959_s17 + $0x8] sm:$0xff] }
0x3cd5   :  { %9335 = vmatmul.mubr.msk.f32.vlgmr.msra.gmra.mrb[52].mxu1 %vm953_vm3, %v6307_v56 }
0x3cd6   :  { %9839 = vmatpush3.bf16.xpose.msk.msra.mxu1 %vm11821_vm2, %v9834_v43  ;;  %9341 = vmatprep.mubr.msk.f32.mxu1 %vm869_vm1, %v6396_v47  ;;  %v675_v47 = vld [vmem:[%s12959_s17 + $0x10] sm:$0xff] }
0x3cdd   :  { %9342 = vmatmul.mubr.msk.f32.vlgmr.msra.gmra.mrb[54].mxu1 %vm869_vm1, %v6398_v22  ;;  %v676_v22 = vld [vmem:[%s12959_s17 + $0x18] sm:$0xff] }
0x3da8   :  { %v9336_v57 = vpop.f32.mrb[52].mxu1 }
0x3da9   :  { %v6386_v58 = vpop.f32.mrb[53].mxu1 }
0x3db0   :  { %v9343_v54 = vpop.f32.mrb[54].mxu1 }
0x3db1   :  { %v6483_v53 = vadd.f32 %v12525_v35, %v9343_v54  ;;  %v6477_v61 = vpop.f32.mrb[55].mxu1 }
0x3db2   :  { %v6478_v62 = vadd.f32 %v12529_v14, %v6477_v61 }
0x3db3   :  { %v6489_v1 = vsel %vm953_vm3, %v6483_v53, -inf }
0x3db4   :  { %6490 = vmax.xlane.f32.xlu1 %v6489_v1  ;;  %v6486_v2 = vsel %vm953_vm3, %v6478_v62, -inf }
0x3db5   :  { %6487 = vmax.xlane.f32.xlu0 %v6486_v2  ;;  %v8482_v2 = vld [vmem:[#allocation5] ss:$0 sm:$0xff] }
0x3dc5   :  { %10254 = vrot.lane.b32.xlu1 %v12502_v59, %s11311_s19 }
0x3dc9   :  { %6599 = vrot.lane.b32.xlu1 %v12566_v39, %s11310_s26 }
0x3dcd   :  { %6605 = vrot.lane.b32.xlu1 %v6386_v58, %s11312_s14  ;;  %v8474_v58 = vld [vmem:[#allocation19] ss:$0 sm:$0xff] }
0x3e41   :  { %v6491_v20 = vpop.xlane.xlu1 %6490 }
0x3e42   :  { %v6493_v5 = vsub.f32 %v6483_v53, %v6491_v20  ;;  %v6488_v35 = vpop.xlane.xlu0 %6487 }
0x3e43   :  { %v6492_v7 = vsub.f32 %v6478_v62, %v6488_v35 }
0x3e44   :  { %v6496_v8 = vmul.f32 1.442695, %v6493_v5 }
0x3e45   :  { %v6494_v14 = vmul.f32 1.442695, %v6492_v7  ;;  %v10255_v9 = vpop.permute.xlu1 %10254 }
0x3e46   :  { %v10257_v11 = vunpack.i.h.bf16 %v10255_v9  ;;  %v10256_v31 = vunpack.i.l.bf16 %v10255_v9 }
0x3e47   :  { %10473 = vpow2.f32 %v6494_v14 }
0x3e48   :  { %v9840_v44 = vpack.c.bf16 %v10257_v11, %v10256_v31  ;;  %10475 = vpow2.f32 %v6496_v8 }
0x3e49   :  { %v6600_v30 = vpop.permute.xlu1 %6599 }
0x3e4a   :  { %9841 = vmatprep.subr.bf16.mxu0 %v9840_v44  ;;  %v6620_v42 = vsel %vm869_vm1, %v12562_v52, %v6600_v30  ;;  %v673_v52 = vld [vmem:[%s12959_s17] sm:$0xff] }
0x3e4b   :  { %9843 = vmatpush3.bf16.msra.mxu0 %v9840_v44  ;;  %v9852_v56 = vpack.c.bf16 %v674_v28, %v673_v52  ;;  %v12681_v52 = vld [vmem:[%s12945_s2] sm:$0xff] }
0x3e4c   :  { %9845 = vmatprep.subr.bf16.mxu0 %v9844_v23 }
0x3e4d   :  { %v6606_v0 = vpop.permute.xlu1 %6605  ;;  %9853 = vmatprep.subr.bf16.mxu1 %v9852_v56 }
0x3e4e   :  { %9855 = vmatpush3.bf16.msra.mxu1 %v9852_v56 }
0x3e51   :  { %v10474_v59 = vpop.eup %10473 }
0x3e52   :  { %v6498_v32 = vsel %vm953_vm3, %v10474_v59, 0.0  ;;  %v10476_v63 = vpop.eup %10475 }
0x3e53   :  { %6499 = vadd.xlane.f32.xlu0 %v6498_v32  ;;  %v6501_v3 = vsel %vm953_vm3, %v10476_v63, 0.0 }
0x3e57   :  { %6502 = vadd.xlane.f32.xlu0 %v6501_v3 }
0x3e6d   :  { %6597 = vrot.lane.b32.xlu0 %v12568_v46, %s11310_s26  ;;  %v687_v46 = vld [vmem:[%s12957_s27 + $0x10] sm:$0xff] }
0x3e6e   :  { %v9848_v26 = vpack.c.bf16 %v688_v25, %v687_v46  ;;  %v8477_v46 = vld [vmem:[#allocation11] ss:$0 sm:$0xff] }
0x3e71   :  { %6607 = vrot.lane.b32.xlu0 %v9336_v57, %s11312_s14  ;;  %v9856_v57 = vpack.c.bf16 %v676_v22, %v675_v47 }
0x3e73   :  { %9857 = vmatprep.subr.bf16.mxu1 %v9856_v57 }
0x3e74   :  { %9859 = vmatpush3.bf16.msra.mxu1 %v9856_v57 }
0x3ee0   :  { %v6500_v37 = vpop.xlane.xlu0 %6499 }
0x3ee1   :  { %10477 = vrcp.f32 %v6500_v37 }
0x3ee4   :  { %v6503_v39 = vpop.xlane.xlu0 %6502 }
0x3ee5   :  { %10479 = vrcp.f32 %v6503_v39 }
0x3ee8   :  { %v6598_v29 = vpop.permute.xlu0 %6597 }
0x3ee9   :  { %v6619_v38 = vsel %vm869_vm1, %v12564_v40, %v6598_v29 }
0x3eea   :  { %v6621_v33 = vsel %vm953_vm3, %v6619_v38, %v6606_v0  ;;  %v8479_v38 = vld [vmem:[#allocation8] ss:$0 sm:$0xff] }
0x3eeb   :  { %v10478_v55 = vpop.eup %10477 }
0x3eec   :  { %v6505_v15 = vmul.f32 %v10478_v55, %v10474_v59  ;;  %v6608_v36 = vpop.permute.xlu0 %6607 }
0x3eed   :  { %v6622_v43 = vsel %vm953_vm3, %v6620_v42, %v6608_v36 }
0x3eee   :  { %9348 = vmatprep.mubr.msk.f32.mxu0 %vm953_vm3, %v6505_v15 }
0x3eef   :  { %v10480_v16 = vpop.eup %10479 }
0x3ef0   :  { %v6507_v45 = vmul.f32 %v10480_v16, %v10476_v63 }
0x3ef2   :  { %9349 = vmatmul.mubr.msk.f32.vlgmr.msra.gmra.mrb[54].mxu0 %vm953_vm3, %v6507_v45 }
0x3ef3   :  { %9847 = vmatpush3.bf16.msra.mxu0 %v9844_v23 }
0x3ef4   :  { %9849 = vmatprep.subr.bf16.mxu0 %v9848_v26 }
0x3ef7   :  { %9851 = vmatpush3.bf16.msra.mxu0 %v9848_v26 }
0x3ef8   :  { %9861 = vmatprep.subr.bf16.mxu0 %v9860_v24 }
0x3fc5   :  { %v9350_v21 = vpop.f32.mrb[54].mxu0 }
0x3fc6   :  { %6615 = vrot.lane.b32.xlu0 %v9350_v21, %s11313_s1  ;;  %v6586_v34 = vpop.f32.mrb[55].mxu0 }
0x3fc7   :  { %6613 = vrot.lane.b32.xlu1 %v6586_v34, %s11313_s1 }
0x4038   :  { %v6616_v41 = vpop.permute.xlu0 %6615 }
0x4039   :  { %v6614_v48 = vpop.permute.xlu1 %6613  ;;  %v6624_v40 = vsel %vm1691_vm4, %v6622_v43, %v6616_v41 }
0x403a   :  { %v6623_v49 = vsel %vm1691_vm4, %v6621_v33, %v6614_v48 }
0x403b   :  { %9359 = vmatprep.mubr.msk.f32.mxu0 %vm781_vm0, %v6623_v49  ;;  %v12677_v49 = vld [vmem:[%s12945_s2 + $0x8] sm:$0xff] }
0x403c   :  { %9360 = vmatmul.mubr.msk.f32.vlgmr.msra.gmra.mrb[56].mxu0 %vm781_vm0, %v6624_v40 }
0x403d   :  { %9863 = vmatpush3.bf16.msra.mxu0 %v9860_v24  ;;  %9381 = vmatprep.mubr.msk.f32.mxu0 %vm781_vm0, %v12292_v4 }
0x403e   :  { %9865 = vmatprep.subr.bf16.mxu0 %v9864_v19 }
0x4041   :  { %9867 = vmatpush3.bf16.msra.mxu0 %v9864_v19 }
0x4044   :  { %9382 = vmatmul.mubr.msk.f32.vlgmr.msra.gmra.mrb[58].mxu0 %vm781_vm0, %v12303_v6 }
0x410f   :  { %v9361_v54 = vpop.f32.mrb[56].mxu0 }
0x4110   :  { %v6709_v53 = vadd.f32 %v9361_v54, %v8474_v58  ;;  %v6703_v61 = vpop.f32.mrb[57].mxu0 }
0x4111   :  { %v6704_v4 = vadd.f32 %v8474_v58, %v6703_v61 }
0x4112   :  { %v6713_v62 = vadd.f32 %v6709_v53, %v12488_v12 }
0x4113   :  { %v6712_v1 = vadd.f32 %v6704_v4, %v12486_v60 }
0x4114   :  { %v6717_v6 = vsel %vm781_vm0, %v6713_v62, 0.0 }
0x4115   :  { %6718 = vadd.xlane.f32.xlu0 %v6717_v6  ;;  %v6714_v20 = vsel %vm781_vm0, %v6712_v1, 0.0 }
0x4116   :  { %6715 = vadd.xlane.f32.xlu1 %v6714_v20 }
0x4117   :  { %v9383_v5 = vpop.f32.mrb[58].mxu0 }
0x4118   :  { %v6921_v35 = vadd.f32 %v9383_v5, %v8482_v2  ;;  %v6915_v7 = vpop.f32.mrb[59].mxu0 }
0x4119   :  { %v6916_v8 = vadd.f32 %v8482_v2, %v6915_v7 }
0x411b   :  { %v9868_v14 = vpack.c.bf16 %v6921_v35, %v6916_v8  ;;  %v12640_v9 = vpack.i.bf16 %v6921_v35, %v6916_v8 }
0x411d   :  { %9870 = vmatprep.subr.msk.bf16.mxu1 %vm11821_vm2, %v9868_v14 }
0x41a2   :  { %v6719_v12 = vpop.xlane.xlu0 %6718 }
0x41a3   :  { %v6721_v11 = vmul.f32 0.03125, %v6719_v12  ;;  %v6716_v60 = vpop.xlane.xlu1 %6715 }
0x41a4   :  { %v6720_v31 = vmul.f32 0.03125, %v6716_v60 }
0x41a5   :  { %v6723_v44 = vsub.f32 %v6713_v62, %v6721_v11 }
0x41a6   :  { %v6722_v59 = vsub.f32 %v6712_v1, %v6720_v31 }
0x41a7   :  { %v6725_v32 = vmul.f32 %v6723_v44, %v6723_v44 }
0x41a8   :  { %v6724_v63 = vmul.f32 %v6722_v59, %v6722_v59 }
0x41a9   :  { %v6729_v3 = vsel %vm781_vm0, %v6725_v32, 0.0 }
0x41aa   :  { %6730 = vadd.xlane.f32.xlu1 %v6729_v3  ;;  %v6726_v37 = vsel %vm781_vm0, %v6724_v63, 0.0 }
0x41ab   :  { %6727 = vadd.xlane.f32.xlu0 %v6726_v37 }
0x41c1   :  { %10259 = vrot.lane.b32.xlu0 %v12640_v9, %s11303_s18 }
0x4237   :  { %v6731_v39 = vpop.xlane.xlu1 %6730 }
0x4238   :  { %v6733_v55 = vmul.f32 0.03125, %v6731_v39  ;;  %v6728_v15 = vpop.xlane.xlu0 %6727 }
0x4239   :  { %v6732_v16 = vmul.f32 0.03125, %v6728_v15 }
0x423a   :  { %v6735_v45 = vadd.f32 1e-05, %v6733_v55 }
0x423b   :  { %v6734_v51 = vadd.f32 1e-05, %v6732_v16 }
0x423c   :  { %10481 = vrsqrt.f32 %v6735_v45  ;;  %v10260_v26 = vpop.permute.xlu0 %10259 }
0x423d   :  { %10483 = vrsqrt.f32 %v6734_v51  ;;  %v10262_v34 = vunpack.i.h.bf16 %v10260_v26  ;;  %v10261_v29 = vunpack.i.l.bf16 %v10260_v26 }
0x423f   :  { %v9878_v0 = vpack.c.bf16 %v10262_v34, %v10261_v29 }
0x4246   :  { %v10482_v18 = vpop.eup %10481 }
0x4247   :  { %v10484_v23 = vpop.eup %10483  ;;  %v6739_v25 = vmul.f32 %v10482_v18, %v6723_v44 }
0x4248   :  { %v6738_v27 = vmul.f32 %v10484_v23, %v6722_v59 }
0x4249   :  { %v6747_v24 = vmul.f32 %v8477_v46, %v6739_v25 }
0x424a   :  { %v6746_v21 = vmul.f32 %v8477_v46, %v6738_v27 }
0x424b   :  { %v12650_v36 = vadd.f32 %v8478_v13, %v6747_v24 }
0x424c   :  { %v12648_v30 = vadd.f32 %v8478_v13, %v6746_v21 }
0x424e   :  { %9370 = vmatprep.mubr.msk.f32.mxu1 %vm781_vm0, %v12648_v30 }
0x424f   :  { %9371 = vmatmul.mubr.msk.f32.vlgmr.msra.gmra.mrb[56].mxu1 %vm781_vm0, %v12650_v36 }
0x4250   :  { %9873 = vmatpush3.bf16.xpose.msk.msra.mxu1 %vm11821_vm2, %v9868_v14 }
0x4251   :  { %9880 = vmatprep.subr.msk.bf16.mxu1 %vm11821_vm2, %v9878_v0 }
0x4322   :  { %v9372_v10 = vpop.f32.mrb[56].mxu1 }
0x4323   :  { %v6834_v50 = vpop.f32.mrb[57].mxu1  ;;  %v12662_v42 = vadd.f32 %v9372_v10, %v8479_v38 }
0x4324   :  { %v12660_v41 = vadd.f32 %v8479_v38, %v6834_v50 }
0x4326   :  { %7120 = vrot.lane.b32.xlu1 %v12660_v41, %s11303_s18  ;;  %9388 = vmatprep.mubr.msk.f32.mxu1 %vm869_vm1, %v12660_v41 }
0x4327   :  { %9389 = vmatmul.mubr.msk.f32.vlgmr.msra.gmra.mrb[58].mxu1 %vm869_vm1, %v12662_v42 }
0x4328   :  { %9883 = vmatpush3.bf16.xpose.msk.msra.mxu1 %vm11821_vm2, %v9878_v0 }
0x432a   :  { %7122 = vrot.lane.b32.xlu1 %v12662_v42, %s11303_s18  ;;  %s12962_s18 = sld [smem:[#allocation96_spill]] }
0x4398   :  { %v7121_v48 = vpop.permute.xlu1 %7120 }
0x4399   :  { %9402 = vmatprep.mubr.msk.f32.mxu1 %vm869_vm1, %v7121_v48 }
0x439c   :  { %v7123_v33 = vpop.permute.xlu1 %7122 }
0x439d   :  { %9403 = vmatmul.mubr.msk.f32.vlgmr.msra.gmra.mrb[60].mxu1 %vm869_vm1, %v7123_v33 }
0x43fa   :  { %v9390_v43 = vpop.f32.mrb[58].mxu1 }
0x43fb   :  { %v7008_v19 = vadd.f32 %v12677_v49, %v9390_v43  ;;  %v7002_v40 = vpop.f32.mrb[59].mxu1 }
0x43fc   :  { %v7003_v28 = vadd.f32 %v12681_v52, %v7002_v40 }
0x43fd   :  { %v7014_v56 = vsel %vm953_vm3, %v7008_v19, -inf }
0x43fe   :  { %7015 = vmax.xlane.f32.xlu1 %v7014_v56  ;;  %v7011_v47 = vsel %vm953_vm3, %v7003_v28, -inf }
0x43ff   :  { %7012 = vmax.xlane.f32.xlu0 %v7011_v47 }
0x440f   :  { %10264 = vrot.lane.b32.xlu1 %v12640_v9, %s11300_s16  ;;  %s12960_s16 = sld [smem:[#allocation87_spill]] }
0x4470   :  { %v9404_v22 = vpop.f32.mrb[60].mxu1 }
0x4471   :  { %v7202_v57 = vpop.f32.mrb[61].mxu1  ;;  %v7208_v54 = vadd.f32 %v12677_v49, %v9404_v22 }
0x4472   :  { %v7203_v58 = vadd.f32 %v12681_v52, %v7202_v57 }
0x4473   :  { %v7214_v61 = vsel %vm953_vm3, %v7208_v54, -inf }
0x4474   :  { %v7211_v53 = vsel %vm953_vm3, %v7203_v58, -inf }
0x4475   :  { %7212 = vmax.xlane.f32.xlu0 %v7211_v53 }
0x4479   :  { %7215 = vmax.xlane.f32.xlu0 %v7214_v61 }
0x448b   :  { %v7016_v4 = vpop.xlane.xlu1 %7015 }
0x448c   :  { %v7018_v62 = vsub.f32 %v7008_v19, %v7016_v4  ;;  %v7013_v1 = vpop.xlane.xlu0 %7012 }
0x448d   :  { %v7017_v6 = vsub.f32 %v7003_v28, %v7013_v1 }
0x448e   :  { %v7021_v2 = vmul.f32 1.442695, %v7018_v62 }
0x448f   :  { %v7019_v20 = vmul.f32 1.442695, %v7017_v6  ;;  %v10265_v5 = vpop.permute.xlu1 %10264 }
0x4490   :  { %10485 = vpow2.f32 %v7021_v2  ;;  %v10267_v35 = vunpack.i.h.bf16 %v10265_v5  ;;  %v10266_v7 = vunpack.i.l.bf16 %v10265_v5 }
0x4491   :  { %10487 = vpow2.f32 %v7019_v20 }
0x4492   :  { %v9874_v8 = vpack.c.bf16 %v10267_v35, %v10266_v7 }
0x4494   :  { %9875 = vmatprep.subr.bf16.mxu0 %v9874_v8 }
0x4495   :  { %9877 = vmatpush3.bf16.msra.mxu0 %v9874_v8 }
0x449a   :  { %v10486_v14 = vpop.eup %10485 }
0x449b   :  { %v10488_v12 = vpop.eup %10487  ;;  %v7026_v11 = vsel %vm953_vm3, %v10486_v14, 0.0 }
0x449c   :  { %7027 = vadd.xlane.f32.xlu0 %v7026_v11  ;;  %v7023_v60 = vsel %vm953_vm3, %v10488_v12, 0.0 }
0x449d   :  { %7024 = vadd.xlane.f32.xlu1 %v7023_v60 }
0x44ae   :  { %10274 = vrot.lane.b32.xlu1 %v12640_v9, %s11306_s22 }
0x4502   :  { %v7213_v31 = vpop.xlane.xlu0 %7212 }
0x4503   :  { %v7217_v44 = vsub.f32 %v7203_v58, %v7213_v31 }
0x4505   :  { %v7219_v59 = vmul.f32 1.442695, %v7217_v44 }
0x4506   :  { %v7216_v32 = vpop.xlane.xlu0 %7215 }
0x4507   :  { %10489 = vpow2.f32 %v7219_v59  ;;  %v7218_v63 = vsub.f32 %v7208_v54, %v7216_v32 }
0x4509   :  { %v7221_v3 = vmul.f32 1.442695, %v7218_v63 }
0x450b   :  { %10491 = vpow2.f32 %v7221_v3 }
0x4511   :  { %v10490_v37 = vpop.eup %10489 }
0x4512   :  { %v7223_v39 = vsel %vm953_vm3, %v10490_v37, 0.0 }
0x4513   :  { %7224 = vadd.xlane.f32.xlu1 %v7223_v39 }
0x4515   :  { %v10492_v55 = vpop.eup %10491 }
0x4516   :  { %v7226_v15 = vsel %vm953_vm3, %v10492_v55, 0.0 }
0x4517   :  { %7227 = vadd.xlane.f32.xlu0 %v7226_v15 }
0x4524   :  { %7320 = vrot.lane.b32.xlu1 %v12660_v41, %s11306_s22 }
0x4529   :  { %v7028_v16 = vpop.xlane.xlu0 %7027 }
0x452a   :  { %10493 = vrcp.f32 %v7028_v16  ;;  %v7025_v45 = vpop.xlane.xlu1 %7024 }
0x452b   :  { %10495 = vrcp.f32 %v7025_v45 }
0x452d   :  { %10269 = vrot.lane.b32.xlu0 %v12640_v9, %s11302_s9  ;;  %s12961_s9 = sld [smem:[#allocation95_spill]] }
0x452e   :  { %v10275_v25 = vpop.permute.xlu1 %10274 }
0x452f   :  { %v10277_v24 = vunpack.i.h.bf16 %v10275_v25  ;;  %v10276_v21 = vunpack.i.l.bf16 %v10275_v25 }
0x4531   :  { %7322 = vrot.lane.b32.xlu0 %v12662_v42, %s11306_s22  ;;  %v9888_v50 = vpack.c.bf16 %v10277_v24, %v10276_v21  ;;  %s12964_s22 = sld [smem:[#allocation63_spill]] }
0x4534   :  { %v10494_v51 = vpop.eup %10493 }
0x4535   :  { %v10496_v18 = vpop.eup %10495  ;;  %v7032_v23 = vmul.f32 %v10494_v51, %v10486_v14 }
0x4536   :  { %v7030_v46 = vmul.f32 %v10496_v18, %v10488_v12 }
0x4538   :  { %9395 = vmatprep.mubr.msk.f32.mxu0 %vm953_vm3, %v7030_v46 }
0x4539   :  { %9396 = vmatmul.mubr.msk.f32.vlgmr.msra.gmra.mrb[60].mxu0 %vm953_vm3, %v7032_v23 }
0x45a0   :  { %v7225_v26 = vpop.xlane.xlu1 %7224 }
0x45a1   :  { %10497 = vrcp.f32 %v7225_v26 }
0x45a4   :  { %v7228_v27 = vpop.xlane.xlu0 %7227  ;;  %v7321_v43 = vpop.permute.xlu1 %7320 }
0x45a5   :  { %10499 = vrcp.f32 %v7228_v27 }
0x45a8   :  { %v10270_v13 = vpop.permute.xlu0 %10269 }
0x45a9   :  { %v10272_v34 = vunpack.i.h.bf16 %v10270_v13  ;;  %v10271_v29 = vunpack.i.l.bf16 %v10270_v13 }
0x45ab   :  { %v10498_v0 = vpop.eup %10497  ;;  %v9884_v38 = vpack.c.bf16 %v10272_v34, %v10271_v29 }
0x45ac   :  { %v7230_v10 = vmul.f32 %v10498_v0, %v10490_v37  ;;  %v7323_v19 = vpop.permute.xlu0 %7322 }
0x45ad   :  { %9885 = vmatprep.subr.bf16.mxu0 %v9884_v38 }
0x45ae   :  { %9887 = vmatpush3.bf16.msra.mxu0 %v9884_v38  ;;  %9409 = vmatprep.mubr.msk.f32.mxu0 %vm953_vm3, %v7230_v10 }
0x45af   :  { %v10500_v48 = vpop.eup %10499  ;;  %9890 = vmatprep.subr.msk.bf16.mxu0 %vm11821_vm2, %v9888_v50 }
0x45b0   :  { %v7232_v33 = vmul.f32 %v10500_v48, %v10492_v55 }
0x45b2   :  { %9410 = vmatmul.mubr.msk.f32.vlgmr.msra.gmra.mrb[62].mxu0 %vm953_vm3, %v7232_v33 }
0x45b3   :  { %9416 = vmatprep.mubr.msk.f32.mxu0 %vm869_vm1, %v7321_v43 }
0x45b7   :  { %9893 = vmatpush3.bf16.xpose.msk.msra.mxu0 %vm11821_vm2, %v9888_v50 }
0x45be   :  { %9417 = vmatmul.mubr.msk.f32.vlgmr.msra.gmra.mrb[64].mxu0 %vm869_vm1, %v7323_v19 }
0x460c   :  { %v12714_v40 = vpop.f32.mrb[60].mxu0 }
0x460d   :  { %v12716_v28 = vpop.f32.mrb[61].mxu0 }
0x4685   :  { %v12718_v56 = vpop.f32.mrb[62].mxu0 }
0x4686   :  { %v12720_v47 = vpop.f32.mrb[63].mxu0 }
0x4691   :  { %v9418_v22 = vpop.f32.mrb[64].mxu0 }
0x4692   :  { %v7408_v57 = vadd.f32 %v12677_v49, %v9418_v22  ;;  %v7402_v58 = vpop.f32.mrb[65].mxu0  ;;  %v669_v22 = vld [vmem:[%s12960_s16] sm:$0xff] }
0x4693   :  { %v7403_v54 = vadd.f32 %v12681_v52, %v7402_v58  ;;  %v671_v58 = vld [vmem:[%s12960_s16 + $0x10] sm:$0xff] }
0x4694   :  { %v7414_v53 = vsel %vm953_vm3, %v7408_v57, -inf }
0x4695   :  { %7415 = vmax.xlane.f32.xlu0 %v7414_v53  ;;  %v7411_v61 = vsel %vm953_vm3, %v7403_v54, -inf  ;;  %v672_v53 = vld [vmem:[%s12960_s16 + $0x18] sm:$0xff] }
0x4696   :  { %7412 = vmax.xlane.f32.xlu1 %v7411_v61  ;;  %v9912_v61 = vpack.c.bf16 %v672_v53, %v671_v58 }
0x4722   :  { %v7416_v4 = vpop.xlane.xlu0 %7415 }
0x4723   :  { %v7418_v62 = vsub.f32 %v7408_v57, %v7416_v4  ;;  %v7413_v1 = vpop.xlane.xlu1 %7412  ;;  %v670_v57 = vld [vmem:[%s12960_s16 + $0x8] sm:$0xff] }
0x4724   :  { %v7417_v6 = vsub.f32 %v7403_v54, %v7413_v1  ;;  %v9908_v54 = vpack.c.bf16 %v670_v57, %v669_v22 }
0x4725   :  { %v7421_v2 = vmul.f32 1.442695, %v7418_v62 }
0x4726   :  { %v7419_v20 = vmul.f32 1.442695, %v7417_v6 }
0x4727   :  { %10501 = vpow2.f32 %v7421_v2 }
0x4728   :  { %10503 = vpow2.f32 %v7419_v20 }
0x4731   :  { %v10502_v5 = vpop.eup %10501 }
0x4732   :  { %v10504_v35 = vpop.eup %10503  ;;  %v7426_v7 = vsel %vm953_vm3, %v10502_v5, 0.0 }
0x4733   :  { %7427 = vadd.xlane.f32.xlu1 %v7426_v7  ;;  %v7423_v8 = vsel %vm953_vm3, %v10504_v35, 0.0 }
0x4734   :  { %7424 = vadd.xlane.f32.xlu0 %v7423_v8 }
0x4744   :  { %10284 = vrot.lane.b32.xlu1 %v12640_v9, %s11308_s8 }
0x4748   :  { %7520 = vrot.lane.b32.xlu1 %v12660_v41, %s11308_s8 }
0x474a   :  { %10279 = vrot.lane.b32.xlu0 %v12640_v9, %s11305_s0  ;;  %s12963_s0 = sld [smem:[#allocation84_spill]] }
0x474e   :  { %7522 = vrot.lane.b32.xlu0 %v12662_v42, %s11308_s8 }
0x47c0   :  { %v7428_v14 = vpop.xlane.xlu1 %7427 }
0x47c1   :  { %10505 = vrcp.f32 %v7428_v14  ;;  %v7425_v12 = vpop.xlane.xlu0 %7424 }
0x47c2   :  { %10507 = vrcp.f32 %v7425_v12 }
0x47c4   :  { %v10285_v11 = vpop.permute.xlu1 %10284 }
0x47c5   :  { %v10280_v60 = vpop.permute.xlu0 %10279  ;;  %v10287_v31 = vunpack.i.h.bf16 %v10285_v11  ;;  %v10286_v44 = vunpack.i.l.bf16 %v10285_v11 }
0x47c6   :  { %v10282_v59 = vunpack.i.h.bf16 %v10280_v60  ;;  %v10281_v32 = vunpack.i.l.bf16 %v10280_v60 }
0x47c7   :  { %v9898_v3 = vpack.c.bf16 %v10287_v31, %v10286_v44  ;;  %v8509_v31 = vld [vmem:[#allocation7] ss:$0 sm:$0xff] }
0x47c8   :  { %v9894_v63 = vpack.c.bf16 %v10282_v59, %v10281_v32  ;;  %v7521_v55 = vpop.permute.xlu1 %7520 }
0x47c9   :  { %v7523_v15 = vpop.permute.xlu0 %7522 }
0x47ca   :  { %9895 = vmatprep.subr.bf16.mxu1 %v9894_v63 }
0x47cb   :  { %v10506_v41 = vpop.eup %10505  ;;  %9897 = vmatpush3.bf16.msra.mxu1 %v9894_v63 }
0x47cc   :  { %v10508_v37 = vpop.eup %10507  ;;  %9900 = vmatprep.subr.msk.bf16.mxu1 %vm11821_vm2, %v9898_v3  ;;  %v7432_v39 = vmul.f32 %v10506_v41, %v10502_v5 }
0x47cd   :  { %v7430_v42 = vmul.f32 %v10508_v37, %v10504_v35 }
0x47cf   :  { %9423 = vmatprep.mubr.msk.f32.mxu1 %vm953_vm3, %v7430_v42 }
0x47d0   :  { %9424 = vmatmul.mubr.msk.f32.vlgmr.msra.gmra.mrb[62].mxu1 %vm953_vm3, %v7432_v39 }
0x47d1   :  { %9430 = vmatprep.mubr.msk.f32.mxu1 %vm869_vm1, %v7521_v55 }
0x47d4   :  { %9903 = vmatpush3.bf16.xpose.msk.msra.mxu1 %vm11821_vm2, %v9898_v3 }
0x47db   :  { %9431 = vmatmul.mubr.msk.f32.vlgmr.msra.gmra.mrb[64].mxu1 %vm869_vm1, %v7523_v15 }
0x48a3   :  { %v9425_v16 = vpop.f32.mrb[62].mxu1 }
0x48a4   :  { %v7511_v45 = vpop.f32.mrb[63].mxu1 }
0x48ae   :  { %v9432_v51 = vpop.f32.mrb[64].mxu1 }
0x48af   :  { %v7608_v18 = vadd.f32 %v12677_v49, %v9432_v51  ;;  %v7602_v46 = vpop.f32.mrb[65].mxu1 }
0x48b0   :  { %v7603_v23 = vadd.f32 %v12681_v52, %v7602_v46  ;;  %v694_v46 = vld [vmem:[%s12961_s9 + $0x8] sm:$0xff] }
0x48b1   :  { %v7614_v25 = vsel %vm953_vm3, %v7608_v18, -inf }
0x48b2   :  { %7615 = vmax.xlane.f32.xlu0 %v7614_v25  ;;  %v7611_v26 = vsel %vm953_vm3, %v7603_v23, -inf  ;;  %v695_v25 = vld [vmem:[%s12961_s9 + $0x10] sm:$0xff] }
0x48b3   :  { %7612 = vmax.xlane.f32.xlu1 %v7611_v26  ;;  %v696_v26 = vld [vmem:[%s12961_s9 + $0x18] sm:$0xff] }
0x493f   :  { %v7616_v27 = vpop.xlane.xlu0 %7615 }
0x4940   :  { %v7618_v17 = vsub.f32 %v7608_v18, %v7616_v27  ;;  %v7613_v13 = vpop.xlane.xlu1 %7612  ;;  %v693_v18 = vld [vmem:[%s12961_s9] sm:$0xff]  ;;  %v9920_v27 = vpack.c.bf16 %v696_v26, %v695_v25 }
0x4941   :  { %v7617_v24 = vsub.f32 %v7603_v23, %v7613_v13  ;;  %v9916_v23 = vpack.c.bf16 %v694_v46, %v693_v18  ;;  %v698_v13 = vld [vmem:[%s12962_s18 + $0x8] sm:$0xff]  ;;  %v774_v18 = vld [vmem:[%s11674_s30 + $0x18] sm:$0xff] }
0x4942   :  { %v7621_v21 = vmul.f32 1.442695, %v7618_v17  ;;  %v697_v17 = vld [vmem:[%s12962_s18] sm:$0xff] }
0x4943   :  { %v7619_v34 = vmul.f32 1.442695, %v7617_v24  ;;  %9917 = vmatprep.subr.bf16.mxu1 %v9916_v23  ;;  %v699_v24 = vld [vmem:[%s12962_s18 + $0x10] sm:$0xff] }
0x4944   :  { %10509 = vpow2.f32 %v7621_v21  ;;  %9919 = vmatpush3.bf16.msra.mxu1 %v9916_v23  ;;  %v9924_v21 = vpack.c.bf16 %v698_v13, %v697_v17 }
0x4945   :  { %10511 = vpow2.f32 %v7619_v34  ;;  %9921 = vmatprep.subr.bf16.mxu1 %v9920_v27  ;;  %v700_v34 = vld [vmem:[%s12962_s18 + $0x18] sm:$0xff] }
0x4948   :  { %9923 = vmatpush3.bf16.msra.mxu1 %v9920_v27 }
0x494e   :  { %v10510_v29 = vpop.eup %10509 }
0x494f   :  { %v10512_v0 = vpop.eup %10511  ;;  %v7626_v49 = vsel %vm953_vm3, %v10510_v29, 0.0 }
0x4950   :  { %7627 = vadd.xlane.f32.xlu1 %v7626_v49  ;;  %v7623_v52 = vsel %vm953_vm3, %v10512_v0, 0.0  ;;  %v702_v49 = vld [vmem:[%s12962_s18 + $0x28] sm:$0xff] }
0x4951   :  { %7624 = vadd.xlane.f32.xlu0 %v7623_v52 }
0x4961   :  { %7722 = vrot.lane.b32.xlu1 %v12720_v47, %s11310_s26 }
0x4965   :  { %7724 = vrot.lane.b32.xlu1 %v12718_v56, %s11310_s26 }
0x4967   :  { %10289 = vrot.lane.b32.xlu0 %v12640_v9, %s11307_s23 }
0x4969   :  { %7732 = vrot.lane.b32.xlu1 %v9425_v16, %s11312_s14 }
0x496b   :  { %7730 = vrot.lane.b32.xlu0 %v7511_v45, %s11312_s14 }
0x49dd   :  { %v7628_v38 = vpop.xlane.xlu1 %7627 }
0x49de   :  { %10513 = vrcp.f32 %v7628_v38  ;;  %v7625_v10 = vpop.xlane.xlu0 %7624 }
0x49df   :  { %10515 = vrcp.f32 %v7625_v10 }
0x49e1   :  { %v7723_v1 = vpop.permute.xlu1 %7722 }
0x49e2   :  { %v10290_v50 = vpop.permute.xlu0 %10289  ;;  %v7744_v5 = vsel %vm869_vm1, %v12716_v28, %v7723_v1 }
0x49e3   :  { %v10292_v48 = vunpack.i.h.bf16 %v10290_v50  ;;  %v10291_v33 = vunpack.i.l.bf16 %v10290_v50 }
0x49e5   :  { %v9904_v43 = vpack.c.bf16 %v10292_v48, %v10291_v33  ;;  %v7725_v6 = vpop.permute.xlu1 %7724 }
0x49e6   :  { %v7731_v20 = vpop.permute.xlu0 %7730  ;;  %v7745_v7 = vsel %vm869_vm1, %v12714_v40, %v7725_v6  ;;  %v8514_v6 = vld [vmem:[%s12963_s0] ss:$0 sm:$0xff] }
0x49e7   :  { %9905 = vmatprep.subr.bf16.mxu0 %v9904_v43  ;;  %v7746_v8 = vsel %vm953_vm3, %v7744_v5, %v7731_v20 }
0x49e8   :  { %v10514_v19 = vpop.eup %10513  ;;  %9907 = vmatpush3.bf16.msra.mxu0 %v9904_v43 }
0x49e9   :  { %v10516_v9 = vpop.eup %10515  ;;  %v7632_v47 = vmul.f32 %v10514_v19, %v10510_v29  ;;  %9909 = vmatprep.subr.bf16.mxu0 %v9908_v54  ;;  %v7733_v2 = vpop.permute.xlu1 %7732  ;;  %v9928_v29 = vpack.c.bf16 %v700_v34, %v699_v24 }
0x49ea   :  { %v7630_v56 = vmul.f32 %v10516_v9, %v10512_v0  ;;  %v7747_v12 = vsel %vm953_vm3, %v7745_v7, %v7733_v2  ;;  %v701_v0 = vld [vmem:[%s12962_s18 + $0x20] sm:$0xff]  ;;  %v8512_v9 = vld [vmem:[#allocation14] ss:$0 sm:$0xff] }
0x49eb   :  { %v9932_v52 = vpack.c.bf16 %v702_v49, %v701_v0  ;;  %v8521_v49 = vld [vmem:[#allocation16] ss:$0 sm:$0xff] }
0x49ec   :  { %9437 = vmatprep.mubr.msk.f32.mxu0 %vm953_vm3, %v7630_v56 }
0x49ed   :  { %9438 = vmatmul.mubr.msk.f32.vlgmr.msra.gmra.mrb[66].mxu0 %vm953_vm3, %v7632_v47  ;;  %v8513_v47 = vld [vmem:[#allocation13] ss:$0 sm:$0xff] }
0x49ee   :  { %9911 = vmatpush3.bf16.msra.mxu0 %v9908_v54 }
0x49ef   :  { %9913 = vmatprep.subr.bf16.mxu0 %v9912_v61 }
0x49f2   :  { %9915 = vmatpush3.bf16.msra.mxu0 %v9912_v61 }
0x49f3   :  { %9925 = vmatprep.subr.bf16.mxu0 %v9924_v21 }
0x4ac0   :  { %v9439_v4 = vpop.f32.mrb[66].mxu0 }
0x4ac1   :  { %7740 = vrot.lane.b32.xlu1 %v9439_v4, %s11313_s1  ;;  %v7711_v62 = vpop.f32.mrb[67].mxu0  ;;  %v703_v4 = vld [vmem:[%s12962_s18 + $0x30] sm:$0xff] }
0x4ac2   :  { %7738 = vrot.lane.b32.xlu0 %v7711_v62, %s11313_s1  ;;  %v704_v62 = vld [vmem:[%s12962_s18 + $0x38] sm:$0xff] }
0x4ac3   :  { %v9936_v1 = vpack.c.bf16 %v704_v62, %v703_v4 }
0x4b33   :  { %v7741_v35 = vpop.permute.xlu1 %7740 }
0x4b34   :  { %v7739_v14 = vpop.permute.xlu0 %7738  ;;  %v7749_v60 = vsel %vm1691_vm4, %v7747_v12, %v7741_v35 }
0x4b35   :  { %v7748_v11 = vsel %vm1691_vm4, %v7746_v8, %v7739_v14  ;;  %v8517_v14 = vld [vmem:[#allocation2] ss:$0 sm:$0xff] }
0x4b36   :  { %9448 = vmatprep.mubr.msk.f32.mxu0 %vm781_vm0, %v7748_v11 }
0x4b37   :  { %9449 = vmatmul.mubr.msk.f32.vlgmr.msra.gmra.mrb[68].mxu0 %vm781_vm0, %v7749_v60 }
0x4b38   :  { %9927 = vmatpush3.bf16.msra.mxu0 %v9924_v21  ;;  %v8520_v21 = vld [vmem:[#allocation17] ss:$0 sm:$0xff] }
0x4b39   :  { %9929 = vmatprep.subr.bf16.mxu0 %v9928_v29 }
0x4b3c   :  { %9931 = vmatpush3.bf16.msra.mxu0 %v9928_v29 }
0x4b3d   :  { %9933 = vmatprep.subr.bf16.mxu0 %v9932_v52 }
0x4b40   :  { %9935 = vmatpush3.bf16.msra.mxu0 %v9932_v52 }
0x4b41   :  { %9937 = vmatprep.subr.bf16.mxu0 %v9936_v1 }
0x4b44   :  { %9939 = vmatpush3.bf16.msra.mxu0 %v9936_v1 }
0x4c0a   :  { %v9450_v44 = vpop.f32.mrb[68].mxu0 }
0x4c0b   :  { %v7834_v28 = vadd.f32 %v9450_v44, %v8509_v31  ;;  %v7828_v59 = vpop.f32.mrb[69].mxu0 }
0x4c0c   :  { %v7829_v32 = vadd.f32 %v8509_v31, %v7828_v59 }
0x4c0d   :  { %v7838_v40 = vadd.f32 %v7834_v28, %v12650_v36 }
0x4c0e   :  { %v7837_v63 = vadd.f32 %v7829_v32, %v12648_v30 }
0x4c0f   :  { %v7842_v3 = vsel %vm781_vm0, %v7838_v40, 0.0 }
0x4c10   :  { %7843 = vadd.xlane.f32.xlu1 %v7842_v3  ;;  %v7839_v41 = vsel %vm781_vm0, %v7837_v63, 0.0 }
0x4c11   :  { %7840 = vadd.xlane.f32.xlu0 %v7839_v41 }
0x4c9d   :  { %v7844_v37 = vpop.xlane.xlu1 %7843 }
0x4c9e   :  { %v7846_v42 = vmul.f32 0.03125, %v7844_v37  ;;  %v7841_v39 = vpop.xlane.xlu0 %7840 }
0x4c9f   :  { %v7845_v55 = vmul.f32 0.03125, %v7841_v39 }
0x4ca0   :  { %v7848_v15 = vsub.f32 %v7838_v40, %v7846_v42 }
0x4ca1   :  { %v7847_v16 = vsub.f32 %v7837_v63, %v7845_v55 }
0x4ca2   :  { %v7850_v36 = vmul.f32 %v7848_v15, %v7848_v15 }
0x4ca3   :  { %v7849_v45 = vmul.f32 %v7847_v16, %v7847_v16 }
0x4ca4   :  { %v7854_v51 = vsel %vm781_vm0, %v7850_v36, 0.0 }
0x4ca5   :  { %v7851_v30 = vsel %vm781_vm0, %v7849_v45, 0.0  ;;  %v771_v45 = vld [vmem:[%s11674_s30] sm:$0xff] }
0x4ca6   :  { %7852 = vadd.xlane.f32.xlu0 %v7851_v30  ;;  %v772_v30 = vld [vmem:[%s11674_s30 + $0x8] sm:$0xff] }
0x4ca7   :  { %v9940_v36 = vpack.c.bf16 %v772_v30, %v771_v45 }
0x4ca9   :  { %9941 = vmatprep.subr.bf16.mxu1 %v9940_v36 }
0x4caa   :  { %7855 = vadd.xlane.f32.xlu0 %v7854_v51  ;;  %v773_v51 = vld [vmem:[%s11674_s30 + $0x10] sm:$0xff]  ;;  %s11314_s30 = smov [#allocation46]  }
0x4cab   :  { %v9944_v46 = vpack.c.bf16 %v774_v18, %v773_v51  ;;  %s8195_s23 = sshll.u32 %s11314_s30, 4  ;;  %s8196_s23 = int_to_ptr.vmem [resolvable:$true] %s8195_s23 }
0x4cac   :  { %s11147_s8 = scalar_lea.vmem %s8196_s23, 256  ;;  %p11152_p1 = scmp.lt.s32.totalorder %s8196_s23, %s8196_s23 }
0x4cad   :  { %p11148_p0 = scmp.ne.s32.totalorder %s8196_s23, %s11147_s8  ;;  %p11153_p2 = scmp.lt.s32.totalorder %s11147_s8, %s11147_s8 }
0x4caf   :  { %p11154_p3 = por %p11153_p2, %p11152_p1 }
0x4cb1   :  { %p11155_p4 = pnand %p11154_p3, %p11148_p0 }
0x4d33   :  { %v7853_v38 = vpop.xlane.xlu0 %7852 }
0x4d34   :  { %v7857_v10 = vmul.f32 0.03125, %v7853_v38 }
0x4d36   :  { %v7859_v50 = vadd.f32 1e-05, %v7857_v10 }
0x4d37   :  { %v7856_v48 = vpop.xlane.xlu0 %7855 }
0x4d38   :  { %10517 = vrsqrt.f32 %v7859_v50  ;;  %v7858_v33 = vmul.f32 0.03125, %v7856_v48  ;;  %v8522_v48 = vld [vmem:[%s12964_s22] ss:$0 sm:$0xff] }
0x4d3a   :  { %v7860_v43 = vadd.f32 1e-05, %v7858_v33 }
0x4d3c   :  { %10519 = vrsqrt.f32 %v7860_v43 }
0x4d42   :  { %v10518_v19 = vpop.eup %10517 }
0x4d43   :  { %v7863_v56 = vmul.f32 %v10518_v19, %v7847_v16 }
0x4d45   :  { %v7871_v22 = vmul.f32 %v8512_v9, %v7863_v56 }
0x4d46   :  { %v10520_v57 = vpop.eup %10519 }
0x4d47   :  { %v7864_v58 = vmul.f32 %v10520_v57, %v7848_v15  ;;  %v7879_v54 = vadd.f32 %v8513_v47, %v7871_v22 }
0x4d49   :  { %v7872_v53 = vmul.f32 %v8512_v9, %v7864_v58  ;;  %9459 = vmatprep.mubr.msk.f32.mxu1 %vm781_vm0, %v7879_v54 }
0x4d4b   :  { %v7880_v61 = vadd.f32 %v8513_v47, %v7872_v53 }
0x4d4d   :  { %9460 = vmatmul.mubr.msk.f32.vlgmr.msra.gmra.mrb[66].mxu1 %vm781_vm0, %v7880_v61 }
0x4d4e   :  { %9943 = vmatpush3.bf16.msra.mxu1 %v9940_v36 }
0x4d4f   :  { %9945 = vmatprep.subr.bf16.mxu1 %v9944_v46 }
0x4d52   :  { %9947 = vmatpush3.bf16.msra.mxu1 %v9944_v46 }
0x4e20   :  { %v9461_v2 = vpop.f32.mrb[66].mxu1 }
0x4e21   :  { %v7965_v20 = vadd.f32 %v9461_v2, %v8514_v6  ;;  %v7959_v5 = vpop.f32.mrb[67].mxu1 }
0x4e22   :  { %v7960_v35 = vadd.f32 %v8514_v6, %v7959_v5 }
0x4e23   :  { %v7969_v8 = vmax.f32 %v7965_v20, 0.0 }
0x4e24   :  { %v7968_v7 = vmax.f32 %v7960_v35, 0.0 }
0x4e26   :  { %9478 = vmatprep.mubr.msk.f32.mxu0 %vm1921_vm5, %v7968_v7 }
0x4e27   :  { %9479 = vmatmul.mubr.msk.f32.vlgmr.msra.gmra.mrb[70].mxu0 %vm1921_vm5, %v7969_v8 }
0x4efa   :  { %v9480_v12 = vpop.f32.mrb[70].mxu0 }
0x4efb   :  { %v8054_v11 = vadd.f32 %v9480_v12, %v8517_v14  ;;  %v8048_v60 = vpop.f32.mrb[71].mxu0 }
0x4efc   :  { %v8049_v31 = vadd.f32 %v8517_v14, %v8048_v60 }
0x4efd   :  { %v8058_v44 = vadd.f32 %v8054_v11, %v7880_v61 }
0x4efe   :  { %v8057_v28 = vadd.f32 %v8049_v31, %v7879_v54 }
0x4eff   :  { %v8062_v59 = vsel %vm781_vm0, %v8058_v44, 0.0 }
0x4f00   :  { %8063 = vadd.xlane.f32.xlu0 %v8062_v59  ;;  %v8059_v32 = vsel %vm781_vm0, %v8057_v28, 0.0 }
0x4f01   :  { %8060 = vadd.xlane.f32.xlu1 %v8059_v32 }
0x4f8d   :  { %v8064_v40 = vpop.xlane.xlu0 %8063 }
0x4f8e   :  { %v8066_v63 = vmul.f32 0.03125, %v8064_v40  ;;  %v8061_v3 = vpop.xlane.xlu1 %8060 }
0x4f8f   :  { %v8065_v41 = vmul.f32 0.03125, %v8061_v3 }
0x4f90   :  { %v8068_v37 = vsub.f32 %v8058_v44, %v8066_v63 }
0x4f91   :  { %v8067_v42 = vsub.f32 %v8057_v28, %v8065_v41 }
0x4f92   :  { %v8070_v39 = vmul.f32 %v8068_v37, %v8068_v37 }
0x4f93   :  { %v8069_v55 = vmul.f32 %v8067_v42, %v8067_v42 }
0x4f94   :  { %v8074_v15 = vsel %vm781_vm0, %v8070_v39, 0.0 }
0x4f95   :  { %8075 = vadd.xlane.f32.xlu0 %v8074_v15  ;;  %v8071_v16 = vsel %vm781_vm0, %v8069_v55, 0.0 }
0x4f96   :  { %8072 = vadd.xlane.f32.xlu1 %v8071_v16 }
0x5022   :  { %v8076_v23 = vpop.xlane.xlu0 %8075 }
0x5023   :  { %v8078_v25 = vmul.f32 0.03125, %v8076_v23  ;;  %v8073_v26 = vpop.xlane.xlu1 %8072 }
0x5024   :  { %v8077_v27 = vmul.f32 0.03125, %v8073_v26 }
0x5025   :  { %v8080_v17 = vadd.f32 1e-05, %v8078_v25 }
0x5026   :  { %v8079_v13 = vadd.f32 1e-05, %v8077_v27 }
0x5027   :  { %10521 = vrsqrt.f32 %v8080_v17 }
0x5028   :  { %10523 = vrsqrt.f32 %v8079_v13 }
0x5031   :  { %v10522_v24 = vpop.eup %10521 }
0x5032   :  { %v10524_v34 = vpop.eup %10523  ;;  %v8084_v29 = vmul.f32 %v10522_v24, %v8068_v37 }
0x5033   :  { %v8083_v0 = vmul.f32 %v10524_v34, %v8067_v42 }
0x5034   :  { %v8092_v52 = vmul.f32 %v8520_v21, %v8084_v29 }
0x5035   :  { %v8091_v38 = vmul.f32 %v8520_v21, %v8083_v0 }
0x5036   :  { %v8100_v50 = vadd.f32 %v8521_v49, %v8092_v52 }
0x5037   :  { %v8099_v10 = vadd.f32 %v8521_v49, %v8091_v38 }
0x5039   :  { %9489 = vmatprep.mubr.msk.f32.mxu1 %vm781_vm0, %v8099_v10 }
0x503a   :  { %9490 = vmatmul.mubr.msk.f32.vlgmr.msra.gmra.mrb[68].mxu1 %vm781_vm0, %v8100_v50 }
0x510d   :  { %v9491_v33 = vpop.f32.mrb[68].mxu1 }
0x510e   :  { %v8185_v43 = vadd.f32 %v9491_v33, %v8522_v48  ;;  %v8179_v19 = vpop.f32.mrb[69].mxu1 }
0x510f   :  { %v8180_v9 = vadd.f32 %v8522_v48, %v8179_v19 }
0x5110   :  { %8189 = vst [vmem:[#allocation46 + $0x8] sm:$0xff] %v8185_v43 }
0x5111   :  { %8188 = vst [vmem:[#allocation46] sm:$0xff] %v8180_v9 }
0x5112   :  { %11158 = shalt.err (!%p11155_p4)
}
0x5113   :  { %s11159_s13 = scalar_lea.hbm %s11679_s20, 256 }
0x5114   :  { %p11160_p5 = scmp.ne.s32.totalorder %s11679_s20, %s11159_s13  ;;  %p11163_p6 = scmp.lt.u32.totalorder %s11159_s13, %s11679_s20 }
0x5116   :  { %p11165_p7 = pnand %p11163_p6, %p11160_p5 }
0x5118   :  { %11168 = shalt.err (!%p11165_p7)
}
0x5119   :  { %s11315_s19 = smov 128  }
0x511a   :  { %8201 = dma.vmem_to_hbm [thread:$0]  %s8196_s23, 256, %s11679_s20, [#allocation4], %s11315_s19, %s11315_s19, %s11310_s26  }
0x511b   :  { %11199 = dma.done.wait [#allocation4], 256  }
0x511c   :  { %11200 = vsyncadd [#allocation4], 4294967040 }
0x511d   :  { %8205 = vsyncpa [#allocation3], 1 }
0x511e   :  { %8206 = vsyncpa [#allocation6], 1 }
0x511f   :  { %8207 = vsyncpa [#allocation9], 1 }
0x5120   :  { %8208 = vsyncpa [#allocation12], 1 }
0x5121   :  { %8209 = vsyncpa [#allocation15], 1 }
0x5122   :  { %8210 = vsyncpa [#allocation18], 1 }
0x5123   :  { %8211 = vsyncpa [#allocation21], 1 }
0x5124   :  { %8212 = vsyncpa [#allocation24], 1 }
0x5125   :  { %8213 = vsyncpa [#allocation27], 1 }
0x5126   :  { %8214 = vsyncpa [#allocation30], 1 }
0x5127   :  { %8215 = vsyncpa [#allocation33], 1 }
0x5128   :  { %8216 = vsyncpa [#allocation36], 1 }
0x5129   :  { %8217 = vsyncpa [#allocation39], 1 }
0x512a   :  { %8218 = vsyncpa [#allocation42], 1 }
0x512b   :  { %8219 = vsyncpa [#allocation45], 1 }
0x512c   :  { %8220 = vsyncpa [#allocation4], 1 }

</bundles_post_ra>
